<compile_context>
chip_gen: v7x
topology: tpu7x:2x2x1
jax: 0.10.0
libtpu: 0.0.40
codegen_flags: <defaults>
</compile_context>

<pallas_src>
import functools

import jax
import jax.numpy as jnp
from jax.experimental import pallas as pl
from jax.experimental.pallas import tpu as pltpu

C_PAD = 128                      # all channel dims padded to one lane tile
VMEM_LIMIT = 32 * 1024 * 1024    # explicit scoped-VMEM limit (safe on v5e..v7x)


# ----------------------------- Pallas kernels -----------------------------

def _make_conv3x3_kernel(H, W, fuse_bn_relu, fuse_residual):
    """3x3 conv (stride 1, pad 1) with in-kernel tap gather.

    grid = (batch, 3): axis 1 iterates the ky taps (reduction, 'arbitrary');
    the 3 kx taps are statically unrolled.  Optional epilogues: BN+ReLU
    (scale/shift) and residual add."""
    HW = H * W

    def kernel(*refs):
        i = 0
        xp_ref = refs[i]; i += 1            # (1, H+2, W+2, C) bf16 (padded)
        w_ref = refs[i]; i += 1             # (3, C, OC) bf16 (taps ky*3+kx)
        b_ref = refs[i]; i += 1             # (1, OC) f32
        scale_ref = shift_ref = res_ref = None
        if fuse_bn_relu:
            scale_ref = refs[i]; i += 1     # (1, OC) f32
            shift_ref = refs[i]; i += 1     # (1, OC) f32
        if fuse_residual:
            res_ref = refs[i]; i += 1       # (1, HW, OC) bf16
        o_ref = refs[i]; i += 1             # (1, HW, OC) bf16
        acc_ref = refs[i]                   # (HW, OC) f32 scratch

        ky = pl.program_id(1)

        @pl.when(ky == 0)
        def _init():
            acc_ref[...] = jnp.zeros_like(acc_ref)

        C = xp_ref.shape[-1]
        acc = acc_ref[...]
        for kx in range(3):                 # static unroll of the kx taps
            a = xp_ref[0, pl.ds(ky, H), pl.ds(kx, W), :].reshape(HW, C)
            acc = acc + jnp.dot(a, w_ref[kx],
                                preferred_element_type=jnp.float32)
        acc_ref[...] = acc

        @pl.when(ky == pl.num_programs(1) - 1)
        def _epilogue():
            r = acc_ref[...] + b_ref[...]
            if fuse_bn_relu:
                r = jnp.maximum(r * scale_ref[...] + shift_ref[...], 0.0)
            if fuse_residual:
                r = r + res_ref[0].astype(jnp.float32)
            o_ref[0] = r.astype(o_ref.dtype)

    return kernel


def _make_conv1x1_kernel(fuse_residual):
    def kernel(*refs):
        i = 0
        x_ref = refs[i]; i += 1             # (1, HW, C) bf16
        w_ref = refs[i]; i += 1             # (C, OC) bf16
        b_ref = refs[i]; i += 1             # (1, OC) f32
        res_ref = None
        if fuse_residual:
            res_ref = refs[i]; i += 1       # (1, HW, OC) bf16
        o_ref = refs[i]                     # (1, HW, OC) bf16

        r = jnp.dot(x_ref[0], w_ref[...],
                    preferred_element_type=jnp.float32) + b_ref[...]
        if fuse_residual:
            r = r + res_ref[0].astype(jnp.float32)
        o_ref[0] = r.astype(o_ref.dtype)
    return kernel


def _bn_relu_kernel(x_ref, scale_ref, shift_ref, o_ref):
    o_ref[0] = jnp.maximum(
        x_ref[0].astype(jnp.float32) * scale_ref[...] + shift_ref[...], 0.0
    ).astype(o_ref.dtype)


def _make_pool_fc_kernel(inv_hw):
    def kernel(x_ref, w_ref, b_ref, o_ref):
        pooled = jnp.sum(x_ref[...].astype(jnp.float32), axis=1) * inv_hw
        o_ref[...] = (jnp.dot(pooled, w_ref[...],
                              preferred_element_type=jnp.float32)
                      + b_ref[...])
    return kernel


# ------------------------------ Pallas wrappers ----------------------------

def conv3x3_pallas(x, w, b, scale=None, shift=None, res=None):
    """3x3 conv, stride 1, pad 1, NHWC, channels padded to C_PAD."""
    N, H, W, C = x.shape
    OC = w.shape[-1]
    HW = H * W
    xp = jnp.pad(x, ((0, 0), (1, 1), (1, 1), (0, 0)))
    fuse_bn = scale is not None
    fuse_res = res is not None

    in_specs = [
        pl.BlockSpec((1, H + 2, W + 2, C), lambda n, ky: (n, 0, 0, 0)),
        pl.BlockSpec((3, C, OC), lambda n, ky: (ky, 0, 0)),
        pl.BlockSpec((1, OC), lambda n, ky: (0, 0)),
    ]
    inputs = [xp, w, b]
    if fuse_bn:
        in_specs.append(pl.BlockSpec((1, OC), lambda n, ky: (0, 0)))
        in_specs.append(pl.BlockSpec((1, OC), lambda n, ky: (0, 0)))
        inputs += [scale, shift]
    if fuse_res:
        in_specs.append(pl.BlockSpec((1, HW, OC), lambda n, ky: (n, 0, 0)))
        inputs.append(res.reshape(N, HW, OC))

    flops = 2 * N * HW * 9 * C * OC
    bytes_accessed = int(xp.size) * 2 + int(w.size) * 2 + N * HW * OC * 2

    out = pl.pallas_call(
        _make_conv3x3_kernel(H, W, fuse_bn, fuse_res),
        out_shape=jax.ShapeDtypeStruct((N, HW, OC), jnp.bfloat16),
        grid=(N, 3),
        in_specs=in_specs,
        out_specs=pl.BlockSpec((1, HW, OC), lambda n, ky: (n, 0, 0)),
        scratch_shapes=[pltpu.VMEM((HW, OC), jnp.float32)],
        compiler_params=pltpu.CompilerParams(
            dimension_semantics=("parallel", "arbitrary"),
            vmem_limit_bytes=VMEM_LIMIT),
        cost_estimate=pl.CostEstimate(flops=flops, transcendentals=0,
                                      bytes_accessed=bytes_accessed),
    )(*inputs)
    return out.reshape(N, H, W, OC)


def conv1x1_pallas(x, w, b, res=None):
    N, H, W, C = x.shape
    OC = w.shape[-1]
    HW = H * W
    fuse_res = res is not None

    in_specs = [
        pl.BlockSpec((1, HW, C), lambda n: (n, 0, 0)),
        pl.BlockSpec((C, OC), lambda n: (0, 0)),
        pl.BlockSpec((1, OC), lambda n: (0, 0)),
    ]
    inputs = [x.reshape(N, HW, C), w, b]
    if fuse_res:
        in_specs.append(pl.BlockSpec((1, HW, OC), lambda n: (n, 0, 0)))
        inputs.append(res.reshape(N, HW, OC))

    out = pl.pallas_call(
        _make_conv1x1_kernel(fuse_res),
        out_shape=jax.ShapeDtypeStruct((N, HW, OC), jnp.bfloat16),
        grid=(N,),
        in_specs=in_specs,
        out_specs=pl.BlockSpec((1, HW, OC), lambda n: (n, 0, 0)),
        compiler_params=pltpu.CompilerParams(
            dimension_semantics=("parallel",),
            vmem_limit_bytes=VMEM_LIMIT),
    )(*inputs)
    return out.reshape(N, H, W, OC)


def bn_relu_pallas(x, scale, shift):
    N, H, W, C = x.shape
    HW = H * W
    out = pl.pallas_call(
        _bn_relu_kernel,
        out_shape=jax.ShapeDtypeStruct((N, HW, C), jnp.bfloat16),
        grid=(N,),
        in_specs=[pl.BlockSpec((1, HW, C), lambda n: (n, 0, 0)),
                  pl.BlockSpec((1, C), lambda n: (0, 0)),
                  pl.BlockSpec((1, C), lambda n: (0, 0))],
        out_specs=pl.BlockSpec((1, HW, C), lambda n: (n, 0, 0)),
        compiler_params=pltpu.CompilerParams(
            dimension_semantics=("parallel",),
            vmem_limit_bytes=VMEM_LIMIT),
    )(x.reshape(N, HW, C), scale, shift)
    return out.reshape(N, H, W, C)


def pool_fc_pallas(x3d, w, b):
    """Fused global average pool + linear.  x3d: (N, HW, C) bf16."""
    N, HW, C = x3d.shape
    NC = w.shape[-1]
    return pl.pallas_call(
        _make_pool_fc_kernel(1.0 / HW),
        out_shape=jax.ShapeDtypeStruct((N, NC), jnp.float32),
        grid=(1,),
        in_specs=[pl.BlockSpec((N, HW, C), lambda i: (0, 0, 0)),
                  pl.BlockSpec((C, NC), lambda i: (0, 0)),
                  pl.BlockSpec((1, NC), lambda i: (0, 0))],
        out_specs=pl.BlockSpec((N, NC), lambda i: (0, 0)),
        compiler_params=pltpu.CompilerParams(
            dimension_semantics=("arbitrary",),
            vmem_limit_bytes=VMEM_LIMIT),
    )(x3d, w, b)


# --------------------------- Parameter creation ---------------------------

class KeyGen:
    def __init__(self, key):
        self.key = key

    def __call__(self):
        self.key, sub = jax.random.split(self.key)
        return sub


def _pad_vec(v, cout):
    return jnp.zeros((1, C_PAD), jnp.float32).at[0, :cout].set(v)


def init_conv3x3(kg, cin, cout):
    fan_in = 9 * cin
    # tap ordering is ky-major, kx-minor: row t = 3*ky + kx
    # (ports from PyTorch (OC,IC,kH,kW) must transpose to (kH*kW, IC, OC)).
    w = jax.random.normal(kg(), (9, cin, cout), jnp.float32) / (fan_in ** 0.5)
    wp = jnp.zeros((9, C_PAD, C_PAD), jnp.float32).at[:, :cin, :cout].set(w)
    b = 0.01 * jax.random.normal(kg(), (cout,), jnp.float32)
    return wp.astype(jnp.bfloat16), _pad_vec(b, cout)


def init_conv1x1(kg, cin, cout):
    w = jax.random.normal(kg(), (cin, cout), jnp.float32) / (cin ** 0.5)
    wp = jnp.zeros((C_PAD, C_PAD), jnp.float32).at[:cin, :cout].set(w)
    b = 0.01 * jax.random.normal(kg(), (cout,), jnp.float32)
    return wp.astype(jnp.bfloat16), _pad_vec(b, cout)


def init_bn(kg, c, eps=1e-5):
    gamma = 1.0 + 0.1 * jax.random.normal(kg(), (c,), jnp.float32)
    beta = 0.1 * jax.random.normal(kg(), (c,), jnp.float32)
    mean = 0.1 * jax.random.normal(kg(), (c,), jnp.float32)
    var = 1.0 + 0.1 * jax.random.uniform(kg(), (c,), jnp.float32)
    scale = gamma / jnp.sqrt(var + eps)
    shift = beta - mean * scale
    return _pad_vec(scale, c), _pad_vec(shift, c)


def init_wide_basic(kg, cin, cout, stride):
    p = {"stride": stride,
         "has_shortcut": (stride != 1 or cin != cout)}   # matches PyTorch
    p["bn1_scale"], p["bn1_shift"] = init_bn(kg, cin)
    p["conv1_w"], p["conv1_b"] = init_conv3x3(kg, cin, cout)
    p["bn2_scale"], p["bn2_shift"] = init_bn(kg, cout)
    p["conv2_w"], p["conv2_b"] = init_conv3x3(kg, cout, cout)
    if p["has_shortcut"]:
        p["sc_w"], p["sc_b"] = init_conv1x1(kg, cin, cout)
    return p


def init_wideresnet(key, depth=10, widen_factor=2, num_classes=10):
    assert (depth - 4) % 6 == 0
    n = (depth - 4) // 6
    k = widen_factor
    stages = [16, 16 * k, 32 * k, 64 * k]
    kg = KeyGen(key)
    params = {"num_classes": num_classes}
    params["conv1_w"], params["conv1_b"] = init_conv3x3(kg, 3, stages[0])

    def make_layer(cin, cout, num_blocks, stride):
        blocks = []
        c = cin
        for s in [stride] + [1] * (num_blocks - 1):
            blocks.append(init_wide_basic(kg, c, cout, s))
            c = cout
        return blocks, c

    c = stages[0]
    params["layer1"], c = make_layer(c, stages[1], n, 1)
    params["layer2"], c = make_layer(c, stages[2], n, 2)
    params["layer3"], c = make_layer(c, stages[3], n, 2)
    params["bn_final_scale"], params["bn_final_shift"] = init_bn(kg, stages[3])

    fc_w = jax.random.normal(kg(), (stages[3], num_classes), jnp.float32) \
        / (stages[3] ** 0.5)
    params["fc_w"] = jnp.zeros((C_PAD, C_PAD), jnp.float32) \
        .at[:stages[3], :num_classes].set(fc_w)
    fc_b = 0.01 * jax.random.normal(kg(), (num_classes,), jnp.float32)
    params["fc_b"] = _pad_vec(fc_b, num_classes)
    return params


# ------------------------------ Forward pass ------------------------------

def wide_basic_forward(x, p):
    stride = p["stride"]
    a1 = bn_relu_pallas(x, p["bn1_scale"], p["bn1_shift"])
    # conv1 (3x3, stride 1) with bias + BN2 + ReLU fused as epilogue.
    # Dropout between conv1 and bn2 is the identity (eval mode).
    a2 = conv3x3_pallas(a1, p["conv1_w"], p["conv1_b"],
                        scale=p["bn2_scale"], shift=p["bn2_shift"])
    if p["has_shortcut"]:
        h = conv3x3_pallas(a2, p["conv2_w"], p["conv2_b"])
        if stride > 1:
            # stride-2 conv == stride-1 conv subsampled at even positions
            h = h[:, ::stride, ::stride, :]
            xs = x[:, ::stride, ::stride, :]
        else:
            xs = x
        # residual add fused into the shortcut 1x1-conv epilogue
        out = conv1x1_pallas(xs, p["sc_w"], p["sc_b"], res=h)
    else:
        # identity shortcut (stride == 1 and cin == cout): fuse the residual
        # add into conv2's epilogue.
        out = conv3x3_pallas(a2, p["conv2_w"], p["conv2_b"], res=x)
    return out


def wideresnet_forward(params, x_nchw):
    # NCHW -> NHWC, pad channels to the 128-lane tile, cast to bf16.
    x = jnp.transpose(x_nchw, (0, 2, 3, 1)).astype(jnp.float32)
    N, H, W, C = x.shape
    x = jnp.pad(x, ((0, 0), (0, 0), (0, 0), (0, C_PAD - C))).astype(jnp.bfloat16)

    out = conv3x3_pallas(x, params["conv1_w"], params["conv1_b"])
    for blk in params["layer1"]:
        out = wide_basic_forward(out, blk)
    for blk in params["layer2"]:
        out = wide_basic_forward(out, blk)
    for blk in params["layer3"]:
        out = wide_basic_forward(out, blk)

    out = bn_relu_pallas(out, params["bn_final_scale"], params["bn_final_shift"])
    N2, H2, W2, _ = out.shape
    logits_padded = pool_fc_pallas(out.reshape(N2, H2 * W2, C_PAD),
                                   params["fc_w"], params["fc_b"])
    return logits_padded[:, :params["num_classes"]]


# ---------------------------------- Main ----------------------------------

if __name__ == "__main__":
    key = jax.random.PRNGKey(0)
    pkey, xkey = jax.random.split(key)
    params = init_wideresnet(pkey, depth=10, widen_factor=2, num_classes=10)

    # small input consistent with the module: NCHW, 3 input channels
    x = jax.random.normal(xkey, (2, 3, 16, 16), jnp.float32)

    fwd = jax.jit(functools.partial(wideresnet_forward, params))
    logits = fwd(x)
    jax.block_until_ready(logits)
    assert logits.shape == (2, 10)
    assert bool(jnp.all(jnp.isfinite(logits)))
    print("KERNEL_OK")
</pallas_src>

<mosaic_0001>
module attributes {stable_mosaic.version = 11 : i64} {
  func.func @kernel(%arg0: i32, %arg1: i32, %arg2: memref<1x18x18x128xbf16, #tpu.memory_space<vmem>>, %arg3: memref<3x128x128xbf16, #tpu.memory_space<vmem>>, %arg4: memref<1x128xf32, #tpu.memory_space<vmem>>, %arg5: memref<1x256x128xbf16, #tpu.memory_space<vmem>>, %arg6: memref<256x128xf32, #tpu.memory_space<vmem>>) attributes {dimension_semantics = [#tpu.dimension_semantics<parallel>, #tpu.dimension_semantics<arbitrary>], iteration_bounds = array<i64: 2, 3>, scalar_prefetch = 0 : i64, scratch_operands = 1 : i64, tpu.core_type = #tpu.core_type<tc>, window_params = [{transform_indices = @transform_0, window_bounds = array<i64: 1, 18, 18, 128>}, {transform_indices = @transform_1, window_bounds = array<i64: 3, 128, 128>}, {pipeline_mode = #tpu.pipeline_mode<synchronous>, transform_indices = @transform_2, window_bounds = array<i64: 1, 128>}, {transform_indices = @transform_3, window_bounds = array<i64: 1, 256, 128>}]} {
    %c0_i32 = arith.constant 0 : i32
    %0 = arith.cmpi eq, %arg1, %c0_i32 : i32
    %1 = arith.extui %0 : i1 to i32
    %c0_i32_0 = arith.constant 0 : i32
    %2 = arith.cmpi ne, %1, %c0_i32_0 : i32
    scf.if %2 {
      %cst_23 = arith.constant 0.000000e+00 : f32
      %32 = vector.broadcast %cst_23 : f32 to vector<256x128xf32>
      %c0_24 = arith.constant 0 : index
      %c0_25 = arith.constant 0 : index
      %33 = vector.load %arg6[%c0_24, %c0_25] : memref<256x128xf32, #tpu.memory_space<vmem>>, vector<256x128xf32>
      tpu.vector_store %arg6[%c0_24, %c0_25], %32 {strides = array<i32>} : memref<256x128xf32, #tpu.memory_space<vmem>>, vector<256x128xf32>,
    } else {
    }
    %c0 = arith.constant 0 : index
    %c0_1 = arith.constant 0 : index
    %3 = vector.load %arg6[%c0, %c0_1] : memref<256x128xf32, #tpu.memory_space<vmem>>, vector<256x128xf32>
    %c0_2 = arith.constant 0 : index
    %4 = arith.index_cast %arg1 : i32 to index
    %c0_3 = arith.constant 0 : index
    %c0_4 = arith.constant 0 : index
    %5 = vector.load %arg2[%c0_2, %4, %c0_3, %c0_4] : memref<1x18x18x128xbf16, #tpu.memory_space<vmem>>, vector<1x16x16x128xbf16>
    %6 = vector.shape_cast %5 : vector<1x16x16x128xbf16> to vector<16x16x128xbf16>
    %7 = vector.shape_cast %6 : vector<16x16x128xbf16> to vector<256x128xbf16>
    %c0_5 = arith.constant 0 : index
    %c0_6 = arith.constant 0 : index
    %c0_7 = arith.constant 0 : index
    %8 = vector.load %arg3[%c0_5, %c0_6, %c0_7] : memref<3x128x128xbf16, #tpu.memory_space<vmem>>, vector<1x128x128xbf16>
    %9 = vector.shape_cast %8 : vector<1x128x128xbf16> to vector<128x128xbf16>
    %cst = arith.constant dense<0.000000e+00> : vector<256x128xf32>
    %10 = tpu.matmul %7, %9, %cst {dimension_numbers = #tpu.dot_dimension_numbers<[1], [0], [0], [1], [0, 0, 1, 1], [], []>} : vector<256x128xbf16>, vector<128x128xbf16>, vector<256x128xf32> -> vector<256x128xf32>
    %11 = arith.addf %3, %10 : vector<256x128xf32>
    %c0_8 = arith.constant 0 : index
    %12 = arith.index_cast %arg1 : i32 to index
    %c1 = arith.constant 1 : index
    %c0_9 = arith.constant 0 : index
    %13 = vector.load %arg2[%c0_8, %12, %c1, %c0_9] : memref<1x18x18x128xbf16, #tpu.memory_space<vmem>>, vector<1x16x16x128xbf16>
    %14 = vector.shape_cast %13 : vector<1x16x16x128xbf16> to vector<16x16x128xbf16>
    %15 = vector.shape_cast %14 : vector<16x16x128xbf16> to vector<256x128xbf16>
    %c1_10 = arith.constant 1 : index
    %c0_11 = arith.constant 0 : index
    %c0_12 = arith.constant 0 : index
    %16 = vector.load %arg3[%c1_10, %c0_11, %c0_12] : memref<3x128x128xbf16, #tpu.memory_space<vmem>>, vector<1x128x128xbf16>
    %17 = vector.shape_cast %16 : vector<1x128x128xbf16> to vector<128x128xbf16>
    %cst_13 = arith.constant dense<0.000000e+00> : vector<256x128xf32>
    %18 = tpu.matmul %15, %17, %cst_13 {dimension_numbers = #tpu.dot_dimension_numbers<[1], [0], [0], [1], [0, 0, 1, 1], [], []>} : vector<256x128xbf16>, vector<128x128xbf16>, vector<256x128xf32> -> vector<256x128xf32>
    %19 = arith.addf %11, %18 : vector<256x128xf32>
    %c0_14 = arith.constant 0 : index
    %20 = arith.index_cast %arg1 : i32 to index
    %c2 = arith.constant 2 : index
    %c0_15 = arith.constant 0 : index
    %21 = vector.load %arg2[%c0_14, %20, %c2, %c0_15] : memref<1x18x18x128xbf16, #tpu.memory_space<vmem>>, vector<1x16x16x128xbf16>
    %22 = vector.shape_cast %21 : vector<1x16x16x128xbf16> to vector<16x16x128xbf16>
    %23 = vector.shape_cast %22 : vector<16x16x128xbf16> to vector<256x128xbf16>
    %c2_16 = arith.constant 2 : index
    %c0_17 = arith.constant 0 : index
    %c0_18 = arith.constant 0 : index
    %24 = vector.load %arg3[%c2_16, %c0_17, %c0_18] : memref<3x128x128xbf16, #tpu.memory_space<vmem>>, vector<1x128x128xbf16>
    %25 = vector.shape_cast %24 : vector<1x128x128xbf16> to vector<128x128xbf16>
    %cst_19 = arith.constant dense<0.000000e+00> : vector<256x128xf32>
    %26 = tpu.matmul %23, %25, %cst_19 {dimension_numbers = #tpu.dot_dimension_numbers<[1], [0], [0], [1], [0, 0, 1, 1], [], []>} : vector<256x128xbf16>, vector<128x128xbf16>, vector<256x128xf32> -> vector<256x128xf32>
    %27 = arith.addf %19, %26 : vector<256x128xf32>
    %c0_20 = arith.constant 0 : index
    %c0_21 = arith.constant 0 : index
    %28 = vector.load %arg6[%c0_20, %c0_21] : memref<256x128xf32, #tpu.memory_space<vmem>>, vector<256x128xf32>
    tpu.vector_store %arg6[%c0_20, %c0_21], %27 {strides = array<i32>} : memref<256x128xf32, #tpu.memory_space<vmem>>, vector<256x128xf32>,
    %c2_i32 = arith.constant 2 : i32
    %29 = arith.cmpi eq, %arg1, %c2_i32 : i32
    %30 = arith.extui %29 : i1 to i32
    %c0_i32_22 = arith.constant 0 : i32
    %31 = arith.cmpi ne, %30, %c0_i32_22 : i32
    scf.if %31 {
      %c0_23 = arith.constant 0 : index
      %c0_24 = arith.constant 0 : index
      %32 = vector.load %arg6[%c0_23, %c0_24] : memref<256x128xf32, #tpu.memory_space<vmem>>, vector<256x128xf32>
      %c0_25 = arith.constant 0 : index
      %c0_26 = arith.constant 0 : index
      %33 = vector.load %arg4[%c0_25, %c0_26] : memref<1x128xf32, #tpu.memory_space<vmem>>, vector<1x128xf32>
      %34 = vector.broadcast %33 : vector<1x128xf32> to vector<256x128xf32>
      %35 = arith.addf %32, %34 : vector<256x128xf32>
      %36 = arith.truncf %35 : vector<256x128xf32> to vector<256x128xbf16>
      %c0_27 = arith.constant 0 : index
      %c0_28 = arith.constant 0 : index
      %c0_29 = arith.constant 0 : index
      %37 = vector.load %arg5[%c0_27, %c0_28, %c0_29] : memref<1x256x128xbf16, #tpu.memory_space<vmem>>, vector<1x256x128xbf16>
      %38 = vector.shape_cast %37 : vector<1x256x128xbf16> to vector<256x128xbf16>
      %39 = vector.shape_cast %36 : vector<256x128xbf16> to vector<1x256x128xbf16>
      tpu.vector_store %arg5[%c0_27, %c0_28, %c0_29], %39 {strides = array<i32>} : memref<1x256x128xbf16, #tpu.memory_space<vmem>>, vector<1x256x128xbf16>,
    } else {
    }
    return
  }
  func.func @transform_0(%arg0: i32, %arg1: i32) -> (i32, i32, i32, i32) {
    %c0_i32 = arith.constant 0 : i32
    %c0_i32_0 = arith.constant 0 : i32
    %c0_i32_1 = arith.constant 0 : i32
    %c0_i32_2 = arith.constant 0 : i32
    return %arg0, %c0_i32, %c0_i32_0, %c0_i32_1 : i32, i32, i32, i32
  }
  func.func @transform_1(%arg0: i32, %arg1: i32) -> (i32, i32, i32) {
    %c0_i32 = arith.constant 0 : i32
    %c0_i32_0 = arith.constant 0 : i32
    %c0_i32_1 = arith.constant 0 : i32
    return %arg1, %c0_i32, %c0_i32_0 : i32, i32, i32
  }
  func.func @transform_2(%arg0: i32, %arg1: i32) -> (i32, i32) {
    %c0_i32 = arith.constant 0 : i32
    %c0_i32_0 = arith.constant 0 : i32
    %c0_i32_1 = arith.constant 0 : i32
    return %c0_i32, %c0_i32_0 : i32, i32
  }
  func.func @transform_3(%arg0: i32, %arg1: i32) -> (i32, i32, i32) {
    %c0_i32 = arith.constant 0 : i32
    %c0_i32_0 = arith.constant 0 : i32
    %c0_i32_1 = arith.constant 0 : i32
    return %arg0, %c0_i32, %c0_i32_0 : i32, i32, i32
  }
}

module attributes {stable_mosaic.version = 11 : i64} {
  func.func @kernel(%arg0: i32, %arg1: i32, %arg2: memref<1x18x18x128xbf16, #tpu.memory_space<vmem>>, %arg3: memref<3x128x128xbf16, #tpu.memory_space<vmem>>, %arg4: memref<1x128xf32, #tpu.memory_space<vmem>>, %arg5: memref<1x128xf32, #tpu.memory_space<vmem>>, %arg6: memref<1x128xf32, #tpu.memory_space<vmem>>, %arg7: memref<1x256x128xbf16, #tpu.memory_space<vmem>>, %arg8: memref<256x128xf32, #tpu.memory_space<vmem>>) attributes {dimension_semantics = [#tpu.dimension_semantics<parallel>, #tpu.dimension_semantics<arbitrary>], iteration_bounds = array<i64: 2, 3>, scalar_prefetch = 0 : i64, scratch_operands = 1 : i64, tpu.core_type = #tpu.core_type<tc>, window_params = [{transform_indices = @transform_0, window_bounds = array<i64: 1, 18, 18, 128>}, {transform_indices = @transform_1, window_bounds = array<i64: 3, 128, 128>}, {pipeline_mode = #tpu.pipeline_mode<synchronous>, transform_indices = @transform_2, window_bounds = array<i64: 1, 128>}, {pipeline_mode = #tpu.pipeline_mode<synchronous>, transform_indices = @transform_3, window_bounds = array<i64: 1, 128>}, {pipeline_mode = #tpu.pipeline_mode<synchronous>, transform_indices = @transform_4, window_bounds = array<i64: 1, 128>}, {transform_indices = @transform_5, window_bounds = array<i64: 1, 256, 128>}]} {
    %c0_i32 = arith.constant 0 : i32
    %0 = arith.cmpi eq, %arg1, %c0_i32 : i32
    %1 = arith.extui %0 : i1 to i32
    %c0_i32_0 = arith.constant 0 : i32
    %2 = arith.cmpi ne, %1, %c0_i32_0 : i32
    scf.if %2 {
      %cst_23 = arith.constant 0.000000e+00 : f32
      %32 = vector.broadcast %cst_23 : f32 to vector<256x128xf32>
      %c0_24 = arith.constant 0 : index
      %c0_25 = arith.constant 0 : index
      %33 = vector.load %arg8[%c0_24, %c0_25] : memref<256x128xf32, #tpu.memory_space<vmem>>, vector<256x128xf32>
      tpu.vector_store %arg8[%c0_24, %c0_25], %32 {strides = array<i32>} : memref<256x128xf32, #tpu.memory_space<vmem>>, vector<256x128xf32>,
    } else {
    }
    %c0 = arith.constant 0 : index
    %c0_1 = arith.constant 0 : index
    %3 = vector.load %arg8[%c0, %c0_1] : memref<256x128xf32, #tpu.memory_space<vmem>>, vector<256x128xf32>
    %c0_2 = arith.constant 0 : index
    %4 = arith.index_cast %arg1 : i32 to index
    %c0_3 = arith.constant 0 : index
    %c0_4 = arith.constant 0 : index
    %5 = vector.load %arg2[%c0_2, %4, %c0_3, %c0_4] : memref<1x18x18x128xbf16, #tpu.memory_space<vmem>>, vector<1x16x16x128xbf16>
    %6 = vector.shape_cast %5 : vector<1x16x16x128xbf16> to vector<16x16x128xbf16>
    %7 = vector.shape_cast %6 : vector<16x16x128xbf16> to vector<256x128xbf16>
    %c0_5 = arith.constant 0 : index
    %c0_6 = arith.constant 0 : index
    %c0_7 = arith.constant 0 : index
    %8 = vector.load %arg3[%c0_5, %c0_6, %c0_7] : memref<3x128x128xbf16, #tpu.memory_space<vmem>>, vector<1x128x128xbf16>
    %9 = vector.shape_cast %8 : vector<1x128x128xbf16> to vector<128x128xbf16>
    %cst = arith.constant dense<0.000000e+00> : vector<256x128xf32>
    %10 = tpu.matmul %7, %9, %cst {dimension_numbers = #tpu.dot_dimension_numbers<[1], [0], [0], [1], [0, 0, 1, 1], [], []>} : vector<256x128xbf16>, vector<128x128xbf16>, vector<256x128xf32> -> vector<256x128xf32>
    %11 = arith.addf %3, %10 : vector<256x128xf32>
    %c0_8 = arith.constant 0 : index
    %12 = arith.index_cast %arg1 : i32 to index
    %c1 = arith.constant 1 : index
    %c0_9 = arith.constant 0 : index
    %13 = vector.load %arg2[%c0_8, %12, %c1, %c0_9] : memref<1x18x18x128xbf16, #tpu.memory_space<vmem>>, vector<1x16x16x128xbf16>
    %14 = vector.shape_cast %13 : vector<1x16x16x128xbf16> to vector<16x16x128xbf16>
    %15 = vector.shape_cast %14 : vector<16x16x128xbf16> to vector<256x128xbf16>
    %c1_10 = arith.constant 1 : index
    %c0_11 = arith.constant 0 : index
    %c0_12 = arith.constant 0 : index
    %16 = vector.load %arg3[%c1_10, %c0_11, %c0_12] : memref<3x128x128xbf16, #tpu.memory_space<vmem>>, vector<1x128x128xbf16>
    %17 = vector.shape_cast %16 : vector<1x128x128xbf16> to vector<128x128xbf16>
    %cst_13 = arith.constant dense<0.000000e+00> : vector<256x128xf32>
    %18 = tpu.matmul %15, %17, %cst_13 {dimension_numbers = #tpu.dot_dimension_numbers<[1], [0], [0], [1], [0, 0, 1, 1], [], []>} : vector<256x128xbf16>, vector<128x128xbf16>, vector<256x128xf32> -> vector<256x128xf32>
    %19 = arith.addf %11, %18 : vector<256x128xf32>
    %c0_14 = arith.constant 0 : index
    %20 = arith.index_cast %arg1 : i32 to index
    %c2 = arith.constant 2 : index
    %c0_15 = arith.constant 0 : index
    %21 = vector.load %arg2[%c0_14, %20, %c2, %c0_15] : memref<1x18x18x128xbf16, #tpu.memory_space<vmem>>, vector<1x16x16x128xbf16>
    %22 = vector.shape_cast %21 : vector<1x16x16x128xbf16> to vector<16x16x128xbf16>
    %23 = vector.shape_cast %22 : vector<16x16x128xbf16> to vector<256x128xbf16>
    %c2_16 = arith.constant 2 : index
    %c0_17 = arith.constant 0 : index
    %c0_18 = arith.constant 0 : index
    %24 = vector.load %arg3[%c2_16, %c0_17, %c0_18] : memref<3x128x128xbf16, #tpu.memory_space<vmem>>, vector<1x128x128xbf16>
    %25 = vector.shape_cast %24 : vector<1x128x128xbf16> to vector<128x128xbf16>
    %cst_19 = arith.constant dense<0.000000e+00> : vector<256x128xf32>
    %26 = tpu.matmul %23, %25, %cst_19 {dimension_numbers = #tpu.dot_dimension_numbers<[1], [0], [0], [1], [0, 0, 1, 1], [], []>} : vector<256x128xbf16>, vector<128x128xbf16>, vector<256x128xf32> -> vector<256x128xf32>
    %27 = arith.addf %19, %26 : vector<256x128xf32>
    %c0_20 = arith.constant 0 : index
    %c0_21 = arith.constant 0 : index
    %28 = vector.load %arg8[%c0_20, %c0_21] : memref<256x128xf32, #tpu.memory_space<vmem>>, vector<256x128xf32>
    tpu.vector_store %arg8[%c0_20, %c0_21], %27 {strides = array<i32>} : memref<256x128xf32, #tpu.memory_space<vmem>>, vector<256x128xf32>,
    %c2_i32 = arith.constant 2 : i32
    %29 = arith.cmpi eq, %arg1, %c2_i32 : i32
    %30 = arith.extui %29 : i1 to i32
    %c0_i32_22 = arith.constant 0 : i32
    %31 = arith.cmpi ne, %30, %c0_i32_22 : i32
    scf.if %31 {
      %c0_23 = arith.constant 0 : index
      %c0_24 = arith.constant 0 : index
      %32 = vector.load %arg8[%c0_23, %c0_24] : memref<256x128xf32, #tpu.memory_space<vmem>>, vector<256x128xf32>
      %c0_25 = arith.constant 0 : index
      %c0_26 = arith.constant 0 : index
      %33 = vector.load %arg4[%c0_25, %c0_26] : memref<1x128xf32, #tpu.memory_space<vmem>>, vector<1x128xf32>
      %34 = vector.broadcast %33 : vector<1x128xf32> to vector<256x128xf32>
      %35 = arith.addf %32, %34 : vector<256x128xf32>
      %c0_27 = arith.constant 0 : index
      %c0_28 = arith.constant 0 : index
      %36 = vector.load %arg5[%c0_27, %c0_28] : memref<1x128xf32, #tpu.memory_space<vmem>>, vector<1x128xf32>
      %37 = vector.broadcast %36 : vector<1x128xf32> to vector<256x128xf32>
      %38 = arith.mulf %35, %37 : vector<256x128xf32>
      %c0_29 = arith.constant 0 : index
      %c0_30 = arith.constant 0 : index
      %39 = vector.load %arg6[%c0_29, %c0_30] : memref<1x128xf32, #tpu.memory_space<vmem>>, vector<1x128xf32>
      %40 = vector.broadcast %39 : vector<1x128xf32> to vector<256x128xf32>
      %41 = arith.addf %38, %40 : vector<256x128xf32>
      %cst_31 = arith.constant 0.000000e+00 : f32
      %42 = vector.broadcast %cst_31 : f32 to vector<256x128xf32>
      %43 = arith.maximumf %41, %42 : vector<256x128xf32>
      %44 = arith.truncf %43 : vector<256x128xf32> to vector<256x128xbf16>
      %c0_32 = arith.constant 0 : index
      %c0_33 = arith.constant 0 : index
      %c0_34 = arith.constant 0 : index
      %45 = vector.load %arg7[%c0_32, %c0_33, %c0_34] : memref<1x256x128xbf16, #tpu.memory_space<vmem>>, vector<1x256x128xbf16>
      %46 = vector.shape_cast %45 : vector<1x256x128xbf16> to vector<256x128xbf16>
      %47 = vector.shape_cast %44 : vector<256x128xbf16> to vector<1x256x128xbf16>
      tpu.vector_store %arg7[%c0_32, %c0_33, %c0_34], %47 {strides = array<i32>} : memref<1x256x128xbf16, #tpu.memory_space<vmem>>, vector<1x256x128xbf16>,
    } else {
    }
    return
  }
  func.func @transform_0(%arg0: i32, %arg1: i32) -> (i32, i32, i32, i32) {
    %c0_i32 = arith.constant 0 : i32
    %c0_i32_0 = arith.constant 0 : i32
    %c0_i32_1 = arith.constant 0 : i32
    %c0_i32_2 = arith.constant 0 : i32
    return %arg0, %c0_i32, %c0_i32_0, %c0_i32_1 : i32, i32, i32, i32
  }
  func.func @transform_1(%arg0: i32, %arg1: i32) -> (i32, i32, i32) {
    %c0_i32 = arith.constant 0 : i32
    %c0_i32_0 = arith.constant 0 : i32
    %c0_i32_1 = arith.constant 0 : i32
    return %arg1, %c0_i32, %c0_i32_0 : i32, i32, i32
  }
  func.func @transform_2(%arg0: i32, %arg1: i32) -> (i32, i32) {
    %c0_i32 = arith.constant 0 : i32
    %c0_i32_0 = arith.constant 0 : i32
    %c0_i32_1 = arith.constant 0 : i32
    return %c0_i32, %c0_i32_0 : i32, i32
  }
  func.func @transform_3(%arg0: i32, %arg1: i32) -> (i32, i32) {
    %c0_i32 = arith.constant 0 : i32
    %c0_i32_0 = arith.constant 0 : i32
    %c0_i32_1 = arith.constant 0 : i32
    return %c0_i32, %c0_i32_0 : i32, i32
  }
  func.func @transform_4(%arg0: i32, %arg1: i32) -> (i32, i32) {
    %c0_i32 = arith.constant 0 : i32
    %c0_i32_0 = arith.constant 0 : i32
    %c0_i32_1 = arith.constant 0 : i32
    return %c0_i32, %c0_i32_0 : i32, i32
  }
  func.func @transform_5(%arg0: i32, %arg1: i32) -> (i32, i32, i32) {
    %c0_i32 = arith.constant 0 : i32
    %c0_i32_0 = arith.constant 0 : i32
    %c0_i32_1 = arith.constant 0 : i32
    return %arg0, %c0_i32, %c0_i32_0 : i32, i32, i32
  }
}

module attributes {stable_mosaic.version = 11 : i64} {
  func.func @_bn_relu_kernel(%arg0: i32, %arg1: memref<1x256x128xbf16, #tpu.memory_space<vmem>>, %arg2: memref<1x128xf32, #tpu.memory_space<vmem>>, %arg3: memref<1x128xf32, #tpu.memory_space<vmem>>, %arg4: memref<1x256x128xbf16, #tpu.memory_space<vmem>>) attributes {dimension_semantics = [#tpu.dimension_semantics<parallel>], iteration_bounds = array<i64: 2>, scalar_prefetch = 0 : i64, scratch_operands = 0 : i64, tpu.core_type = #tpu.core_type<tc>, window_params = [{transform_indices = @transform_0, window_bounds = array<i64: 1, 256, 128>}, {pipeline_mode = #tpu.pipeline_mode<synchronous>, transform_indices = @transform_1, window_bounds = array<i64: 1, 128>}, {pipeline_mode = #tpu.pipeline_mode<synchronous>, transform_indices = @transform_2, window_bounds = array<i64: 1, 128>}, {transform_indices = @transform_3, window_bounds = array<i64: 1, 256, 128>}]} {
    %c0 = arith.constant 0 : index
    %c0_0 = arith.constant 0 : index
    %c0_1 = arith.constant 0 : index
    %0 = vector.load %arg1[%c0, %c0_0, %c0_1] : memref<1x256x128xbf16, #tpu.memory_space<vmem>>, vector<1x256x128xbf16>
    %1 = vector.shape_cast %0 : vector<1x256x128xbf16> to vector<256x128xbf16>
    %2 = arith.extf %1 : vector<256x128xbf16> to vector<256x128xf32>
    %c0_2 = arith.constant 0 : index
    %c0_3 = arith.constant 0 : index
    %3 = vector.load %arg2[%c0_2, %c0_3] : memref<1x128xf32, #tpu.memory_space<vmem>>, vector<1x128xf32>
    %4 = vector.broadcast %3 : vector<1x128xf32> to vector<256x128xf32>
    %5 = arith.mulf %2, %4 : vector<256x128xf32>
    %c0_4 = arith.constant 0 : index
    %c0_5 = arith.constant 0 : index
    %6 = vector.load %arg3[%c0_4, %c0_5] : memref<1x128xf32, #tpu.memory_space<vmem>>, vector<1x128xf32>
    %7 = vector.broadcast %6 : vector<1x128xf32> to vector<256x128xf32>
    %8 = arith.addf %5, %7 : vector<256x128xf32>
    %cst = arith.constant 0.000000e+00 : f32
    %9 = vector.broadcast %cst : f32 to vector<256x128xf32>
    %10 = arith.maximumf %8, %9 : vector<256x128xf32>
    %11 = arith.truncf %10 : vector<256x128xf32> to vector<256x128xbf16>
    %c0_6 = arith.constant 0 : index
    %c0_7 = arith.constant 0 : index
    %c0_8 = arith.constant 0 : index
    %12 = vector.load %arg4[%c0_6, %c0_7, %c0_8] : memref<1x256x128xbf16, #tpu.memory_space<vmem>>, vector<1x256x128xbf16>
    %13 = vector.shape_cast %12 : vector<1x256x128xbf16> to vector<256x128xbf16>
    %14 = vector.shape_cast %11 : vector<256x128xbf16> to vector<1x256x128xbf16>
    tpu.vector_store %arg4[%c0_6, %c0_7, %c0_8], %14 {strides = array<i32>} : memref<1x256x128xbf16, #tpu.memory_space<vmem>>, vector<1x256x128xbf16>,
    return
  }
  func.func @transform_0(%arg0: i32) -> (i32, i32, i32) {
    %c0_i32 = arith.constant 0 : i32
    %c0_i32_0 = arith.constant 0 : i32
    %c0_i32_1 = arith.constant 0 : i32
    return %arg0, %c0_i32, %c0_i32_0 : i32, i32, i32
  }
  func.func @transform_1(%arg0: i32) -> (i32, i32) {
    %c0_i32 = arith.constant 0 : i32
    %c0_i32_0 = arith.constant 0 : i32
    %c0_i32_1 = arith.constant 0 : i32
    return %c0_i32, %c0_i32_0 : i32, i32
  }
  func.func @transform_2(%arg0: i32) -> (i32, i32) {
    %c0_i32 = arith.constant 0 : i32
    %c0_i32_0 = arith.constant 0 : i32
    %c0_i32_1 = arith.constant 0 : i32
    return %c0_i32, %c0_i32_0 : i32, i32
  }
  func.func @transform_3(%arg0: i32) -> (i32, i32, i32) {
    %c0_i32 = arith.constant 0 : i32
    %c0_i32_0 = arith.constant 0 : i32
    %c0_i32_1 = arith.constant 0 : i32
    return %arg0, %c0_i32, %c0_i32_0 : i32, i32, i32
  }
}

module attributes {stable_mosaic.version = 11 : i64} {
  func.func @kernel(%arg0: i32, %arg1: memref<1x256x128xbf16, #tpu.memory_space<vmem>>, %arg2: memref<128x128xbf16, #tpu.memory_space<vmem>>, %arg3: memref<1x128xf32, #tpu.memory_space<vmem>>, %arg4: memref<1x256x128xbf16, #tpu.memory_space<vmem>>, %arg5: memref<1x256x128xbf16, #tpu.memory_space<vmem>>) attributes {dimension_semantics = [#tpu.dimension_semantics<parallel>], iteration_bounds = array<i64: 2>, scalar_prefetch = 0 : i64, scratch_operands = 0 : i64, tpu.core_type = #tpu.core_type<tc>, window_params = [{transform_indices = @transform_0, window_bounds = array<i64: 1, 256, 128>}, {pipeline_mode = #tpu.pipeline_mode<synchronous>, transform_indices = @transform_1, window_bounds = array<i64: 128, 128>}, {pipeline_mode = #tpu.pipeline_mode<synchronous>, transform_indices = @transform_2, window_bounds = array<i64: 1, 128>}, {transform_indices = @transform_3, window_bounds = array<i64: 1, 256, 128>}, {transform_indices = @transform_4, window_bounds = array<i64: 1, 256, 128>}]} {
    %c0 = arith.constant 0 : index
    %c0_0 = arith.constant 0 : index
    %c0_1 = arith.constant 0 : index
    %0 = vector.load %arg1[%c0, %c0_0, %c0_1] : memref<1x256x128xbf16, #tpu.memory_space<vmem>>, vector<1x256x128xbf16>
    %1 = vector.shape_cast %0 : vector<1x256x128xbf16> to vector<256x128xbf16>
    %c0_2 = arith.constant 0 : index
    %c0_3 = arith.constant 0 : index
    %2 = vector.load %arg2[%c0_2, %c0_3] : memref<128x128xbf16, #tpu.memory_space<vmem>>, vector<128x128xbf16>
    %cst = arith.constant dense<0.000000e+00> : vector<256x128xf32>
    %3 = tpu.matmul %1, %2, %cst {dimension_numbers = #tpu.dot_dimension_numbers<[1], [0], [0], [1], [0, 0, 1, 1], [], []>} : vector<256x128xbf16>, vector<128x128xbf16>, vector<256x128xf32> -> vector<256x128xf32>
    %c0_4 = arith.constant 0 : index
    %c0_5 = arith.constant 0 : index
    %4 = vector.load %arg3[%c0_4, %c0_5] : memref<1x128xf32, #tpu.memory_space<vmem>>, vector<1x128xf32>
    %5 = vector.broadcast %4 : vector<1x128xf32> to vector<256x128xf32>
    %6 = arith.addf %3, %5 : vector<256x128xf32>
    %c0_6 = arith.constant 0 : index
    %c0_7 = arith.constant 0 : index
    %c0_8 = arith.constant 0 : index
    %7 = vector.load %arg4[%c0_6, %c0_7, %c0_8] : memref<1x256x128xbf16, #tpu.memory_space<vmem>>, vector<1x256x128xbf16>
    %8 = vector.shape_cast %7 : vector<1x256x128xbf16> to vector<256x128xbf16>
    %9 = arith.extf %8 : vector<256x128xbf16> to vector<256x128xf32>
    %10 = arith.addf %6, %9 : vector<256x128xf32>
    %11 = arith.truncf %10 : vector<256x128xf32> to vector<256x128xbf16>
    %c0_9 = arith.constant 0 : index
    %c0_10 = arith.constant 0 : index
    %c0_11 = arith.constant 0 : index
    %12 = vector.load %arg5[%c0_9, %c0_10, %c0_11] : memref<1x256x128xbf16, #tpu.memory_space<vmem>>, vector<1x256x128xbf16>
    %13 = vector.shape_cast %12 : vector<1x256x128xbf16> to vector<256x128xbf16>
    %14 = vector.shape_cast %11 : vector<256x128xbf16> to vector<1x256x128xbf16>
    tpu.vector_store %arg5[%c0_9, %c0_10, %c0_11], %14 {strides = array<i32>} : memref<1x256x128xbf16, #tpu.memory_space<vmem>>, vector<1x256x128xbf16>,
    return
  }
  func.func @transform_0(%arg0: i32) -> (i32, i32, i32) {
    %c0_i32 = arith.constant 0 : i32
    %c0_i32_0 = arith.constant 0 : i32
    %c0_i32_1 = arith.constant 0 : i32
    return %arg0, %c0_i32, %c0_i32_0 : i32, i32, i32
  }
  func.func @transform_1(%arg0: i32) -> (i32, i32) {
    %c0_i32 = arith.constant 0 : i32
    %c0_i32_0 = arith.constant 0 : i32
    %c0_i32_1 = arith.constant 0 : i32
    return %c0_i32, %c0_i32_0 : i32, i32
  }
  func.func @transform_2(%arg0: i32) -> (i32, i32) {
    %c0_i32 = arith.constant 0 : i32
    %c0_i32_0 = arith.constant 0 : i32
    %c0_i32_1 = arith.constant 0 : i32
    return %c0_i32, %c0_i32_0 : i32, i32
  }
  func.func @transform_3(%arg0: i32) -> (i32, i32, i32) {
    %c0_i32 = arith.constant 0 : i32
    %c0_i32_0 = arith.constant 0 : i32
    %c0_i32_1 = arith.constant 0 : i32
    return %arg0, %c0_i32, %c0_i32_0 : i32, i32, i32
  }
  func.func @transform_4(%arg0: i32) -> (i32, i32, i32) {
    %c0_i32 = arith.constant 0 : i32
    %c0_i32_0 = arith.constant 0 : i32
    %c0_i32_1 = arith.constant 0 : i32
    return %arg0, %c0_i32, %c0_i32_0 : i32, i32, i32
  }
}

module attributes {stable_mosaic.version = 11 : i64} {
  func.func @kernel(%arg0: i32, %arg1: memref<1x64x128xbf16, #tpu.memory_space<vmem>>, %arg2: memref<128x128xbf16, #tpu.memory_space<vmem>>, %arg3: memref<1x128xf32, #tpu.memory_space<vmem>>, %arg4: memref<1x64x128xbf16, #tpu.memory_space<vmem>>, %arg5: memref<1x64x128xbf16, #tpu.memory_space<vmem>>) attributes {dimension_semantics = [#tpu.dimension_semantics<parallel>], iteration_bounds = array<i64: 2>, scalar_prefetch = 0 : i64, scratch_operands = 0 : i64, tpu.core_type = #tpu.core_type<tc>, window_params = [{transform_indices = @transform_0, window_bounds = array<i64: 1, 64, 128>}, {pipeline_mode = #tpu.pipeline_mode<synchronous>, transform_indices = @transform_1, window_bounds = array<i64: 128, 128>}, {pipeline_mode = #tpu.pipeline_mode<synchronous>, transform_indices = @transform_2, window_bounds = array<i64: 1, 128>}, {transform_indices = @transform_3, window_bounds = array<i64: 1, 64, 128>}, {transform_indices = @transform_4, window_bounds = array<i64: 1, 64, 128>}]} {
    %c0 = arith.constant 0 : index
    %c0_0 = arith.constant 0 : index
    %c0_1 = arith.constant 0 : index
    %0 = vector.load %arg1[%c0, %c0_0, %c0_1] : memref<1x64x128xbf16, #tpu.memory_space<vmem>>, vector<1x64x128xbf16>
    %1 = vector.shape_cast %0 : vector<1x64x128xbf16> to vector<64x128xbf16>
    %c0_2 = arith.constant 0 : index
    %c0_3 = arith.constant 0 : index
    %2 = vector.load %arg2[%c0_2, %c0_3] : memref<128x128xbf16, #tpu.memory_space<vmem>>, vector<128x128xbf16>
    %cst = arith.constant dense<0.000000e+00> : vector<64x128xf32>
    %3 = tpu.matmul %1, %2, %cst {dimension_numbers = #tpu.dot_dimension_numbers<[1], [0], [0], [1], [0, 0, 1, 1], [], []>} : vector<64x128xbf16>, vector<128x128xbf16>, vector<64x128xf32> -> vector<64x128xf32>
    %c0_4 = arith.constant 0 : index
    %c0_5 = arith.constant 0 : index
    %4 = vector.load %arg3[%c0_4, %c0_5] : memref<1x128xf32, #tpu.memory_space<vmem>>, vector<1x128xf32>
    %5 = vector.broadcast %4 : vector<1x128xf32> to vector<64x128xf32>
    %6 = arith.addf %3, %5 : vector<64x128xf32>
    %c0_6 = arith.constant 0 : index
    %c0_7 = arith.constant 0 : index
    %c0_8 = arith.constant 0 : index
    %7 = vector.load %arg4[%c0_6, %c0_7, %c0_8] : memref<1x64x128xbf16, #tpu.memory_space<vmem>>, vector<1x64x128xbf16>
    %8 = vector.shape_cast %7 : vector<1x64x128xbf16> to vector<64x128xbf16>
    %9 = arith.extf %8 : vector<64x128xbf16> to vector<64x128xf32>
    %10 = arith.addf %6, %9 : vector<64x128xf32>
    %11 = arith.truncf %10 : vector<64x128xf32> to vector<64x128xbf16>
    %c0_9 = arith.constant 0 : index
    %c0_10 = arith.constant 0 : index
    %c0_11 = arith.constant 0 : index
    %12 = vector.load %arg5[%c0_9, %c0_10, %c0_11] : memref<1x64x128xbf16, #tpu.memory_space<vmem>>, vector<1x64x128xbf16>
    %13 = vector.shape_cast %12 : vector<1x64x128xbf16> to vector<64x128xbf16>
    %14 = vector.shape_cast %11 : vector<64x128xbf16> to vector<1x64x128xbf16>
    tpu.vector_store %arg5[%c0_9, %c0_10, %c0_11], %14 {strides = array<i32>} : memref<1x64x128xbf16, #tpu.memory_space<vmem>>, vector<1x64x128xbf16>,
    return
  }
  func.func @transform_0(%arg0: i32) -> (i32, i32, i32) {
    %c0_i32 = arith.constant 0 : i32
    %c0_i32_0 = arith.constant 0 : i32
    %c0_i32_1 = arith.constant 0 : i32
    return %arg0, %c0_i32, %c0_i32_0 : i32, i32, i32
  }
  func.func @transform_1(%arg0: i32) -> (i32, i32) {
    %c0_i32 = arith.constant 0 : i32
    %c0_i32_0 = arith.constant 0 : i32
    %c0_i32_1 = arith.constant 0 : i32
    return %c0_i32, %c0_i32_0 : i32, i32
  }
  func.func @transform_2(%arg0: i32) -> (i32, i32) {
    %c0_i32 = arith.constant 0 : i32
    %c0_i32_0 = arith.constant 0 : i32
    %c0_i32_1 = arith.constant 0 : i32
    return %c0_i32, %c0_i32_0 : i32, i32
  }
  func.func @transform_3(%arg0: i32) -> (i32, i32, i32) {
    %c0_i32 = arith.constant 0 : i32
    %c0_i32_0 = arith.constant 0 : i32
    %c0_i32_1 = arith.constant 0 : i32
    return %arg0, %c0_i32, %c0_i32_0 : i32, i32, i32
  }
  func.func @transform_4(%arg0: i32) -> (i32, i32, i32) {
    %c0_i32 = arith.constant 0 : i32
    %c0_i32_0 = arith.constant 0 : i32
    %c0_i32_1 = arith.constant 0 : i32
    return %arg0, %c0_i32, %c0_i32_0 : i32, i32, i32
  }
}

module attributes {stable_mosaic.version = 11 : i64} {
  func.func @_bn_relu_kernel(%arg0: i32, %arg1: memref<1x64x128xbf16, #tpu.memory_space<vmem>>, %arg2: memref<1x128xf32, #tpu.memory_space<vmem>>, %arg3: memref<1x128xf32, #tpu.memory_space<vmem>>, %arg4: memref<1x64x128xbf16, #tpu.memory_space<vmem>>) attributes {dimension_semantics = [#tpu.dimension_semantics<parallel>], iteration_bounds = array<i64: 2>, scalar_prefetch = 0 : i64, scratch_operands = 0 : i64, tpu.core_type = #tpu.core_type<tc>, window_params = [{transform_indices = @transform_0, window_bounds = array<i64: 1, 64, 128>}, {pipeline_mode = #tpu.pipeline_mode<synchronous>, transform_indices = @transform_1, window_bounds = array<i64: 1, 128>}, {pipeline_mode = #tpu.pipeline_mode<synchronous>, transform_indices = @transform_2, window_bounds = array<i64: 1, 128>}, {transform_indices = @transform_3, window_bounds = array<i64: 1, 64, 128>}]} {
    %c0 = arith.constant 0 : index
    %c0_0 = arith.constant 0 : index
    %c0_1 = arith.constant 0 : index
    %0 = vector.load %arg1[%c0, %c0_0, %c0_1] : memref<1x64x128xbf16, #tpu.memory_space<vmem>>, vector<1x64x128xbf16>
    %1 = vector.shape_cast %0 : vector<1x64x128xbf16> to vector<64x128xbf16>
    %2 = arith.extf %1 : vector<64x128xbf16> to vector<64x128xf32>
    %c0_2 = arith.constant 0 : index
    %c0_3 = arith.constant 0 : index
    %3 = vector.load %arg2[%c0_2, %c0_3] : memref<1x128xf32, #tpu.memory_space<vmem>>, vector<1x128xf32>
    %4 = vector.broadcast %3 : vector<1x128xf32> to vector<64x128xf32>
    %5 = arith.mulf %2, %4 : vector<64x128xf32>
    %c0_4 = arith.constant 0 : index
    %c0_5 = arith.constant 0 : index
    %6 = vector.load %arg3[%c0_4, %c0_5] : memref<1x128xf32, #tpu.memory_space<vmem>>, vector<1x128xf32>
    %7 = vector.broadcast %6 : vector<1x128xf32> to vector<64x128xf32>
    %8 = arith.addf %5, %7 : vector<64x128xf32>
    %cst = arith.constant 0.000000e+00 : f32
    %9 = vector.broadcast %cst : f32 to vector<64x128xf32>
    %10 = arith.maximumf %8, %9 : vector<64x128xf32>
    %11 = arith.truncf %10 : vector<64x128xf32> to vector<64x128xbf16>
    %c0_6 = arith.constant 0 : index
    %c0_7 = arith.constant 0 : index
    %c0_8 = arith.constant 0 : index
    %12 = vector.load %arg4[%c0_6, %c0_7, %c0_8] : memref<1x64x128xbf16, #tpu.memory_space<vmem>>, vector<1x64x128xbf16>
    %13 = vector.shape_cast %12 : vector<1x64x128xbf16> to vector<64x128xbf16>
    %14 = vector.shape_cast %11 : vector<64x128xbf16> to vector<1x64x128xbf16>
    tpu.vector_store %arg4[%c0_6, %c0_7, %c0_8], %14 {strides = array<i32>} : memref<1x64x128xbf16, #tpu.memory_space<vmem>>, vector<1x64x128xbf16>,
    return
  }
  func.func @transform_0(%arg0: i32) -> (i32, i32, i32) {
    %c0_i32 = arith.constant 0 : i32
    %c0_i32_0 = arith.constant 0 : i32
    %c0_i32_1 = arith.constant 0 : i32
    return %arg0, %c0_i32, %c0_i32_0 : i32, i32, i32
  }
  func.func @transform_1(%arg0: i32) -> (i32, i32) {
    %c0_i32 = arith.constant 0 : i32
    %c0_i32_0 = arith.constant 0 : i32
    %c0_i32_1 = arith.constant 0 : i32
    return %c0_i32, %c0_i32_0 : i32, i32
  }
  func.func @transform_2(%arg0: i32) -> (i32, i32) {
    %c0_i32 = arith.constant 0 : i32
    %c0_i32_0 = arith.constant 0 : i32
    %c0_i32_1 = arith.constant 0 : i32
    return %c0_i32, %c0_i32_0 : i32, i32
  }
  func.func @transform_3(%arg0: i32) -> (i32, i32, i32) {
    %c0_i32 = arith.constant 0 : i32
    %c0_i32_0 = arith.constant 0 : i32
    %c0_i32_1 = arith.constant 0 : i32
    return %arg0, %c0_i32, %c0_i32_0 : i32, i32, i32
  }
}

module attributes {stable_mosaic.version = 11 : i64} {
  func.func @kernel(%arg0: i32, %arg1: i32, %arg2: memref<1x10x10x128xbf16, #tpu.memory_space<vmem>>, %arg3: memref<3x128x128xbf16, #tpu.memory_space<vmem>>, %arg4: memref<1x128xf32, #tpu.memory_space<vmem>>, %arg5: memref<1x128xf32, #tpu.memory_space<vmem>>, %arg6: memref<1x128xf32, #tpu.memory_space<vmem>>, %arg7: memref<1x64x128xbf16, #tpu.memory_space<vmem>>, %arg8: memref<64x128xf32, #tpu.memory_space<vmem>>) attributes {dimension_semantics = [#tpu.dimension_semantics<parallel>, #tpu.dimension_semantics<arbitrary>], iteration_bounds = array<i64: 2, 3>, scalar_prefetch = 0 : i64, scratch_operands = 1 : i64, tpu.core_type = #tpu.core_type<tc>, window_params = [{transform_indices = @transform_0, window_bounds = array<i64: 1, 10, 10, 128>}, {transform_indices = @transform_1, window_bounds = array<i64: 3, 128, 128>}, {pipeline_mode = #tpu.pipeline_mode<synchronous>, transform_indices = @transform_2, window_bounds = array<i64: 1, 128>}, {pipeline_mode = #tpu.pipeline_mode<synchronous>, transform_indices = @transform_3, window_bounds = array<i64: 1, 128>}, {pipeline_mode = #tpu.pipeline_mode<synchronous>, transform_indices = @transform_4, window_bounds = array<i64: 1, 128>}, {transform_indices = @transform_5, window_bounds = array<i64: 1, 64, 128>}]} {
    %c0_i32 = arith.constant 0 : i32
    %0 = arith.cmpi eq, %arg1, %c0_i32 : i32
    %1 = arith.extui %0 : i1 to i32
    %c0_i32_0 = arith.constant 0 : i32
    %2 = arith.cmpi ne, %1, %c0_i32_0 : i32
    scf.if %2 {
      %cst_23 = arith.constant 0.000000e+00 : f32
      %32 = vector.broadcast %cst_23 : f32 to vector<64x128xf32>
      %c0_24 = arith.constant 0 : index
      %c0_25 = arith.constant 0 : index
      %33 = vector.load %arg8[%c0_24, %c0_25] : memref<64x128xf32, #tpu.memory_space<vmem>>, vector<64x128xf32>
      tpu.vector_store %arg8[%c0_24, %c0_25], %32 {strides = array<i32>} : memref<64x128xf32, #tpu.memory_space<vmem>>, vector<64x128xf32>,
    } else {
    }
    %c0 = arith.constant 0 : index
    %c0_1 = arith.constant 0 : index
    %3 = vector.load %arg8[%c0, %c0_1] : memref<64x128xf32, #tpu.memory_space<vmem>>, vector<64x128xf32>
    %c0_2 = arith.constant 0 : index
    %4 = arith.index_cast %arg1 : i32 to index
    %c0_3 = arith.constant 0 : index
    %c0_4 = arith.constant 0 : index
    %5 = vector.load %arg2[%c0_2, %4, %c0_3, %c0_4] : memref<1x10x10x128xbf16, #tpu.memory_space<vmem>>, vector<1x8x8x128xbf16>
    %6 = vector.shape_cast %5 : vector<1x8x8x128xbf16> to vector<8x8x128xbf16>
    %7 = vector.shape_cast %6 : vector<8x8x128xbf16> to vector<64x128xbf16>
    %c0_5 = arith.constant 0 : index
    %c0_6 = arith.constant 0 : index
    %c0_7 = arith.constant 0 : index
    %8 = vector.load %arg3[%c0_5, %c0_6, %c0_7] : memref<3x128x128xbf16, #tpu.memory_space<vmem>>, vector<1x128x128xbf16>
    %9 = vector.shape_cast %8 : vector<1x128x128xbf16> to vector<128x128xbf16>
    %cst = arith.constant dense<0.000000e+00> : vector<64x128xf32>
    %10 = tpu.matmul %7, %9, %cst {dimension_numbers = #tpu.dot_dimension_numbers<[1], [0], [0], [1], [0, 0, 1, 1], [], []>} : vector<64x128xbf16>, vector<128x128xbf16>, vector<64x128xf32> -> vector<64x128xf32>
    %11 = arith.addf %3, %10 : vector<64x128xf32>
    %c0_8 = arith.constant 0 : index
    %12 = arith.index_cast %arg1 : i32 to index
    %c1 = arith.constant 1 : index
    %c0_9 = arith.constant 0 : index
    %13 = vector.load %arg2[%c0_8, %12, %c1, %c0_9] : memref<1x10x10x128xbf16, #tpu.memory_space<vmem>>, vector<1x8x8x128xbf16>
    %14 = vector.shape_cast %13 : vector<1x8x8x128xbf16> to vector<8x8x128xbf16>
    %15 = vector.shape_cast %14 : vector<8x8x128xbf16> to vector<64x128xbf16>
    %c1_10 = arith.constant 1 : index
    %c0_11 = arith.constant 0 : index
    %c0_12 = arith.constant 0 : index
    %16 = vector.load %arg3[%c1_10, %c0_11, %c0_12] : memref<3x128x128xbf16, #tpu.memory_space<vmem>>, vector<1x128x128xbf16>
    %17 = vector.shape_cast %16 : vector<1x128x128xbf16> to vector<128x128xbf16>
    %cst_13 = arith.constant dense<0.000000e+00> : vector<64x128xf32>
    %18 = tpu.matmul %15, %17, %cst_13 {dimension_numbers = #tpu.dot_dimension_numbers<[1], [0], [0], [1], [0, 0, 1, 1], [], []>} : vector<64x128xbf16>, vector<128x128xbf16>, vector<64x128xf32> -> vector<64x128xf32>
    %19 = arith.addf %11, %18 : vector<64x128xf32>
    %c0_14 = arith.constant 0 : index
    %20 = arith.index_cast %arg1 : i32 to index
    %c2 = arith.constant 2 : index
    %c0_15 = arith.constant 0 : index
    %21 = vector.load %arg2[%c0_14, %20, %c2, %c0_15] : memref<1x10x10x128xbf16, #tpu.memory_space<vmem>>, vector<1x8x8x128xbf16>
    %22 = vector.shape_cast %21 : vector<1x8x8x128xbf16> to vector<8x8x128xbf16>
    %23 = vector.shape_cast %22 : vector<8x8x128xbf16> to vector<64x128xbf16>
    %c2_16 = arith.constant 2 : index
    %c0_17 = arith.constant 0 : index
    %c0_18 = arith.constant 0 : index
    %24 = vector.load %arg3[%c2_16, %c0_17, %c0_18] : memref<3x128x128xbf16, #tpu.memory_space<vmem>>, vector<1x128x128xbf16>
    %25 = vector.shape_cast %24 : vector<1x128x128xbf16> to vector<128x128xbf16>
    %cst_19 = arith.constant dense<0.000000e+00> : vector<64x128xf32>
    %26 = tpu.matmul %23, %25, %cst_19 {dimension_numbers = #tpu.dot_dimension_numbers<[1], [0], [0], [1], [0, 0, 1, 1], [], []>} : vector<64x128xbf16>, vector<128x128xbf16>, vector<64x128xf32> -> vector<64x128xf32>
    %27 = arith.addf %19, %26 : vector<64x128xf32>
    %c0_20 = arith.constant 0 : index
    %c0_21 = arith.constant 0 : index
    %28 = vector.load %arg8[%c0_20, %c0_21] : memref<64x128xf32, #tpu.memory_space<vmem>>, vector<64x128xf32>
    tpu.vector_store %arg8[%c0_20, %c0_21], %27 {strides = array<i32>} : memref<64x128xf32, #tpu.memory_space<vmem>>, vector<64x128xf32>,
    %c2_i32 = arith.constant 2 : i32
    %29 = arith.cmpi eq, %arg1, %c2_i32 : i32
    %30 = arith.extui %29 : i1 to i32
    %c0_i32_22 = arith.constant 0 : i32
    %31 = arith.cmpi ne, %30, %c0_i32_22 : i32
    scf.if %31 {
      %c0_23 = arith.constant 0 : index
      %c0_24 = arith.constant 0 : index
      %32 = vector.load %arg8[%c0_23, %c0_24] : memref<64x128xf32, #tpu.memory_space<vmem>>, vector<64x128xf32>
      %c0_25 = arith.constant 0 : index
      %c0_26 = arith.constant 0 : index
      %33 = vector.load %arg4[%c0_25, %c0_26] : memref<1x128xf32, #tpu.memory_space<vmem>>, vector<1x128xf32>
      %34 = vector.broadcast %33 : vector<1x128xf32> to vector<64x128xf32>
      %35 = arith.addf %32, %34 : vector<64x128xf32>
      %c0_27 = arith.constant 0 : index
      %c0_28 = arith.constant 0 : index
      %36 = vector.load %arg5[%c0_27, %c0_28] : memref<1x128xf32, #tpu.memory_space<vmem>>, vector<1x128xf32>
      %37 = vector.broadcast %36 : vector<1x128xf32> to vector<64x128xf32>
      %38 = arith.mulf %35, %37 : vector<64x128xf32>
      %c0_29 = arith.constant 0 : index
      %c0_30 = arith.constant 0 : index
      %39 = vector.load %arg6[%c0_29, %c0_30] : memref<1x128xf32, #tpu.memory_space<vmem>>, vector<1x128xf32>
      %40 = vector.broadcast %39 : vector<1x128xf32> to vector<64x128xf32>
      %41 = arith.addf %38, %40 : vector<64x128xf32>
      %cst_31 = arith.constant 0.000000e+00 : f32
      %42 = vector.broadcast %cst_31 : f32 to vector<64x128xf32>
      %43 = arith.maximumf %41, %42 : vector<64x128xf32>
      %44 = arith.truncf %43 : vector<64x128xf32> to vector<64x128xbf16>
      %c0_32 = arith.constant 0 : index
      %c0_33 = arith.constant 0 : index
      %c0_34 = arith.constant 0 : index
      %45 = vector.load %arg7[%c0_32, %c0_33, %c0_34] : memref<1x64x128xbf16, #tpu.memory_space<vmem>>, vector<1x64x128xbf16>
      %46 = vector.shape_cast %45 : vector<1x64x128xbf16> to vector<64x128xbf16>
      %47 = vector.shape_cast %44 : vector<64x128xbf16> to vector<1x64x128xbf16>
      tpu.vector_store %arg7[%c0_32, %c0_33, %c0_34], %47 {strides = array<i32>} : memref<1x64x128xbf16, #tpu.memory_space<vmem>>, vector<1x64x128xbf16>,
    } else {
    }
    return
  }
  func.func @transform_0(%arg0: i32, %arg1: i32) -> (i32, i32, i32, i32) {
    %c0_i32 = arith.constant 0 : i32
    %c0_i32_0 = arith.constant 0 : i32
    %c0_i32_1 = arith.constant 0 : i32
    %c0_i32_2 = arith.constant 0 : i32
    return %arg0, %c0_i32, %c0_i32_0, %c0_i32_1 : i32, i32, i32, i32
  }
  func.func @transform_1(%arg0: i32, %arg1: i32) -> (i32, i32, i32) {
    %c0_i32 = arith.constant 0 : i32
    %c0_i32_0 = arith.constant 0 : i32
    %c0_i32_1 = arith.constant 0 : i32
    return %arg1, %c0_i32, %c0_i32_0 : i32, i32, i32
  }
  func.func @transform_2(%arg0: i32, %arg1: i32) -> (i32, i32) {
    %c0_i32 = arith.constant 0 : i32
    %c0_i32_0 = arith.constant 0 : i32
    %c0_i32_1 = arith.constant 0 : i32
    return %c0_i32, %c0_i32_0 : i32, i32
  }
  func.func @transform_3(%arg0: i32, %arg1: i32) -> (i32, i32) {
    %c0_i32 = arith.constant 0 : i32
    %c0_i32_0 = arith.constant 0 : i32
    %c0_i32_1 = arith.constant 0 : i32
    return %c0_i32, %c0_i32_0 : i32, i32
  }
  func.func @transform_4(%arg0: i32, %arg1: i32) -> (i32, i32) {
    %c0_i32 = arith.constant 0 : i32
    %c0_i32_0 = arith.constant 0 : i32
    %c0_i32_1 = arith.constant 0 : i32
    return %c0_i32, %c0_i32_0 : i32, i32
  }
  func.func @transform_5(%arg0: i32, %arg1: i32) -> (i32, i32, i32) {
    %c0_i32 = arith.constant 0 : i32
    %c0_i32_0 = arith.constant 0 : i32
    %c0_i32_1 = arith.constant 0 : i32
    return %arg0, %c0_i32, %c0_i32_0 : i32, i32, i32
  }
}

module attributes {stable_mosaic.version = 11 : i64} {
  func.func @kernel(%arg0: i32, %arg1: i32, %arg2: memref<1x10x10x128xbf16, #tpu.memory_space<vmem>>, %arg3: memref<3x128x128xbf16, #tpu.memory_space<vmem>>, %arg4: memref<1x128xf32, #tpu.memory_space<vmem>>, %arg5: memref<1x64x128xbf16, #tpu.memory_space<vmem>>, %arg6: memref<64x128xf32, #tpu.memory_space<vmem>>) attributes {dimension_semantics = [#tpu.dimension_semantics<parallel>, #tpu.dimension_semantics<arbitrary>], iteration_bounds = array<i64: 2, 3>, scalar_prefetch = 0 : i64, scratch_operands = 1 : i64, tpu.core_type = #tpu.core_type<tc>, window_params = [{transform_indices = @transform_0, window_bounds = array<i64: 1, 10, 10, 128>}, {transform_indices = @transform_1, window_bounds = array<i64: 3, 128, 128>}, {pipeline_mode = #tpu.pipeline_mode<synchronous>, transform_indices = @transform_2, window_bounds = array<i64: 1, 128>}, {transform_indices = @transform_3, window_bounds = array<i64: 1, 64, 128>}]} {
    %c0_i32 = arith.constant 0 : i32
    %0 = arith.cmpi eq, %arg1, %c0_i32 : i32
    %1 = arith.extui %0 : i1 to i32
    %c0_i32_0 = arith.constant 0 : i32
    %2 = arith.cmpi ne, %1, %c0_i32_0 : i32
    scf.if %2 {
      %cst_23 = arith.constant 0.000000e+00 : f32
      %32 = vector.broadcast %cst_23 : f32 to vector<64x128xf32>
      %c0_24 = arith.constant 0 : index
      %c0_25 = arith.constant 0 : index
      %33 = vector.load %arg6[%c0_24, %c0_25] : memref<64x128xf32, #tpu.memory_space<vmem>>, vector<64x128xf32>
      tpu.vector_store %arg6[%c0_24, %c0_25], %32 {strides = array<i32>} : memref<64x128xf32, #tpu.memory_space<vmem>>, vector<64x128xf32>,
    } else {
    }
    %c0 = arith.constant 0 : index
    %c0_1 = arith.constant 0 : index
    %3 = vector.load %arg6[%c0, %c0_1] : memref<64x128xf32, #tpu.memory_space<vmem>>, vector<64x128xf32>
    %c0_2 = arith.constant 0 : index
    %4 = arith.index_cast %arg1 : i32 to index
    %c0_3 = arith.constant 0 : index
    %c0_4 = arith.constant 0 : index
    %5 = vector.load %arg2[%c0_2, %4, %c0_3, %c0_4] : memref<1x10x10x128xbf16, #tpu.memory_space<vmem>>, vector<1x8x8x128xbf16>
    %6 = vector.shape_cast %5 : vector<1x8x8x128xbf16> to vector<8x8x128xbf16>
    %7 = vector.shape_cast %6 : vector<8x8x128xbf16> to vector<64x128xbf16>
    %c0_5 = arith.constant 0 : index
    %c0_6 = arith.constant 0 : index
    %c0_7 = arith.constant 0 : index
    %8 = vector.load %arg3[%c0_5, %c0_6, %c0_7] : memref<3x128x128xbf16, #tpu.memory_space<vmem>>, vector<1x128x128xbf16>
    %9 = vector.shape_cast %8 : vector<1x128x128xbf16> to vector<128x128xbf16>
    %cst = arith.constant dense<0.000000e+00> : vector<64x128xf32>
    %10 = tpu.matmul %7, %9, %cst {dimension_numbers = #tpu.dot_dimension_numbers<[1], [0], [0], [1], [0, 0, 1, 1], [], []>} : vector<64x128xbf16>, vector<128x128xbf16>, vector<64x128xf32> -> vector<64x128xf32>
    %11 = arith.addf %3, %10 : vector<64x128xf32>
    %c0_8 = arith.constant 0 : index
    %12 = arith.index_cast %arg1 : i32 to index
    %c1 = arith.constant 1 : index
    %c0_9 = arith.constant 0 : index
    %13 = vector.load %arg2[%c0_8, %12, %c1, %c0_9] : memref<1x10x10x128xbf16, #tpu.memory_space<vmem>>, vector<1x8x8x128xbf16>
    %14 = vector.shape_cast %13 : vector<1x8x8x128xbf16> to vector<8x8x128xbf16>
    %15 = vector.shape_cast %14 : vector<8x8x128xbf16> to vector<64x128xbf16>
    %c1_10 = arith.constant 1 : index
    %c0_11 = arith.constant 0 : index
    %c0_12 = arith.constant 0 : index
    %16 = vector.load %arg3[%c1_10, %c0_11, %c0_12] : memref<3x128x128xbf16, #tpu.memory_space<vmem>>, vector<1x128x128xbf16>
    %17 = vector.shape_cast %16 : vector<1x128x128xbf16> to vector<128x128xbf16>
    %cst_13 = arith.constant dense<0.000000e+00> : vector<64x128xf32>
    %18 = tpu.matmul %15, %17, %cst_13 {dimension_numbers = #tpu.dot_dimension_numbers<[1], [0], [0], [1], [0, 0, 1, 1], [], []>} : vector<64x128xbf16>, vector<128x128xbf16>, vector<64x128xf32> -> vector<64x128xf32>
    %19 = arith.addf %11, %18 : vector<64x128xf32>
    %c0_14 = arith.constant 0 : index
    %20 = arith.index_cast %arg1 : i32 to index
    %c2 = arith.constant 2 : index
    %c0_15 = arith.constant 0 : index
    %21 = vector.load %arg2[%c0_14, %20, %c2, %c0_15] : memref<1x10x10x128xbf16, #tpu.memory_space<vmem>>, vector<1x8x8x128xbf16>
    %22 = vector.shape_cast %21 : vector<1x8x8x128xbf16> to vector<8x8x128xbf16>
    %23 = vector.shape_cast %22 : vector<8x8x128xbf16> to vector<64x128xbf16>
    %c2_16 = arith.constant 2 : index
    %c0_17 = arith.constant 0 : index
    %c0_18 = arith.constant 0 : index
    %24 = vector.load %arg3[%c2_16, %c0_17, %c0_18] : memref<3x128x128xbf16, #tpu.memory_space<vmem>>, vector<1x128x128xbf16>
    %25 = vector.shape_cast %24 : vector<1x128x128xbf16> to vector<128x128xbf16>
    %cst_19 = arith.constant dense<0.000000e+00> : vector<64x128xf32>
    %26 = tpu.matmul %23, %25, %cst_19 {dimension_numbers = #tpu.dot_dimension_numbers<[1], [0], [0], [1], [0, 0, 1, 1], [], []>} : vector<64x128xbf16>, vector<128x128xbf16>, vector<64x128xf32> -> vector<64x128xf32>
    %27 = arith.addf %19, %26 : vector<64x128xf32>
    %c0_20 = arith.constant 0 : index
    %c0_21 = arith.constant 0 : index
    %28 = vector.load %arg6[%c0_20, %c0_21] : memref<64x128xf32, #tpu.memory_space<vmem>>, vector<64x128xf32>
    tpu.vector_store %arg6[%c0_20, %c0_21], %27 {strides = array<i32>} : memref<64x128xf32, #tpu.memory_space<vmem>>, vector<64x128xf32>,
    %c2_i32 = arith.constant 2 : i32
    %29 = arith.cmpi eq, %arg1, %c2_i32 : i32
    %30 = arith.extui %29 : i1 to i32
    %c0_i32_22 = arith.constant 0 : i32
    %31 = arith.cmpi ne, %30, %c0_i32_22 : i32
    scf.if %31 {
      %c0_23 = arith.constant 0 : index
      %c0_24 = arith.constant 0 : index
      %32 = vector.load %arg6[%c0_23, %c0_24] : memref<64x128xf32, #tpu.memory_space<vmem>>, vector<64x128xf32>
      %c0_25 = arith.constant 0 : index
      %c0_26 = arith.constant 0 : index
      %33 = vector.load %arg4[%c0_25, %c0_26] : memref<1x128xf32, #tpu.memory_space<vmem>>, vector<1x128xf32>
      %34 = vector.broadcast %33 : vector<1x128xf32> to vector<64x128xf32>
      %35 = arith.addf %32, %34 : vector<64x128xf32>
      %36 = arith.truncf %35 : vector<64x128xf32> to vector<64x128xbf16>
      %c0_27 = arith.constant 0 : index
      %c0_28 = arith.constant 0 : index
      %c0_29 = arith.constant 0 : index
      %37 = vector.load %arg5[%c0_27, %c0_28, %c0_29] : memref<1x64x128xbf16, #tpu.memory_space<vmem>>, vector<1x64x128xbf16>
      %38 = vector.shape_cast %37 : vector<1x64x128xbf16> to vector<64x128xbf16>
      %39 = vector.shape_cast %36 : vector<64x128xbf16> to vector<1x64x128xbf16>
      tpu.vector_store %arg5[%c0_27, %c0_28, %c0_29], %39 {strides = array<i32>} : memref<1x64x128xbf16, #tpu.memory_space<vmem>>, vector<1x64x128xbf16>,
    } else {
    }
    return
  }
  func.func @transform_0(%arg0: i32, %arg1: i32) -> (i32, i32, i32, i32) {
    %c0_i32 = arith.constant 0 : i32
    %c0_i32_0 = arith.constant 0 : i32
    %c0_i32_1 = arith.constant 0 : i32
    %c0_i32_2 = arith.constant 0 : i32
    return %arg0, %c0_i32, %c0_i32_0, %c0_i32_1 : i32, i32, i32, i32
  }
  func.func @transform_1(%arg0: i32, %arg1: i32) -> (i32, i32, i32) {
    %c0_i32 = arith.constant 0 : i32
    %c0_i32_0 = arith.constant 0 : i32
    %c0_i32_1 = arith.constant 0 : i32
    return %arg1, %c0_i32, %c0_i32_0 : i32, i32, i32
  }
  func.func @transform_2(%arg0: i32, %arg1: i32) -> (i32, i32) {
    %c0_i32 = arith.constant 0 : i32
    %c0_i32_0 = arith.constant 0 : i32
    %c0_i32_1 = arith.constant 0 : i32
    return %c0_i32, %c0_i32_0 : i32, i32
  }
  func.func @transform_3(%arg0: i32, %arg1: i32) -> (i32, i32, i32) {
    %c0_i32 = arith.constant 0 : i32
    %c0_i32_0 = arith.constant 0 : i32
    %c0_i32_1 = arith.constant 0 : i32
    return %arg0, %c0_i32, %c0_i32_0 : i32, i32, i32
  }
}

module attributes {stable_mosaic.version = 11 : i64} {
  func.func @_bn_relu_kernel(%arg0: i32, %arg1: memref<1x16x128xbf16, #tpu.memory_space<vmem>>, %arg2: memref<1x128xf32, #tpu.memory_space<vmem>>, %arg3: memref<1x128xf32, #tpu.memory_space<vmem>>, %arg4: memref<1x16x128xbf16, #tpu.memory_space<vmem>>) attributes {dimension_semantics = [#tpu.dimension_semantics<parallel>], iteration_bounds = array<i64: 2>, scalar_prefetch = 0 : i64, scratch_operands = 0 : i64, tpu.core_type = #tpu.core_type<tc>, window_params = [{transform_indices = @transform_0, window_bounds = array<i64: 1, 16, 128>}, {pipeline_mode = #tpu.pipeline_mode<synchronous>, transform_indices = @transform_1, window_bounds = array<i64: 1, 128>}, {pipeline_mode = #tpu.pipeline_mode<synchronous>, transform_indices = @transform_2, window_bounds = array<i64: 1, 128>}, {transform_indices = @transform_3, window_bounds = array<i64: 1, 16, 128>}]} {
    %c0 = arith.constant 0 : index
    %c0_0 = arith.constant 0 : index
    %c0_1 = arith.constant 0 : index
    %0 = vector.load %arg1[%c0, %c0_0, %c0_1] : memref<1x16x128xbf16, #tpu.memory_space<vmem>>, vector<1x16x128xbf16>
    %1 = vector.shape_cast %0 : vector<1x16x128xbf16> to vector<16x128xbf16>
    %2 = arith.extf %1 : vector<16x128xbf16> to vector<16x128xf32>
    %c0_2 = arith.constant 0 : index
    %c0_3 = arith.constant 0 : index
    %3 = vector.load %arg2[%c0_2, %c0_3] : memref<1x128xf32, #tpu.memory_space<vmem>>, vector<1x128xf32>
    %4 = vector.broadcast %3 : vector<1x128xf32> to vector<16x128xf32>
    %5 = arith.mulf %2, %4 : vector<16x128xf32>
    %c0_4 = arith.constant 0 : index
    %c0_5 = arith.constant 0 : index
    %6 = vector.load %arg3[%c0_4, %c0_5] : memref<1x128xf32, #tpu.memory_space<vmem>>, vector<1x128xf32>
    %7 = vector.broadcast %6 : vector<1x128xf32> to vector<16x128xf32>
    %8 = arith.addf %5, %7 : vector<16x128xf32>
    %cst = arith.constant 0.000000e+00 : f32
    %9 = vector.broadcast %cst : f32 to vector<16x128xf32>
    %10 = arith.maximumf %8, %9 : vector<16x128xf32>
    %11 = arith.truncf %10 : vector<16x128xf32> to vector<16x128xbf16>
    %c0_6 = arith.constant 0 : index
    %c0_7 = arith.constant 0 : index
    %c0_8 = arith.constant 0 : index
    %12 = vector.load %arg4[%c0_6, %c0_7, %c0_8] : memref<1x16x128xbf16, #tpu.memory_space<vmem>>, vector<1x16x128xbf16>
    %13 = vector.shape_cast %12 : vector<1x16x128xbf16> to vector<16x128xbf16>
    %14 = vector.shape_cast %11 : vector<16x128xbf16> to vector<1x16x128xbf16>
    tpu.vector_store %arg4[%c0_6, %c0_7, %c0_8], %14 {strides = array<i32>} : memref<1x16x128xbf16, #tpu.memory_space<vmem>>, vector<1x16x128xbf16>,
    return
  }
  func.func @transform_0(%arg0: i32) -> (i32, i32, i32) {
    %c0_i32 = arith.constant 0 : i32
    %c0_i32_0 = arith.constant 0 : i32
    %c0_i32_1 = arith.constant 0 : i32
    return %arg0, %c0_i32, %c0_i32_0 : i32, i32, i32
  }
  func.func @transform_1(%arg0: i32) -> (i32, i32) {
    %c0_i32 = arith.constant 0 : i32
    %c0_i32_0 = arith.constant 0 : i32
    %c0_i32_1 = arith.constant 0 : i32
    return %c0_i32, %c0_i32_0 : i32, i32
  }
  func.func @transform_2(%arg0: i32) -> (i32, i32) {
    %c0_i32 = arith.constant 0 : i32
    %c0_i32_0 = arith.constant 0 : i32
    %c0_i32_1 = arith.constant 0 : i32
    return %c0_i32, %c0_i32_0 : i32, i32
  }
  func.func @transform_3(%arg0: i32) -> (i32, i32, i32) {
    %c0_i32 = arith.constant 0 : i32
    %c0_i32_0 = arith.constant 0 : i32
    %c0_i32_1 = arith.constant 0 : i32
    return %arg0, %c0_i32, %c0_i32_0 : i32, i32, i32
  }
}

module attributes {stable_mosaic.version = 11 : i64} {
  func.func @kernel(%arg0: i32, %arg1: memref<1x16x128xbf16, #tpu.memory_space<vmem>>, %arg2: memref<128x128xbf16, #tpu.memory_space<vmem>>, %arg3: memref<1x128xf32, #tpu.memory_space<vmem>>, %arg4: memref<1x16x128xbf16, #tpu.memory_space<vmem>>, %arg5: memref<1x16x128xbf16, #tpu.memory_space<vmem>>) attributes {dimension_semantics = [#tpu.dimension_semantics<parallel>], iteration_bounds = array<i64: 2>, scalar_prefetch = 0 : i64, scratch_operands = 0 : i64, tpu.core_type = #tpu.core_type<tc>, window_params = [{transform_indices = @transform_0, window_bounds = array<i64: 1, 16, 128>}, {pipeline_mode = #tpu.pipeline_mode<synchronous>, transform_indices = @transform_1, window_bounds = array<i64: 128, 128>}, {pipeline_mode = #tpu.pipeline_mode<synchronous>, transform_indices = @transform_2, window_bounds = array<i64: 1, 128>}, {transform_indices = @transform_3, window_bounds = array<i64: 1, 16, 128>}, {transform_indices = @transform_4, window_bounds = array<i64: 1, 16, 128>}]} {
    %c0 = arith.constant 0 : index
    %c0_0 = arith.constant 0 : index
    %c0_1 = arith.constant 0 : index
    %0 = vector.load %arg1[%c0, %c0_0, %c0_1] : memref<1x16x128xbf16, #tpu.memory_space<vmem>>, vector<1x16x128xbf16>
    %1 = vector.shape_cast %0 : vector<1x16x128xbf16> to vector<16x128xbf16>
    %c0_2 = arith.constant 0 : index
    %c0_3 = arith.constant 0 : index
    %2 = vector.load %arg2[%c0_2, %c0_3] : memref<128x128xbf16, #tpu.memory_space<vmem>>, vector<128x128xbf16>
    %cst = arith.constant dense<0.000000e+00> : vector<16x128xf32>
    %3 = tpu.matmul %1, %2, %cst {dimension_numbers = #tpu.dot_dimension_numbers<[1], [0], [0], [1], [0, 0, 1, 1], [], []>} : vector<16x128xbf16>, vector<128x128xbf16>, vector<16x128xf32> -> vector<16x128xf32>
    %c0_4 = arith.constant 0 : index
    %c0_5 = arith.constant 0 : index
    %4 = vector.load %arg3[%c0_4, %c0_5] : memref<1x128xf32, #tpu.memory_space<vmem>>, vector<1x128xf32>
    %5 = vector.broadcast %4 : vector<1x128xf32> to vector<16x128xf32>
    %6 = arith.addf %3, %5 : vector<16x128xf32>
    %c0_6 = arith.constant 0 : index
    %c0_7 = arith.constant 0 : index
    %c0_8 = arith.constant 0 : index
    %7 = vector.load %arg4[%c0_6, %c0_7, %c0_8] : memref<1x16x128xbf16, #tpu.memory_space<vmem>>, vector<1x16x128xbf16>
    %8 = vector.shape_cast %7 : vector<1x16x128xbf16> to vector<16x128xbf16>
    %9 = arith.extf %8 : vector<16x128xbf16> to vector<16x128xf32>
    %10 = arith.addf %6, %9 : vector<16x128xf32>
    %11 = arith.truncf %10 : vector<16x128xf32> to vector<16x128xbf16>
    %c0_9 = arith.constant 0 : index
    %c0_10 = arith.constant 0 : index
    %c0_11 = arith.constant 0 : index
    %12 = vector.load %arg5[%c0_9, %c0_10, %c0_11] : memref<1x16x128xbf16, #tpu.memory_space<vmem>>, vector<1x16x128xbf16>
    %13 = vector.shape_cast %12 : vector<1x16x128xbf16> to vector<16x128xbf16>
    %14 = vector.shape_cast %11 : vector<16x128xbf16> to vector<1x16x128xbf16>
    tpu.vector_store %arg5[%c0_9, %c0_10, %c0_11], %14 {strides = array<i32>} : memref<1x16x128xbf16, #tpu.memory_space<vmem>>, vector<1x16x128xbf16>,
    return
  }
  func.func @transform_0(%arg0: i32) -> (i32, i32, i32) {
    %c0_i32 = arith.constant 0 : i32
    %c0_i32_0 = arith.constant 0 : i32
    %c0_i32_1 = arith.constant 0 : i32
    return %arg0, %c0_i32, %c0_i32_0 : i32, i32, i32
  }
  func.func @transform_1(%arg0: i32) -> (i32, i32) {
    %c0_i32 = arith.constant 0 : i32
    %c0_i32_0 = arith.constant 0 : i32
    %c0_i32_1 = arith.constant 0 : i32
    return %c0_i32, %c0_i32_0 : i32, i32
  }
  func.func @transform_2(%arg0: i32) -> (i32, i32) {
    %c0_i32 = arith.constant 0 : i32
    %c0_i32_0 = arith.constant 0 : i32
    %c0_i32_1 = arith.constant 0 : i32
    return %c0_i32, %c0_i32_0 : i32, i32
  }
  func.func @transform_3(%arg0: i32) -> (i32, i32, i32) {
    %c0_i32 = arith.constant 0 : i32
    %c0_i32_0 = arith.constant 0 : i32
    %c0_i32_1 = arith.constant 0 : i32
    return %arg0, %c0_i32, %c0_i32_0 : i32, i32, i32
  }
  func.func @transform_4(%arg0: i32) -> (i32, i32, i32) {
    %c0_i32 = arith.constant 0 : i32
    %c0_i32_0 = arith.constant 0 : i32
    %c0_i32_1 = arith.constant 0 : i32
    return %arg0, %c0_i32, %c0_i32_0 : i32, i32, i32
  }
}

module attributes {stable_mosaic.version = 11 : i64} {
  func.func @kernel(%arg0: i32, %arg1: memref<2x16x128xbf16, #tpu.memory_space<vmem>>, %arg2: memref<128x128xf32, #tpu.memory_space<vmem>>, %arg3: memref<1x128xf32, #tpu.memory_space<vmem>>, %arg4: memref<2x128xf32, #tpu.memory_space<vmem>>) attributes {dimension_semantics = [#tpu.dimension_semantics<arbitrary>], iteration_bounds = array<i64: 1>, scalar_prefetch = 0 : i64, scratch_operands = 0 : i64, tpu.core_type = #tpu.core_type<tc>, window_params = [{pipeline_mode = #tpu.pipeline_mode<synchronous>, transform_indices = @transform_0, window_bounds = array<i64: 2, 16, 128>}, {pipeline_mode = #tpu.pipeline_mode<synchronous>, transform_indices = @transform_1, window_bounds = array<i64: 128, 128>}, {pipeline_mode = #tpu.pipeline_mode<synchronous>, transform_indices = @transform_2, window_bounds = array<i64: 1, 128>}, {pipeline_mode = #tpu.pipeline_mode<synchronous>, transform_indices = @transform_3, window_bounds = array<i64: 2, 128>}]} {
    %c0 = arith.constant 0 : index
    %c0_0 = arith.constant 0 : index
    %c0_1 = arith.constant 0 : index
    %0 = vector.load %arg1[%c0, %c0_0, %c0_1] : memref<2x16x128xbf16, #tpu.memory_space<vmem>>, vector<2x16x128xbf16>
    %1 = arith.extf %0 : vector<2x16x128xbf16> to vector<2x16x128xf32>
    %cst = arith.constant dense<0.000000e+00> : vector<2x128xf32>
    %2 = vector.multi_reduction <add>, %1, %cst [1] : vector<2x16x128xf32> to vector<2x128xf32>
    %cst_2 = arith.constant 6.250000e-02 : f32
    %3 = vector.broadcast %cst_2 : f32 to vector<2x128xf32>
    %4 = arith.mulf %2, %3 : vector<2x128xf32>
    %c0_3 = arith.constant 0 : index
    %c0_4 = arith.constant 0 : index
    %5 = vector.load %arg2[%c0_3, %c0_4] : memref<128x128xf32, #tpu.memory_space<vmem>>, vector<128x128xf32>
    %cst_5 = arith.constant dense<0.000000e+00> : vector<2x128xf32>
    %6 = tpu.matmul %4, %5, %cst_5 {dimension_numbers = #tpu.dot_dimension_numbers<[1], [0], [0], [1], [0, 0, 1, 1], [], []>} : vector<2x128xf32>, vector<128x128xf32>, vector<2x128xf32> -> vector<2x128xf32>
    %c0_6 = arith.constant 0 : index
    %c0_7 = arith.constant 0 : index
    %7 = vector.load %arg3[%c0_6, %c0_7] : memref<1x128xf32, #tpu.memory_space<vmem>>, vector<1x128xf32>
    %8 = vector.broadcast %7 : vector<1x128xf32> to vector<2x128xf32>
    %9 = arith.addf %6, %8 : vector<2x128xf32>
    %c0_8 = arith.constant 0 : index
    %c0_9 = arith.constant 0 : index
    %10 = vector.load %arg4[%c0_8, %c0_9] : memref<2x128xf32, #tpu.memory_space<vmem>>, vector<2x128xf32>
    tpu.vector_store %arg4[%c0_8, %c0_9], %9 {strides = array<i32>} : memref<2x128xf32, #tpu.memory_space<vmem>>, vector<2x128xf32>,
    return
  }
  func.func @transform_0(%arg0: i32) -> (i32, i32, i32) {
    %c0_i32 = arith.constant 0 : i32
    %c0_i32_0 = arith.constant 0 : i32
    %c0_i32_1 = arith.constant 0 : i32
    %c0_i32_2 = arith.constant 0 : i32
    return %c0_i32, %c0_i32_0, %c0_i32_1 : i32, i32, i32
  }
  func.func @transform_1(%arg0: i32) -> (i32, i32) {
    %c0_i32 = arith.constant 0 : i32
    %c0_i32_0 = arith.constant 0 : i32
    %c0_i32_1 = arith.constant 0 : i32
    return %c0_i32, %c0_i32_0 : i32, i32
  }
  func.func @transform_2(%arg0: i32) -> (i32, i32) {
    %c0_i32 = arith.constant 0 : i32
    %c0_i32_0 = arith.constant 0 : i32
    %c0_i32_1 = arith.constant 0 : i32
    return %c0_i32, %c0_i32_0 : i32, i32
  }
  func.func @transform_3(%arg0: i32) -> (i32, i32) {
    %c0_i32 = arith.constant 0 : i32
    %c0_i32_0 = arith.constant 0 : i32
    %c0_i32_1 = arith.constant 0 : i32
    return %c0_i32, %c0_i32_0 : i32, i32
  }
}

</mosaic_0001>

<bundles_post_ra>
// kernel: wideresnet_forward.16
= control target key start
LH: loop header
LB: loop body
LE: loop exit
PB: predicated region body
PF: predicated region fallthrough
CT: control target
= control target key end

     0   :  { %s849_s12 = smov 0   ;;  %s983_s0 = inlined_call_operand.vmem [shape: bf16[2,256,128], index: 0, kind: input, shape index: {}]   ;;  %s984_s1 = inlined_call_operand.vmem [shape: f32[1,128], index: 1, kind: input, shape index: {}]   ;;  %s985_s2 = inlined_call_operand.vmem [shape: f32[1,128], index: 2, kind: input, shape index: {}]   ;;  %s986_s3 = inlined_call_operand.vmem [shape: bf16[2,256,128], index: 3, kind: output, shape index: {}]  }
   0x1 LB: > { %s560_s13 = sadd.s32 4294967295, %s827_s12   ;;  %p564_p0 = scmp.ge.s32.totalorder %s827_s12, 1  ;;  %s827_s12 = sphi %s849_s12, %s13_s12  }
   0x2   : > { %p137_p1 = scmp.lt.s32.totalorder %s827_s12, 3 }
   0x4   : > { %p138_p2 = pnand %p564_p0, %p137_p1 }
   0x5   : > { %p161_p3 = scmp.lt.s32.totalorder (!%p138_p2), %s560_s13, 1  ;;  %v870_v0 = vld [vmem:[%s984_s1] ss:$0 sm:$0xff] (!%p138_p2) }
   0x6   : > { %141 = sbr.rel (%p138_p2) target bundleno = 59 (0x3b), region = 32  ;;  %v879_v9 = vld [vmem:[%s985_s2] ss:$0 sm:$0xff] (!%p138_p2) }
   0xd   : > { %s988_s13 = smov (!%p161_p3, %s560_s13), 1 }
   0xe   : > { %s605_s14 = sshll.u32 %s988_s13, 7 }
   0xf   : > { %s865_s17 = scalar_lea.vmem %s983_s0, %s605_s14  ;;  %s904_s24 = scalar_lea.vmem %s986_s3, %s605_s14 }
  0x10   : > { %v640_v1 = vld [vmem:[%s865_s17] sm:$0xff]   ;;  %v783_v2 = vld [vmem:[%s865_s17 + $0x8] sm:$0xff]   ;;  %v784_v3 = vld [vmem:[%s865_s17 + $0x10] sm:$0xff]  }
  0x11   : > { %v641_v4 = vunpack.c.l.bf16 %v640_v1  ;;  %v642_v5 = vunpack.c.h.bf16 %v640_v1  ;;  %v645_v6 = vunpack.c.l.bf16 %v783_v2  ;;  %v646_v7 = vunpack.c.h.bf16 %v783_v2  ;;  %v785_v8 = vld [vmem:[%s865_s17 + $0x18] sm:$0xff]   ;;  %v786_v30 = vld [vmem:[%s865_s17 + $0x20] sm:$0xff]   ;;  %v787_v35 = vld [vmem:[%s865_s17 + $0x28] sm:$0xff]  }
  0x12   : > { %v649_v10 = vunpack.c.l.bf16 %v784_v3  ;;  %v650_v11 = vunpack.c.h.bf16 %v784_v3  ;;  %v653_v12 = vunpack.c.l.bf16 %v785_v8  ;;  %v654_v13 = vunpack.c.h.bf16 %v785_v8  ;;  %v788_v40 = vld [vmem:[%s865_s17 + $0x30] sm:$0xff]   ;;  %v789_v45 = vld [vmem:[%s865_s17 + $0x38] sm:$0xff]   ;;  %v790_v3 = vld [vmem:[%s865_s17 + $0x40] sm:$0xff]  }
  0x13   : > { %v242_v14 = vmul.f32 %v641_v4, %v870_v0  ;;  %v243_v15 = vmul.f32 %v642_v5, %v870_v0  ;;  %v244_v16 = vmul.f32 %v645_v6, %v870_v0  ;;  %v245_v17 = vmul.f32 %v646_v7, %v870_v0 }
  0x14   : > { %v246_v18 = vmul.f32 %v649_v10, %v870_v0  ;;  %v247_v19 = vmul.f32 %v650_v11, %v870_v0  ;;  %v248_v20 = vmul.f32 %v653_v12, %v870_v0  ;;  %v249_v21 = vmul.f32 %v654_v13, %v870_v0  ;;  %v791_v13 = vld [vmem:[%s865_s17 + $0x48] sm:$0xff]  }
  0x15   : > { %v281_v22 = vadd.f32 %v879_v9, %v242_v14  ;;  %v282_v23 = vadd.f32 %v879_v9, %v243_v15  ;;  %v283_v24 = vadd.f32 %v879_v9, %v244_v16  ;;  %v284_v25 = vadd.f32 %v879_v9, %v245_v17 }
  0x16   : > { %v285_v26 = vadd.f32 %v879_v9, %v246_v18  ;;  %v286_v27 = vadd.f32 %v879_v9, %v247_v19  ;;  %v287_v28 = vadd.f32 %v879_v9, %v248_v20  ;;  %v288_v29 = vadd.f32 %v879_v9, %v249_v21  ;;  %v792_v18 = vld [vmem:[%s865_s17 + $0x50] sm:$0xff]  }
  0x17   : > { %v313_v31 = vmax.f32 %v281_v22, 0.0  ;;  %v314_v32 = vmax.f32 %v282_v23, 0.0  ;;  %v315_v33 = vmax.f32 %v283_v24, 0.0  ;;  %v316_v34 = vmax.f32 %v284_v25, 0.0  ;;  %v793_v23 = vld [vmem:[%s865_s17 + $0x58] sm:$0xff]  }
  0x18   : > { %v317_v36 = vmax.f32 %v285_v26, 0.0  ;;  %v318_v37 = vmax.f32 %v286_v27, 0.0  ;;  %v319_v38 = vmax.f32 %v287_v28, 0.0  ;;  %v320_v39 = vmax.f32 %v288_v29, 0.0 }
  0x19   : > { %v706_v41 = vpack.c.bf16 %v314_v32, %v313_v31  ;;  %v711_v42 = vpack.c.bf16 %v316_v34, %v315_v33  ;;  %v657_v43 = vunpack.c.l.bf16 %v786_v30  ;;  %v658_v44 = vunpack.c.h.bf16 %v786_v30 }
  0x1a   : > { %v716_v46 = vpack.c.bf16 %v318_v37, %v317_v36  ;;  %v721_v47 = vpack.c.bf16 %v320_v39, %v319_v38  ;;  %v661_v48 = vunpack.c.l.bf16 %v787_v35  ;;  %v662_v49 = vunpack.c.h.bf16 %v787_v35 }
  0x1b   : > { %707 = vst [vmem:[%s904_s24] sm:$0xff] %v706_v41   ;;  %798 = vst [vmem:[%s904_s24 + $0x8] sm:$0xff] %v711_v42   ;;  %v250_v50 = vmul.f32 %v657_v43, %v870_v0  ;;  %v251_v51 = vmul.f32 %v658_v44, %v870_v0  ;;  %v665_v52 = vunpack.c.l.bf16 %v788_v40  ;;  %v666_v53 = vunpack.c.h.bf16 %v788_v40  ;;  %v794_v40 = vld [vmem:[%s865_s17 + $0x60] sm:$0xff]  }
  0x1c   : > { %799 = vst [vmem:[%s904_s24 + $0x10] sm:$0xff] %v716_v46   ;;  %800 = vst [vmem:[%s904_s24 + $0x18] sm:$0xff] %v721_v47   ;;  %v252_v54 = vmul.f32 %v661_v48, %v870_v0  ;;  %v253_v55 = vmul.f32 %v662_v49, %v870_v0  ;;  %v669_v56 = vunpack.c.l.bf16 %v789_v45  ;;  %v670_v57 = vunpack.c.h.bf16 %v789_v45 }
  0x1d   : > { %v289_v58 = vadd.f32 %v879_v9, %v250_v50  ;;  %v290_v59 = vadd.f32 %v879_v9, %v251_v51  ;;  %v254_v60 = vmul.f32 %v665_v52, %v870_v0  ;;  %v255_v61 = vmul.f32 %v666_v53, %v870_v0  ;;  %v795_v53 = vld [vmem:[%s865_s17 + $0x68] sm:$0xff]  }
  0x1e   : > { %v291_v62 = vadd.f32 %v879_v9, %v252_v54  ;;  %v292_v63 = vadd.f32 %v879_v9, %v253_v55  ;;  %v256_v1 = vmul.f32 %v669_v56, %v870_v0  ;;  %v257_v2 = vmul.f32 %v670_v57, %v870_v0 }
  0x1f   : > { %v321_v4 = vmax.f32 %v289_v58, 0.0  ;;  %v322_v5 = vmax.f32 %v290_v59, 0.0  ;;  %v293_v6 = vadd.f32 %v879_v9, %v254_v60  ;;  %v294_v7 = vadd.f32 %v879_v9, %v255_v61  ;;  %v796_v58 = vld [vmem:[%s865_s17 + $0x70] sm:$0xff]  }
  0x20   : > { %v323_v8 = vmax.f32 %v291_v62, 0.0  ;;  %v324_v10 = vmax.f32 %v292_v63, 0.0  ;;  %v295_v11 = vadd.f32 %v879_v9, %v256_v1  ;;  %v296_v12 = vadd.f32 %v879_v9, %v257_v2  ;;  %v797_v63 = vld [vmem:[%s865_s17 + $0x78] sm:$0xff]  }
  0x21   : > { %v726_v14 = vpack.c.bf16 %v322_v5, %v321_v4  ;;  %v325_v15 = vmax.f32 %v293_v6, 0.0  ;;  %v326_v16 = vmax.f32 %v294_v7, 0.0  ;;  %v673_v17 = vunpack.c.l.bf16 %v790_v3 }
  0x22   : > { %v731_v19 = vpack.c.bf16 %v324_v10, %v323_v8  ;;  %v327_v20 = vmax.f32 %v295_v11, 0.0  ;;  %v328_v21 = vmax.f32 %v296_v12, 0.0  ;;  %v674_v22 = vunpack.c.h.bf16 %v790_v3 }
  0x23   : > { %801 = vst [vmem:[%s904_s24 + $0x20] sm:$0xff] %v726_v14   ;;  %v736_v24 = vpack.c.bf16 %v326_v16, %v325_v15  ;;  %v258_v25 = vmul.f32 %v673_v17, %v870_v0  ;;  %v677_v26 = vunpack.c.l.bf16 %v791_v13  ;;  %v678_v27 = vunpack.c.h.bf16 %v791_v13 }
  0x24   : > { %802 = vst [vmem:[%s904_s24 + $0x28] sm:$0xff] %v731_v19   ;;  %v741_v28 = vpack.c.bf16 %v328_v21, %v327_v20  ;;  %v259_v29 = vmul.f32 %v674_v22, %v870_v0  ;;  %v681_v30 = vunpack.c.l.bf16 %v792_v18  ;;  %v682_v31 = vunpack.c.h.bf16 %v792_v18 }
  0x25   : > { %803 = vst [vmem:[%s904_s24 + $0x30] sm:$0xff] %v736_v24   ;;  %v297_v32 = vadd.f32 %v879_v9, %v258_v25  ;;  %v260_v33 = vmul.f32 %v677_v26, %v870_v0  ;;  %v261_v34 = vmul.f32 %v678_v27, %v870_v0  ;;  %v685_v35 = vunpack.c.l.bf16 %v793_v23 }
  0x26   : > { %804 = vst [vmem:[%s904_s24 + $0x38] sm:$0xff] %v741_v28   ;;  %v298_v36 = vadd.f32 %v879_v9, %v259_v29  ;;  %v262_v37 = vmul.f32 %v681_v30, %v870_v0  ;;  %v263_v38 = vmul.f32 %v682_v31, %v870_v0  ;;  %v686_v39 = vunpack.c.h.bf16 %v793_v23 }
  0x27   : > { %v329_v41 = vmax.f32 %v297_v32, 0.0  ;;  %v299_v42 = vadd.f32 %v879_v9, %v260_v33  ;;  %v300_v43 = vadd.f32 %v879_v9, %v261_v34  ;;  %v264_v44 = vmul.f32 %v685_v35, %v870_v0 }
  0x28   : > { %v330_v45 = vmax.f32 %v298_v36, 0.0  ;;  %v301_v46 = vadd.f32 %v879_v9, %v262_v37  ;;  %v302_v47 = vadd.f32 %v879_v9, %v263_v38  ;;  %v265_v48 = vmul.f32 %v686_v39, %v870_v0 }
  0x29   : > { %v331_v49 = vmax.f32 %v299_v42, 0.0  ;;  %v332_v50 = vmax.f32 %v300_v43, 0.0  ;;  %v303_v51 = vadd.f32 %v879_v9, %v264_v44  ;;  %v689_v52 = vunpack.c.l.bf16 %v794_v40 }
  0x2a   : > { %v746_v54 = vpack.c.bf16 %v330_v45, %v329_v41  ;;  %v333_v55 = vmax.f32 %v301_v46, 0.0  ;;  %v334_v56 = vmax.f32 %v302_v47, 0.0  ;;  %v304_v57 = vadd.f32 %v879_v9, %v265_v48 }
  0x2b   : > { %v751_v59 = vpack.c.bf16 %v332_v50, %v331_v49  ;;  %v335_v60 = vmax.f32 %v303_v51, 0.0  ;;  %v690_v61 = vunpack.c.h.bf16 %v794_v40  ;;  %v266_v62 = vmul.f32 %v689_v52, %v870_v0 }
  0x2c   : > { %805 = vst [vmem:[%s904_s24 + $0x40] sm:$0xff] %v746_v54   ;;  %v756_v1 = vpack.c.bf16 %v334_v56, %v333_v55  ;;  %v336_v2 = vmax.f32 %v304_v57, 0.0  ;;  %v693_v3 = vunpack.c.l.bf16 %v795_v53  ;;  %v694_v4 = vunpack.c.h.bf16 %v795_v53 }
  0x2d   : > { %806 = vst [vmem:[%s904_s24 + $0x48] sm:$0xff] %v751_v59   ;;  %v267_v5 = vmul.f32 %v690_v61, %v870_v0  ;;  %v305_v6 = vadd.f32 %v879_v9, %v266_v62  ;;  %v697_v7 = vunpack.c.l.bf16 %v796_v58  ;;  %v698_v8 = vunpack.c.h.bf16 %v796_v58 }
  0x2e   : > { %807 = vst [vmem:[%s904_s24 + $0x50] sm:$0xff] %v756_v1   ;;  %v761_v10 = vpack.c.bf16 %v336_v2, %v335_v60  ;;  %v268_v11 = vmul.f32 %v693_v3, %v870_v0  ;;  %v269_v12 = vmul.f32 %v694_v4, %v870_v0  ;;  %v701_v13 = vunpack.c.l.bf16 %v797_v63 }
  0x2f   : > { %v306_v14 = vadd.f32 %v879_v9, %v267_v5  ;;  %v337_v15 = vmax.f32 %v305_v6, 0.0  ;;  %v270_v16 = vmul.f32 %v697_v7, %v870_v0  ;;  %v271_v17 = vmul.f32 %v698_v8, %v870_v0 }
  0x30   : > { %808 = vst [vmem:[%s904_s24 + $0x58] sm:$0xff] %v761_v10   ;;  %v307_v18 = vadd.f32 %v879_v9, %v268_v11  ;;  %v308_v19 = vadd.f32 %v879_v9, %v269_v12  ;;  %v702_v20 = vunpack.c.h.bf16 %v797_v63  ;;  %v272_v21 = vmul.f32 %v701_v13, %v870_v0 }
  0x31   : > { %v338_v22 = vmax.f32 %v306_v14, 0.0  ;;  %v309_v23 = vadd.f32 %v879_v9, %v270_v16  ;;  %v310_v24 = vadd.f32 %v879_v9, %v271_v17 }
  0x32   : > { %v339_v25 = vmax.f32 %v307_v18, 0.0  ;;  %v340_v26 = vmax.f32 %v308_v19, 0.0  ;;  %v273_v27 = vmul.f32 %v702_v20, %v870_v0  ;;  %v311_v28 = vadd.f32 %v879_v9, %v272_v21 }
  0x33   : > { %v766_v29 = vpack.c.bf16 %v338_v22, %v337_v15  ;;  %v341_v30 = vmax.f32 %v309_v23, 0.0  ;;  %v342_v31 = vmax.f32 %v310_v24, 0.0 }
  0x34   : > { %v771_v32 = vpack.c.bf16 %v340_v26, %v339_v25  ;;  %v312_v33 = vadd.f32 %v879_v9, %v273_v27  ;;  %v343_v34 = vmax.f32 %v311_v28, 0.0 }
  0x35   : > { %809 = vst [vmem:[%s904_s24 + $0x60] sm:$0xff] %v766_v29   ;;  %v776_v35 = vpack.c.bf16 %v342_v31, %v341_v30 }
  0x36   : > { %810 = vst [vmem:[%s904_s24 + $0x68] sm:$0xff] %v771_v32   ;;  %v344_v36 = vmax.f32 %v312_v33, 0.0 }
  0x37   : > { %811 = vst [vmem:[%s904_s24 + $0x70] sm:$0xff] %v776_v35  }
  0x38   : > { %v781_v37 = vpack.c.bf16 %v344_v36, %v343_v34 }
  0x3a   : > { %812 = vst [vmem:[%s904_s24 + $0x78] sm:$0xff] %v781_v37  }
  0x3b PF: > { %s13_s12 = sadd.s32 1, %s827_s12  }
  0x3c   : > { %p10_p4 = scmp.ge.s32.totalorder %s13_s12, 4  }
  0x3e   :  { %12 = sbr.rel (!%p10_p4) target bundleno = 1 (0x1), region = 62 }

// kernel: wideresnet_forward.19
= control target key start
LH: loop header
LB: loop body
LE: loop exit
PB: predicated region body
PF: predicated region fallthrough
CT: control target
= control target key end

     0   :  { %s1334_s15 = smov 0   ;;  %s1474_s0 = inlined_call_operand.vmem [shape: bf16[2,256,128], index: 0, kind: input, shape index: {}]   ;;  %s1475_s1 = inlined_call_operand.vmem [shape: bf16[128,128], index: 1, kind: input, shape index: {}]   ;;  %s1476_s2 = inlined_call_operand.vmem [shape: f32[1,128], index: 2, kind: input, shape index: {}]   ;;  %s1477_s3 = inlined_call_operand.vmem [shape: bf16[2,256,128], index: 3, kind: input, shape index: {}]   ;;  %s1478_s4 = inlined_call_operand.vmem [shape: bf16[2,256,128], index: 4, kind: output, shape index: {}]  }
   0x1 LB: > { %s902_s16 = sadd.s32 4294967295, %s1307_s15   ;;  %p906_p0 = scmp.ge.s32.totalorder %s1307_s15, 1  ;;  %s1307_s15 = sphi %s1334_s15, %s14_s15  }
   0x2   : > { %p172_p1 = scmp.lt.s32.totalorder %s1307_s15, 3 }
   0x4   : > { %p173_p2 = pnand %p906_p0, %p172_p1 }
   0x5   : > { %v1277_v0 = vld [vmem:[%s1475_s1] sm:$0xff] (!%p173_p2)   ;;  %p203_p3 = scmp.lt.s32.totalorder (!%p173_p2), %s902_s16, 1  ;;  %v1278_v1 = vld [vmem:[%s1475_s1 + $0x8] sm:$0xff] (!%p173_p2)   ;;  %v1279_v2 = vld [vmem:[%s1475_s1 + $0x10] sm:$0xff] (!%p173_p2)  }
   0x6   : > { %176 = sbr.rel (%p173_p2) target bundleno = 284 (0x11c), region = 36  ;;  %1205 = vmatprep.subr.bf16.mxu0 (!%p173_p2), %v1277_v0  ;;  %1253 = vmatprep.subr.bf16.mxu1 (!%p173_p2), %v1277_v0  ;;  %v1280_v3 = vld [vmem:[%s1475_s1 + $0x18] sm:$0xff] (!%p173_p2)   ;;  %v1281_v6 = vld [vmem:[%s1475_s1 + $0x20] sm:$0xff] (!%p173_p2)   ;;  %v1282_v7 = vld [vmem:[%s1475_s1 + $0x28] sm:$0xff] (!%p173_p2)  }
   0x7   : > { %1206 = vmatpush3.bf16.msra.mxu0 (!%p173_p2), %v1277_v0  ;;  %1261 = vmatpush3.bf16.msra.mxu1 (!%p173_p2), %v1277_v0  ;;  %v1283_v8 = vld [vmem:[%s1475_s1 + $0x30] sm:$0xff] (!%p173_p2)   ;;  %v1284_v9 = vld [vmem:[%s1475_s1 + $0x38] sm:$0xff] (!%p173_p2)   ;;  %v1403_v28 = vld [vmem:[%s1476_s2] ss:$0 sm:$0xff] (!%p173_p2) }
   0x8   : > { %1207 = vmatprep.subr.bf16.mxu0 (!%p173_p2), %v1278_v1  ;;  %1254 = vmatprep.subr.bf16.mxu1 (!%p173_p2), %v1278_v1 }
   0xb   : > { %1208 = vmatpush3.bf16.msra.mxu0 (!%p173_p2), %v1278_v1  ;;  %1262 = vmatpush3.bf16.msra.mxu1 (!%p173_p2), %v1278_v1 }
   0xc   : > { %1209 = vmatprep.subr.bf16.mxu0 (!%p173_p2), %v1279_v2  ;;  %1255 = vmatprep.subr.bf16.mxu1 (!%p173_p2), %v1279_v2 }
   0xd   : > { %s1480_s16 = smov (!%p203_p3, %s902_s16), 1 }
   0xe   : > { %s1351_s23 = sshll.u32 %s1480_s16, 7 }
   0xf   : > { %s1357_s26 = scalar_lea.vmem %s1474_s0, %s1351_s23  ;;  %1210 = vmatpush3.bf16.msra.mxu0 %v1279_v2  ;;  %1263 = vmatpush3.bf16.msra.mxu1 %v1279_v2  ;;  %s1394_s13 = scalar_lea.vmem %s1477_s3, %s1351_s23 }
  0x10   : > { %v1285_v4 = vld [vmem:[%s1357_s26] sm:$0xff]   ;;  %1211 = vmatprep.subr.bf16.mxu0 %v1280_v3  ;;  %1256 = vmatprep.subr.bf16.mxu1 %v1280_v3  ;;  %v1287_v10 = vld [vmem:[%s1357_s26 + $0x8] sm:$0xff]   ;;  %v1289_v12 = vld [vmem:[%s1357_s26 + $0x10] sm:$0xff]   ;;  %s1421_s19 = scalar_lea.vmem %s1478_s4, %s1351_s23 }
  0x11   : > { %v1286_v5 = vld [vmem:[%s1357_s26 + $0x40] sm:$0xff]   ;;  %1221 = vmatprep.mubr.bf16.mxu0 %v1285_v4  ;;  %v1288_v11 = vld [vmem:[%s1357_s26 + $0x48] sm:$0xff]   ;;  %v1290_v13 = vld [vmem:[%s1357_s26 + $0x50] sm:$0xff]  }
  0x12   : > { %1237 = vmatprep.mubr.bf16.mxu1 %v1286_v5  ;;  %v1291_v14 = vld [vmem:[%s1357_s26 + $0x18] sm:$0xff]   ;;  %v1293_v16 = vld [vmem:[%s1357_s26 + $0x20] sm:$0xff]   ;;  %v1295_v18 = vld [vmem:[%s1357_s26 + $0x28] sm:$0xff]  }
  0x13   : > { %1212 = vmatpush3.bf16.msra.mxu0 %v1280_v3  ;;  %1264 = vmatpush3.bf16.msra.mxu1 %v1280_v3  ;;  %v1292_v15 = vld [vmem:[%s1357_s26 + $0x58] sm:$0xff]   ;;  %v1294_v17 = vld [vmem:[%s1357_s26 + $0x60] sm:$0xff]   ;;  %v1296_v19 = vld [vmem:[%s1357_s26 + $0x68] sm:$0xff]  }
  0x14   : > { %1213 = vmatprep.subr.bf16.mxu0 %v1281_v6  ;;  %1257 = vmatprep.subr.bf16.mxu1 %v1281_v6  ;;  %v1297_v20 = vld [vmem:[%s1357_s26 + $0x30] sm:$0xff]   ;;  %v1299_v22 = vld [vmem:[%s1357_s26 + $0x38] sm:$0xff]   ;;  %v1151_v24 = vld [vmem:[%s1394_s13 + $0x8] sm:$0xff]  }
  0x15   : > { %v1298_v21 = vld [vmem:[%s1357_s26 + $0x70] sm:$0xff]   ;;  %v1300_v23 = vld [vmem:[%s1357_s26 + $0x78] sm:$0xff]   ;;  %v1159_v25 = vld [vmem:[%s1394_s13 + $0x48] sm:$0xff]   ;;  %v1013_v30 = vunpack.c.l.bf16 %v1151_v24  ;;  %v1014_v39 = vunpack.c.h.bf16 %v1151_v24 }
  0x16   : > { %v1008_v26 = vld [vmem:[%s1394_s13] sm:$0xff]   ;;  %v1045_v32 = vunpack.c.l.bf16 %v1159_v25  ;;  %v1046_v40 = vunpack.c.h.bf16 %v1159_v25  ;;  %v1153_v53 = vld [vmem:[%s1394_s13 + $0x18] sm:$0xff]   ;;  %v1152_v59 = vld [vmem:[%s1394_s13 + $0x10] sm:$0xff]  }
  0x17   : > { %1214 = vmatpush3.bf16.msra.mxu0 %v1281_v6  ;;  %1265 = vmatpush3.bf16.msra.mxu1 %v1281_v6  ;;  %v1158_v27 = vld [vmem:[%s1394_s13 + $0x40] sm:$0xff]   ;;  %v1009_v33 = vunpack.c.l.bf16 %v1008_v26  ;;  %v1010_v45 = vunpack.c.h.bf16 %v1008_v26  ;;  %v1161_v54 = vld [vmem:[%s1394_s13 + $0x58] sm:$0xff]   ;;  %v1160_v60 = vld [vmem:[%s1394_s13 + $0x50] sm:$0xff]   ;;  %v1021_v3 = vunpack.c.l.bf16 %v1153_v53 }
  0x18   : > { %1215 = vmatprep.subr.bf16.mxu0 %v1282_v7  ;;  %1258 = vmatprep.subr.bf16.mxu1 %v1282_v7  ;;  %v1041_v34 = vunpack.c.l.bf16 %v1158_v27  ;;  %v1042_v46 = vunpack.c.h.bf16 %v1158_v27  ;;  %v1053_v4 = vunpack.c.l.bf16 %v1161_v54 }
  0x1b   : > { %1216 = vmatpush3.bf16.msra.mxu0 %v1282_v7  ;;  %1266 = vmatpush3.bf16.msra.mxu1 %v1282_v7 }
  0x1c   : > { %1217 = vmatprep.subr.bf16.mxu0 %v1283_v8  ;;  %1259 = vmatprep.subr.bf16.mxu1 %v1283_v8 }
  0x1f   : > { %1218 = vmatpush3.bf16.msra.mxu0 %v1283_v8  ;;  %1267 = vmatpush3.bf16.msra.mxu1 %v1283_v8 }
  0x20   : > { %1219 = vmatprep.subr.bf16.mxu0 %v1284_v9  ;;  %1260 = vmatprep.subr.bf16.mxu1 %v1284_v9 }
  0x23   : > { %1220 = vmatpush3.bf16.msra.mxu0 %v1284_v9  ;;  %1268 = vmatpush3.bf16.msra.mxu1 %v1284_v9  ;;  %v1017_v9 = vunpack.c.l.bf16 %v1152_v59 }
  0x26   : > { %1222 = vmatmul.mubr.bf16.vlgmr.msra.gmra.mrb[0].mxu0 %v1287_v10  ;;  %1238 = vmatmul.mubr.bf16.vlgmr.msra.gmra.mrb[0].mxu1 %v1288_v11  ;;  %v1049_v10 = vunpack.c.l.bf16 %v1160_v60 }
  0x27   : > { %1225 = vmatprep.mubr.bf16.mxu0 %v1289_v12  ;;  %1241 = vmatprep.mubr.bf16.mxu1 %v1290_v13 }
  0x2e   : > { %1226 = vmatmul.mubr.bf16.gmra.mrb[4].mxu0 %v1291_v14  ;;  %1242 = vmatmul.mubr.bf16.gmra.mrb[4].mxu1 %v1292_v15  ;;  %v1022_v15 = vunpack.c.h.bf16 %v1153_v53 }
  0x2f   : > { %1229 = vmatprep.mubr.bf16.mxu0 %v1293_v16  ;;  %1245 = vmatprep.mubr.bf16.mxu1 %v1294_v17  ;;  %v1054_v16 = vunpack.c.h.bf16 %v1161_v54 }
  0x36   : > { %1230 = vmatmul.mubr.bf16.gmra.mrb[8].mxu0 %v1295_v18  ;;  %1246 = vmatmul.mubr.bf16.gmra.mrb[8].mxu1 %v1296_v19 }
  0x37   : > { %1233 = vmatprep.mubr.bf16.mxu0 %v1297_v20  ;;  %1249 = vmatprep.mubr.bf16.mxu1 %v1298_v21  ;;  %v1018_v21 = vunpack.c.h.bf16 %v1152_v59 }
  0x3e   : > { %1234 = vmatmul.mubr.bf16.gmra.mrb[12].mxu0 %v1299_v22  ;;  %1250 = vmatmul.mubr.bf16.gmra.mrb[12].mxu1 %v1300_v23  ;;  %v1050_v22 = vunpack.c.h.bf16 %v1160_v60 }
  0xf9   : > { %v1223_v29 = vpop.f32.mrb[0].mxu0  ;;  %v1239_v31 = vpop.f32.mrb[0].mxu1 }
  0xfa   : > { %v461_v35 = vadd.f32 %v1223_v29, %v1403_v28  ;;  %v525_v36 = vadd.f32 %v1239_v31, %v1403_v28  ;;  %v452_v37 = vpop.f32.mrb[1].mxu0  ;;  %v516_v38 = vpop.f32.mrb[1].mxu1  ;;  %v1163_v31 = vld [vmem:[%s1394_s13 + $0x68] sm:$0xff]  }
  0xfb   : > { %v453_v41 = vadd.f32 %v1403_v28, %v452_v37  ;;  %v517_v42 = vadd.f32 %v1403_v28, %v516_v38  ;;  %v1224_v43 = vpop.f32.mrb[2].mxu0  ;;  %v1240_v44 = vpop.f32.mrb[2].mxu1  ;;  %v1162_v37 = vld [vmem:[%s1394_s13 + $0x60] sm:$0xff]  }
  0xfc   : > { %v464_v47 = vadd.f32 %v1224_v43, %v1403_v28  ;;  %v528_v48 = vadd.f32 %v1240_v44, %v1403_v28  ;;  %v455_v49 = vpop.f32.mrb[3].mxu0  ;;  %v519_v50 = vpop.f32.mrb[3].mxu1  ;;  %v645_v55 = vadd.f32 %v1013_v30, %v461_v35  ;;  %v661_v56 = vadd.f32 %v1045_v32, %v525_v36  ;;  %v1155_v30 = vld [vmem:[%s1394_s13 + $0x28] sm:$0xff]   ;;  %v1154_v36 = vld [vmem:[%s1394_s13 + $0x20] sm:$0xff]  }
  0xfd   : > { %v456_v51 = vadd.f32 %v1403_v28, %v455_v49  ;;  %v520_v52 = vadd.f32 %v1403_v28, %v519_v50  ;;  %v643_v61 = vadd.f32 %v1009_v33, %v453_v41  ;;  %v659_v62 = vadd.f32 %v1041_v34, %v517_v42 }
  0xfe   : > { %v646_v57 = vadd.f32 %v1014_v39, %v464_v47  ;;  %v662_v58 = vadd.f32 %v1046_v40, %v528_v48  ;;  %v1029_v44 = vunpack.c.l.bf16 %v1155_v30  ;;  %v1025_v50 = vunpack.c.l.bf16 %v1154_v36 }
  0xff   : > { %v644_v63 = vadd.f32 %v1010_v45, %v456_v51  ;;  %v660_v0 = vadd.f32 %v1042_v46, %v520_v52  ;;  %v1061_v45 = vunpack.c.l.bf16 %v1163_v31  ;;  %v1057_v51 = vunpack.c.l.bf16 %v1162_v37 }
 0x100   : > { %v1079_v1 = vpack.c.bf16 %v646_v57, %v645_v55  ;;  %v1119_v2 = vpack.c.bf16 %v662_v58, %v661_v56  ;;  %v1030_v56 = vunpack.c.h.bf16 %v1155_v30  ;;  %v1062_v57 = vunpack.c.h.bf16 %v1163_v31 }
 0x101   : > { %v1074_v5 = vpack.c.bf16 %v644_v63, %v643_v61  ;;  %v1114_v6 = vpack.c.bf16 %v660_v0, %v659_v62  ;;  %v1227_v7 = vpop.f32.mrb[4].mxu0  ;;  %v1243_v8 = vpop.f32.mrb[4].mxu1  ;;  %v1026_v62 = vunpack.c.h.bf16 %v1154_v36  ;;  %v1058_v63 = vunpack.c.h.bf16 %v1162_v37 }
 0x102   : > { %1166 = vst [vmem:[%s1421_s19 + $0x8] sm:$0xff] %v1079_v1   ;;  %1174 = vst [vmem:[%s1421_s19 + $0x48] sm:$0xff] %v1119_v2   ;;  %v477_v11 = vadd.f32 %v1227_v7, %v1403_v28  ;;  %v541_v12 = vadd.f32 %v1243_v8, %v1403_v28  ;;  %v468_v13 = vpop.f32.mrb[5].mxu0  ;;  %v532_v14 = vpop.f32.mrb[5].mxu1  ;;  %v1165_v7 = vld [vmem:[%s1394_s13 + $0x78] sm:$0xff]  }
 0x103   : > { %1075 = vst [vmem:[%s1421_s19] sm:$0xff] %v1074_v5   ;;  %1173 = vst [vmem:[%s1421_s19 + $0x40] sm:$0xff] %v1114_v6   ;;  %v469_v17 = vadd.f32 %v1403_v28, %v468_v13  ;;  %v533_v18 = vadd.f32 %v1403_v28, %v532_v14  ;;  %v1228_v19 = vpop.f32.mrb[6].mxu0  ;;  %v1244_v20 = vpop.f32.mrb[6].mxu1  ;;  %v1157_v6 = vld [vmem:[%s1394_s13 + $0x38] sm:$0xff]   ;;  %v1164_v13 = vld [vmem:[%s1394_s13 + $0x70] sm:$0xff]  }
 0x104   : > { %v480_v23 = vadd.f32 %v1228_v19, %v1403_v28  ;;  %v544_v24 = vadd.f32 %v1244_v20, %v1403_v28  ;;  %v471_v25 = vpop.f32.mrb[7].mxu0  ;;  %v535_v26 = vpop.f32.mrb[7].mxu1  ;;  %v649_v32 = vadd.f32 %v1021_v3, %v477_v11  ;;  %v665_v33 = vadd.f32 %v1053_v4, %v541_v12  ;;  %v1156_v12 = vld [vmem:[%s1394_s13 + $0x30] sm:$0xff]  }
 0x105   : > { %v472_v27 = vadd.f32 %v1403_v28, %v471_v25  ;;  %v536_v29 = vadd.f32 %v1403_v28, %v535_v26  ;;  %v647_v38 = vadd.f32 %v1017_v9, %v469_v17  ;;  %v663_v39 = vadd.f32 %v1049_v10, %v533_v18 }
 0x106   : > { %v650_v34 = vadd.f32 %v1022_v15, %v480_v23  ;;  %v666_v35 = vadd.f32 %v1054_v16, %v544_v24  ;;  %v1037_v20 = vunpack.c.l.bf16 %v1157_v6  ;;  %v1033_v26 = vunpack.c.l.bf16 %v1156_v12 }
 0x107   : > { %v648_v40 = vadd.f32 %v1018_v21, %v472_v27  ;;  %v664_v41 = vadd.f32 %v1050_v22, %v536_v29  ;;  %v1069_v21 = vunpack.c.l.bf16 %v1165_v7  ;;  %v1065_v27 = vunpack.c.l.bf16 %v1164_v13 }
 0x108   : > { %v1089_v42 = vpack.c.bf16 %v650_v34, %v649_v32  ;;  %v1129_v43 = vpack.c.bf16 %v666_v35, %v665_v33  ;;  %v1038_v33 = vunpack.c.h.bf16 %v1157_v6  ;;  %v1070_v34 = vunpack.c.h.bf16 %v1165_v7 }
 0x109   : > { %v1084_v46 = vpack.c.bf16 %v648_v40, %v647_v38  ;;  %v1124_v47 = vpack.c.bf16 %v664_v41, %v663_v39  ;;  %v1231_v48 = vpop.f32.mrb[8].mxu0  ;;  %v1247_v49 = vpop.f32.mrb[8].mxu1  ;;  %v1034_v39 = vunpack.c.h.bf16 %v1156_v12  ;;  %v1066_v40 = vunpack.c.h.bf16 %v1164_v13 }
 0x10a   : > { %1168 = vst [vmem:[%s1421_s19 + $0x18] sm:$0xff] %v1089_v42   ;;  %1176 = vst [vmem:[%s1421_s19 + $0x58] sm:$0xff] %v1129_v43   ;;  %v493_v52 = vadd.f32 %v1231_v48, %v1403_v28  ;;  %v557_v53 = vadd.f32 %v1247_v49, %v1403_v28  ;;  %v484_v54 = vpop.f32.mrb[9].mxu0  ;;  %v548_v55 = vpop.f32.mrb[9].mxu1 }
 0x10b   : > { %1167 = vst [vmem:[%s1421_s19 + $0x10] sm:$0xff] %v1084_v46   ;;  %1175 = vst [vmem:[%s1421_s19 + $0x50] sm:$0xff] %v1124_v47   ;;  %v485_v58 = vadd.f32 %v1403_v28, %v484_v54  ;;  %v549_v59 = vadd.f32 %v1403_v28, %v548_v55  ;;  %v1232_v60 = vpop.f32.mrb[10].mxu0  ;;  %v1248_v61 = vpop.f32.mrb[10].mxu1 }
 0x10c   : > { %v496_v0 = vadd.f32 %v1232_v60, %v1403_v28  ;;  %v560_v1 = vadd.f32 %v1248_v61, %v1403_v28  ;;  %v487_v2 = vpop.f32.mrb[11].mxu0  ;;  %v551_v3 = vpop.f32.mrb[11].mxu1  ;;  %v653_v8 = vadd.f32 %v1029_v44, %v493_v52  ;;  %v669_v9 = vadd.f32 %v1061_v45, %v557_v53 }
 0x10d   : > { %v488_v4 = vadd.f32 %v1403_v28, %v487_v2  ;;  %v552_v5 = vadd.f32 %v1403_v28, %v551_v3  ;;  %v651_v14 = vadd.f32 %v1025_v50, %v485_v58  ;;  %v667_v15 = vadd.f32 %v1057_v51, %v549_v59 }
 0x10e   : > { %v654_v10 = vadd.f32 %v1030_v56, %v496_v0  ;;  %v670_v11 = vadd.f32 %v1062_v57, %v560_v1 }
 0x10f   : > { %v652_v16 = vadd.f32 %v1026_v62, %v488_v4  ;;  %v668_v17 = vadd.f32 %v1058_v63, %v552_v5 }
 0x110   : > { %v1099_v18 = vpack.c.bf16 %v654_v10, %v653_v8  ;;  %v1139_v19 = vpack.c.bf16 %v670_v11, %v669_v9 }
 0x111   : > { %v1094_v22 = vpack.c.bf16 %v652_v16, %v651_v14  ;;  %v1134_v23 = vpack.c.bf16 %v668_v17, %v667_v15  ;;  %v1235_v24 = vpop.f32.mrb[12].mxu0  ;;  %v1251_v25 = vpop.f32.mrb[12].mxu1 }
 0x112   : > { %1170 = vst [vmem:[%s1421_s19 + $0x28] sm:$0xff] %v1099_v18   ;;  %1178 = vst [vmem:[%s1421_s19 + $0x68] sm:$0xff] %v1139_v19   ;;  %v509_v29 = vadd.f32 %v1235_v24, %v1403_v28  ;;  %v573_v30 = vadd.f32 %v1251_v25, %v1403_v28  ;;  %v500_v31 = vpop.f32.mrb[13].mxu0  ;;  %v564_v32 = vpop.f32.mrb[13].mxu1 }
 0x113   : > { %1169 = vst [vmem:[%s1421_s19 + $0x20] sm:$0xff] %v1094_v22   ;;  %1177 = vst [vmem:[%s1421_s19 + $0x60] sm:$0xff] %v1134_v23   ;;  %v501_v35 = vadd.f32 %v1403_v28, %v500_v31  ;;  %v565_v36 = vadd.f32 %v1403_v28, %v564_v32  ;;  %v1236_v37 = vpop.f32.mrb[14].mxu0  ;;  %v1252_v38 = vpop.f32.mrb[14].mxu1 }
 0x114   : > { %v512_v41 = vadd.f32 %v1236_v37, %v1403_v28  ;;  %v576_v42 = vadd.f32 %v1252_v38, %v1403_v28  ;;  %v503_v43 = vpop.f32.mrb[15].mxu0  ;;  %v567_v44 = vpop.f32.mrb[15].mxu1  ;;  %v657_v47 = vadd.f32 %v1037_v20, %v509_v29  ;;  %v673_v48 = vadd.f32 %v1069_v21, %v573_v30 }
 0x115   : > { %v504_v45 = vadd.f32 %v1403_v28, %v503_v43  ;;  %v568_v46 = vadd.f32 %v1403_v28, %v567_v44  ;;  %v655_v51 = vadd.f32 %v1033_v26, %v501_v35  ;;  %v671_v52 = vadd.f32 %v1065_v27, %v565_v36 }
 0x116   : > { %v658_v49 = vadd.f32 %v1038_v33, %v512_v41  ;;  %v674_v50 = vadd.f32 %v1070_v34, %v576_v42 }
 0x117   : > { %v656_v53 = vadd.f32 %v1034_v39, %v504_v45  ;;  %v672_v54 = vadd.f32 %v1066_v40, %v568_v46 }
 0x118   : > { %v1109_v55 = vpack.c.bf16 %v658_v49, %v657_v47  ;;  %v1149_v56 = vpack.c.bf16 %v674_v50, %v673_v48 }
 0x119   : > { %v1104_v57 = vpack.c.bf16 %v656_v53, %v655_v51  ;;  %v1144_v58 = vpack.c.bf16 %v672_v54, %v671_v52 }
 0x11a   : > { %1172 = vst [vmem:[%s1421_s19 + $0x38] sm:$0xff] %v1109_v55   ;;  %1180 = vst [vmem:[%s1421_s19 + $0x78] sm:$0xff] %v1149_v56  }
 0x11b   : > { %1171 = vst [vmem:[%s1421_s19 + $0x30] sm:$0xff] %v1104_v57   ;;  %1179 = vst [vmem:[%s1421_s19 + $0x70] sm:$0xff] %v1144_v58  }
 0x11c PF: > { %s14_s15 = sadd.s32 1, %s1307_s15  }
 0x11d   : > { %p11_p4 = scmp.ge.s32.totalorder %s14_s15, 4  }
 0x11f   :  { %13 = sbr.rel (!%p11_p4) target bundleno = 1 (0x1), region = 69 }

// kernel: wideresnet_forward.15
= control target key start
LH: loop header
LB: loop body
LE: loop exit
PB: predicated region body
PF: predicated region fallthrough
CT: control target
= control target key end

     0   :  { %s3039_s12 = smov 0   ;;  %s3041_s13 = smov 0   ;;  %s3632_s0 = inlined_call_operand.vmem [shape: bf16[2,18,18,128], index: 0, kind: input, shape index: {}]   ;;  %s3633_s1 = inlined_call_operand.vmem [shape: bf16[9,128,128], index: 1, kind: input, shape index: {}]   ;;  %s3634_s2 = inlined_call_operand.vmem [shape: f32[1,128], index: 2, kind: input, shape index: {}]   ;;  %s3635_s3 = inlined_call_operand.vmem [shape: bf16[2,256,128], index: 3, kind: output, shape index: {}]  }
   0x1   :  { %s3043_s14 = smov 0   ;;  %s3045_s15 = smov 0  }
   0x2   :  { %s3047_s16 = smov 0  }
   0x3 LB: > { %s22_s17 = sadd.s32 1, %s3008_s14  ;;  %s25_s18 = sadd.s32 1, %s3012_s15  ;;  %s3016_s16 = sphi %s3047_s16, %s13_s16   ;;  %s3012_s15 = sphi %s3045_s15, %s3643_s15   ;;  %s3008_s14 = sphi %s3043_s14, %s3642_s14   ;;  %s3004_s13 = sphi %s3041_s13, %s3641_s13   ;;  %s3000_s12 = sphi %s3039_s12, %s3640_s12  }
   0x4   : > { %p23_p0 = scmp.ge.s32.totalorder %s22_s17, 3  ;;  %p2274_p1 = scmp.ge.s32.totalorder %s3016_s16, 1 }
   0x5   : > { %p161_p2 = scmp.lt.s32.totalorder %s3016_s16, 7 }
   0x6   : > { %s3645_s17 = smov (%p23_p0, %s22_s17), 0  ;;  %s3647_s18 = smov (!%p23_p0, %s25_s18), %s3012_s15 }
   0x7   : > { %p162_p3 = pnand %p2274_p1, %p161_p2  ;;  %p27_p4 = scmp.ge.s32.totalorder %s3647_s18, 2 }
   0x8   : > { %p191_p5 = scmp.lt.s32.totalorder (!%p162_p3), %s3004_s13, 1  ;;  %s196_s19 = smul.u32 (!%p162_p3), 3, %s3000_s12 }
   0x9   : > { %s3649_s18 = smov (%p27_p4, %s3647_s18), 0  ;;  %165 = sbr.rel (%p162_p3) target bundleno = 387 (0x183), region = 32 }
   0xa   : > { %p197_p6 = scmp.lt.s32.totalorder (!%p162_p3), %s196_s19, 8  ;;  %p2280_p7 = scmp.ne.s32.totalorder (!%p162_p3), %s3000_s12, 0 }
  0x10   : > { %s3651_s13 = smov (!%p191_p5, %s3004_s13), 1  ;;  %s3653_s19 = smov (!%p197_p6, %s196_s19), 8 }
  0x11   : > { %s2896_s20 = smul.u32 216, %s3651_s13  ;;  %s2439_s21 = sshll.u32 %s3651_s13, 7  ;;  %v3018_v0 = vmov (!%p2280_p7), 0.0  }
  0x12   : > { %s3080_s27 = scalar_lea.vmem %s3635_s3, %s2439_s21  ;;  %s2438_s28 = sshll.u32 %s3653_s19, 6  ;;  %213 = vst [vmem:[#allocation2] sm:$0xff] (!%p2280_p7), %v3018_v0  ;;  %214 = vst [vmem:[#allocation2 + $0x8] sm:$0xff] (!%p2280_p7), %v3018_v0 }
  0x13   : > { %s3075_s24 = scalar_lea.vmem %s3632_s0, %s2896_s20  ;;  %s3085_s4 = scalar_lea.vmem %s3633_s1, %s2438_s28  ;;  %215 = vst [vmem:[#allocation2 + $0x10] sm:$0xff] (!%p2280_p7), %v3018_v0  ;;  %216 = vst [vmem:[#allocation2 + $0x18] sm:$0xff] (!%p2280_p7), %v3018_v0 }
  0x14   : > { %212 = sbr.rel (%p2280_p7) target bundleno = 34 (0x22), region = 36  ;;  %217 = vst [vmem:[#allocation2 + $0x20] sm:$0xff] (!%p2280_p7), %v3018_v0  ;;  %218 = vst [vmem:[#allocation2 + $0x28] sm:$0xff] (!%p2280_p7), %v3018_v0 }
  0x15   : > { %219 = vst [vmem:[#allocation2 + $0x30] sm:$0xff] (!%p2280_p7), %v3018_v0  ;;  %220 = vst [vmem:[#allocation2 + $0x38] sm:$0xff] (!%p2280_p7), %v3018_v0 }
  0x16   : > { %221 = vst [vmem:[#allocation2 + $0x40] sm:$0xff] (!%p2280_p7), %v3018_v0  ;;  %222 = vst [vmem:[#allocation2 + $0x48] sm:$0xff] (!%p2280_p7), %v3018_v0 }
  0x17   : > { %223 = vst [vmem:[#allocation2 + $0x50] sm:$0xff] (!%p2280_p7), %v3018_v0  ;;  %224 = vst [vmem:[#allocation2 + $0x58] sm:$0xff] (!%p2280_p7), %v3018_v0 }
  0x18   : > { %225 = vst [vmem:[#allocation2 + $0x60] sm:$0xff] (!%p2280_p7), %v3018_v0  ;;  %226 = vst [vmem:[#allocation2 + $0x68] sm:$0xff] (!%p2280_p7), %v3018_v0 }
  0x19   : > { %227 = vst [vmem:[#allocation2 + $0x70] sm:$0xff] (!%p2280_p7), %v3018_v0  ;;  %228 = vst [vmem:[#allocation2 + $0x78] sm:$0xff] (!%p2280_p7), %v3018_v0 }
  0x1a   : > { %229 = vst [vmem:[#allocation2 + $0x80] sm:$0xff] (!%p2280_p7), %v3018_v0  ;;  %230 = vst [vmem:[#allocation2 + $0x88] sm:$0xff] (!%p2280_p7), %v3018_v0 }
  0x1b   : > { %231 = vst [vmem:[#allocation2 + $0x90] sm:$0xff] %v3018_v0  ;;  %232 = vst [vmem:[#allocation2 + $0x98] sm:$0xff] %v3018_v0 }
  0x1c   : > { %233 = vst [vmem:[#allocation2 + $0xa0] sm:$0xff] %v3018_v0  ;;  %234 = vst [vmem:[#allocation2 + $0xa8] sm:$0xff] %v3018_v0 }
  0x1d   : > { %235 = vst [vmem:[#allocation2 + $0xb0] sm:$0xff] %v3018_v0  ;;  %236 = vst [vmem:[#allocation2 + $0xb8] sm:$0xff] %v3018_v0 }
  0x1e   : > { %237 = vst [vmem:[#allocation2 + $0xc0] sm:$0xff] %v3018_v0  ;;  %238 = vst [vmem:[#allocation2 + $0xc8] sm:$0xff] %v3018_v0 }
  0x1f   : > { %239 = vst [vmem:[#allocation2 + $0xd0] sm:$0xff] %v3018_v0  ;;  %240 = vst [vmem:[#allocation2 + $0xd8] sm:$0xff] %v3018_v0 }
  0x20   : > { %241 = vst [vmem:[#allocation2 + $0xe0] sm:$0xff] %v3018_v0  ;;  %242 = vst [vmem:[#allocation2 + $0xe8] sm:$0xff] %v3018_v0 }
  0x21   : > { %243 = vst [vmem:[#allocation2 + $0xf0] sm:$0xff] %v3018_v0  ;;  %244 = vst [vmem:[#allocation2 + $0xf8] sm:$0xff] %v3018_v0 }
  0x22 PF: > { %v2938_v1 = vld [vmem:[%s3085_s4] sm:$0xff]   ;;  %v2940_v3 = vld [vmem:[%s3085_s4 + $0x8] sm:$0xff]   ;;  %v2942_v5 = vld [vmem:[%s3085_s4 + $0x10] sm:$0xff]   ;;  %s2440_s5 = smul.u32 12, %s3000_s12  ;;  %vm713_vm0 = vsmask.f32 3328 }
  0x23   : > { %v3090_v2 = vld [vmem:[%s3085_s4 + $0x40] sm:$0xff]   ;;  %2640 = vmatprep.subr.bf16.mxu1 %v2938_v1  ;;  %v3095_v4 = vld [vmem:[%s3085_s4 + $0x48] sm:$0xff]   ;;  %v3101_v6 = vld [vmem:[%s3085_s4 + $0x50] sm:$0xff]   ;;  %vm714_vm1 = vsmask.f32 7440  ;;  %vm1486_vm3 = vcmask 1042432  }
  0x24   : > { %2688 = vmatprep.subr.bf16.mxu0 %v3090_v2  ;;  %2641 = vmatpush3.bf16.msra.mxu1 %v2938_v1  ;;  %v2944_v7 = vld [vmem:[%s3085_s4 + $0x18] sm:$0xff]   ;;  %v2946_v9 = vld [vmem:[%s3085_s4 + $0x20] sm:$0xff]   ;;  %v2948_v11 = vld [vmem:[%s3085_s4 + $0x28] sm:$0xff]   ;;  %s3118_s6 = scalar_lea.vmem %s3075_s24, %s2440_s5  ;;  %vm1487_vm4 = vcmask 1046532   ;;  %p2402_p8 = scmp.ne.s32.totalorder %s3000_s12, 2 }
  0x25   : > { %2689 = vmatpush3.bf16.msra.mxu0 %v3090_v2  ;;  %2642 = vmatprep.subr.bf16.mxu1 %v2940_v3  ;;  %v3107_v8 = vld [vmem:[%s3085_s4 + $0x58] sm:$0xff]   ;;  %v3114_v10 = vld [vmem:[%s3085_s4 + $0x60] sm:$0xff]   ;;  %v3121_v12 = vld [vmem:[%s3085_s4 + $0x68] sm:$0xff]  }
  0x26   : > { %2690 = vmatprep.subr.bf16.mxu0 %v3095_v4  ;;  %v2954_v13 = vld [vmem:[%s3118_s6] sm:$0xff]   ;;  %v3131_v16 = vld [vmem:[%s3118_s6 + $0x8] sm:$0x1]  ;;  %v2950_v19 = vld [vmem:[%s3085_s4 + $0x30] sm:$0xff]  }
  0x27   : > { %v665_v14 = vld [vmem:[%s3118_s6] sm:$0xf]  ;;  %v3128_v15 = vld [vmem:[%s3118_s6 + $0x4] sm:$0xf]  ;;  %2656 = vmatprep.mubr.bf16.mxu1 %v2954_v13  ;;  %v736_v22 = vshll.u32 %v3131_v16, 16  ;;  %v3140_v25 = vld [vmem:[%s3085_s4 + $0x70] sm:$0xff]  }
  0x28   : > { %2643 = vmatpush3.bf16.msra.mxu1 %v2940_v3  ;;  %v717_v17 = vshrl.u32 %v665_v14, 16  ;;  %v720_v18 = vshll.u32 %v665_v14, 16  ;;  %v726_v20 = vshll.u32 %v3128_v15, 16  ;;  %v730_v21 = vshrl.u32 %v3128_v15, 16  ;;  %v668_v29 = vld [vmem:[%s3118_s6 + $0xc] sm:$0xf]  ;;  %vm3152_vm2 = vmor %vm713_vm0, %vm714_vm1 }
  0x29   : > { %2691 = vmatpush3.bf16.msra.mxu0 %v3095_v4  ;;  %2644 = vmatprep.subr.bf16.mxu1 %v2942_v5  ;;  %v738_v28 = vrot.slane %v736_v22, 5  ;;  %v3144_v31 = vld [vmem:[%s3118_s6 + $0x10] sm:$0xf]  ;;  %v3147_v32 = vld [vmem:[%s3118_s6 + $0x14] sm:$0x1]  ;;  %v741_v33 = vshrl.u32 %v668_v29, 16  ;;  %vm3285_vm5 = vmor %vm1486_vm3, %vm1487_vm4 }
  0x2a   : > { %2692 = vmatprep.subr.bf16.mxu0 %v3101_v6  ;;  %v719_v23 = vrot.slane %v717_v17, 4  ;;  %v722_v24 = vrot.slane %v720_v18, 5  ;;  %v728_v26 = vrot.slane %v726_v20, 5  ;;  %v732_v27 = vrot.slane %v730_v21, 4  ;;  %v2952_v35 = vld [vmem:[%s3085_s4 + $0x38] sm:$0xff]   ;;  %v2955_v58 = vld [vmem:[%s3118_s6 + $0xc] sm:$0xff]  }
  0x2b   : > { %v744_v34 = vshll.u32 %v668_v29, 16  ;;  %v750_v38 = vshll.u32 %v3144_v31, 16  ;;  %v754_v39 = vshrl.u32 %v3144_v31, 16  ;;  %v760_v40 = vshll.u32 %v3147_v32, 16  ;;  %v3161_v41 = vld [vmem:[%s3085_s4 + $0x78] sm:$0xff]   ;;  %v2956_v60 = vld [vmem:[%s3085_s4 + $0x80] sm:$0xff]  }
  0x2c   : > { %2645 = vmatpush3.bf16.msra.mxu1 %v2942_v5  ;;  %v723_v30 = vor.u32 %v722_v24, %v719_v23  ;;  %v733_v37 = vor.u32 %v732_v27, %v728_v26  ;;  %v743_v43 = vrot.slane %v741_v33, 4  ;;  %v1494_v46 = vrot.slane %v3131_v16, 5  ;;  %v671_v55 = vld [vmem:[%s3118_s6 + $0x18] sm:$0xf]  ;;  %v3172_v56 = vld [vmem:[%s3118_s6 + $0x1c] sm:$0xf] }
  0x2d   : > { %2693 = vmatpush3.bf16.msra.mxu0 %v3101_v6  ;;  %2646 = vmatprep.subr.bf16.mxu1 %v2944_v7  ;;  %v746_v44 = vrot.slane %v744_v34, 5  ;;  %v752_v47 = vrot.slane %v750_v38, 5  ;;  %v756_v48 = vrot.slane %v754_v39, 4  ;;  %v762_v51 = vrot.slane %v760_v40, 5  ;;  %v3178_v61 = vld [vmem:[%s3118_s6 + $0x20] sm:$0x1] }
  0x2e   : > { %2694 = vmatprep.subr.bf16.mxu0 %v3107_v8  ;;  %v724_v42 = vrot.slane %v723_v30, 4  ;;  %v734_v45 = vrot.slane %v733_v37, 4  ;;  %v1498_v52 = vrot.slane %v3144_v31, 5  ;;  %v765_v62 = vshrl.u32 %v671_v55, 16  ;;  %v674_v13 = vld [vmem:[%s3118_s6 + $0x24] sm:$0xf] }
  0x2f   : > { %v747_v50 = vor.u32 %v746_v44, %v743_v43  ;;  %v757_v54 = vor.u32 %v756_v48, %v752_v47  ;;  %v768_v63 = vshll.u32 %v671_v55, 16  ;;  %v774_v1 = vshll.u32 %v3172_v56, 16  ;;  %v2958_v17 = vld [vmem:[%s3118_s6 + $0x18] sm:$0xff]   ;;  %v3191_v21 = vld [vmem:[%s3118_s6 + $0x28] sm:$0xf] }
  0x30   : > { %2647 = vmatpush3.bf16.msra.mxu1 %v2944_v7  ;;  %v729_v49 = vsel %vm3152_vm2, %v724_v42, %v728_v26  ;;  %v739_v53 = vsel %vm3152_vm2, %v734_v45, %v738_v28  ;;  %v778_v3 = vshrl.u32 %v3172_v56, 16  ;;  %v784_v5 = vshll.u32 %v3178_v61, 16  ;;  %v3196_v24 = vld [vmem:[%s3118_s6 + $0x2c] sm:$0x1]  ;;  %v2960_v45 = vld [vmem:[%s3085_s4 + $0x90] sm:$0xff]   ;;  %v2959_v48 = vld [vmem:[%s3118_s6 + $0x24] sm:$0xff]  }
  0x31   : > { %2695 = vmatpush3.bf16.msra.mxu0 %v3107_v8  ;;  %2648 = vmatprep.subr.bf16.mxu1 %v2946_v9  ;;  %v2322_v57 = vcombine.low %v729_v49, %v739_v53  ;;  %v748_v59 = vrot.slane %v747_v50, 4  ;;  %v758_v0 = vrot.slane %v757_v54, 4  ;;  %v776_v18 = vrot.slane %v774_v1, 5  ;;  %v2957_v28 = vld [vmem:[%s3085_s4 + $0x88] sm:$0xff]   ;;  %v677_v50 = vld [vmem:[%s3118_s6 + $0x30] sm:$0xf] }
  0x32   : > { %2696 = vmatprep.subr.bf16.mxu0 %v3114_v10  ;;  %v786_v20 = vrot.slane %v784_v5, 5  ;;  %v789_v26 = vshrl.u32 %v674_v13, 16  ;;  %v792_v27 = vshll.u32 %v674_v13, 16  ;;  %v798_v30 = vshll.u32 %v3191_v21, 16  ;;  %v3216_v53 = vld [vmem:[%s3118_s6 + $0x34] sm:$0xf] }
  0x33   : > { %2704 = vmatprep.mubr.bf16.mxu0 %v2322_v57  ;;  %v753_v7 = vsel %vm3152_vm2, %v748_v59, %v752_v47  ;;  %v763_v14 = vsel %vm3152_vm2, %v758_v0, %v762_v51  ;;  %v802_v33 = vshrl.u32 %v3191_v21, 16  ;;  %v808_v34 = vshll.u32 %v3196_v24, 16  ;;  %v3219_v54 = vld [vmem:[%s3118_s6 + $0x38] sm:$0x1]  ;;  %v680_v13 = vld [vmem:[%s3118_s6 + $0x3c] sm:$0xf] }
  0x34   : > { %2649 = vmatpush3.bf16.msra.mxu1 %v2946_v9  ;;  %v767_v9 = vrot.slane %v765_v62, 4  ;;  %v2323_v22 = vcombine.low %v753_v7, %v763_v14  ;;  %v791_v38 = vrot.slane %v789_v26, 4  ;;  %v794_v39 = vrot.slane %v792_v27, 5  ;;  %v3230_v14 = vld [vmem:[%s3118_s6 + $0x40] sm:$0xf] }
  0x35   : > { %2697 = vmatpush3.bf16.msra.mxu0 %v3114_v10  ;;  %2650 = vmatprep.subr.bf16.mxu1 %v2948_v11  ;;  %v800_v42 = vrot.slane %v798_v30, 5  ;;  %v804_v43 = vrot.slane %v802_v33, 4  ;;  %v810_v44 = vrot.slane %v808_v34, 5  ;;  %v813_v55 = vshrl.u32 %v677_v50, 16 }
  0x36   : > { %2698 = vmatprep.subr.bf16.mxu0 %v3121_v12  ;;  %v795_v49 = vor.u32 %v794_v39, %v791_v38  ;;  %v816_v57 = vshll.u32 %v677_v50, 16  ;;  %v822_v62 = vshll.u32 %v3216_v53, 16  ;;  %v832_v5 = vshll.u32 %v3219_v54, 16  ;;  %v2963_v38 = vld [vmem:[%s3118_s6 + $0x3c] sm:$0xff]   ;;  %v683_v50 = vld [vmem:[%s3118_s6 + $0x48] sm:$0xf] }
  0x37   : > { %v805_v51 = vor.u32 %v804_v43, %v800_v42  ;;  %v815_v1 = vrot.slane %v813_v55, 4  ;;  %v840_v27 = vshll.u32 %v680_v13, 16  ;;  %v850_v33 = vshrl.u32 %v3230_v14, 16 }
  0x38   : > { %2651 = vmatpush3.bf16.msra.mxu1 %v2948_v11  ;;  %v770_v11 = vrot.slane %v768_v63, 5  ;;  %v796_v59 = vrot.slane %v795_v49, 4  ;;  %v826_v63 = vshrl.u32 %v3216_v53, 16  ;;  %v1505_v16 = vrot.slane %v3172_v56, 5 }
  0x39   : > { %2699 = vmatpush3.bf16.msra.mxu0 %v3121_v12  ;;  %2652 = vmatprep.subr.bf16.mxu1 %v2950_v19  ;;  %v806_v0 = vrot.slane %v805_v51, 4  ;;  %v842_v39 = vrot.slane %v840_v27, 5  ;;  %v3256_v51 = vld [vmem:[%s3118_s6 + $0x50] sm:$0x1] }
  0x3a   : > { %2700 = vmatprep.subr.bf16.mxu0 %v3140_v25  ;;  %v771_v23 = vor.u32 %v770_v11, %v767_v9  ;;  %v801_v7 = vsel %vm3152_vm2, %v796_v59, %v800_v42  ;;  %v824_v9 = vrot.slane %v822_v62, 5  ;;  %v828_v11 = vrot.slane %v826_v63, 4  ;;  %v2964_v42 = vld [vmem:[%s3085_s4 + $0xa0] sm:$0xff]  }
  0x3b   : > { %v880_v63 = vshll.u32 %v3256_v51, 16 }
  0x3c   : > { %2653 = vmatpush3.bf16.msra.mxu1 %v2950_v19  ;;  %v780_v19 = vrot.slane %v778_v3, 4  ;;  %v772_v37 = vrot.slane %v771_v23, 4  ;;  %v818_v3 = vrot.slane %v816_v57, 5  ;;  %v2961_v23 = vld [vmem:[%s3085_s4 + $0x98] sm:$0xff]   ;;  %v829_v26 = vor.u32 %v828_v11, %v824_v9 }
  0x3d   : > { %2701 = vmatpush3.bf16.msra.mxu0 %v3140_v25  ;;  %2654 = vmatprep.subr.bf16.mxu1 %v2952_v35 }
  0x3e   : > { %2702 = vmatprep.subr.bf16.mxu0 %v3161_v41  ;;  %v781_v29 = vor.u32 %v780_v19, %v776_v18  ;;  %v777_v47 = vsel %vm3152_vm2, %v772_v37, %v776_v18  ;;  %v834_v18 = vrot.slane %v832_v5, 5  ;;  %v3236_v19 = vld [vmem:[%s3118_s6 + $0x44] sm:$0x1]  ;;  %v830_v37 = vrot.slane %v829_v26, 4 }
  0x3f   : > { %v856_v34 = vshll.u32 %v3236_v19, 16 }
  0x40   : > { %2655 = vmatpush3.bf16.msra.mxu1 %v2952_v35  ;;  %v3204_v35 = vrot.slane %v1498_v52, 4  ;;  %v782_v40 = vrot.slane %v781_v29, 4 }
  0x41   : > { %2703 = vmatpush3.bf16.msra.mxu0 %v3161_v41  ;;  %2784 = vmatprep.subr.bf16.mxu1 %v3090_v2 }
  0x42   : > { %2736 = vmatprep.subr.bf16.mxu0 %v2956_v60 }
  0x43   : > { %2657 = vmatmul.mubr.bf16.vlgmr.msra.gmra.mrb[0].mxu1 %v2955_v58 }
  0x44   : > { %2705 = vmatmul.mubr.bf16.vlgmr.msra.gmra.mrb[0].mxu0 %v2323_v22  ;;  %2792 = vmatpush3.bf16.msra.mxu1 %v3090_v2  ;;  %v787_v2 = vsel %vm3152_vm2, %v782_v40, %v786_v20  ;;  %v837_v20 = vshrl.u32 %v680_v13, 16 }
  0x45   : > { %2737 = vmatpush3.bf16.msra.mxu0 %v2956_v60  ;;  %2660 = vmatprep.mubr.bf16.mxu1 %v2958_v17  ;;  %v2324_v58 = vcombine.low %v777_v47, %v787_v2  ;;  %v2962_v60 = vld [vmem:[%s3118_s6 + $0x30] sm:$0xff]   ;;  %v811_v17 = vsel %vm3152_vm2, %v806_v0, %v810_v44  ;;  %v852_v44 = vrot.slane %v850_v33, 4  ;;  %v858_v47 = vrot.slane %v856_v34, 5  ;;  %v3253_v2 = vld [vmem:[%s3118_s6 + $0x4c] sm:$0xf] }
  0x46   : > { %2738 = vmatprep.subr.bf16.mxu0 %v2957_v28  ;;  %2785 = vmatprep.subr.bf16.mxu1 %v3095_v4  ;;  %v2325_v22 = vcombine.low %v801_v7, %v811_v17  ;;  %v839_v30 = vrot.slane %v837_v20, 4  ;;  %v874_v62 = vshrl.u32 %v3253_v2, 16  ;;  %v1501_v0 = vrot.slane %v3147_v32, 5  ;;  %v2968_v34 = vld [vmem:[%s3085_s4 + $0xb0] sm:$0xff]  }
  0x47   : > { %2708 = vmatprep.mubr.bf16.mxu0 %v2324_v58  ;;  %v864_v58 = vshll.u32 %v683_v50, 16  ;;  %v882_v17 = vrot.slane %v880_v63, 5  ;;  %v1423_v63 = vld [vmem:[%s3118_s6 + $0xc] sm:$0xe] }
  0x48   : > { %2793 = vmatpush3.bf16.msra.mxu1 %v3095_v4  ;;  %v819_v4 = vor.u32 %v818_v3, %v815_v1  ;;  %v843_v49 = vor.u32 %v842_v39, %v839_v30  ;;  %v876_v13 = vrot.slane %v874_v62, 4  ;;  %v2969_v62 = vld [vmem:[%s3085_s4 + $0xb8] sm:$0xff]  }
  0x49   : > { %2739 = vmatpush3.bf16.msra.mxu0 %v2957_v28  ;;  %2786 = vmatprep.subr.bf16.mxu1 %v3101_v6  ;;  %v846_v28 = vshll.u32 %v3230_v14, 16  ;;  %v866_v5 = vrot.slane %v864_v58, 5 }
  0x4a   : > { %2740 = vmatprep.subr.bf16.mxu0 %v2960_v45  ;;  %v820_v29 = vrot.slane %v819_v4, 4  ;;  %v844_v59 = vrot.slane %v843_v49, 4  ;;  %v3269_v4 = vld [vmem:[%s3118_s6 + $0x58] sm:$0xf] }
  0x4b   : > { %2661 = vmatmul.mubr.bf16.gmra.mrb[4].mxu1 %v2959_v48  ;;  %v848_v40 = vrot.slane %v846_v28, 5  ;;  %v835_v48 = vsel %vm3152_vm2, %v830_v37, %v834_v18  ;;  %v894_v30 = vshll.u32 %v3269_v4, 16  ;;  %v898_v33 = vshrl.u32 %v3269_v4, 16 }
  0x4c   : > { %2664 = vmatprep.mubr.bf16.mxu1 %v2962_v60  ;;  %2794 = vmatpush3.bf16.msra.mxu1 %v3101_v6  ;;  %v825_v43 = vsel %vm3152_vm2, %v820_v29, %v824_v9  ;;  %v2966_v6 = vld [vmem:[%s3118_s6 + $0x48] sm:$0xff]   ;;  %v870_v60 = vshll.u32 %v3253_v2, 16  ;;  %v2967_v29 = vld [vmem:[%s3118_s6 + $0x54] sm:$0xff]  }
  0x4d   : > { %2709 = vmatmul.mubr.bf16.gmra.mrb[4].mxu0 %v2325_v22  ;;  %2787 = vmatprep.subr.bf16.mxu1 %v3107_v8  ;;  %v2326_v55 = vcombine.low %v825_v43, %v835_v48  ;;  %v853_v57 = vor.u32 %v852_v44, %v848_v40  ;;  %v849_v7 = vsel %vm3152_vm2, %v844_v59, %v848_v40  ;;  %v2965_v9 = vld [vmem:[%s3085_s4 + $0xa8] sm:$0xff]   ;;  %v3274_v22 = vld [vmem:[%s3118_s6 + $0x5c] sm:$0x1]  ;;  %v896_v43 = vrot.slane %v894_v30, 5 }
  0x4e   : > { %2741 = vmatpush3.bf16.msra.mxu0 %v2960_v45  ;;  %v861_v45 = vshrl.u32 %v683_v50, 16  ;;  %v872_v11 = vrot.slane %v870_v60, 5  ;;  %v904_v40 = vshll.u32 %v3274_v22, 16  ;;  %v900_v44 = vrot.slane %v898_v33, 4  ;;  %v2970_v50 = vld [vmem:[%s3118_s6 + $0x60] sm:$0xff]  }
  0x4f   : > { %2742 = vmatprep.subr.bf16.mxu0 %v2961_v23  ;;  %2712 = vmatprep.mubr.bf16.mxu0 %v2326_v55  ;;  %v854_v1 = vrot.slane %v853_v57, 4  ;;  %v1422_v55 = vld [vmem:[%s3118_s6] sm:$0xe] }
  0x50   : > { %2795 = vmatpush3.bf16.msra.mxu1 %v3107_v8  ;;  %v863_v3 = vrot.slane %v861_v45, 4  ;;  %v686_v8 = vld [vmem:[%s3118_s6 + $0x54] sm:$0xf]  ;;  %v877_v28 = vor.u32 %v876_v13, %v872_v11  ;;  %v906_v49 = vrot.slane %v904_v40, 5  ;;  %v901_v45 = vor.u32 %v900_v44, %v896_v43  ;;  %v1428_v40 = vld [vmem:[%s3118_s6 + $0x48] sm:$0xe] }
  0x51   : > { %2788 = vmatprep.subr.bf16.mxu1 %v3114_v10  ;;  %v859_v18 = vsel %vm3152_vm2, %v854_v1, %v858_v47  ;;  %v888_v26 = vshll.u32 %v686_v8, 16  ;;  %v2346_v58 = vrot.slane %v1422_v55, 9  ;;  %v1533_v44 = vrot.slane %v3253_v2, 5 }
  0x52   : > { %2743 = vmatpush3.bf16.msra.mxu0 %v2961_v23  ;;  %v867_v20 = vor.u32 %v866_v5, %v863_v3  ;;  %v885_v23 = vshrl.u32 %v686_v8, 16  ;;  %v2327_v27 = vcombine.low %v849_v7, %v859_v18  ;;  %v902_v1 = vrot.slane %v901_v45, 4  ;;  %v1424_v8 = vld [vmem:[%s3118_s6 + $0x18] sm:$0xe] }
  0x53   : > { %2665 = vmatmul.mubr.bf16.gmra.mrb[8].mxu1 %v2963_v38  ;;  %2744 = vmatprep.subr.bf16.mxu0 %v2964_v42  ;;  %v890_v39 = vrot.slane %v888_v26, 5  ;;  %v2347_v5 = vrot.slane %v1423_v63, 9  ;;  %v1508_v18 = vrot.slane %v3178_v61, 5  ;;  %v1507_v26 = vrot.slane %v1505_v16, 4 }
  0x54   : > { %2668 = vmatprep.mubr.bf16.mxu1 %v2966_v6  ;;  %2796 = vmatpush3.bf16.msra.mxu1 %v3114_v10  ;;  %v868_v37 = vrot.slane %v867_v20, 4  ;;  %v887_v38 = vrot.slane %v885_v23, 4  ;;  %v878_v10 = vrot.slane %v877_v28, 4  ;;  %v1425_v20 = vld [vmem:[%s3118_s6 + $0x24] sm:$0xe]  ;;  %v1512_v23 = vrot.slane %v3191_v21, 5 }
  0x55   : > { %2789 = vmatprep.subr.bf16.mxu1 %v3121_v12  ;;  %2713 = vmatmul.mubr.bf16.gmra.mrb[8].mxu0 %v2327_v27  ;;  %v1499_v56 = vsel %vm3285_vm5, %v2347_v5, %v1498_v52  ;;  %v2349_v61 = vrot.slane %v1425_v20, 9  ;;  %v1426_v27 = vld [vmem:[%s3118_s6 + $0x30] sm:$0xe]  ;;  %v1519_v28 = vrot.slane %v3216_v53, 5  ;;  %v1509_v31 = vsel %vm3285_vm5, %v1507_v26, %v1508_v18 }
  0x56   : > { %2745 = vmatpush3.bf16.msra.mxu0 %v2964_v42  ;;  %v1491_v42 = vrot.slane %v3128_v15, 5  ;;  %v873_v6 = vsel %vm3152_vm2, %v868_v37, %v872_v11  ;;  %v891_v48 = vor.u32 %v890_v39, %v887_v38  ;;  %v883_v57 = vsel %vm3152_vm2, %v878_v10, %v882_v17  ;;  %v2971_v17 = vld [vmem:[%s3118_s6 + $0x6c] sm:$0xff]  }
  0x57   : > { %2746 = vmatprep.subr.bf16.mxu0 %v2965_v9  ;;  %v2328_v15 = vcombine.low %v873_v6, %v883_v57  ;;  %v2348_v11 = vrot.slane %v1424_v8, 9  ;;  %v1514_v21 = vrot.slane %v1512_v23, 4  ;;  %v2350_v52 = vrot.slane %v1426_v27, 9  ;;  %v689_v57 = vld [vmem:[%s3118_s6 + $0x60] sm:$0xf] }
  0x58   : > { %2797 = vmatpush3.bf16.msra.mxu1 %v3121_v12  ;;  %v1493_v59 = vrot.slane %v1491_v42, 4  ;;  %v892_v60 = vrot.slane %v891_v48, 4  ;;  %v1492_v12 = vsel %vm3285_vm5, %v2346_v58, %v1491_v42  ;;  %v3341_v33 = vsel %vm3285_vm5, %v2349_v61, %v1512_v23  ;;  %v694_v61 = vld [vmem:[%s3118_s6 + $0x74] sm:$0x1] }
  0x59   : > { %2790 = vmatprep.subr.bf16.mxu1 %v3140_v25  ;;  %2716 = vmatprep.mubr.bf16.mxu0 %v2328_v15  ;;  %v1521_v53 = vrot.slane %v1519_v28, 4  ;;  %v1526_v39 = vrot.slane %v3230_v14, 5  ;;  %v1536_v48 = vrot.slane %v3256_v51, 5  ;;  %v1535_v2 = vrot.slane %v1533_v44, 4  ;;  %v691_v15 = vld [vmem:[%s3118_s6 + $0x68] sm:$0x1] }
  0x5a   : > { %2747 = vmatpush3.bf16.msra.mxu0 %v2965_v9  ;;  %v1495_v3 = vsel %vm3285_vm5, %v1493_v59, %v1494_v46  ;;  %v897_v7 = vsel %vm3152_vm2, %v892_v60, %v896_v43  ;;  %v3314_v9 = vsel %vm3285_vm5, %v3204_v35, %v1501_v0  ;;  %v907_v46 = vsel %vm3152_vm2, %v902_v1, %v906_v49  ;;  %v2972_v35 = vld [vmem:[%s3118_s6 + $0x78] sm:$0xff]   ;;  %v1429_v49 = vld [vmem:[%s3118_s6 + $0x54] sm:$0xe]  ;;  %v690_v59 = vld [vmem:[%s3118_s6 + $0x64] sm:$0xf] }
  0x5b   : > { %2669 = vmatmul.mubr.bf16.gmra.mrb[12].mxu1 %v2967_v29  ;;  %2748 = vmatprep.subr.bf16.mxu0 %v2968_v34  ;;  %v2378_v13 = vcombine.low %v1492_v12, %v1495_v3  ;;  %v2329_v32 = vcombine.low %v897_v7, %v907_v46  ;;  %v1506_v0 = vsel %vm3285_vm5, %v2348_v11, %v1505_v16  ;;  %v1522_v29 = vrot.slane %v3219_v54, 5  ;;  %v1430_v3 = vld [vmem:[%s3118_s6 + $0x60] sm:$0xe]  ;;  %v692_v11 = vld [vmem:[%s3118_s6 + $0x6c] sm:$0xf] }
  0x5c   : > { %2672 = vmatprep.mubr.bf16.mxu1 %v2970_v50  ;;  %2798 = vmatpush3.bf16.msra.mxu1 %v3140_v25  ;;  %v1515_v25 = vrot.slane %v3196_v24, 5  ;;  %v2379_v30 = vcombine.low %v1499_v56, %v3314_v9  ;;  %v2380_v37 = vcombine.low %v1506_v0, %v1509_v31  ;;  %v3351_v54 = vsel %vm3285_vm5, %v2350_v52, %v1519_v28  ;;  %v693_v56 = vld [vmem:[%s3118_s6 + $0x70] sm:$0xf] }
  0x5d   : > { %2791 = vmatprep.subr.bf16.mxu1 %v3161_v41  ;;  %2717 = vmatmul.mubr.bf16.gmra.mrb[12].mxu0 %v2329_v32  ;;  %v3357_v10 = vsel %vm3285_vm5, %v1521_v53, %v1522_v29  ;;  %v1529_v43 = vrot.slane %v3236_v19, 5  ;;  %v1528_v6 = vrot.slane %v1526_v39, 4  ;;  %v2353_v50 = vrot.slane %v1429_v49, 9 }
  0x5e   : > { %2749 = vmatpush3.bf16.msra.mxu0 %v2968_v34  ;;  %2752 = vmatprep.mubr.bf16.mxu0 %v2378_v13  ;;  %v3345_v24 = vsel %vm3285_vm5, %v1514_v21, %v1515_v25  ;;  %v1427_v34 = vld [vmem:[%s3118_s6 + $0x3c] sm:$0xe]  ;;  %v1540_v55 = vrot.slane %v3269_v4, 5  ;;  %v2382_v45 = vcombine.low %v3351_v54, %v3357_v10  ;;  %v1543_v51 = vrot.slane %v3274_v22, 5  ;;  %v2974_v22 = vld [vmem:[%s3118_s6 + $0x90] sm:$0xff]  }
  0x5f   : > { %2750 = vmatprep.subr.bf16.mxu0 %v2969_v62  ;;  %v2351_v38 = vrot.slane %v1427_v34, 9  ;;  %v2381_v42 = vcombine.low %v3341_v33, %v3345_v24  ;;  %v3379_v58 = vsel %vm3285_vm5, %v1528_v6, %v1529_v43  ;;  %v909_v60 = vshrl.u32 %v689_v57, 16  ;;  %v1431_v34 = vld [vmem:[%s3118_s6 + $0x6c] sm:$0xe]  ;;  %v695_v6 = vld [vmem:[%s3118_s6 + $0x78] sm:$0xf] }
  0x60   : > { %2799 = vmatpush3.bf16.msra.mxu1 %v3161_v41  ;;  %v2352_v41 = vrot.slane %v1428_v40, 9  ;;  %v3389_v4 = vsel %vm3285_vm5, %v1535_v2, %v1536_v48  ;;  %v3393_v1 = vsel %vm3285_vm5, %v2353_v50, %v1540_v55  ;;  %v1542_v12 = vrot.slane %v1540_v55, 4  ;;  %v2975_v40 = vld [vmem:[%s3118_s6 + $0x9c] sm:$0xff]   ;;  %v2976_v48 = vld [vmem:[%s3118_s6 + $0xa8] sm:$0xff]  }
  0x61   : > { %v3365_v14 = vsel %vm3285_vm5, %v2351_v38, %v1526_v39  ;;  %v911_v8 = vrot.slane %v909_v60, 4  ;;  %v912_v7 = vshll.u32 %v689_v57, 16  ;;  %v918_v9 = vshll.u32 %v690_v59, 16  ;;  %v696_v57 = vld [vmem:[%s3118_s6 + $0x7c] sm:$0xf] }
  0x62   : > { %2751 = vmatpush3.bf16.msra.mxu0 %v2969_v62  ;;  %v3371_v19 = vsel %vm3285_vm5, %v2352_v41, %v1533_v44  ;;  %v2973_v62 = vld [vmem:[%s3118_s6 + $0x84] sm:$0xff]   ;;  %v2383_v63 = vcombine.low %v3365_v14, %v3379_v58  ;;  %v3402_v16 = vsel %vm3285_vm5, %v1542_v12, %v1543_v51  ;;  %v922_v46 = vshrl.u32 %v690_v59, 16  ;;  %v697_v33 = vld [vmem:[%s3118_s6 + $0x80] sm:$0x1] }
  0x63   : > { %2673 = vmatmul.mubr.bf16.gmra.mrb[16].mxu1 %v2971_v17  ;;  %v2384_v5 = vcombine.low %v3371_v19, %v3389_v4  ;;  %v928_v13 = vshll.u32 %v691_v15, 16  ;;  %v2354_v17 = vrot.slane %v1430_v3, 9  ;;  %v2385_v18 = vcombine.low %v3393_v1, %v3402_v16 }
  0x64   : > { %2676 = vmatprep.mubr.bf16.mxu1 %v2972_v35  ;;  %v914_v20 = vrot.slane %v912_v7, 5  ;;  %v920_v23 = vrot.slane %v918_v9, 5  ;;  %v1547_v32 = vrot.slane %v690_v59, 5  ;;  %v924_v35 = vrot.slane %v922_v46, 4 }
  0x65   : > { %2753 = vmatmul.mubr.bf16.vlgmr.msra.gmra.mrb[0].mxu0 %v2379_v30  ;;  %v930_v0 = vrot.slane %v928_v13, 5  ;;  %v1550_v26 = vrot.slane %v691_v15, 5  ;;  %v933_v21 = vshrl.u32 %v692_v11, 16  ;;  %v936_v31 = vshll.u32 %v692_v11, 16  ;;  %v1432_v13 = vld [vmem:[%s3118_s6 + $0x78] sm:$0xe] }
  0x66   : > { %2756 = vmatprep.mubr.bf16.mxu0 %v2380_v37  ;;  %v915_v25 = vor.u32 %v914_v20, %v911_v8  ;;  %v3410_v27 = vsel %vm3285_vm5, %v2354_v17, %v1547_v32  ;;  %v1549_v28 = vrot.slane %v1547_v32, 4  ;;  %v925_v52 = vor.u32 %v924_v35, %v920_v23 }
  0x67   : > { %v935_v29 = vrot.slane %v933_v21, 4  ;;  %v942_v30 = vshll.u32 %v693_v56, 16  ;;  %v946_v53 = vshrl.u32 %v693_v56, 16  ;;  %v938_v38 = vrot.slane %v936_v31, 5  ;;  %v699_v21 = vld [vmem:[%s3118_s6 + $0x88] sm:$0xf] }
  0x68   : > { %v916_v37 = vrot.slane %v915_v25, 4  ;;  %v3415_v54 = vsel %vm3285_vm5, %v1549_v28, %v1550_v26  ;;  %v952_v39 = vshll.u32 %v694_v61, 16  ;;  %v926_v10 = vrot.slane %v925_v52, 4  ;;  %v2977_v25 = vld [vmem:[%s3118_s6 + $0xb4] sm:$0xff]  }
  0x69   : > { %v2386_v43 = vcombine.low %v3410_v27, %v3415_v54  ;;  %v944_v41 = vrot.slane %v942_v30, 5  ;;  %v948_v44 = vrot.slane %v946_v53, 4  ;;  %v939_v2 = vor.u32 %v938_v38, %v935_v29 }
  0x6a   : > { %v921_v49 = vsel %vm3152_vm2, %v916_v37, %v920_v23  ;;  %v954_v50 = vrot.slane %v952_v39, 5  ;;  %v2355_v55 = vrot.slane %v1431_v34, 9  ;;  %v931_v51 = vsel %vm3152_vm2, %v926_v10, %v930_v0  ;;  %v700_v34 = vld [vmem:[%s3118_s6 + $0x8c] sm:$0x1] }
  0x6b   : > { %2677 = vmatmul.mubr.bf16.gmra.mrb[20].mxu1 %v2973_v62  ;;  %v949_v59 = vor.u32 %v948_v44, %v944_v41  ;;  %v1554_v15 = vrot.slane %v693_v56, 5  ;;  %v1557_v60 = vrot.slane %v694_v61, 5  ;;  %v2330_v62 = vcombine.low %v921_v49, %v931_v51  ;;  %v698_v56 = vld [vmem:[%s3118_s6 + $0x84] sm:$0xf]  ;;  %v701_v49 = vld [vmem:[%s3118_s6 + $0x90] sm:$0xf] }
  0x6c   : > { %2680 = vmatprep.mubr.bf16.mxu1 %v2974_v22  ;;  %v940_v12 = vrot.slane %v939_v2, 4  ;;  %v957_v24 = vshrl.u32 %v695_v6, 16  ;;  %v966_v8 = vshll.u32 %v696_v57, 16  ;;  %v970_v46 = vshrl.u32 %v696_v57, 16  ;;  %v1433_v44 = vld [vmem:[%s3118_s6 + $0x84] sm:$0xe] }
  0x6d   : > { %2757 = vmatmul.mubr.bf16.gmra.mrb[4].mxu0 %v2381_v42  ;;  %v960_v42 = vshll.u32 %v695_v6, 16  ;;  %v950_v3 = vrot.slane %v949_v59, 4  ;;  %v3433_v22 = vsel %vm3285_vm5, %v2355_v55, %v1554_v15  ;;  %v976_v32 = vshll.u32 %v697_v33, 16  ;;  %v702_v51 = vld [vmem:[%s3118_s6 + $0x94] sm:$0xf] }
  0x6e   : > { %2760 = vmatprep.mubr.bf16.mxu0 %v2382_v45  ;;  %v1556_v45 = vrot.slane %v1554_v15, 4  ;;  %v945_v7 = vsel %vm3152_vm2, %v940_v12, %v944_v41  ;;  %v959_v9 = vrot.slane %v957_v24, 4  ;;  %v968_v23 = vrot.slane %v966_v8, 5 }
  0x6f   : > { %v962_v11 = vrot.slane %v960_v42, 5  ;;  %v955_v17 = vsel %vm3152_vm2, %v950_v3, %v954_v50  ;;  %v972_v61 = vrot.slane %v970_v46, 4  ;;  %v978_v28 = vrot.slane %v976_v32, 5  ;;  %v703_v42 = vld [vmem:[%s3118_s6 + $0x98] sm:$0x1] }
  0x70   : > { %v3442_v20 = vsel %vm3285_vm5, %v1556_v45, %v1557_v60  ;;  %v3445_v35 = vcombine.low %v945_v7, %v955_v17  ;;  %v2356_v31 = vrot.slane %v1432_v13, 9  ;;  %v1561_v52 = vrot.slane %v696_v57, 5 }
  0x71   : > { %v2387_v0 = vcombine.low %v3433_v22, %v3442_v20  ;;  %v963_v26 = vor.u32 %v962_v11, %v959_v9  ;;  %v1564_v29 = vrot.slane %v697_v33, 5  ;;  %v973_v53 = vor.u32 %v972_v61, %v968_v23  ;;  %v709_v22 = vld [vmem:[%s3118_s6 + $0xb0] sm:$0x1] }
  0x72   : > { %v981_v37 = vshrl.u32 %v698_v56, 16  ;;  %v984_v38 = vshll.u32 %v698_v56, 16  ;;  %v3460_v39 = vsel %vm3285_vm5, %v2356_v31, %v1561_v52  ;;  %v990_v10 = vshll.u32 %v699_v21, 16 }
  0x73   : > { %2681 = vmatmul.mubr.bf16.gmra.mrb[24].mxu1 %v2975_v40  ;;  %v964_v30 = vrot.slane %v963_v26, 4  ;;  %v1563_v40 = vrot.slane %v1561_v52, 4  ;;  %v994_v41 = vshrl.u32 %v699_v21, 16  ;;  %v974_v58 = vrot.slane %v973_v53, 4 }
  0x74   : > { %2684 = vmatprep.mubr.bf16.mxu1 %v2976_v48  ;;  %v986_v6 = vrot.slane %v984_v38, 5  ;;  %v992_v4 = vrot.slane %v990_v10, 5  ;;  %v1000_v48 = vshll.u32 %v700_v34, 16  ;;  %v2357_v57 = vrot.slane %v1433_v44, 9 }
  0x75   : > { %2761 = vmatmul.mubr.bf16.gmra.mrb[8].mxu0 %v2383_v63  ;;  %v969_v14 = vsel %vm3152_vm2, %v964_v30, %v968_v23  ;;  %v983_v63 = vrot.slane %v981_v37, 4  ;;  %v3467_v19 = vsel %vm3285_vm5, %v1563_v40, %v1564_v29  ;;  %v979_v2 = vsel %vm3152_vm2, %v974_v58, %v978_v28  ;;  %v1434_v23 = vld [vmem:[%s3118_s6 + $0x90] sm:$0xe]  ;;  %v705_v28 = vld [vmem:[%s3118_s6 + $0xa0] sm:$0xf] }
  0x76   : > { %2764 = vmatprep.mubr.bf16.mxu0 %v2384_v5  ;;  %v996_v5 = vrot.slane %v994_v41, 4  ;;  %v2388_v50 = vcombine.low %v3460_v39, %v3467_v19  ;;  %v2332_v59 = vcombine.low %v969_v14, %v979_v2  ;;  %v1002_v60 = vrot.slane %v1000_v48, 5  ;;  %v706_v30 = vld [vmem:[%s3118_s6 + $0xa4] sm:$0x1]  ;;  %v1435_v41 = vld [vmem:[%s3118_s6 + $0x9c] sm:$0xe] }
  0x77   : > { %v987_v55 = vor.u32 %v986_v6, %v983_v63  ;;  %v1568_v12 = vrot.slane %v699_v21, 5  ;;  %v1571_v24 = vrot.slane %v700_v34, 5  ;;  %v1005_v3 = vshrl.u32 %v701_v49, 16  ;;  %v707_v48 = vld [vmem:[%s3118_s6 + $0xa8] sm:$0xf] }
  0x78   : > { %v997_v15 = vor.u32 %v996_v5, %v992_v4  ;;  %v1008_v45 = vshll.u32 %v701_v49, 16  ;;  %v1014_v9 = vshll.u32 %v702_v51, 16  ;;  %v1018_v17 = vshrl.u32 %v702_v51, 16 }
  0x79   : > { %v988_v33 = vrot.slane %v987_v55, 4  ;;  %v3478_v8 = vsel %vm3285_vm5, %v2357_v57, %v1568_v12  ;;  %v1570_v7 = vrot.slane %v1568_v12, 4  ;;  %v1007_v46 = vrot.slane %v1005_v3, 4 }
  0x7a   : > { %v1010_v13 = vrot.slane %v1008_v45, 5  ;;  %v1016_v1 = vrot.slane %v1014_v9, 5  ;;  %v1024_v16 = vshll.u32 %v703_v42, 16  ;;  %v2358_v54 = vrot.slane %v1434_v23, 9  ;;  %v1436_v9 = vld [vmem:[%s3118_s6 + $0xa8] sm:$0xe] }
  0x7b   : > { %2685 = vmatmul.mubr.bf16.gmra.mrb[28].mxu1 %v2977_v25  ;;  %v993_v11 = vsel %vm3152_vm2, %v988_v33, %v992_v4  ;;  %v3493_v56 = vsel %vm3285_vm5, %v1570_v7, %v1571_v24  ;;  %v1020_v25 = vrot.slane %v1018_v17, 4  ;;  %v1578_v31 = vrot.slane %v703_v42, 5  ;;  %v710_v23 = vld [vmem:[%s3118_s6 + $0xb4] sm:$0xf] }
  0x7c   : > { %2720 = vmatprep.mubr.bf16.mxu1 %v2330_v62  ;;  %v998_v62 = vrot.slane %v997_v15, 4  ;;  %v2389_v61 = vcombine.low %v3478_v8, %v3493_v56  ;;  %v1011_v21 = vor.u32 %v1010_v13, %v1007_v46  ;;  %v1026_v27 = vrot.slane %v1024_v16, 5 }
  0x7d   : > { %2765 = vmatmul.mubr.bf16.gmra.mrb[12].mxu0 %v2385_v18  ;;  %v704_v18 = vld [vmem:[%s3118_s6 + $0x9c] sm:$0xf]  ;;  %v1021_v29 = vor.u32 %v1020_v25, %v1016_v1  ;;  %v1038_v40 = vshll.u32 %v705_v28, 16  ;;  %v1042_v10 = vshrl.u32 %v705_v28, 16  ;;  %v1048_v5 = vshll.u32 %v706_v30, 16 }
  0x7e   : > { %2768 = vmatprep.mubr.bf16.mxu0 %v2386_v43  ;;  %v1003_v32 = vsel %vm3152_vm2, %v998_v62, %v1002_v60  ;;  %v1575_v43 = vrot.slane %v702_v51, 5  ;;  %v1012_v52 = vrot.slane %v1011_v21, 4  ;;  %v1029_v53 = vshrl.u32 %v704_v18, 16  ;;  %v708_v51 = vld [vmem:[%s3118_s6 + $0xac] sm:$0xf] }
  0x7f   : > { %v2333_v26 = vcombine.low %v993_v11, %v1003_v32  ;;  %v1032_v34 = vshll.u32 %v704_v18, 16  ;;  %v1022_v44 = vrot.slane %v1021_v29, 4  ;;  %v1040_v6 = vrot.slane %v1038_v40, 5 }
  0x80   : > { %v1576_v37 = vsel %vm3285_vm5, %v2358_v54, %v1575_v43  ;;  %v1577_v38 = vrot.slane %v1575_v43, 4  ;;  %v1031_v14 = vrot.slane %v1029_v53, 4  ;;  %v1044_v4 = vrot.slane %v1042_v10, 4 }
  0x81   : > { %v1034_v58 = vrot.slane %v1032_v34, 5  ;;  %v1027_v49 = vsel %vm3152_vm2, %v1022_v44, %v1026_v27  ;;  %v2359_v57 = vrot.slane %v1435_v41, 9  ;;  %v1050_v60 = vrot.slane %v1048_v5, 5 }
  0x82   : > { %v1579_v63 = vsel %vm3285_vm5, %v1577_v38, %v1578_v31  ;;  %v1045_v15 = vor.u32 %v1044_v4, %v1040_v6  ;;  %v1582_v12 = vrot.slane %v705_v28, 5  ;;  %v1585_v24 = vrot.slane %v706_v30, 5  ;;  %v712_v31 = vld [vmem:[%s3118_s6 + $0xbc] sm:$0x1]  ;;  %v1437_v38 = vld [vmem:[%s3118_s6 + $0xb4] sm:$0xe] }
  0x83   : > { %2721 = vmatmul.mubr.bf16.vlgmr.msra.gmra.mrb[16].mxu1 %v3445_v35  ;;  %v1017_v35 = vsel %vm3152_vm2, %v1012_v52, %v1016_v1  ;;  %v2390_v2 = vcombine.low %v1576_v37, %v1579_v63  ;;  %v1035_v55 = vor.u32 %v1034_v58, %v1031_v14  ;;  %v1053_v20 = vshrl.u32 %v707_v48, 16 }
  0x84   : > { %2724 = vmatprep.mubr.bf16.mxu1 %v2332_v59  ;;  %v2334_v59 = vcombine.low %v1017_v35, %v1027_v49  ;;  %v1046_v42 = vrot.slane %v1045_v15, 4  ;;  %v1583_v3 = vsel %vm3285_vm5, %v2359_v57, %v1582_v12  ;;  %v1584_v45 = vrot.slane %v1582_v12, 4 }
  0x85   : > { %2769 = vmatmul.mubr.bf16.gmra.mrb[16].mxu0 %v2387_v0  ;;  %v1036_v33 = vrot.slane %v1035_v55, 4  ;;  %v1056_v0 = vshll.u32 %v707_v48, 16  ;;  %v1062_v62 = vshll.u32 %v708_v51, 16  ;;  %v1055_v19 = vrot.slane %v1053_v20, 4 }
  0x86   : > { %2772 = vmatprep.mubr.bf16.mxu0 %v2388_v50  ;;  %v1066_v7 = vshrl.u32 %v708_v51, 16  ;;  %v1051_v11 = vsel %vm3152_vm2, %v1046_v42, %v1050_v60  ;;  %v1586_v46 = vsel %vm3285_vm5, %v1584_v45, %v1585_v24  ;;  %v1072_v17 = vshll.u32 %v709_v22, 16 }
  0x87   : > { %v1041_v39 = vsel %vm3152_vm2, %v1036_v33, %v1040_v6  ;;  %v1058_v50 = vrot.slane %v1056_v0, 5  ;;  %v1064_v13 = vrot.slane %v1062_v62, 5  ;;  %v2391_v1 = vcombine.low %v1583_v3, %v1586_v46 }
  0x88   : > { %v2335_v32 = vcombine.low %v1041_v39, %v1051_v11  ;;  %v1068_v18 = vrot.slane %v1066_v7, 4  ;;  %v1074_v21 = vrot.slane %v1072_v17, 5  ;;  %v2360_v25 = vrot.slane %v1436_v9, 9  ;;  %v245_v17 = vld [vmem:[#allocation2] sm:$0xff] }
  0x89   : > { %v1059_v16 = vor.u32 %v1058_v50, %v1055_v19  ;;  %v1589_v28 = vrot.slane %v708_v51, 5  ;;  %v1592_v27 = vrot.slane %v709_v22, 5  ;;  %v1077_v52 = vshrl.u32 %v710_v23, 16 }
  0x8a   : > { %v1069_v43 = vor.u32 %v1068_v18, %v1064_v13  ;;  %v1080_v29 = vshll.u32 %v710_v23, 16  ;;  %v1096_v44 = vshll.u32 %v712_v31, 16  ;;  %v2361_v6 = vrot.slane %v1437_v38, 9  ;;  %v248_v23 = vld [vmem:[#allocation2 + $0x18] sm:$0xff] }
  0x8b   : > { %2725 = vmatmul.mubr.bf16.gmra.mrb[20].mxu1 %v2333_v26  ;;  %v711_v26 = vld [vmem:[%s3118_s6 + $0xb8] sm:$0xf]  ;;  %v1060_v54 = vrot.slane %v1059_v16, 4  ;;  %v1590_v30 = vsel %vm3285_vm5, %v2360_v25, %v1589_v28  ;;  %v1591_v53 = vrot.slane %v1589_v28, 4  ;;  %v1079_v41 = vrot.slane %v1077_v52, 4  ;;  %v251_v52 = vld [vmem:[#allocation2 + $0x30] sm:$0xff] }
  0x8c   : > { %2728 = vmatprep.mubr.bf16.mxu1 %v2334_v59  ;;  %v1086_v34 = vshll.u32 %v711_v26, 16  ;;  %v1090_v37 = vshrl.u32 %v711_v26, 16  ;;  %v1070_v10 = vrot.slane %v1069_v43, 4  ;;  %v1082_v8 = vrot.slane %v1080_v29, 5 }
  0x8d   : > { %2773 = vmatmul.mubr.bf16.gmra.mrb[20].mxu0 %v2389_v61  ;;  %v1065_v40 = vsel %vm3152_vm2, %v1060_v54, %v1064_v13  ;;  %v1593_v56 = vsel %vm3285_vm5, %v1591_v53, %v1592_v27  ;;  %v1098_v48 = vrot.slane %v1096_v44, 5  ;;  %v1596_v49 = vrot.slane %v711_v26, 5  ;;  %v247_v13 = vld [vmem:[#allocation2 + $0x10] sm:$0xff]  ;;  %v252_v53 = vld [vmem:[#allocation2 + $0x38] sm:$0xff] }
  0x8e   : > { %2776 = vmatprep.mubr.bf16.mxu0 %v2390_v2  ;;  %v1088_v61 = vrot.slane %v1086_v34, 5  ;;  %v1092_v35 = vrot.slane %v1090_v37, 4  ;;  %v1075_v14 = vsel %vm3152_vm2, %v1070_v10, %v1074_v21  ;;  %v2392_v58 = vcombine.low %v1590_v30, %v1593_v56  ;;  %v249_v30 = vld [vmem:[#allocation2 + $0x20] sm:$0xff]  ;;  %v250_v37 = vld [vmem:[#allocation2 + $0x28] sm:$0xff] }
  0x8f   : > { %v1083_v63 = vor.u32 %v1082_v8, %v1079_v41  ;;  %v2336_v4 = vcombine.low %v1065_v40, %v1075_v14  ;;  %v1599_v55 = vrot.slane %v712_v31, 5  ;;  %v1598_v51 = vrot.slane %v1596_v49, 4 }
  0x90   : > { %v1093_v5 = vor.u32 %v1092_v35, %v1088_v61  ;;  %v1597_v60 = vsel %vm3285_vm5, %v2361_v6, %v1596_v49  ;;  %v253_v6 = vld [vmem:[#allocation2 + $0x40] sm:$0xff] }
  0x91   : > { %v1084_v2 = vrot.slane %v1083_v63, 4  ;;  %v1600_v12 = vsel %vm3285_vm5, %v1598_v51, %v1599_v55 }
  0x92   : > { %v1094_v57 = vrot.slane %v1093_v5, 4  ;;  %v2393_v24 = vcombine.low %v1597_v60, %v1600_v12 }
  0x93   : > { %2729 = vmatmul.mubr.bf16.gmra.mrb[24].mxu1 %v2335_v32  ;;  %v1089_v59 = vsel %vm3152_vm2, %v1084_v2, %v1088_v61 }
  0x94   : > { %2732 = vmatprep.mubr.bf16.mxu1 %v2336_v4  ;;  %v1099_v15 = vsel %vm3152_vm2, %v1094_v57, %v1098_v48  ;;  %v256_v4 = vld [vmem:[#allocation2 + $0x58] sm:$0xff]  ;;  %v254_v48 = vld [vmem:[#allocation2 + $0x48] sm:$0xff] }
  0x95   : > { %2777 = vmatmul.mubr.bf16.gmra.mrb[24].mxu0 %v2391_v1  ;;  %v2337_v33 = vcombine.low %v1089_v59, %v1099_v15  ;;  %v246_v1 = vld [vmem:[#allocation2 + $0x8] sm:$0xff] }
  0x96   : > { %2780 = vmatprep.mubr.bf16.mxu0 %v2392_v58  ;;  %v255_v58 = vld [vmem:[#allocation2 + $0x50] sm:$0xff] }
  0x9b   : > { %2733 = vmatmul.mubr.bf16.gmra.mrb[28].mxu1 %v2337_v33 }
  0x9d   : > { %2781 = vmatmul.mubr.bf16.gmra.mrb[28].mxu0 %v2393_v24  ;;  %v259_v24 = vld [vmem:[#allocation2 + $0x70] sm:$0xff] }
 0x116   : > { %v2658_v22 = vpop.f32.mrb[0].mxu1 }
 0x117   : > { %v506_v20 = vpop.f32.mrb[1].mxu1  ;;  %v635_v32 = vadd.f32 %v2658_v22, %v247_v13 }
 0x118   : > { %v2659_v0 = vpop.f32.mrb[2].mxu1  ;;  %v633_v16 = vadd.f32 %v506_v20, %v245_v17  ;;  %v257_v20 = vld [vmem:[#allocation2 + $0x60] sm:$0xff]  ;;  %v263_v17 = vld [vmem:[#allocation2 + $0x90] sm:$0xff] }
 0x119   : > { %v509_v42 = vpop.f32.mrb[3].mxu1  ;;  %v636_v26 = vadd.f32 %v2659_v0, %v248_v23  ;;  %v260_v0 = vld [vmem:[#allocation2 + $0x78] sm:$0xff] }
 0x11a   : > { %v634_v28 = vadd.f32 %v509_v42, %v246_v1 }
 0x11e   : > { %v2662_v3 = vpop.f32.mrb[4].mxu1 }
 0x11f   : > { %v522_v45 = vpop.f32.mrb[5].mxu1  ;;  %v639_v34 = vadd.f32 %v2662_v3, %v251_v52  ;;  %v258_v3 = vld [vmem:[#allocation2 + $0x68] sm:$0xff] }
 0x120   : > { %v2663_v62 = vpop.f32.mrb[6].mxu1  ;;  %v637_v38 = vadd.f32 %v522_v45, %v249_v30  ;;  %v267_v30 = vld [vmem:[#allocation2 + $0xb0] sm:$0xff] }
 0x121   : > { %v525_v39 = vpop.f32.mrb[7].mxu1  ;;  %v640_v10 = vadd.f32 %v2663_v62, %v252_v53 }
 0x122   : > { %v638_v56 = vadd.f32 %v525_v39, %v250_v37 }
 0x126   : > { %v2666_v36 = vpop.f32.mrb[8].mxu1 }
 0x127   : > { %v538_v19 = vpop.f32.mrb[9].mxu1  ;;  %v643_v5 = vadd.f32 %v2666_v36, %v255_v58 }
 0x128   : > { %v2667_v50 = vpop.f32.mrb[10].mxu1  ;;  %v641_v49 = vadd.f32 %v538_v19, %v253_v6 }
 0x129   : > { %v541_v7 = vpop.f32.mrb[11].mxu1  ;;  %v644_v55 = vadd.f32 %v2667_v50, %v256_v4 }
 0x12a   : > { %v642_v59 = vadd.f32 %v541_v7, %v254_v48 }
 0x12e   : > { %v3551_v9 = vpop.f32.mrb[12].mxu1 }
 0x12f   : > { %v3553_v47 = vpop.f32.mrb[13].mxu1  ;;  %v647_v42 = vadd.f32 %v3551_v9, %v259_v24  ;;  %v270_v24 = vld [vmem:[#allocation2 + $0xc8] sm:$0xff] }
 0x130   : > { %v3555_v11 = vpop.f32.mrb[14].mxu1  ;;  %v645_v45 = vadd.f32 %v3553_v47, %v257_v20 }
 0x131   : > { %v3557_v46 = vpop.f32.mrb[15].mxu1  ;;  %v648_v39 = vadd.f32 %v3555_v11, %v260_v0  ;;  %v262_v11 = vld [vmem:[#allocation2 + $0x88] sm:$0xff] }
 0x132   : > { %v646_v50 = vadd.f32 %v3557_v46, %v258_v3 }
 0x138   : > { %v2754_v18 = vpop.f32.mrb[0].mxu0 }
 0x139   : > { %v2801_v21 = vadd.f32 %v2754_v18, %v635_v32  ;;  %v1764_v25 = vpop.f32.mrb[1].mxu0 }
 0x13a   : > { %v2803_v27 = vadd.f32 %v1764_v25, %v633_v16  ;;  %v2755_v54 = vpop.f32.mrb[2].mxu0  ;;  %v261_v16 = vld [vmem:[#allocation2 + $0x80] sm:$0xff] }
 0x13b   : > { %1925 = vst [vmem:[#allocation2 + $0x10] sm:$0xff] %v2801_v21  ;;  %v2805_v43 = vadd.f32 %v2755_v54, %v636_v26  ;;  %v1767_v31 = vpop.f32.mrb[3].mxu0  ;;  %v264_v26 = vld [vmem:[#allocation2 + $0x98] sm:$0xff] }
 0x13c   : > { %1923 = vst [vmem:[#allocation2] sm:$0xff] %v2803_v27  ;;  %v2807_v29 = vadd.f32 %v1767_v31, %v634_v28 }
 0x13d   : > { %1926 = vst [vmem:[#allocation2 + $0x18] sm:$0xff] %v2805_v43 }
 0x13e   : > { %1924 = vst [vmem:[#allocation2 + $0x8] sm:$0xff] %v2807_v29 }
 0x140   : > { %v2758_v40 = vpop.f32.mrb[4].mxu0 }
 0x141   : > { %v2809_v41 = vadd.f32 %v2758_v40, %v639_v34  ;;  %v1780_v8 = vpop.f32.mrb[5].mxu0 }
 0x142   : > { %v2811_v61 = vadd.f32 %v1780_v8, %v637_v38  ;;  %v2759_v35 = vpop.f32.mrb[6].mxu0  ;;  %v265_v38 = vld [vmem:[#allocation2 + $0xa0] sm:$0xff] }
 0x143   : > { %1929 = vst [vmem:[#allocation2 + $0x30] sm:$0xff] %v2809_v41  ;;  %v2813_v44 = vadd.f32 %v2759_v35, %v640_v10  ;;  %v1783_v14 = vpop.f32.mrb[7].mxu0  ;;  %v268_v41 = vld [vmem:[#allocation2 + $0xb8] sm:$0xff] }
 0x144   : > { %1927 = vst [vmem:[#allocation2 + $0x20] sm:$0xff] %v2811_v61  ;;  %v2815_v63 = vadd.f32 %v1783_v14, %v638_v56  ;;  %v266_v61 = vld [vmem:[#allocation2 + $0xa8] sm:$0xff] }
 0x145   : > { %1930 = vst [vmem:[#allocation2 + $0x38] sm:$0xff] %v2813_v44 }
 0x146   : > { %1928 = vst [vmem:[#allocation2 + $0x28] sm:$0xff] %v2815_v63 }
 0x148   : > { %v2762_v2 = vpop.f32.mrb[8].mxu0 }
 0x149   : > { %v2817_v57 = vadd.f32 %v2762_v2, %v643_v5  ;;  %v1796_v51 = vpop.f32.mrb[9].mxu0 }
 0x14a   : > { %v2819_v15 = vadd.f32 %v1796_v51, %v641_v49  ;;  %v2763_v60 = vpop.f32.mrb[10].mxu0  ;;  %v271_v49 = vld [vmem:[#allocation2 + $0xd0] sm:$0xff]  ;;  %v269_v51 = vld [vmem:[#allocation2 + $0xc0] sm:$0xff] }
 0x14b   : > { %1933 = vst [vmem:[#allocation2 + $0x50] sm:$0xff] %v2817_v57  ;;  %v2821_v12 = vadd.f32 %v2763_v60, %v644_v55  ;;  %v1799_v33 = vpop.f32.mrb[11].mxu0  ;;  %v272_v60 = vld [vmem:[#allocation2 + $0xd8] sm:$0xff] }
 0x14c   : > { %1931 = vst [vmem:[#allocation2 + $0x40] sm:$0xff] %v2819_v15  ;;  %v2823_v22 = vadd.f32 %v1799_v33, %v642_v59 }
 0x14d   : > { %1934 = vst [vmem:[#allocation2 + $0x58] sm:$0xff] %v2821_v12 }
 0x14e   : > { %1932 = vst [vmem:[#allocation2 + $0x48] sm:$0xff] %v2823_v22 }
 0x150   : > { %v2766_v62 = vpop.f32.mrb[12].mxu0 }
 0x151   : > { %v2825_v36 = vadd.f32 %v2766_v62, %v647_v42  ;;  %v1812_v19 = vpop.f32.mrb[13].mxu0 }
 0x152   : > { %v2827_v7 = vadd.f32 %v1812_v19, %v645_v45  ;;  %v2767_v13 = vpop.f32.mrb[14].mxu0  ;;  %v275_v19 = vld [vmem:[#allocation2 + $0xf0] sm:$0xff] }
 0x153   : > { %1937 = vst [vmem:[#allocation2 + $0x70] sm:$0xff] %v2825_v36  ;;  %v2829_v23 = vadd.f32 %v2767_v13, %v648_v39  ;;  %v1815_v32 = vpop.f32.mrb[15].mxu0  ;;  %v273_v13 = vld [vmem:[#allocation2 + $0xe0] sm:$0xff] }
 0x154   : > { %1935 = vst [vmem:[#allocation2 + $0x60] sm:$0xff] %v2827_v7  ;;  %v2831_v9 = vadd.f32 %v1815_v32, %v646_v50  ;;  %v276_v32 = vld [vmem:[#allocation2 + $0xf8] sm:$0xff] }
 0x155   : > { %1938 = vst [vmem:[#allocation2 + $0x78] sm:$0xff] %v2829_v23 }
 0x156   : > { %v2722_v1 = vpop.f32.mrb[16].mxu1  ;;  %1936 = vst [vmem:[#allocation2 + $0x68] sm:$0xff] %v2831_v9  ;;  %v274_v9 = vld [vmem:[#allocation2 + $0xe8] sm:$0xff] }
 0x157   : > { %v1327_v18 = vpop.f32.mrb[17].mxu1  ;;  %v2832_v47 = vadd.f32 %v2722_v1, %v263_v17 }
 0x158   : > { %v2723_v21 = vpop.f32.mrb[18].mxu1  ;;  %v2834_v25 = vadd.f32 %v1327_v18, %v261_v16  ;;  %v2770_v27 = vpop.f32.mrb[16].mxu0 }
 0x159   : > { %v1330_v28 = vpop.f32.mrb[19].mxu1  ;;  %v2836_v46 = vadd.f32 %v2723_v21, %v264_v26  ;;  %v2833_v43 = vadd.f32 %v2832_v47, %v2770_v27  ;;  %v1828_v31 = vpop.f32.mrb[17].mxu0 }
 0x15a   : > { %v2838_v54 = vadd.f32 %v1330_v28, %v262_v11  ;;  %v2835_v52 = vadd.f32 %v2834_v25, %v1828_v31  ;;  %v2771_v29 = vpop.f32.mrb[18].mxu0 }
 0x15b   : > { %1941 = vst [vmem:[#allocation2 + $0x90] sm:$0xff] %v2833_v43  ;;  %v2837_v53 = vadd.f32 %v2836_v46, %v2771_v29  ;;  %v1831_v34 = vpop.f32.mrb[19].mxu0  ;;  %v1959_v29 = vld [vmem:[#allocation2] sm:$0xff] (!%p2402_p8) }
 0x15c   : > { %1939 = vst [vmem:[#allocation2 + $0x80] sm:$0xff] %v2835_v52  ;;  %v2839_v40 = vadd.f32 %v2838_v54, %v1831_v34 }
 0x15d   : > { %1942 = vst [vmem:[#allocation2 + $0x98] sm:$0xff] %v2837_v53  ;;  %v3567_v53 = vld [vmem:[%s3634_s2] ss:$0 sm:$0xff] (!%p2402_p8) }
 0x15e   : > { %v2726_v37 = vpop.f32.mrb[20].mxu1  ;;  %1940 = vst [vmem:[#allocation2 + $0x88] sm:$0xff] %v2839_v40  ;;  %v1998_v34 = vadd.f32 (!%p2402_p8), %v3567_v53, %v1959_v29  ;;  %v1962_v40 = vld [vmem:[#allocation2 + $0x18] sm:$0xff] (!%p2402_p8) }
 0x15f   : > { %v1343_v10 = vpop.f32.mrb[21].mxu1  ;;  %v2840_v8 = vadd.f32 %v2726_v37, %v267_v30  ;;  %v1960_v30 = vld [vmem:[#allocation2 + $0x8] sm:$0xff] (!%p2402_p8) }
 0x160   : > { %v2727_v56 = vpop.f32.mrb[22].mxu1  ;;  %v2842_v35 = vadd.f32 %v1343_v10, %v265_v38  ;;  %v2774_v58 = vpop.f32.mrb[20].mxu0  ;;  %v1999_v37 = vadd.f32 (!%p2402_p8), %v3567_v53, %v1960_v30  ;;  %v1961_v38 = vld [vmem:[#allocation2 + $0x10] sm:$0xff] (!%p2402_p8)  ;;  %v1963_v10 = vld [vmem:[#allocation2 + $0x20] sm:$0xff] (!%p2402_p8) }
 0x161   : > { %v1346_v44 = vpop.f32.mrb[23].mxu1  ;;  %v2844_v14 = vadd.f32 %v2727_v56, %v268_v41  ;;  %v2841_v6 = vadd.f32 %v2840_v8, %v2774_v58  ;;  %v1844_v4 = vpop.f32.mrb[21].mxu0  ;;  %v2000_v41 = vadd.f32 (!%p2402_p8), %v3567_v53, %v1961_v38  ;;  %v2001_v8 = vadd.f32 (!%p2402_p8), %v3567_v53, %v1962_v40  ;;  %v1964_v56 = vld [vmem:[#allocation2 + $0x28] sm:$0xff] (!%p2402_p8) }
 0x162   : > { %v2846_v63 = vadd.f32 %v1346_v44, %v266_v61  ;;  %v2843_v5 = vadd.f32 %v2842_v35, %v1844_v4  ;;  %v2775_v48 = vpop.f32.mrb[22].mxu0  ;;  %v2002_v61 = vadd.f32 (!%p2402_p8), %v3567_v53, %v1963_v10  ;;  %v1965_v35 = vld [vmem:[#allocation2 + $0x30] sm:$0xff] (!%p2402_p8)  ;;  %v1966_v44 = vld [vmem:[#allocation2 + $0x38] sm:$0xff] (!%p2402_p8)  ;;  %v2003_v58 = vadd.f32 (!%p2402_p8), %v3567_v53, %v1964_v56  ;;  %v1967_v4 = vld [vmem:[#allocation2 + $0x40] sm:$0xff] (!%p2402_p8) }
 0x163   : > { %1945 = vst [vmem:[#allocation2 + $0xb0] sm:$0xff] %v2841_v6  ;;  %v2845_v2 = vadd.f32 %v2844_v14, %v2775_v48  ;;  %v1847_v55 = vpop.f32.mrb[23].mxu0  ;;  %v2476_v14 = vpack.c.bf16 (!%p2402_p8), %v1999_v37, %v1998_v34  ;;  %v2005_v6 = vadd.f32 (!%p2402_p8), %v3567_v53, %v1966_v44  ;;  %v1969_v48 = vld [vmem:[#allocation2 + $0x50] sm:$0xff] (!%p2402_p8) }
 0x164   : > { %1943 = vst [vmem:[#allocation2 + $0xa0] sm:$0xff] %v2843_v5  ;;  %v2847_v59 = vadd.f32 %v2846_v63, %v1847_v55  ;;  %v2004_v63 = vadd.f32 (!%p2402_p8), %v3567_v53, %v1965_v35  ;;  %v1968_v5 = vld [vmem:[#allocation2 + $0x48] sm:$0xff] (!%p2402_p8) }
 0x165   : > { %1946 = vst [vmem:[#allocation2 + $0xb8] sm:$0xff] %v2845_v2  ;;  %v2006_v2 = vadd.f32 (!%p2402_p8), %v3567_v53, %v1967_v4  ;;  %v2007_v55 = vadd.f32 (!%p2402_p8), %v3567_v53, %v1968_v5  ;;  %2477 = vst [vmem:[%s3080_s27] sm:$0xff] (!%p2402_p8), %v2476_v14  }
 0x166   : > { %v2730_v57 = vpop.f32.mrb[24].mxu1  ;;  %1944 = vst [vmem:[#allocation2 + $0xa8] sm:$0xff] %v2847_v59  ;;  %v1971_v59 = vld [vmem:[#allocation2 + $0x60] sm:$0xff] (!%p2402_p8) }
 0x167   : > { %v1359_v15 = vpop.f32.mrb[25].mxu1  ;;  %v2848_v12 = vadd.f32 %v2730_v57, %v271_v49  ;;  %v2481_v49 = vpack.c.bf16 (!%p2402_p8), %v2001_v8, %v2000_v41  ;;  %v1970_v57 = vld [vmem:[#allocation2 + $0x58] sm:$0xff] (!%p2402_p8) }
 0x168   : > { %v2731_v33 = vpop.f32.mrb[26].mxu1  ;;  %v2850_v22 = vadd.f32 %v1359_v15, %v269_v51  ;;  %v2778_v42 = vpop.f32.mrb[24].mxu0  ;;  %v2008_v51 = vadd.f32 (!%p2402_p8), %v3567_v53, %v1969_v48  ;;  %v1972_v15 = vld [vmem:[#allocation2 + $0x68] sm:$0xff] (!%p2402_p8) }
 0x169   : > { %v1362_v20 = vpop.f32.mrb[27].mxu1  ;;  %v2852_v0 = vadd.f32 %v2731_v33, %v272_v60  ;;  %v2849_v45 = vadd.f32 %v2848_v12, %v2778_v42  ;;  %v1860_v62 = vpop.f32.mrb[25].mxu0  ;;  %v2486_v60 = vpack.c.bf16 (!%p2402_p8), %v2003_v58, %v2002_v61  ;;  %v2491_v12 = vpack.c.bf16 (!%p2402_p8), %v2005_v6, %v2004_v63  ;;  %2553 = vst [vmem:[%s3080_s27 + $0x8] sm:$0xff] (!%p2402_p8), %v2481_v49  }
 0x16a   : > { %v2854_v3 = vadd.f32 %v1362_v20, %v270_v24  ;;  %v2851_v39 = vadd.f32 %v2850_v22, %v1860_v62  ;;  %v2779_v36 = vpop.f32.mrb[26].mxu0  ;;  %v2009_v33 = vadd.f32 (!%p2402_p8), %v3567_v53, %v1970_v57  ;;  %v2010_v24 = vadd.f32 (!%p2402_p8), %v3567_v53, %v1971_v59  ;;  %v1973_v22 = vld [vmem:[#allocation2 + $0x70] sm:$0xff] (!%p2402_p8)  ;;  %v1974_v20 = vld [vmem:[#allocation2 + $0x78] sm:$0xff] (!%p2402_p8) }
 0x16b   : > { %1949 = vst [vmem:[#allocation2 + $0xd0] sm:$0xff] %v2849_v45  ;;  %v2853_v50 = vadd.f32 %v2852_v0, %v2779_v36  ;;  %v1863_v7 = vpop.f32.mrb[27].mxu0  ;;  %v1975_v0 = vld [vmem:[#allocation2 + $0x80] sm:$0xff] (!%p2402_p8)  ;;  %v2496_v42 = vpack.c.bf16 (!%p2402_p8), %v2007_v55, %v2006_v2  ;;  %v2012_v45 = vadd.f32 (!%p2402_p8), %v3567_v53, %v1973_v22  ;;  %v2013_v62 = vadd.f32 (!%p2402_p8), %v3567_v53, %v1974_v20  ;;  %v1977_v36 = vld [vmem:[#allocation2 + $0x90] sm:$0xff] (!%p2402_p8) }
 0x16c   : > { %1947 = vst [vmem:[#allocation2 + $0xc0] sm:$0xff] %v2851_v39  ;;  %v2855_v17 = vadd.f32 %v2854_v3, %v1863_v7  ;;  %v2011_v3 = vadd.f32 (!%p2402_p8), %v3567_v53, %v1972_v15  ;;  %v1976_v39 = vld [vmem:[#allocation2 + $0x88] sm:$0xff] (!%p2402_p8)  ;;  %2554 = vst [vmem:[%s3080_s27 + $0x10] sm:$0xff] (!%p2402_p8), %v2486_v60   ;;  %v2014_v7 = vadd.f32 (!%p2402_p8), %v3567_v53, %v1975_v0 }
 0x16d   : > { %1950 = vst [vmem:[#allocation2 + $0xd8] sm:$0xff] %v2853_v50  ;;  %2555 = vst [vmem:[%s3080_s27 + $0x18] sm:$0xff] (!%p2402_p8), %v2491_v12   ;;  %v2501_v50 = vpack.c.bf16 (!%p2402_p8), %v2009_v33, %v2008_v51 }
 0x16e   : > { %v2734_v23 = vpop.f32.mrb[28].mxu1  ;;  %1948 = vst [vmem:[#allocation2 + $0xc8] sm:$0xff] %v2855_v17  ;;  %v2016_v17 = vadd.f32 (!%p2402_p8), %v3567_v53, %v1977_v36  ;;  %2556 = vst [vmem:[%s3080_s27 + $0x20] sm:$0xff] (!%p2402_p8), %v2496_v42  }
 0x16f   : > { %v2856_v1 = vadd.f32 %v2734_v23, %v275_v19  ;;  %v1375_v16 = vpop.f32.mrb[29].mxu1  ;;  %v1978_v19 = vld [vmem:[#allocation2 + $0x98] sm:$0xff] (!%p2402_p8)  ;;  %v1979_v23 = vld [vmem:[#allocation2 + $0xa0] sm:$0xff] (!%p2402_p8)  ;;  %2557 = vst [vmem:[%s3080_s27 + $0x28] sm:$0xff] (!%p2402_p8), %v2501_v50  }
 0x170   : > { %v2858_v18 = vadd.f32 %v1375_v16, %v273_v13  ;;  %v2735_v26 = vpop.f32.mrb[30].mxu1  ;;  %v2782_v11 = vpop.f32.mrb[28].mxu0  ;;  %1958 = sbr.rel (%p2402_p8) target bundleno = 387 (0x183), region = 40  ;;  %v2015_v13 = vadd.f32 (!%p2402_p8), %v3567_v53, %v1976_v39  ;;  %v2506_v16 = vpack.c.bf16 (!%p2402_p8), %v2011_v3, %v2010_v24 }
 0x171   : > { %v2860_v47 = vadd.f32 %v2735_v26, %v276_v32  ;;  %v1378_v21 = vpop.f32.mrb[31].mxu1  ;;  %v2857_v28 = vadd.f32 %v2856_v1, %v2782_v11  ;;  %v1876_v46 = vpop.f32.mrb[29].mxu0  ;;  %v1980_v32 = vld [vmem:[#allocation2 + $0xa8] sm:$0xff] (!%p2402_p8)  ;;  %v1981_v1 = vld [vmem:[#allocation2 + $0xb0] sm:$0xff] (!%p2402_p8)  ;;  %v2018_v26 = vadd.f32 (!%p2402_p8), %v3567_v53, %v1979_v23 }
 0x172   : > { %v2862_v25 = vadd.f32 %v1378_v21, %v274_v9  ;;  %v2859_v27 = vadd.f32 %v2858_v18, %v1876_v46  ;;  %v2783_v54 = vpop.f32.mrb[30].mxu0  ;;  %v2511_v9 = vpack.c.bf16 (!%p2402_p8), %v2013_v62, %v2012_v45  ;;  %v2017_v18 = vadd.f32 (!%p2402_p8), %v3567_v53, %v1978_v19  ;;  %2558 = vst [vmem:[%s3080_s27 + $0x30] sm:$0xff] (!%p2402_p8), %v2506_v16  }
 0x173   : > { %1953 = vst [vmem:[#allocation2 + $0xf0] sm:$0xff] %v2857_v28  ;;  %v2861_v43 = vadd.f32 %v2860_v47, %v2783_v54  ;;  %v1879_v31 = vpop.f32.mrb[31].mxu0  ;;  %v1982_v47 = vld [vmem:[#allocation2 + $0xb8] sm:$0xff] (!%p2402_p8)  ;;  %v1983_v21 = vld [vmem:[#allocation2 + $0xc0] sm:$0xff] (!%p2402_p8)  ;;  %v2019_v28 = vadd.f32 (!%p2402_p8), %v3567_v53, %v1980_v32  ;;  %v2020_v46 = vadd.f32 (!%p2402_p8), %v3567_v53, %v1981_v1  ;;  %v1985_v54 = vld [vmem:[#allocation2 + $0xd0] sm:$0xff] (!%p2402_p8) }
 0x174   : > { %1951 = vst [vmem:[#allocation2 + $0xe0] sm:$0xff] %v2859_v27  ;;  %v2863_v52 = vadd.f32 %v2862_v25, %v1879_v31  ;;  %v2516_v25 = vpack.c.bf16 (!%p2402_p8), %v2015_v13, %v2014_v7  ;;  %v2021_v27 = vadd.f32 (!%p2402_p8), %v3567_v53, %v1982_v47  ;;  %2559 = vst [vmem:[%s3080_s27 + $0x38] sm:$0xff] (!%p2402_p8), %v2511_v9  }
 0x175   : > { %1954 = vst [vmem:[#allocation2 + $0xf8] sm:$0xff] %v2861_v43  ;;  %v1984_v11 = vld [vmem:[#allocation2 + $0xc8] sm:$0xff] (!%p2402_p8)  ;;  %v1986_v43 = vld [vmem:[#allocation2 + $0xd8] sm:$0xff] (!%p2402_p8)  ;;  %v2022_v29 = vadd.f32 (!%p2402_p8), %v3567_v53, %v1983_v21  ;;  %v2024_v34 = vadd.f32 (!%p2402_p8), %v3567_v53, %v1985_v54  ;;  %v2526_v10 = vpack.c.bf16 (!%p2402_p8), %v2019_v28, %v2018_v26 }
 0x176   : > { %1952 = vst [vmem:[#allocation2 + $0xe8] sm:$0xff] %v2863_v52  ;;  %v2521_v52 = vpack.c.bf16 (!%p2402_p8), %v2017_v18, %v2016_v17  ;;  %v2023_v30 = vadd.f32 (!%p2402_p8), %v3567_v53, %v1984_v11  ;;  %2560 = vst [vmem:[%s3080_s27 + $0x40] sm:$0xff] (!%p2402_p8), %v2516_v25   ;;  %v2531_v41 = vpack.c.bf16 (!%p2402_p8), %v2021_v27, %v2020_v46 }
 0x177   : > { %v2025_v8 = vadd.f32 %v3567_v53, %v1986_v43  ;;  %2562 = vst [vmem:[%s3080_s27 + $0x50] sm:$0xff] %v2526_v10  }
 0x178   : > { %2561 = vst [vmem:[%s3080_s27 + $0x48] sm:$0xff] %v2521_v52   ;;  %v2536_v61 = vpack.c.bf16 %v2023_v30, %v2022_v29  ;;  %2563 = vst [vmem:[%s3080_s27 + $0x58] sm:$0xff] %v2531_v41  }
 0x179   : > { %v2541_v58 = vpack.c.bf16 %v2025_v8, %v2024_v34 }
 0x17a   : > { %v1989_v38 = vld [vmem:[#allocation2 + $0xf0] sm:$0xff]  ;;  %2564 = vst [vmem:[%s3080_s27 + $0x60] sm:$0xff] %v2536_v61  }
 0x17b   : > { %v1987_v31 = vld [vmem:[#allocation2 + $0xe0] sm:$0xff]  ;;  %v2028_v44 = vadd.f32 %v3567_v53, %v1989_v38  ;;  %2565 = vst [vmem:[%s3080_s27 + $0x68] sm:$0xff] %v2541_v58  }
 0x17c   : > { %v1990_v40 = vld [vmem:[#allocation2 + $0xf8] sm:$0xff]  ;;  %v2026_v56 = vadd.f32 %v3567_v53, %v1987_v31 }
 0x17d   : > { %v1988_v37 = vld [vmem:[#allocation2 + $0xe8] sm:$0xff]  ;;  %v2029_v14 = vadd.f32 %v3567_v53, %v1990_v40 }
 0x17e   : > { %v2027_v35 = vadd.f32 %v3567_v53, %v1988_v37 }
 0x17f   : > { %v2551_v6 = vpack.c.bf16 %v2029_v14, %v2028_v44 }
 0x180   : > { %v2546_v63 = vpack.c.bf16 %v2027_v35, %v2026_v56 }
 0x181   : > { %2567 = vst [vmem:[%s3080_s27 + $0x78] sm:$0xff] %v2551_v6  }
 0x182   : > { %2566 = vst [vmem:[%s3080_s27 + $0x70] sm:$0xff] %v2546_v63  }
 0x183 PF: > { %s13_s16 = sadd.s32 1, %s3016_s16   ;;  %s3640_s12 = smov %s3008_s14 }
 0x184   : > { %p10_p9 = scmp.ge.s32.totalorder %s13_s16, 8   ;;  %s3641_s13 = smov %s3012_s15 }
 0x185   : > { %s3642_s14 = smov %s3645_s17  ;;  %s3643_s15 = smov %s3649_s18 }
 0x186   :  { %12 = sbr.rel (!%p10_p9) target bundleno = 3 (0x3), region = 76 }

// kernel: wideresnet_forward.17
= control target key start
LH: loop header
LB: loop body
LE: loop exit
PB: predicated region body
PF: predicated region fallthrough
CT: control target
= control target key end

     0   :  { %s3215_s18 = smov 0   ;;  %s3217_s19 = smov 0   ;;  %s3882_s0 = inlined_call_operand.vmem [shape: bf16[2,18,18,128], index: 0, kind: input, shape index: {}]   ;;  %s3883_s1 = inlined_call_operand.vmem [shape: bf16[9,128,128], index: 1, kind: input, shape index: {}]   ;;  %s3884_s2 = inlined_call_operand.vmem [shape: f32[1,128], index: 2, kind: input, shape index: {}]   ;;  %s3885_s3 = inlined_call_operand.vmem [shape: f32[1,128], index: 3, kind: input, shape index: {}]   ;;  %s3886_s4 = inlined_call_operand.vmem [shape: f32[1,128], index: 4, kind: input, shape index: {}]   ;;  %s3887_s5 = inlined_call_operand.vmem [shape: bf16[2,256,128], index: 5, kind: output, shape index: {}]  }
   0x1   :  { %s3219_s20 = smov 0   ;;  %s3221_s21 = smov 0  }
   0x2   :  { %s3223_s22 = smov 0  }
   0x3 LB: > { %s24_s23 = sadd.s32 1, %s3174_s20  ;;  %s27_s24 = sadd.s32 1, %s3178_s21  ;;  %s3182_s22 = sphi %s3223_s22, %s15_s22   ;;  %s3178_s21 = sphi %s3221_s21, %s3895_s21   ;;  %s3174_s20 = sphi %s3219_s20, %s3894_s20   ;;  %s3170_s19 = sphi %s3217_s19, %s3893_s19   ;;  %s3166_s18 = sphi %s3215_s18, %s3892_s18  }
   0x4   : > { %p25_p0 = scmp.ge.s32.totalorder %s24_s23, 3  ;;  %p2438_p1 = scmp.ge.s32.totalorder %s3182_s22, 1 }
   0x5   : > { %p211_p2 = scmp.lt.s32.totalorder %s3182_s22, 7 }
   0x6   : > { %s3897_s23 = smov (%p25_p0, %s24_s23), 0  ;;  %s3899_s24 = smov (!%p25_p0, %s27_s24), %s3178_s21 }
   0x7   : > { %p212_p3 = pnand %p2438_p1, %p211_p2  ;;  %p29_p4 = scmp.ge.s32.totalorder %s3899_s24, 2 }
   0x8   : > { %p245_p5 = scmp.lt.s32.totalorder (!%p212_p3), %s3170_s19, 1  ;;  %s250_s25 = smul.u32 (!%p212_p3), 3, %s3166_s18 }
   0x9   : > { %s3901_s24 = smov (%p29_p4, %s3899_s24), 0  ;;  %215 = sbr.rel (%p212_p3) target bundleno = 405 (0x195), region = 40 }
   0xa   : > { %p251_p6 = scmp.lt.s32.totalorder (!%p212_p3), %s250_s25, 8  ;;  %p2444_p7 = scmp.ne.s32.totalorder (!%p212_p3), %s3166_s18, 0 }
  0x10   : > { %s3903_s19 = smov (!%p245_p5, %s3170_s19), 1  ;;  %s3905_s25 = smov (!%p251_p6, %s250_s25), 8 }
  0x11   : > { %s3062_s26 = smul.u32 216, %s3903_s19  ;;  %s2605_s27 = sshll.u32 %s3903_s19, 7  ;;  %v3184_v0 = vmov (!%p2444_p7), 0.0  }
  0x12   : > { %s3256_s8 = scalar_lea.vmem %s3887_s5, %s2605_s27  ;;  %s2604_s9 = sshll.u32 %s3905_s25, 6  ;;  %267 = vst [vmem:[#allocation2] sm:$0xff] (!%p2444_p7), %v3184_v0  ;;  %268 = vst [vmem:[#allocation2 + $0x8] sm:$0xff] (!%p2444_p7), %v3184_v0 }
  0x13   : > { %s3251_s30 = scalar_lea.vmem %s3882_s0, %s3062_s26  ;;  %s3261_s12 = scalar_lea.vmem %s3883_s1, %s2604_s9  ;;  %269 = vst [vmem:[#allocation2 + $0x10] sm:$0xff] (!%p2444_p7), %v3184_v0  ;;  %270 = vst [vmem:[#allocation2 + $0x18] sm:$0xff] (!%p2444_p7), %v3184_v0 }
  0x14   : > { %266 = sbr.rel (%p2444_p7) target bundleno = 34 (0x22), region = 44  ;;  %271 = vst [vmem:[#allocation2 + $0x20] sm:$0xff] (!%p2444_p7), %v3184_v0  ;;  %272 = vst [vmem:[#allocation2 + $0x28] sm:$0xff] (!%p2444_p7), %v3184_v0 }
  0x15   : > { %273 = vst [vmem:[#allocation2 + $0x30] sm:$0xff] (!%p2444_p7), %v3184_v0  ;;  %274 = vst [vmem:[#allocation2 + $0x38] sm:$0xff] (!%p2444_p7), %v3184_v0 }
  0x16   : > { %275 = vst [vmem:[#allocation2 + $0x40] sm:$0xff] (!%p2444_p7), %v3184_v0  ;;  %276 = vst [vmem:[#allocation2 + $0x48] sm:$0xff] (!%p2444_p7), %v3184_v0 }
  0x17   : > { %277 = vst [vmem:[#allocation2 + $0x50] sm:$0xff] (!%p2444_p7), %v3184_v0  ;;  %278 = vst [vmem:[#allocation2 + $0x58] sm:$0xff] (!%p2444_p7), %v3184_v0 }
  0x18   : > { %279 = vst [vmem:[#allocation2 + $0x60] sm:$0xff] (!%p2444_p7), %v3184_v0  ;;  %280 = vst [vmem:[#allocation2 + $0x68] sm:$0xff] (!%p2444_p7), %v3184_v0 }
  0x19   : > { %281 = vst [vmem:[#allocation2 + $0x70] sm:$0xff] (!%p2444_p7), %v3184_v0  ;;  %282 = vst [vmem:[#allocation2 + $0x78] sm:$0xff] (!%p2444_p7), %v3184_v0 }
  0x1a   : > { %283 = vst [vmem:[#allocation2 + $0x80] sm:$0xff] (!%p2444_p7), %v3184_v0  ;;  %284 = vst [vmem:[#allocation2 + $0x88] sm:$0xff] (!%p2444_p7), %v3184_v0 }
  0x1b   : > { %285 = vst [vmem:[#allocation2 + $0x90] sm:$0xff] %v3184_v0  ;;  %286 = vst [vmem:[#allocation2 + $0x98] sm:$0xff] %v3184_v0 }
  0x1c   : > { %287 = vst [vmem:[#allocation2 + $0xa0] sm:$0xff] %v3184_v0  ;;  %288 = vst [vmem:[#allocation2 + $0xa8] sm:$0xff] %v3184_v0 }
  0x1d   : > { %289 = vst [vmem:[#allocation2 + $0xb0] sm:$0xff] %v3184_v0  ;;  %290 = vst [vmem:[#allocation2 + $0xb8] sm:$0xff] %v3184_v0 }
  0x1e   : > { %291 = vst [vmem:[#allocation2 + $0xc0] sm:$0xff] %v3184_v0  ;;  %292 = vst [vmem:[#allocation2 + $0xc8] sm:$0xff] %v3184_v0 }
  0x1f   : > { %293 = vst [vmem:[#allocation2 + $0xd0] sm:$0xff] %v3184_v0  ;;  %294 = vst [vmem:[#allocation2 + $0xd8] sm:$0xff] %v3184_v0 }
  0x20   : > { %295 = vst [vmem:[#allocation2 + $0xe0] sm:$0xff] %v3184_v0  ;;  %296 = vst [vmem:[#allocation2 + $0xe8] sm:$0xff] %v3184_v0 }
  0x21   : > { %297 = vst [vmem:[#allocation2 + $0xf0] sm:$0xff] %v3184_v0  ;;  %298 = vst [vmem:[#allocation2 + $0xf8] sm:$0xff] %v3184_v0 }
  0x22 PF: > { %v3104_v1 = vld [vmem:[%s3261_s12] sm:$0xff]   ;;  %v3106_v3 = vld [vmem:[%s3261_s12 + $0x8] sm:$0xff]   ;;  %v3108_v5 = vld [vmem:[%s3261_s12 + $0x10] sm:$0xff]   ;;  %s2606_s13 = smul.u32 12, %s3166_s18  ;;  %vm767_vm0 = vsmask.f32 3328 }
  0x23   : > { %v3266_v2 = vld [vmem:[%s3261_s12 + $0x40] sm:$0xff]   ;;  %2806 = vmatprep.subr.bf16.mxu1 %v3104_v1  ;;  %v3271_v4 = vld [vmem:[%s3261_s12 + $0x48] sm:$0xff]   ;;  %v3277_v6 = vld [vmem:[%s3261_s12 + $0x50] sm:$0xff]   ;;  %vm768_vm1 = vsmask.f32 7440  ;;  %vm1540_vm3 = vcmask 1042432  }
  0x24   : > { %2854 = vmatprep.subr.bf16.mxu0 %v3266_v2  ;;  %2807 = vmatpush3.bf16.msra.mxu1 %v3104_v1  ;;  %v3110_v7 = vld [vmem:[%s3261_s12 + $0x18] sm:$0xff]   ;;  %v3112_v9 = vld [vmem:[%s3261_s12 + $0x20] sm:$0xff]   ;;  %v3114_v11 = vld [vmem:[%s3261_s12 + $0x28] sm:$0xff]   ;;  %s3294_s14 = scalar_lea.vmem %s3251_s30, %s2606_s13  ;;  %vm1541_vm4 = vcmask 1046532   ;;  %p2566_p8 = scmp.ne.s32.totalorder %s3166_s18, 2 }
  0x25   : > { %2855 = vmatpush3.bf16.msra.mxu0 %v3266_v2  ;;  %2808 = vmatprep.subr.bf16.mxu1 %v3106_v3  ;;  %v3283_v8 = vld [vmem:[%s3261_s12 + $0x58] sm:$0xff]   ;;  %v3290_v10 = vld [vmem:[%s3261_s12 + $0x60] sm:$0xff]   ;;  %v3297_v12 = vld [vmem:[%s3261_s12 + $0x68] sm:$0xff]  }
  0x26   : > { %2856 = vmatprep.subr.bf16.mxu0 %v3271_v4  ;;  %v3120_v13 = vld [vmem:[%s3294_s14] sm:$0xff]   ;;  %v3307_v16 = vld [vmem:[%s3294_s14 + $0x8] sm:$0x1]  ;;  %v3116_v19 = vld [vmem:[%s3261_s12 + $0x30] sm:$0xff]  }
  0x27   : > { %v719_v14 = vld [vmem:[%s3294_s14] sm:$0xf]  ;;  %v3304_v15 = vld [vmem:[%s3294_s14 + $0x4] sm:$0xf]  ;;  %2822 = vmatprep.mubr.bf16.mxu1 %v3120_v13  ;;  %v790_v22 = vshll.u32 %v3307_v16, 16  ;;  %v3316_v25 = vld [vmem:[%s3261_s12 + $0x70] sm:$0xff]  }
  0x28   : > { %2809 = vmatpush3.bf16.msra.mxu1 %v3106_v3  ;;  %v771_v17 = vshrl.u32 %v719_v14, 16  ;;  %v774_v18 = vshll.u32 %v719_v14, 16  ;;  %v780_v20 = vshll.u32 %v3304_v15, 16  ;;  %v784_v21 = vshrl.u32 %v3304_v15, 16  ;;  %v722_v29 = vld [vmem:[%s3294_s14 + $0xc] sm:$0xf]  ;;  %vm3328_vm2 = vmor %vm767_vm0, %vm768_vm1 }
  0x29   : > { %2857 = vmatpush3.bf16.msra.mxu0 %v3271_v4  ;;  %2810 = vmatprep.subr.bf16.mxu1 %v3108_v5  ;;  %v792_v28 = vrot.slane %v790_v22, 5  ;;  %v3320_v31 = vld [vmem:[%s3294_s14 + $0x10] sm:$0xf]  ;;  %v3323_v32 = vld [vmem:[%s3294_s14 + $0x14] sm:$0x1]  ;;  %v795_v33 = vshrl.u32 %v722_v29, 16  ;;  %vm3461_vm5 = vmor %vm1540_vm3, %vm1541_vm4 }
  0x2a   : > { %2858 = vmatprep.subr.bf16.mxu0 %v3277_v6  ;;  %v773_v23 = vrot.slane %v771_v17, 4  ;;  %v776_v24 = vrot.slane %v774_v18, 5  ;;  %v782_v26 = vrot.slane %v780_v20, 5  ;;  %v786_v27 = vrot.slane %v784_v21, 4  ;;  %v3118_v35 = vld [vmem:[%s3261_s12 + $0x38] sm:$0xff]   ;;  %v3121_v58 = vld [vmem:[%s3294_s14 + $0xc] sm:$0xff]  }
  0x2b   : > { %v798_v34 = vshll.u32 %v722_v29, 16  ;;  %v804_v38 = vshll.u32 %v3320_v31, 16  ;;  %v808_v39 = vshrl.u32 %v3320_v31, 16  ;;  %v814_v40 = vshll.u32 %v3323_v32, 16  ;;  %v3337_v41 = vld [vmem:[%s3261_s12 + $0x78] sm:$0xff]   ;;  %v3122_v60 = vld [vmem:[%s3261_s12 + $0x80] sm:$0xff]  }
  0x2c   : > { %2811 = vmatpush3.bf16.msra.mxu1 %v3108_v5  ;;  %v777_v30 = vor.u32 %v776_v24, %v773_v23  ;;  %v787_v37 = vor.u32 %v786_v27, %v782_v26  ;;  %v797_v43 = vrot.slane %v795_v33, 4  ;;  %v1548_v46 = vrot.slane %v3307_v16, 5  ;;  %v725_v55 = vld [vmem:[%s3294_s14 + $0x18] sm:$0xf]  ;;  %v3348_v56 = vld [vmem:[%s3294_s14 + $0x1c] sm:$0xf] }
  0x2d   : > { %2859 = vmatpush3.bf16.msra.mxu0 %v3277_v6  ;;  %2812 = vmatprep.subr.bf16.mxu1 %v3110_v7  ;;  %v800_v44 = vrot.slane %v798_v34, 5  ;;  %v806_v47 = vrot.slane %v804_v38, 5  ;;  %v810_v48 = vrot.slane %v808_v39, 4  ;;  %v816_v51 = vrot.slane %v814_v40, 5  ;;  %v3354_v61 = vld [vmem:[%s3294_s14 + $0x20] sm:$0x1] }
  0x2e   : > { %2860 = vmatprep.subr.bf16.mxu0 %v3283_v8  ;;  %v778_v42 = vrot.slane %v777_v30, 4  ;;  %v788_v45 = vrot.slane %v787_v37, 4  ;;  %v1552_v52 = vrot.slane %v3320_v31, 5  ;;  %v819_v62 = vshrl.u32 %v725_v55, 16  ;;  %v728_v13 = vld [vmem:[%s3294_s14 + $0x24] sm:$0xf] }
  0x2f   : > { %v801_v50 = vor.u32 %v800_v44, %v797_v43  ;;  %v811_v54 = vor.u32 %v810_v48, %v806_v47  ;;  %v822_v63 = vshll.u32 %v725_v55, 16  ;;  %v828_v1 = vshll.u32 %v3348_v56, 16  ;;  %v3124_v17 = vld [vmem:[%s3294_s14 + $0x18] sm:$0xff]   ;;  %v3367_v21 = vld [vmem:[%s3294_s14 + $0x28] sm:$0xf] }
  0x30   : > { %2813 = vmatpush3.bf16.msra.mxu1 %v3110_v7  ;;  %v783_v49 = vsel %vm3328_vm2, %v778_v42, %v782_v26  ;;  %v793_v53 = vsel %vm3328_vm2, %v788_v45, %v792_v28  ;;  %v832_v3 = vshrl.u32 %v3348_v56, 16  ;;  %v838_v5 = vshll.u32 %v3354_v61, 16  ;;  %v3372_v24 = vld [vmem:[%s3294_s14 + $0x2c] sm:$0x1]  ;;  %v3126_v45 = vld [vmem:[%s3261_s12 + $0x90] sm:$0xff]   ;;  %v3125_v48 = vld [vmem:[%s3294_s14 + $0x24] sm:$0xff]  }
  0x31   : > { %2861 = vmatpush3.bf16.msra.mxu0 %v3283_v8  ;;  %2814 = vmatprep.subr.bf16.mxu1 %v3112_v9  ;;  %v2486_v57 = vcombine.low %v783_v49, %v793_v53  ;;  %v802_v59 = vrot.slane %v801_v50, 4  ;;  %v812_v0 = vrot.slane %v811_v54, 4  ;;  %v830_v18 = vrot.slane %v828_v1, 5  ;;  %v3123_v28 = vld [vmem:[%s3261_s12 + $0x88] sm:$0xff]   ;;  %v731_v50 = vld [vmem:[%s3294_s14 + $0x30] sm:$0xf] }
  0x32   : > { %2862 = vmatprep.subr.bf16.mxu0 %v3290_v10  ;;  %v840_v20 = vrot.slane %v838_v5, 5  ;;  %v843_v26 = vshrl.u32 %v728_v13, 16  ;;  %v846_v27 = vshll.u32 %v728_v13, 16  ;;  %v852_v30 = vshll.u32 %v3367_v21, 16  ;;  %v3392_v53 = vld [vmem:[%s3294_s14 + $0x34] sm:$0xf] }
  0x33   : > { %2870 = vmatprep.mubr.bf16.mxu0 %v2486_v57  ;;  %v807_v7 = vsel %vm3328_vm2, %v802_v59, %v806_v47  ;;  %v817_v14 = vsel %vm3328_vm2, %v812_v0, %v816_v51  ;;  %v856_v33 = vshrl.u32 %v3367_v21, 16  ;;  %v862_v34 = vshll.u32 %v3372_v24, 16  ;;  %v3395_v54 = vld [vmem:[%s3294_s14 + $0x38] sm:$0x1]  ;;  %v734_v13 = vld [vmem:[%s3294_s14 + $0x3c] sm:$0xf] }
  0x34   : > { %2815 = vmatpush3.bf16.msra.mxu1 %v3112_v9  ;;  %v821_v9 = vrot.slane %v819_v62, 4  ;;  %v2487_v22 = vcombine.low %v807_v7, %v817_v14  ;;  %v845_v38 = vrot.slane %v843_v26, 4  ;;  %v848_v39 = vrot.slane %v846_v27, 5  ;;  %v3406_v14 = vld [vmem:[%s3294_s14 + $0x40] sm:$0xf] }
  0x35   : > { %2863 = vmatpush3.bf16.msra.mxu0 %v3290_v10  ;;  %2816 = vmatprep.subr.bf16.mxu1 %v3114_v11  ;;  %v854_v42 = vrot.slane %v852_v30, 5  ;;  %v858_v43 = vrot.slane %v856_v33, 4  ;;  %v864_v44 = vrot.slane %v862_v34, 5  ;;  %v867_v55 = vshrl.u32 %v731_v50, 16 }
  0x36   : > { %2864 = vmatprep.subr.bf16.mxu0 %v3297_v12  ;;  %v849_v49 = vor.u32 %v848_v39, %v845_v38  ;;  %v870_v57 = vshll.u32 %v731_v50, 16  ;;  %v876_v62 = vshll.u32 %v3392_v53, 16  ;;  %v886_v5 = vshll.u32 %v3395_v54, 16  ;;  %v3129_v38 = vld [vmem:[%s3294_s14 + $0x3c] sm:$0xff]   ;;  %v737_v50 = vld [vmem:[%s3294_s14 + $0x48] sm:$0xf] }
  0x37   : > { %v859_v51 = vor.u32 %v858_v43, %v854_v42  ;;  %v869_v1 = vrot.slane %v867_v55, 4  ;;  %v894_v27 = vshll.u32 %v734_v13, 16  ;;  %v904_v33 = vshrl.u32 %v3406_v14, 16 }
  0x38   : > { %2817 = vmatpush3.bf16.msra.mxu1 %v3114_v11  ;;  %v824_v11 = vrot.slane %v822_v63, 5  ;;  %v850_v59 = vrot.slane %v849_v49, 4  ;;  %v880_v63 = vshrl.u32 %v3392_v53, 16  ;;  %v1559_v16 = vrot.slane %v3348_v56, 5 }
  0x39   : > { %2865 = vmatpush3.bf16.msra.mxu0 %v3297_v12  ;;  %2818 = vmatprep.subr.bf16.mxu1 %v3116_v19  ;;  %v860_v0 = vrot.slane %v859_v51, 4  ;;  %v896_v39 = vrot.slane %v894_v27, 5  ;;  %v3432_v51 = vld [vmem:[%s3294_s14 + $0x50] sm:$0x1] }
  0x3a   : > { %2866 = vmatprep.subr.bf16.mxu0 %v3316_v25  ;;  %v825_v23 = vor.u32 %v824_v11, %v821_v9  ;;  %v855_v7 = vsel %vm3328_vm2, %v850_v59, %v854_v42  ;;  %v878_v9 = vrot.slane %v876_v62, 5  ;;  %v882_v11 = vrot.slane %v880_v63, 4  ;;  %v3130_v42 = vld [vmem:[%s3261_s12 + $0xa0] sm:$0xff]  }
  0x3b   : > { %v934_v63 = vshll.u32 %v3432_v51, 16 }
  0x3c   : > { %2819 = vmatpush3.bf16.msra.mxu1 %v3116_v19  ;;  %v834_v19 = vrot.slane %v832_v3, 4  ;;  %v826_v37 = vrot.slane %v825_v23, 4  ;;  %v872_v3 = vrot.slane %v870_v57, 5  ;;  %v3127_v23 = vld [vmem:[%s3261_s12 + $0x98] sm:$0xff]   ;;  %v883_v26 = vor.u32 %v882_v11, %v878_v9 }
  0x3d   : > { %2867 = vmatpush3.bf16.msra.mxu0 %v3316_v25  ;;  %2820 = vmatprep.subr.bf16.mxu1 %v3118_v35 }
  0x3e   : > { %2868 = vmatprep.subr.bf16.mxu0 %v3337_v41  ;;  %v835_v29 = vor.u32 %v834_v19, %v830_v18  ;;  %v831_v47 = vsel %vm3328_vm2, %v826_v37, %v830_v18  ;;  %v888_v18 = vrot.slane %v886_v5, 5  ;;  %v3412_v19 = vld [vmem:[%s3294_s14 + $0x44] sm:$0x1]  ;;  %v884_v37 = vrot.slane %v883_v26, 4 }
  0x3f   : > { %v910_v34 = vshll.u32 %v3412_v19, 16 }
  0x40   : > { %2821 = vmatpush3.bf16.msra.mxu1 %v3118_v35  ;;  %v3380_v35 = vrot.slane %v1552_v52, 4  ;;  %v836_v40 = vrot.slane %v835_v29, 4 }
  0x41   : > { %2869 = vmatpush3.bf16.msra.mxu0 %v3337_v41  ;;  %2950 = vmatprep.subr.bf16.mxu1 %v3266_v2 }
  0x42   : > { %2902 = vmatprep.subr.bf16.mxu0 %v3122_v60 }
  0x43   : > { %2823 = vmatmul.mubr.bf16.vlgmr.msra.gmra.mrb[0].mxu1 %v3121_v58 }
  0x44   : > { %2871 = vmatmul.mubr.bf16.vlgmr.msra.gmra.mrb[0].mxu0 %v2487_v22  ;;  %2958 = vmatpush3.bf16.msra.mxu1 %v3266_v2  ;;  %v841_v2 = vsel %vm3328_vm2, %v836_v40, %v840_v20  ;;  %v891_v20 = vshrl.u32 %v734_v13, 16 }
  0x45   : > { %2903 = vmatpush3.bf16.msra.mxu0 %v3122_v60  ;;  %2826 = vmatprep.mubr.bf16.mxu1 %v3124_v17  ;;  %v2488_v58 = vcombine.low %v831_v47, %v841_v2  ;;  %v3128_v60 = vld [vmem:[%s3294_s14 + $0x30] sm:$0xff]   ;;  %v865_v17 = vsel %vm3328_vm2, %v860_v0, %v864_v44  ;;  %v906_v44 = vrot.slane %v904_v33, 4  ;;  %v912_v47 = vrot.slane %v910_v34, 5  ;;  %v3429_v2 = vld [vmem:[%s3294_s14 + $0x4c] sm:$0xf] }
  0x46   : > { %2904 = vmatprep.subr.bf16.mxu0 %v3123_v28  ;;  %2951 = vmatprep.subr.bf16.mxu1 %v3271_v4  ;;  %v2489_v22 = vcombine.low %v855_v7, %v865_v17  ;;  %v893_v30 = vrot.slane %v891_v20, 4  ;;  %v928_v62 = vshrl.u32 %v3429_v2, 16  ;;  %v1555_v0 = vrot.slane %v3323_v32, 5  ;;  %v3134_v34 = vld [vmem:[%s3261_s12 + $0xb0] sm:$0xff]  }
  0x47   : > { %2874 = vmatprep.mubr.bf16.mxu0 %v2488_v58  ;;  %v918_v58 = vshll.u32 %v737_v50, 16  ;;  %v936_v17 = vrot.slane %v934_v63, 5  ;;  %v1477_v63 = vld [vmem:[%s3294_s14 + $0xc] sm:$0xe] }
  0x48   : > { %2959 = vmatpush3.bf16.msra.mxu1 %v3271_v4  ;;  %v873_v4 = vor.u32 %v872_v3, %v869_v1  ;;  %v897_v49 = vor.u32 %v896_v39, %v893_v30  ;;  %v930_v13 = vrot.slane %v928_v62, 4  ;;  %v3135_v62 = vld [vmem:[%s3261_s12 + $0xb8] sm:$0xff]  }
  0x49   : > { %2905 = vmatpush3.bf16.msra.mxu0 %v3123_v28  ;;  %2952 = vmatprep.subr.bf16.mxu1 %v3277_v6  ;;  %v900_v28 = vshll.u32 %v3406_v14, 16  ;;  %v920_v5 = vrot.slane %v918_v58, 5 }
  0x4a   : > { %2906 = vmatprep.subr.bf16.mxu0 %v3126_v45  ;;  %v874_v29 = vrot.slane %v873_v4, 4  ;;  %v898_v59 = vrot.slane %v897_v49, 4  ;;  %v3445_v4 = vld [vmem:[%s3294_s14 + $0x58] sm:$0xf] }
  0x4b   : > { %2827 = vmatmul.mubr.bf16.gmra.mrb[4].mxu1 %v3125_v48  ;;  %v902_v40 = vrot.slane %v900_v28, 5  ;;  %v889_v48 = vsel %vm3328_vm2, %v884_v37, %v888_v18  ;;  %v948_v30 = vshll.u32 %v3445_v4, 16  ;;  %v952_v33 = vshrl.u32 %v3445_v4, 16 }
  0x4c   : > { %2830 = vmatprep.mubr.bf16.mxu1 %v3128_v60  ;;  %2960 = vmatpush3.bf16.msra.mxu1 %v3277_v6  ;;  %v879_v43 = vsel %vm3328_vm2, %v874_v29, %v878_v9  ;;  %v3132_v6 = vld [vmem:[%s3294_s14 + $0x48] sm:$0xff]   ;;  %v924_v60 = vshll.u32 %v3429_v2, 16  ;;  %v3133_v29 = vld [vmem:[%s3294_s14 + $0x54] sm:$0xff]  }
  0x4d   : > { %2875 = vmatmul.mubr.bf16.gmra.mrb[4].mxu0 %v2489_v22  ;;  %2953 = vmatprep.subr.bf16.mxu1 %v3283_v8  ;;  %v2490_v55 = vcombine.low %v879_v43, %v889_v48  ;;  %v907_v57 = vor.u32 %v906_v44, %v902_v40  ;;  %v903_v7 = vsel %vm3328_vm2, %v898_v59, %v902_v40  ;;  %v3131_v9 = vld [vmem:[%s3261_s12 + $0xa8] sm:$0xff]   ;;  %v3450_v22 = vld [vmem:[%s3294_s14 + $0x5c] sm:$0x1]  ;;  %v950_v43 = vrot.slane %v948_v30, 5 }
  0x4e   : > { %2907 = vmatpush3.bf16.msra.mxu0 %v3126_v45  ;;  %v915_v45 = vshrl.u32 %v737_v50, 16  ;;  %v926_v11 = vrot.slane %v924_v60, 5  ;;  %v958_v40 = vshll.u32 %v3450_v22, 16  ;;  %v954_v44 = vrot.slane %v952_v33, 4  ;;  %v3136_v50 = vld [vmem:[%s3294_s14 + $0x60] sm:$0xff]  }
  0x4f   : > { %2908 = vmatprep.subr.bf16.mxu0 %v3127_v23  ;;  %2878 = vmatprep.mubr.bf16.mxu0 %v2490_v55  ;;  %v908_v1 = vrot.slane %v907_v57, 4  ;;  %v1476_v55 = vld [vmem:[%s3294_s14] sm:$0xe] }
  0x50   : > { %2961 = vmatpush3.bf16.msra.mxu1 %v3283_v8  ;;  %v917_v3 = vrot.slane %v915_v45, 4  ;;  %v740_v8 = vld [vmem:[%s3294_s14 + $0x54] sm:$0xf]  ;;  %v931_v28 = vor.u32 %v930_v13, %v926_v11  ;;  %v960_v49 = vrot.slane %v958_v40, 5  ;;  %v955_v45 = vor.u32 %v954_v44, %v950_v43  ;;  %v1482_v40 = vld [vmem:[%s3294_s14 + $0x48] sm:$0xe] }
  0x51   : > { %2954 = vmatprep.subr.bf16.mxu1 %v3290_v10  ;;  %v913_v18 = vsel %vm3328_vm2, %v908_v1, %v912_v47  ;;  %v942_v26 = vshll.u32 %v740_v8, 16  ;;  %v2510_v58 = vrot.slane %v1476_v55, 9  ;;  %v1587_v44 = vrot.slane %v3429_v2, 5 }
  0x52   : > { %2909 = vmatpush3.bf16.msra.mxu0 %v3127_v23  ;;  %v921_v20 = vor.u32 %v920_v5, %v917_v3  ;;  %v939_v23 = vshrl.u32 %v740_v8, 16  ;;  %v2491_v27 = vcombine.low %v903_v7, %v913_v18  ;;  %v956_v1 = vrot.slane %v955_v45, 4  ;;  %v1478_v8 = vld [vmem:[%s3294_s14 + $0x18] sm:$0xe] }
  0x53   : > { %2831 = vmatmul.mubr.bf16.gmra.mrb[8].mxu1 %v3129_v38  ;;  %2910 = vmatprep.subr.bf16.mxu0 %v3130_v42  ;;  %v944_v39 = vrot.slane %v942_v26, 5  ;;  %v2511_v5 = vrot.slane %v1477_v63, 9  ;;  %v1562_v18 = vrot.slane %v3354_v61, 5  ;;  %v1561_v26 = vrot.slane %v1559_v16, 4 }
  0x54   : > { %2834 = vmatprep.mubr.bf16.mxu1 %v3132_v6  ;;  %2962 = vmatpush3.bf16.msra.mxu1 %v3290_v10  ;;  %v922_v37 = vrot.slane %v921_v20, 4  ;;  %v941_v38 = vrot.slane %v939_v23, 4  ;;  %v932_v10 = vrot.slane %v931_v28, 4  ;;  %v1479_v20 = vld [vmem:[%s3294_s14 + $0x24] sm:$0xe]  ;;  %v1566_v23 = vrot.slane %v3367_v21, 5 }
  0x55   : > { %2955 = vmatprep.subr.bf16.mxu1 %v3297_v12  ;;  %2879 = vmatmul.mubr.bf16.gmra.mrb[8].mxu0 %v2491_v27  ;;  %v1553_v56 = vsel %vm3461_vm5, %v2511_v5, %v1552_v52  ;;  %v2513_v61 = vrot.slane %v1479_v20, 9  ;;  %v1480_v27 = vld [vmem:[%s3294_s14 + $0x30] sm:$0xe]  ;;  %v1573_v28 = vrot.slane %v3392_v53, 5  ;;  %v1563_v31 = vsel %vm3461_vm5, %v1561_v26, %v1562_v18 }
  0x56   : > { %2911 = vmatpush3.bf16.msra.mxu0 %v3130_v42  ;;  %v1545_v42 = vrot.slane %v3304_v15, 5  ;;  %v927_v6 = vsel %vm3328_vm2, %v922_v37, %v926_v11  ;;  %v945_v48 = vor.u32 %v944_v39, %v941_v38  ;;  %v937_v57 = vsel %vm3328_vm2, %v932_v10, %v936_v17  ;;  %v3137_v17 = vld [vmem:[%s3294_s14 + $0x6c] sm:$0xff]  }
  0x57   : > { %2912 = vmatprep.subr.bf16.mxu0 %v3131_v9  ;;  %v2492_v15 = vcombine.low %v927_v6, %v937_v57  ;;  %v2512_v11 = vrot.slane %v1478_v8, 9  ;;  %v1568_v21 = vrot.slane %v1566_v23, 4  ;;  %v2514_v52 = vrot.slane %v1480_v27, 9  ;;  %v743_v57 = vld [vmem:[%s3294_s14 + $0x60] sm:$0xf] }
  0x58   : > { %2963 = vmatpush3.bf16.msra.mxu1 %v3297_v12  ;;  %v1547_v59 = vrot.slane %v1545_v42, 4  ;;  %v946_v60 = vrot.slane %v945_v48, 4  ;;  %v1546_v12 = vsel %vm3461_vm5, %v2510_v58, %v1545_v42  ;;  %v3517_v33 = vsel %vm3461_vm5, %v2513_v61, %v1566_v23  ;;  %v748_v61 = vld [vmem:[%s3294_s14 + $0x74] sm:$0x1] }
  0x59   : > { %2956 = vmatprep.subr.bf16.mxu1 %v3316_v25  ;;  %2882 = vmatprep.mubr.bf16.mxu0 %v2492_v15  ;;  %v1575_v53 = vrot.slane %v1573_v28, 4  ;;  %v1580_v39 = vrot.slane %v3406_v14, 5  ;;  %v1590_v48 = vrot.slane %v3432_v51, 5  ;;  %v1589_v2 = vrot.slane %v1587_v44, 4  ;;  %v745_v15 = vld [vmem:[%s3294_s14 + $0x68] sm:$0x1] }
  0x5a   : > { %2913 = vmatpush3.bf16.msra.mxu0 %v3131_v9  ;;  %v1549_v3 = vsel %vm3461_vm5, %v1547_v59, %v1548_v46  ;;  %v951_v7 = vsel %vm3328_vm2, %v946_v60, %v950_v43  ;;  %v3490_v9 = vsel %vm3461_vm5, %v3380_v35, %v1555_v0  ;;  %v961_v46 = vsel %vm3328_vm2, %v956_v1, %v960_v49  ;;  %v3138_v35 = vld [vmem:[%s3294_s14 + $0x78] sm:$0xff]   ;;  %v1483_v49 = vld [vmem:[%s3294_s14 + $0x54] sm:$0xe]  ;;  %v744_v59 = vld [vmem:[%s3294_s14 + $0x64] sm:$0xf] }
  0x5b   : > { %2835 = vmatmul.mubr.bf16.gmra.mrb[12].mxu1 %v3133_v29  ;;  %2914 = vmatprep.subr.bf16.mxu0 %v3134_v34  ;;  %v2542_v13 = vcombine.low %v1546_v12, %v1549_v3  ;;  %v2493_v32 = vcombine.low %v951_v7, %v961_v46  ;;  %v1560_v0 = vsel %vm3461_vm5, %v2512_v11, %v1559_v16  ;;  %v1576_v29 = vrot.slane %v3395_v54, 5  ;;  %v1484_v3 = vld [vmem:[%s3294_s14 + $0x60] sm:$0xe]  ;;  %v746_v11 = vld [vmem:[%s3294_s14 + $0x6c] sm:$0xf] }
  0x5c   : > { %2838 = vmatprep.mubr.bf16.mxu1 %v3136_v50  ;;  %2964 = vmatpush3.bf16.msra.mxu1 %v3316_v25  ;;  %v1569_v25 = vrot.slane %v3372_v24, 5  ;;  %v2543_v30 = vcombine.low %v1553_v56, %v3490_v9  ;;  %v2544_v37 = vcombine.low %v1560_v0, %v1563_v31  ;;  %v3527_v54 = vsel %vm3461_vm5, %v2514_v52, %v1573_v28  ;;  %v747_v56 = vld [vmem:[%s3294_s14 + $0x70] sm:$0xf] }
  0x5d   : > { %2957 = vmatprep.subr.bf16.mxu1 %v3337_v41  ;;  %2883 = vmatmul.mubr.bf16.gmra.mrb[12].mxu0 %v2493_v32  ;;  %v3533_v10 = vsel %vm3461_vm5, %v1575_v53, %v1576_v29  ;;  %v1583_v43 = vrot.slane %v3412_v19, 5  ;;  %v1582_v6 = vrot.slane %v1580_v39, 4  ;;  %v2517_v50 = vrot.slane %v1483_v49, 9 }
  0x5e   : > { %2915 = vmatpush3.bf16.msra.mxu0 %v3134_v34  ;;  %2918 = vmatprep.mubr.bf16.mxu0 %v2542_v13  ;;  %v3521_v24 = vsel %vm3461_vm5, %v1568_v21, %v1569_v25  ;;  %v1481_v34 = vld [vmem:[%s3294_s14 + $0x3c] sm:$0xe]  ;;  %v1594_v55 = vrot.slane %v3445_v4, 5  ;;  %v2546_v45 = vcombine.low %v3527_v54, %v3533_v10  ;;  %v1597_v51 = vrot.slane %v3450_v22, 5  ;;  %v3140_v22 = vld [vmem:[%s3294_s14 + $0x90] sm:$0xff]  }
  0x5f   : > { %2916 = vmatprep.subr.bf16.mxu0 %v3135_v62  ;;  %v2515_v38 = vrot.slane %v1481_v34, 9  ;;  %v2545_v42 = vcombine.low %v3517_v33, %v3521_v24  ;;  %v3555_v58 = vsel %vm3461_vm5, %v1582_v6, %v1583_v43  ;;  %v963_v60 = vshrl.u32 %v743_v57, 16  ;;  %v1485_v34 = vld [vmem:[%s3294_s14 + $0x6c] sm:$0xe]  ;;  %v749_v6 = vld [vmem:[%s3294_s14 + $0x78] sm:$0xf] }
  0x60   : > { %2965 = vmatpush3.bf16.msra.mxu1 %v3337_v41  ;;  %v2516_v41 = vrot.slane %v1482_v40, 9  ;;  %v3565_v4 = vsel %vm3461_vm5, %v1589_v2, %v1590_v48  ;;  %v3569_v1 = vsel %vm3461_vm5, %v2517_v50, %v1594_v55  ;;  %v1596_v12 = vrot.slane %v1594_v55, 4  ;;  %v3141_v40 = vld [vmem:[%s3294_s14 + $0x9c] sm:$0xff]   ;;  %v3142_v48 = vld [vmem:[%s3294_s14 + $0xa8] sm:$0xff]  }
  0x61   : > { %v3541_v14 = vsel %vm3461_vm5, %v2515_v38, %v1580_v39  ;;  %v965_v8 = vrot.slane %v963_v60, 4  ;;  %v966_v7 = vshll.u32 %v743_v57, 16  ;;  %v972_v9 = vshll.u32 %v744_v59, 16  ;;  %v750_v57 = vld [vmem:[%s3294_s14 + $0x7c] sm:$0xf] }
  0x62   : > { %2917 = vmatpush3.bf16.msra.mxu0 %v3135_v62  ;;  %v3547_v19 = vsel %vm3461_vm5, %v2516_v41, %v1587_v44  ;;  %v3139_v62 = vld [vmem:[%s3294_s14 + $0x84] sm:$0xff]   ;;  %v2547_v63 = vcombine.low %v3541_v14, %v3555_v58  ;;  %v3578_v16 = vsel %vm3461_vm5, %v1596_v12, %v1597_v51  ;;  %v976_v46 = vshrl.u32 %v744_v59, 16  ;;  %v751_v33 = vld [vmem:[%s3294_s14 + $0x80] sm:$0x1] }
  0x63   : > { %2839 = vmatmul.mubr.bf16.gmra.mrb[16].mxu1 %v3137_v17  ;;  %v2548_v5 = vcombine.low %v3547_v19, %v3565_v4  ;;  %v982_v13 = vshll.u32 %v745_v15, 16  ;;  %v2518_v17 = vrot.slane %v1484_v3, 9  ;;  %v2549_v18 = vcombine.low %v3569_v1, %v3578_v16 }
  0x64   : > { %2842 = vmatprep.mubr.bf16.mxu1 %v3138_v35  ;;  %v968_v20 = vrot.slane %v966_v7, 5  ;;  %v974_v23 = vrot.slane %v972_v9, 5  ;;  %v1601_v32 = vrot.slane %v744_v59, 5  ;;  %v978_v35 = vrot.slane %v976_v46, 4 }
  0x65   : > { %2919 = vmatmul.mubr.bf16.vlgmr.msra.gmra.mrb[0].mxu0 %v2543_v30  ;;  %v984_v0 = vrot.slane %v982_v13, 5  ;;  %v1604_v26 = vrot.slane %v745_v15, 5  ;;  %v987_v21 = vshrl.u32 %v746_v11, 16  ;;  %v990_v31 = vshll.u32 %v746_v11, 16  ;;  %v1486_v13 = vld [vmem:[%s3294_s14 + $0x78] sm:$0xe] }
  0x66   : > { %2922 = vmatprep.mubr.bf16.mxu0 %v2544_v37  ;;  %v969_v25 = vor.u32 %v968_v20, %v965_v8  ;;  %v3586_v27 = vsel %vm3461_vm5, %v2518_v17, %v1601_v32  ;;  %v1603_v28 = vrot.slane %v1601_v32, 4  ;;  %v979_v52 = vor.u32 %v978_v35, %v974_v23 }
  0x67   : > { %v989_v29 = vrot.slane %v987_v21, 4  ;;  %v996_v30 = vshll.u32 %v747_v56, 16  ;;  %v1000_v53 = vshrl.u32 %v747_v56, 16  ;;  %v992_v38 = vrot.slane %v990_v31, 5  ;;  %v753_v21 = vld [vmem:[%s3294_s14 + $0x88] sm:$0xf] }
  0x68   : > { %v970_v37 = vrot.slane %v969_v25, 4  ;;  %v3591_v54 = vsel %vm3461_vm5, %v1603_v28, %v1604_v26  ;;  %v1006_v39 = vshll.u32 %v748_v61, 16  ;;  %v980_v10 = vrot.slane %v979_v52, 4  ;;  %v3143_v25 = vld [vmem:[%s3294_s14 + $0xb4] sm:$0xff]  }
  0x69   : > { %v2550_v43 = vcombine.low %v3586_v27, %v3591_v54  ;;  %v998_v41 = vrot.slane %v996_v30, 5  ;;  %v1002_v44 = vrot.slane %v1000_v53, 4  ;;  %v993_v2 = vor.u32 %v992_v38, %v989_v29 }
  0x6a   : > { %v975_v49 = vsel %vm3328_vm2, %v970_v37, %v974_v23  ;;  %v1008_v50 = vrot.slane %v1006_v39, 5  ;;  %v2519_v55 = vrot.slane %v1485_v34, 9  ;;  %v985_v51 = vsel %vm3328_vm2, %v980_v10, %v984_v0  ;;  %v754_v34 = vld [vmem:[%s3294_s14 + $0x8c] sm:$0x1] }
  0x6b   : > { %2843 = vmatmul.mubr.bf16.gmra.mrb[20].mxu1 %v3139_v62  ;;  %v1003_v59 = vor.u32 %v1002_v44, %v998_v41  ;;  %v1608_v15 = vrot.slane %v747_v56, 5  ;;  %v1611_v60 = vrot.slane %v748_v61, 5  ;;  %v2494_v62 = vcombine.low %v975_v49, %v985_v51  ;;  %v752_v56 = vld [vmem:[%s3294_s14 + $0x84] sm:$0xf]  ;;  %v755_v49 = vld [vmem:[%s3294_s14 + $0x90] sm:$0xf] }
  0x6c   : > { %2846 = vmatprep.mubr.bf16.mxu1 %v3140_v22  ;;  %v994_v12 = vrot.slane %v993_v2, 4  ;;  %v1011_v24 = vshrl.u32 %v749_v6, 16  ;;  %v1020_v8 = vshll.u32 %v750_v57, 16  ;;  %v1024_v46 = vshrl.u32 %v750_v57, 16  ;;  %v1487_v44 = vld [vmem:[%s3294_s14 + $0x84] sm:$0xe] }
  0x6d   : > { %2923 = vmatmul.mubr.bf16.gmra.mrb[4].mxu0 %v2545_v42  ;;  %v1014_v42 = vshll.u32 %v749_v6, 16  ;;  %v1004_v3 = vrot.slane %v1003_v59, 4  ;;  %v3609_v22 = vsel %vm3461_vm5, %v2519_v55, %v1608_v15  ;;  %v1030_v32 = vshll.u32 %v751_v33, 16  ;;  %v756_v51 = vld [vmem:[%s3294_s14 + $0x94] sm:$0xf] }
  0x6e   : > { %2926 = vmatprep.mubr.bf16.mxu0 %v2546_v45  ;;  %v1610_v45 = vrot.slane %v1608_v15, 4  ;;  %v999_v7 = vsel %vm3328_vm2, %v994_v12, %v998_v41  ;;  %v1013_v9 = vrot.slane %v1011_v24, 4  ;;  %v1022_v23 = vrot.slane %v1020_v8, 5 }
  0x6f   : > { %v1016_v11 = vrot.slane %v1014_v42, 5  ;;  %v1009_v17 = vsel %vm3328_vm2, %v1004_v3, %v1008_v50  ;;  %v1026_v61 = vrot.slane %v1024_v46, 4  ;;  %v1032_v28 = vrot.slane %v1030_v32, 5  ;;  %v757_v42 = vld [vmem:[%s3294_s14 + $0x98] sm:$0x1] }
  0x70   : > { %v3618_v20 = vsel %vm3461_vm5, %v1610_v45, %v1611_v60  ;;  %v3621_v35 = vcombine.low %v999_v7, %v1009_v17  ;;  %v2520_v31 = vrot.slane %v1486_v13, 9  ;;  %v1615_v52 = vrot.slane %v750_v57, 5 }
  0x71   : > { %v2551_v0 = vcombine.low %v3609_v22, %v3618_v20  ;;  %v1017_v26 = vor.u32 %v1016_v11, %v1013_v9  ;;  %v1618_v29 = vrot.slane %v751_v33, 5  ;;  %v1027_v53 = vor.u32 %v1026_v61, %v1022_v23  ;;  %v763_v22 = vld [vmem:[%s3294_s14 + $0xb0] sm:$0x1] }
  0x72   : > { %v1035_v37 = vshrl.u32 %v752_v56, 16  ;;  %v1038_v38 = vshll.u32 %v752_v56, 16  ;;  %v3636_v39 = vsel %vm3461_vm5, %v2520_v31, %v1615_v52  ;;  %v1044_v10 = vshll.u32 %v753_v21, 16 }
  0x73   : > { %2847 = vmatmul.mubr.bf16.gmra.mrb[24].mxu1 %v3141_v40  ;;  %v1018_v30 = vrot.slane %v1017_v26, 4  ;;  %v1617_v40 = vrot.slane %v1615_v52, 4  ;;  %v1048_v41 = vshrl.u32 %v753_v21, 16  ;;  %v1028_v58 = vrot.slane %v1027_v53, 4 }
  0x74   : > { %2850 = vmatprep.mubr.bf16.mxu1 %v3142_v48  ;;  %v1040_v6 = vrot.slane %v1038_v38, 5  ;;  %v1046_v4 = vrot.slane %v1044_v10, 5  ;;  %v1054_v48 = vshll.u32 %v754_v34, 16  ;;  %v2521_v57 = vrot.slane %v1487_v44, 9 }
  0x75   : > { %2927 = vmatmul.mubr.bf16.gmra.mrb[8].mxu0 %v2547_v63  ;;  %v1023_v14 = vsel %vm3328_vm2, %v1018_v30, %v1022_v23  ;;  %v1037_v63 = vrot.slane %v1035_v37, 4  ;;  %v3643_v19 = vsel %vm3461_vm5, %v1617_v40, %v1618_v29  ;;  %v1033_v2 = vsel %vm3328_vm2, %v1028_v58, %v1032_v28  ;;  %v1488_v23 = vld [vmem:[%s3294_s14 + $0x90] sm:$0xe]  ;;  %v759_v28 = vld [vmem:[%s3294_s14 + $0xa0] sm:$0xf] }
  0x76   : > { %2930 = vmatprep.mubr.bf16.mxu0 %v2548_v5  ;;  %v1050_v5 = vrot.slane %v1048_v41, 4  ;;  %v2552_v50 = vcombine.low %v3636_v39, %v3643_v19  ;;  %v2496_v59 = vcombine.low %v1023_v14, %v1033_v2  ;;  %v1056_v60 = vrot.slane %v1054_v48, 5  ;;  %v760_v30 = vld [vmem:[%s3294_s14 + $0xa4] sm:$0x1]  ;;  %v1489_v41 = vld [vmem:[%s3294_s14 + $0x9c] sm:$0xe] }
  0x77   : > { %v1041_v55 = vor.u32 %v1040_v6, %v1037_v63  ;;  %v1622_v12 = vrot.slane %v753_v21, 5  ;;  %v1625_v24 = vrot.slane %v754_v34, 5  ;;  %v1059_v3 = vshrl.u32 %v755_v49, 16  ;;  %v761_v48 = vld [vmem:[%s3294_s14 + $0xa8] sm:$0xf] }
  0x78   : > { %v1051_v15 = vor.u32 %v1050_v5, %v1046_v4  ;;  %v1062_v45 = vshll.u32 %v755_v49, 16  ;;  %v1068_v9 = vshll.u32 %v756_v51, 16  ;;  %v1072_v17 = vshrl.u32 %v756_v51, 16 }
  0x79   : > { %v1042_v33 = vrot.slane %v1041_v55, 4  ;;  %v3654_v8 = vsel %vm3461_vm5, %v2521_v57, %v1622_v12  ;;  %v1624_v7 = vrot.slane %v1622_v12, 4  ;;  %v1061_v46 = vrot.slane %v1059_v3, 4 }
  0x7a   : > { %v1064_v13 = vrot.slane %v1062_v45, 5  ;;  %v1070_v1 = vrot.slane %v1068_v9, 5  ;;  %v1078_v16 = vshll.u32 %v757_v42, 16  ;;  %v2522_v54 = vrot.slane %v1488_v23, 9  ;;  %v1490_v9 = vld [vmem:[%s3294_s14 + $0xa8] sm:$0xe] }
  0x7b   : > { %2851 = vmatmul.mubr.bf16.gmra.mrb[28].mxu1 %v3143_v25  ;;  %v1047_v11 = vsel %vm3328_vm2, %v1042_v33, %v1046_v4  ;;  %v3669_v56 = vsel %vm3461_vm5, %v1624_v7, %v1625_v24  ;;  %v1074_v25 = vrot.slane %v1072_v17, 4  ;;  %v1632_v31 = vrot.slane %v757_v42, 5  ;;  %v764_v23 = vld [vmem:[%s3294_s14 + $0xb4] sm:$0xf] }
  0x7c   : > { %2886 = vmatprep.mubr.bf16.mxu1 %v2494_v62  ;;  %v1052_v62 = vrot.slane %v1051_v15, 4  ;;  %v2553_v61 = vcombine.low %v3654_v8, %v3669_v56  ;;  %v1065_v21 = vor.u32 %v1064_v13, %v1061_v46  ;;  %v1080_v27 = vrot.slane %v1078_v16, 5 }
  0x7d   : > { %2931 = vmatmul.mubr.bf16.gmra.mrb[12].mxu0 %v2549_v18  ;;  %v758_v18 = vld [vmem:[%s3294_s14 + $0x9c] sm:$0xf]  ;;  %v1075_v29 = vor.u32 %v1074_v25, %v1070_v1  ;;  %v1092_v40 = vshll.u32 %v759_v28, 16  ;;  %v1096_v10 = vshrl.u32 %v759_v28, 16  ;;  %v1102_v5 = vshll.u32 %v760_v30, 16 }
  0x7e   : > { %2934 = vmatprep.mubr.bf16.mxu0 %v2550_v43  ;;  %v1057_v32 = vsel %vm3328_vm2, %v1052_v62, %v1056_v60  ;;  %v1629_v43 = vrot.slane %v756_v51, 5  ;;  %v1066_v52 = vrot.slane %v1065_v21, 4  ;;  %v1083_v53 = vshrl.u32 %v758_v18, 16  ;;  %v762_v51 = vld [vmem:[%s3294_s14 + $0xac] sm:$0xf] }
  0x7f   : > { %v2497_v26 = vcombine.low %v1047_v11, %v1057_v32  ;;  %v1086_v34 = vshll.u32 %v758_v18, 16  ;;  %v1076_v44 = vrot.slane %v1075_v29, 4  ;;  %v1094_v6 = vrot.slane %v1092_v40, 5 }
  0x80   : > { %v1630_v37 = vsel %vm3461_vm5, %v2522_v54, %v1629_v43  ;;  %v1631_v38 = vrot.slane %v1629_v43, 4  ;;  %v1085_v14 = vrot.slane %v1083_v53, 4  ;;  %v1098_v4 = vrot.slane %v1096_v10, 4 }
  0x81   : > { %v1088_v58 = vrot.slane %v1086_v34, 5  ;;  %v1081_v49 = vsel %vm3328_vm2, %v1076_v44, %v1080_v27  ;;  %v2523_v57 = vrot.slane %v1489_v41, 9  ;;  %v1104_v60 = vrot.slane %v1102_v5, 5 }
  0x82   : > { %v1633_v63 = vsel %vm3461_vm5, %v1631_v38, %v1632_v31  ;;  %v1099_v15 = vor.u32 %v1098_v4, %v1094_v6  ;;  %v1636_v12 = vrot.slane %v759_v28, 5  ;;  %v1639_v24 = vrot.slane %v760_v30, 5  ;;  %v766_v31 = vld [vmem:[%s3294_s14 + $0xbc] sm:$0x1]  ;;  %v1491_v38 = vld [vmem:[%s3294_s14 + $0xb4] sm:$0xe] }
  0x83   : > { %2887 = vmatmul.mubr.bf16.vlgmr.msra.gmra.mrb[16].mxu1 %v3621_v35  ;;  %v1071_v35 = vsel %vm3328_vm2, %v1066_v52, %v1070_v1  ;;  %v2554_v2 = vcombine.low %v1630_v37, %v1633_v63  ;;  %v1089_v55 = vor.u32 %v1088_v58, %v1085_v14  ;;  %v1107_v20 = vshrl.u32 %v761_v48, 16 }
  0x84   : > { %2890 = vmatprep.mubr.bf16.mxu1 %v2496_v59  ;;  %v2498_v59 = vcombine.low %v1071_v35, %v1081_v49  ;;  %v1100_v42 = vrot.slane %v1099_v15, 4  ;;  %v1637_v3 = vsel %vm3461_vm5, %v2523_v57, %v1636_v12  ;;  %v1638_v45 = vrot.slane %v1636_v12, 4 }
  0x85   : > { %2935 = vmatmul.mubr.bf16.gmra.mrb[16].mxu0 %v2551_v0  ;;  %v1090_v33 = vrot.slane %v1089_v55, 4  ;;  %v1110_v0 = vshll.u32 %v761_v48, 16  ;;  %v1116_v62 = vshll.u32 %v762_v51, 16  ;;  %v1109_v19 = vrot.slane %v1107_v20, 4 }
  0x86   : > { %2938 = vmatprep.mubr.bf16.mxu0 %v2552_v50  ;;  %v1120_v7 = vshrl.u32 %v762_v51, 16  ;;  %v1105_v11 = vsel %vm3328_vm2, %v1100_v42, %v1104_v60  ;;  %v1640_v46 = vsel %vm3461_vm5, %v1638_v45, %v1639_v24  ;;  %v1126_v17 = vshll.u32 %v763_v22, 16 }
  0x87   : > { %v1095_v39 = vsel %vm3328_vm2, %v1090_v33, %v1094_v6  ;;  %v1112_v50 = vrot.slane %v1110_v0, 5  ;;  %v1118_v13 = vrot.slane %v1116_v62, 5  ;;  %v2555_v1 = vcombine.low %v1637_v3, %v1640_v46 }
  0x88   : > { %v2499_v32 = vcombine.low %v1095_v39, %v1105_v11  ;;  %v1122_v18 = vrot.slane %v1120_v7, 4  ;;  %v1128_v21 = vrot.slane %v1126_v17, 5  ;;  %v2524_v25 = vrot.slane %v1490_v9, 9  ;;  %v299_v17 = vld [vmem:[#allocation2] sm:$0xff] }
  0x89   : > { %v1113_v16 = vor.u32 %v1112_v50, %v1109_v19  ;;  %v1643_v28 = vrot.slane %v762_v51, 5  ;;  %v1646_v27 = vrot.slane %v763_v22, 5  ;;  %v1131_v52 = vshrl.u32 %v764_v23, 16 }
  0x8a   : > { %v1123_v43 = vor.u32 %v1122_v18, %v1118_v13  ;;  %v1134_v29 = vshll.u32 %v764_v23, 16  ;;  %v1150_v44 = vshll.u32 %v766_v31, 16  ;;  %v2525_v6 = vrot.slane %v1491_v38, 9  ;;  %v302_v23 = vld [vmem:[#allocation2 + $0x18] sm:$0xff] }
  0x8b   : > { %2891 = vmatmul.mubr.bf16.gmra.mrb[20].mxu1 %v2497_v26  ;;  %v765_v26 = vld [vmem:[%s3294_s14 + $0xb8] sm:$0xf]  ;;  %v1114_v54 = vrot.slane %v1113_v16, 4  ;;  %v1644_v30 = vsel %vm3461_vm5, %v2524_v25, %v1643_v28  ;;  %v1645_v53 = vrot.slane %v1643_v28, 4  ;;  %v1133_v41 = vrot.slane %v1131_v52, 4  ;;  %v305_v52 = vld [vmem:[#allocation2 + $0x30] sm:$0xff] }
  0x8c   : > { %2894 = vmatprep.mubr.bf16.mxu1 %v2498_v59  ;;  %v1140_v34 = vshll.u32 %v765_v26, 16  ;;  %v1144_v37 = vshrl.u32 %v765_v26, 16  ;;  %v1124_v10 = vrot.slane %v1123_v43, 4  ;;  %v1136_v8 = vrot.slane %v1134_v29, 5 }
  0x8d   : > { %2939 = vmatmul.mubr.bf16.gmra.mrb[20].mxu0 %v2553_v61  ;;  %v1119_v40 = vsel %vm3328_vm2, %v1114_v54, %v1118_v13  ;;  %v1647_v56 = vsel %vm3461_vm5, %v1645_v53, %v1646_v27  ;;  %v1152_v48 = vrot.slane %v1150_v44, 5  ;;  %v1650_v49 = vrot.slane %v765_v26, 5  ;;  %v301_v13 = vld [vmem:[#allocation2 + $0x10] sm:$0xff]  ;;  %v306_v53 = vld [vmem:[#allocation2 + $0x38] sm:$0xff] }
  0x8e   : > { %2942 = vmatprep.mubr.bf16.mxu0 %v2554_v2  ;;  %v1142_v61 = vrot.slane %v1140_v34, 5  ;;  %v1146_v35 = vrot.slane %v1144_v37, 4  ;;  %v1129_v14 = vsel %vm3328_vm2, %v1124_v10, %v1128_v21  ;;  %v2556_v58 = vcombine.low %v1644_v30, %v1647_v56  ;;  %v303_v30 = vld [vmem:[#allocation2 + $0x20] sm:$0xff]  ;;  %v304_v37 = vld [vmem:[#allocation2 + $0x28] sm:$0xff] }
  0x8f   : > { %v1137_v63 = vor.u32 %v1136_v8, %v1133_v41  ;;  %v2500_v4 = vcombine.low %v1119_v40, %v1129_v14  ;;  %v1653_v55 = vrot.slane %v766_v31, 5  ;;  %v1652_v51 = vrot.slane %v1650_v49, 4 }
  0x90   : > { %v1147_v5 = vor.u32 %v1146_v35, %v1142_v61  ;;  %v1651_v60 = vsel %vm3461_vm5, %v2525_v6, %v1650_v49  ;;  %v307_v6 = vld [vmem:[#allocation2 + $0x40] sm:$0xff] }
  0x91   : > { %v1138_v2 = vrot.slane %v1137_v63, 4  ;;  %v1654_v12 = vsel %vm3461_vm5, %v1652_v51, %v1653_v55 }
  0x92   : > { %v1148_v57 = vrot.slane %v1147_v5, 4  ;;  %v2557_v24 = vcombine.low %v1651_v60, %v1654_v12 }
  0x93   : > { %2895 = vmatmul.mubr.bf16.gmra.mrb[24].mxu1 %v2499_v32  ;;  %v1143_v59 = vsel %vm3328_vm2, %v1138_v2, %v1142_v61 }
  0x94   : > { %2898 = vmatprep.mubr.bf16.mxu1 %v2500_v4  ;;  %v1153_v15 = vsel %vm3328_vm2, %v1148_v57, %v1152_v48  ;;  %v310_v4 = vld [vmem:[#allocation2 + $0x58] sm:$0xff]  ;;  %v308_v48 = vld [vmem:[#allocation2 + $0x48] sm:$0xff] }
  0x95   : > { %2943 = vmatmul.mubr.bf16.gmra.mrb[24].mxu0 %v2555_v1  ;;  %v2501_v33 = vcombine.low %v1143_v59, %v1153_v15  ;;  %v300_v1 = vld [vmem:[#allocation2 + $0x8] sm:$0xff] }
  0x96   : > { %2946 = vmatprep.mubr.bf16.mxu0 %v2556_v58  ;;  %v309_v58 = vld [vmem:[#allocation2 + $0x50] sm:$0xff] }
  0x9b   : > { %2899 = vmatmul.mubr.bf16.gmra.mrb[28].mxu1 %v2501_v33 }
  0x9d   : > { %2947 = vmatmul.mubr.bf16.gmra.mrb[28].mxu0 %v2557_v24  ;;  %v313_v24 = vld [vmem:[#allocation2 + $0x70] sm:$0xff] }
 0x116   : > { %v2824_v22 = vpop.f32.mrb[0].mxu1 }
 0x117   : > { %v560_v20 = vpop.f32.mrb[1].mxu1  ;;  %v689_v32 = vadd.f32 %v2824_v22, %v301_v13 }
 0x118   : > { %v2825_v0 = vpop.f32.mrb[2].mxu1  ;;  %v687_v16 = vadd.f32 %v560_v20, %v299_v17  ;;  %v311_v20 = vld [vmem:[#allocation2 + $0x60] sm:$0xff]  ;;  %v317_v17 = vld [vmem:[#allocation2 + $0x90] sm:$0xff] }
 0x119   : > { %v563_v42 = vpop.f32.mrb[3].mxu1  ;;  %v690_v26 = vadd.f32 %v2825_v0, %v302_v23  ;;  %v314_v0 = vld [vmem:[#allocation2 + $0x78] sm:$0xff] }
 0x11a   : > { %v688_v28 = vadd.f32 %v563_v42, %v300_v1 }
 0x11e   : > { %v2828_v3 = vpop.f32.mrb[4].mxu1 }
 0x11f   : > { %v576_v45 = vpop.f32.mrb[5].mxu1  ;;  %v693_v34 = vadd.f32 %v2828_v3, %v305_v52  ;;  %v312_v3 = vld [vmem:[#allocation2 + $0x68] sm:$0xff] }
 0x120   : > { %v2829_v62 = vpop.f32.mrb[6].mxu1  ;;  %v691_v38 = vadd.f32 %v576_v45, %v303_v30  ;;  %v321_v30 = vld [vmem:[#allocation2 + $0xb0] sm:$0xff] }
 0x121   : > { %v579_v39 = vpop.f32.mrb[7].mxu1  ;;  %v694_v10 = vadd.f32 %v2829_v62, %v306_v53 }
 0x122   : > { %v692_v56 = vadd.f32 %v579_v39, %v304_v37 }
 0x126   : > { %v2832_v36 = vpop.f32.mrb[8].mxu1 }
 0x127   : > { %v592_v19 = vpop.f32.mrb[9].mxu1  ;;  %v697_v5 = vadd.f32 %v2832_v36, %v309_v58 }
 0x128   : > { %v2833_v50 = vpop.f32.mrb[10].mxu1  ;;  %v695_v49 = vadd.f32 %v592_v19, %v307_v6 }
 0x129   : > { %v595_v7 = vpop.f32.mrb[11].mxu1  ;;  %v698_v55 = vadd.f32 %v2833_v50, %v310_v4 }
 0x12a   : > { %v696_v59 = vadd.f32 %v595_v7, %v308_v48 }
 0x12e   : > { %v3727_v9 = vpop.f32.mrb[12].mxu1 }
 0x12f   : > { %v3729_v47 = vpop.f32.mrb[13].mxu1  ;;  %v701_v42 = vadd.f32 %v3727_v9, %v313_v24  ;;  %v324_v24 = vld [vmem:[#allocation2 + $0xc8] sm:$0xff] }
 0x130   : > { %v3731_v11 = vpop.f32.mrb[14].mxu1  ;;  %v699_v45 = vadd.f32 %v3729_v47, %v311_v20 }
 0x131   : > { %v3733_v46 = vpop.f32.mrb[15].mxu1  ;;  %v702_v39 = vadd.f32 %v3731_v11, %v314_v0  ;;  %v316_v11 = vld [vmem:[#allocation2 + $0x88] sm:$0xff] }
 0x132   : > { %v700_v50 = vadd.f32 %v3733_v46, %v312_v3 }
 0x138   : > { %v2920_v18 = vpop.f32.mrb[0].mxu0 }
 0x139   : > { %v2967_v21 = vadd.f32 %v2920_v18, %v689_v32  ;;  %v1818_v25 = vpop.f32.mrb[1].mxu0 }
 0x13a   : > { %v2969_v27 = vadd.f32 %v1818_v25, %v687_v16  ;;  %v2921_v54 = vpop.f32.mrb[2].mxu0  ;;  %v315_v16 = vld [vmem:[#allocation2 + $0x80] sm:$0xff] }
 0x13b   : > { %1979 = vst [vmem:[#allocation2 + $0x10] sm:$0xff] %v2967_v21  ;;  %v2971_v43 = vadd.f32 %v2921_v54, %v690_v26  ;;  %v1821_v31 = vpop.f32.mrb[3].mxu0  ;;  %v318_v26 = vld [vmem:[#allocation2 + $0x98] sm:$0xff] }
 0x13c   : > { %1977 = vst [vmem:[#allocation2] sm:$0xff] %v2969_v27  ;;  %v2973_v29 = vadd.f32 %v1821_v31, %v688_v28 }
 0x13d   : > { %1980 = vst [vmem:[#allocation2 + $0x18] sm:$0xff] %v2971_v43 }
 0x13e   : > { %1978 = vst [vmem:[#allocation2 + $0x8] sm:$0xff] %v2973_v29 }
 0x140   : > { %v2924_v40 = vpop.f32.mrb[4].mxu0 }
 0x141   : > { %v2975_v41 = vadd.f32 %v2924_v40, %v693_v34  ;;  %v1834_v8 = vpop.f32.mrb[5].mxu0 }
 0x142   : > { %v2977_v61 = vadd.f32 %v1834_v8, %v691_v38  ;;  %v2925_v35 = vpop.f32.mrb[6].mxu0  ;;  %v319_v38 = vld [vmem:[#allocation2 + $0xa0] sm:$0xff] }
 0x143   : > { %1983 = vst [vmem:[#allocation2 + $0x30] sm:$0xff] %v2975_v41  ;;  %v2979_v44 = vadd.f32 %v2925_v35, %v694_v10  ;;  %v1837_v14 = vpop.f32.mrb[7].mxu0  ;;  %v322_v41 = vld [vmem:[#allocation2 + $0xb8] sm:$0xff] }
 0x144   : > { %1981 = vst [vmem:[#allocation2 + $0x20] sm:$0xff] %v2977_v61  ;;  %v2981_v63 = vadd.f32 %v1837_v14, %v692_v56  ;;  %v320_v61 = vld [vmem:[#allocation2 + $0xa8] sm:$0xff] }
 0x145   : > { %1984 = vst [vmem:[#allocation2 + $0x38] sm:$0xff] %v2979_v44 }
 0x146   : > { %1982 = vst [vmem:[#allocation2 + $0x28] sm:$0xff] %v2981_v63 }
 0x148   : > { %v2928_v2 = vpop.f32.mrb[8].mxu0 }
 0x149   : > { %v2983_v57 = vadd.f32 %v2928_v2, %v697_v5  ;;  %v1850_v51 = vpop.f32.mrb[9].mxu0 }
 0x14a   : > { %v2985_v15 = vadd.f32 %v1850_v51, %v695_v49  ;;  %v2929_v60 = vpop.f32.mrb[10].mxu0  ;;  %v325_v49 = vld [vmem:[#allocation2 + $0xd0] sm:$0xff]  ;;  %v323_v51 = vld [vmem:[#allocation2 + $0xc0] sm:$0xff] }
 0x14b   : > { %1987 = vst [vmem:[#allocation2 + $0x50] sm:$0xff] %v2983_v57  ;;  %v2987_v12 = vadd.f32 %v2929_v60, %v698_v55  ;;  %v1853_v33 = vpop.f32.mrb[11].mxu0  ;;  %v326_v60 = vld [vmem:[#allocation2 + $0xd8] sm:$0xff] }
 0x14c   : > { %1985 = vst [vmem:[#allocation2 + $0x40] sm:$0xff] %v2985_v15  ;;  %v2989_v22 = vadd.f32 %v1853_v33, %v696_v59 }
 0x14d   : > { %1988 = vst [vmem:[#allocation2 + $0x58] sm:$0xff] %v2987_v12 }
 0x14e   : > { %1986 = vst [vmem:[#allocation2 + $0x48] sm:$0xff] %v2989_v22 }
 0x150   : > { %v2932_v62 = vpop.f32.mrb[12].mxu0 }
 0x151   : > { %v2991_v36 = vadd.f32 %v2932_v62, %v701_v42  ;;  %v1866_v19 = vpop.f32.mrb[13].mxu0 }
 0x152   : > { %v2993_v7 = vadd.f32 %v1866_v19, %v699_v45  ;;  %v2933_v13 = vpop.f32.mrb[14].mxu0  ;;  %v329_v19 = vld [vmem:[#allocation2 + $0xf0] sm:$0xff] }
 0x153   : > { %1991 = vst [vmem:[#allocation2 + $0x70] sm:$0xff] %v2991_v36  ;;  %v2995_v23 = vadd.f32 %v2933_v13, %v702_v39  ;;  %v1869_v32 = vpop.f32.mrb[15].mxu0  ;;  %v327_v13 = vld [vmem:[#allocation2 + $0xe0] sm:$0xff] }
 0x154   : > { %1989 = vst [vmem:[#allocation2 + $0x60] sm:$0xff] %v2993_v7  ;;  %v2997_v9 = vadd.f32 %v1869_v32, %v700_v50  ;;  %v330_v32 = vld [vmem:[#allocation2 + $0xf8] sm:$0xff] }
 0x155   : > { %1992 = vst [vmem:[#allocation2 + $0x78] sm:$0xff] %v2995_v23 }
 0x156   : > { %v2888_v1 = vpop.f32.mrb[16].mxu1  ;;  %1990 = vst [vmem:[#allocation2 + $0x68] sm:$0xff] %v2997_v9  ;;  %v328_v9 = vld [vmem:[#allocation2 + $0xe8] sm:$0xff] }
 0x157   : > { %v1381_v18 = vpop.f32.mrb[17].mxu1  ;;  %v2998_v47 = vadd.f32 %v2888_v1, %v317_v17 }
 0x158   : > { %v2889_v21 = vpop.f32.mrb[18].mxu1  ;;  %v3000_v25 = vadd.f32 %v1381_v18, %v315_v16  ;;  %v2936_v27 = vpop.f32.mrb[16].mxu0 }
 0x159   : > { %v1384_v28 = vpop.f32.mrb[19].mxu1  ;;  %v3002_v46 = vadd.f32 %v2889_v21, %v318_v26  ;;  %v2999_v43 = vadd.f32 %v2998_v47, %v2936_v27  ;;  %v1882_v31 = vpop.f32.mrb[17].mxu0 }
 0x15a   : > { %v3004_v54 = vadd.f32 %v1384_v28, %v316_v11  ;;  %v3001_v52 = vadd.f32 %v3000_v25, %v1882_v31  ;;  %v2937_v29 = vpop.f32.mrb[18].mxu0 }
 0x15b   : > { %1995 = vst [vmem:[#allocation2 + $0x90] sm:$0xff] %v2999_v43  ;;  %v3003_v53 = vadd.f32 %v3002_v46, %v2937_v29  ;;  %v1885_v34 = vpop.f32.mrb[19].mxu0  ;;  %v2013_v29 = vld [vmem:[#allocation2] sm:$0xff] (!%p2566_p8) }
 0x15c   : > { %1993 = vst [vmem:[#allocation2 + $0x80] sm:$0xff] %v3001_v52  ;;  %v3005_v40 = vadd.f32 %v3004_v54, %v1885_v34 }
 0x15d   : > { %1996 = vst [vmem:[#allocation2 + $0x98] sm:$0xff] %v3003_v53  ;;  %v3743_v53 = vld [vmem:[%s3884_s2] ss:$0 sm:$0xff] (!%p2566_p8) }
 0x15e   : > { %v2892_v37 = vpop.f32.mrb[20].mxu1  ;;  %1994 = vst [vmem:[#allocation2 + $0x88] sm:$0xff] %v3005_v40  ;;  %v2052_v34 = vadd.f32 (!%p2566_p8), %v3743_v53, %v2013_v29  ;;  %v3755_v40 = vld [vmem:[%s3886_s4] ss:$0 sm:$0xff] (!%p2566_p8) }
 0x15f   : > { %v1397_v10 = vpop.f32.mrb[21].mxu1  ;;  %v3006_v8 = vadd.f32 %v2892_v37, %v321_v30  ;;  %v2014_v30 = vld [vmem:[#allocation2 + $0x8] sm:$0xff] (!%p2566_p8) }
 0x160   : > { %v2893_v56 = vpop.f32.mrb[22].mxu1  ;;  %v3008_v35 = vadd.f32 %v1397_v10, %v319_v38  ;;  %v2940_v58 = vpop.f32.mrb[20].mxu0  ;;  %v2053_v37 = vadd.f32 (!%p2566_p8), %v3743_v53, %v2014_v30  ;;  %v3750_v38 = vld [vmem:[%s3885_s3] ss:$0 sm:$0xff] (!%p2566_p8)  ;;  %v2015_v10 = vld [vmem:[#allocation2 + $0x10] sm:$0xff] (!%p2566_p8) }
 0x161   : > { %v1400_v44 = vpop.f32.mrb[23].mxu1  ;;  %v3010_v14 = vadd.f32 %v2893_v56, %v322_v41  ;;  %v3007_v6 = vadd.f32 %v3006_v8, %v2940_v58  ;;  %v1898_v4 = vpop.f32.mrb[21].mxu0  ;;  %v2016_v41 = vld [vmem:[#allocation2 + $0x18] sm:$0xff] (!%p2566_p8)  ;;  %v2054_v8 = vadd.f32 (!%p2566_p8), %v3743_v53, %v2015_v10  ;;  %v2017_v56 = vld [vmem:[#allocation2 + $0x20] sm:$0xff] (!%p2566_p8) }
 0x162   : > { %v3012_v63 = vadd.f32 %v1400_v44, %v320_v61  ;;  %v3009_v5 = vadd.f32 %v3008_v35, %v1898_v4  ;;  %v2941_v48 = vpop.f32.mrb[22].mxu0  ;;  %v2018_v61 = vld [vmem:[#allocation2 + $0x28] sm:$0xff] (!%p2566_p8)  ;;  %v2091_v35 = vmul.f32 (!%p2566_p8), %v3750_v38, %v2052_v34  ;;  %v2092_v44 = vmul.f32 (!%p2566_p8), %v3750_v38, %v2053_v37 }
 0x163   : > { %1999 = vst [vmem:[#allocation2 + $0xb0] sm:$0xff] %v3007_v6  ;;  %v3011_v2 = vadd.f32 %v3010_v14, %v2941_v48  ;;  %v1901_v55 = vpop.f32.mrb[23].mxu0  ;;  %v2055_v14 = vadd.f32 (!%p2566_p8), %v3743_v53, %v2016_v41  ;;  %v2056_v58 = vadd.f32 (!%p2566_p8), %v3743_v53, %v2017_v56  ;;  %v2020_v6 = vld [vmem:[#allocation2 + $0x38] sm:$0xff] (!%p2566_p8)  ;;  %v2093_v4 = vmul.f32 (!%p2566_p8), %v3750_v38, %v2054_v8  ;;  %v2029_v8 = vld [vmem:[#allocation2 + $0x80] sm:$0xff] (!%p2566_p8) }
 0x164   : > { %1997 = vst [vmem:[#allocation2 + $0xa0] sm:$0xff] %v3009_v5  ;;  %v3013_v59 = vadd.f32 %v3012_v63, %v1901_v55  ;;  %v2019_v63 = vld [vmem:[#allocation2 + $0x30] sm:$0xff] (!%p2566_p8)  ;;  %v2057_v5 = vadd.f32 (!%p2566_p8), %v3743_v53, %v2018_v61  ;;  %v2131_v55 = vadd.f32 (!%p2566_p8), %v3755_v40, %v2092_v44 }
 0x165   : > { %2000 = vst [vmem:[#allocation2 + $0xb8] sm:$0xff] %v3011_v2  ;;  %v2058_v48 = vadd.f32 (!%p2566_p8), %v3743_v53, %v2019_v63  ;;  %v2130_v2 = vadd.f32 (!%p2566_p8), %v3755_v40, %v2091_v35 }
 0x166   : > { %v2896_v57 = vpop.f32.mrb[24].mxu1  ;;  %1998 = vst [vmem:[#allocation2 + $0xa8] sm:$0xff] %v3013_v59  ;;  %v2132_v59 = vadd.f32 (!%p2566_p8), %v3755_v40, %v2093_v4  ;;  %v2030_v4 = vld [vmem:[#allocation2 + $0x88] sm:$0xff] (!%p2566_p8) }
 0x167   : > { %v1413_v15 = vpop.f32.mrb[25].mxu1  ;;  %v3014_v12 = vadd.f32 %v2896_v57, %v325_v49  ;;  %v2059_v49 = vadd.f32 (!%p2566_p8), %v3743_v53, %v2020_v6  ;;  %v2094_v57 = vmul.f32 (!%p2566_p8), %v3750_v38, %v2055_v14 }
 0x168   : > { %v2897_v33 = vpop.f32.mrb[26].mxu1  ;;  %v3016_v22 = vadd.f32 %v1413_v15, %v323_v51  ;;  %v2944_v42 = vpop.f32.mrb[24].mxu0  ;;  %v2095_v51 = vmul.f32 (!%p2566_p8), %v3750_v38, %v2056_v58  ;;  %v2096_v15 = vmul.f32 (!%p2566_p8), %v3750_v38, %v2057_v5 }
 0x169   : > { %v1416_v20 = vpop.f32.mrb[27].mxu1  ;;  %v3018_v0 = vadd.f32 %v2897_v33, %v326_v60  ;;  %v3015_v45 = vadd.f32 %v3014_v12, %v2944_v42  ;;  %v1914_v62 = vpop.f32.mrb[25].mxu0  ;;  %v2097_v60 = vmul.f32 (!%p2566_p8), %v3750_v38, %v2058_v48  ;;  %v2098_v12 = vmul.f32 (!%p2566_p8), %v3750_v38, %v2059_v49  ;;  %v2021_v33 = vld [vmem:[#allocation2 + $0x40] sm:$0xff] (!%p2566_p8)  ;;  %v2022_v42 = vld [vmem:[#allocation2 + $0x48] sm:$0xff] (!%p2566_p8) }
 0x16a   : > { %v3020_v3 = vadd.f32 %v1416_v20, %v324_v24  ;;  %v3017_v39 = vadd.f32 %v3016_v22, %v1914_v62  ;;  %v2945_v36 = vpop.f32.mrb[26].mxu0  ;;  %v2162_v24 = vmax.f32 (!%p2566_p8), %v2130_v2, 0.0  ;;  %v2163_v22 = vmax.f32 (!%p2566_p8), %v2131_v55, 0.0  ;;  %v2031_v55 = vld [vmem:[#allocation2 + $0x90] sm:$0xff] (!%p2566_p8) }
 0x16b   : > { %2003 = vst [vmem:[#allocation2 + $0xd0] sm:$0xff] %v3015_v45  ;;  %v3019_v50 = vadd.f32 %v3018_v0, %v2945_v36  ;;  %v1917_v7 = vpop.f32.mrb[27].mxu0  ;;  %v2133_v20 = vadd.f32 (!%p2566_p8), %v3755_v40, %v2094_v57  ;;  %v2134_v0 = vadd.f32 (!%p2566_p8), %v3755_v40, %v2095_v51  ;;  %v2135_v45 = vadd.f32 (!%p2566_p8), %v3755_v40, %v2096_v15  ;;  %v2023_v36 = vld [vmem:[#allocation2 + $0x50] sm:$0xff] (!%p2566_p8)  ;;  %v2032_v57 = vld [vmem:[#allocation2 + $0x98] sm:$0xff] (!%p2566_p8) }
 0x16c   : > { %2001 = vst [vmem:[#allocation2 + $0xc0] sm:$0xff] %v3017_v39  ;;  %v3021_v17 = vadd.f32 %v3020_v3, %v1917_v7  ;;  %v2164_v3 = vmax.f32 (!%p2566_p8), %v2132_v59, 0.0  ;;  %v2136_v62 = vadd.f32 (!%p2566_p8), %v3755_v40, %v2097_v60  ;;  %v2137_v39 = vadd.f32 (!%p2566_p8), %v3755_v40, %v2098_v12  ;;  %v2033_v12 = vld [vmem:[#allocation2 + $0xa0] sm:$0xff] (!%p2566_p8) }
 0x16d   : > { %2004 = vst [vmem:[#allocation2 + $0xd8] sm:$0xff] %v3019_v50  ;;  %v2642_v50 = vpack.c.bf16 (!%p2566_p8), %v2163_v22, %v2162_v24  ;;  %v2165_v7 = vmax.f32 (!%p2566_p8), %v2133_v20, 0.0  ;;  %v2068_v2 = vadd.f32 (!%p2566_p8), %v3743_v53, %v2029_v8  ;;  %v2069_v22 = vadd.f32 (!%p2566_p8), %v3743_v53, %v2030_v4 }
 0x16e   : > { %v2900_v23 = vpop.f32.mrb[28].mxu1  ;;  %2002 = vst [vmem:[#allocation2 + $0xc8] sm:$0xff] %v3021_v17  ;;  %v2060_v17 = vadd.f32 (!%p2566_p8), %v3743_v53, %v2021_v33 }
 0x16f   : > { %v3022_v1 = vadd.f32 %v2900_v23, %v329_v19  ;;  %v1429_v16 = vpop.f32.mrb[29].mxu1  ;;  %v2024_v19 = vld [vmem:[#allocation2 + $0x58] sm:$0xff] (!%p2566_p8)  ;;  %v2025_v23 = vld [vmem:[#allocation2 + $0x60] sm:$0xff] (!%p2566_p8)  ;;  %2643 = vst [vmem:[%s3256_s8] sm:$0xff] (!%p2566_p8), %v2642_v50   ;;  %v2107_v20 = vmul.f32 (!%p2566_p8), %v3750_v38, %v2068_v2 }
 0x170   : > { %v3024_v18 = vadd.f32 %v1429_v16, %v327_v13  ;;  %v2901_v26 = vpop.f32.mrb[30].mxu1  ;;  %v2948_v11 = vpop.f32.mrb[28].mxu0  ;;  %2012 = sbr.rel (%p2566_p8) target bundleno = 405 (0x195), region = 48  ;;  %v2166_v13 = vmax.f32 (!%p2566_p8), %v2134_v0, 0.0  ;;  %v2169_v16 = vmax.f32 (!%p2566_p8), %v2137_v39, 0.0  ;;  %v2034_v0 = vld [vmem:[#allocation2 + $0xa8] sm:$0xff] (!%p2566_p8) }
 0x171   : > { %v3026_v47 = vadd.f32 %v2901_v26, %v330_v32  ;;  %v1432_v21 = vpop.f32.mrb[31].mxu1  ;;  %v3023_v28 = vadd.f32 %v3022_v1, %v2948_v11  ;;  %v1930_v46 = vpop.f32.mrb[29].mxu0  ;;  %v2167_v32 = vmax.f32 (!%p2566_p8), %v2135_v45, 0.0  ;;  %v2168_v1 = vmax.f32 (!%p2566_p8), %v2136_v62, 0.0  ;;  %v2035_v39 = vld [vmem:[#allocation2 + $0xb0] sm:$0xff] (!%p2566_p8) }
 0x172   : > { %v3028_v25 = vadd.f32 %v1432_v21, %v328_v9  ;;  %v3025_v27 = vadd.f32 %v3024_v18, %v1930_v46  ;;  %v2949_v54 = vpop.f32.mrb[30].mxu0  ;;  %v2061_v9 = vadd.f32 (!%p2566_p8), %v3743_v53, %v2022_v42  ;;  %v2026_v18 = vld [vmem:[#allocation2 + $0x68] sm:$0xff] (!%p2566_p8)  ;;  %v2647_v26 = vpack.c.bf16 (!%p2566_p8), %v2165_v7, %v2164_v3 }
 0x173   : > { %2007 = vst [vmem:[#allocation2 + $0xf0] sm:$0xff] %v3023_v28  ;;  %v3027_v43 = vadd.f32 %v3026_v47, %v2949_v54  ;;  %v1933_v31 = vpop.f32.mrb[31].mxu0  ;;  %v2099_v47 = vmul.f32 (!%p2566_p8), %v3750_v38, %v2060_v17  ;;  %v2062_v21 = vadd.f32 (!%p2566_p8), %v3743_v53, %v2023_v36  ;;  %v2063_v11 = vadd.f32 (!%p2566_p8), %v3743_v53, %v2024_v19  ;;  %v2028_v28 = vld [vmem:[#allocation2 + $0x78] sm:$0xff] (!%p2566_p8) }
 0x174   : > { %2005 = vst [vmem:[#allocation2 + $0xe0] sm:$0xff] %v3025_v27  ;;  %v3029_v52 = vadd.f32 %v3028_v25, %v1933_v31  ;;  %v2027_v25 = vld [vmem:[#allocation2 + $0x70] sm:$0xff] (!%p2566_p8)  ;;  %v2652_v46 = vpack.c.bf16 (!%p2566_p8), %v2167_v32, %v2166_v13  ;;  %v2657_v27 = vpack.c.bf16 (!%p2566_p8), %v2169_v16, %v2168_v1  ;;  %v2100_v54 = vmul.f32 (!%p2566_p8), %v3750_v38, %v2061_v9  ;;  %v2036_v13 = vld [vmem:[#allocation2 + $0xb8] sm:$0xff] (!%p2566_p8)  ;;  %v2037_v16 = vld [vmem:[#allocation2 + $0xc0] sm:$0xff] (!%p2566_p8) }
 0x175   : > { %2008 = vst [vmem:[#allocation2 + $0xf8] sm:$0xff] %v3027_v43  ;;  %v2064_v43 = vadd.f32 (!%p2566_p8), %v3743_v53, %v2025_v23  ;;  %2719 = vst [vmem:[%s3256_s8 + $0x8] sm:$0xff] (!%p2566_p8), %v2647_v26   ;;  %v2138_v31 = vadd.f32 (!%p2566_p8), %v3755_v40, %v2099_v47  ;;  %v2102_v29 = vmul.f32 (!%p2566_p8), %v3750_v38, %v2063_v11 }
 0x176   : > { %2006 = vst [vmem:[#allocation2 + $0xe8] sm:$0xff] %v3029_v52  ;;  %v2101_v52 = vmul.f32 (!%p2566_p8), %v3750_v38, %v2062_v21  ;;  %v2065_v30 = vadd.f32 (!%p2566_p8), %v3743_v53, %v2026_v18  ;;  %2720 = vst [vmem:[%s3256_s8 + $0x10] sm:$0xff] (!%p2566_p8), %v2652_v46   ;;  %v2139_v34 = vadd.f32 (!%p2566_p8), %v3755_v40, %v2100_v54  ;;  %v2038_v46 = vld [vmem:[#allocation2 + $0xc8] sm:$0xff] (!%p2566_p8) }
 0x177   : > { %2721 = vst [vmem:[%s3256_s8 + $0x18] sm:$0xff] %v2657_v27   ;;  %v2103_v37 = vmul.f32 %v3750_v38, %v2064_v43  ;;  %v2066_v10 = vadd.f32 %v3743_v53, %v2027_v25  ;;  %v2067_v41 = vadd.f32 %v3743_v53, %v2028_v28  ;;  %v2170_v56 = vmax.f32 %v2138_v31, 0.0 }
 0x178   : > { %v2140_v61 = vadd.f32 %v3755_v40, %v2101_v52  ;;  %v2141_v35 = vadd.f32 %v3755_v40, %v2102_v29  ;;  %v2104_v44 = vmul.f32 %v3750_v38, %v2065_v30  ;;  %v2171_v14 = vmax.f32 %v2139_v34, 0.0 }
 0x179   : > { %v2142_v58 = vadd.f32 %v3755_v40, %v2103_v37  ;;  %v2105_v63 = vmul.f32 %v3750_v38, %v2066_v10  ;;  %v2106_v6 = vmul.f32 %v3750_v38, %v2067_v41  ;;  %v2070_v45 = vadd.f32 %v3743_v53, %v2031_v55  ;;  %v2039_v37 = vld [vmem:[#allocation2 + $0xd0] sm:$0xff]  ;;  %v2040_v10 = vld [vmem:[#allocation2 + $0xd8] sm:$0xff] }
 0x17a   : > { %v2172_v5 = vmax.f32 %v2140_v61, 0.0  ;;  %v2173_v48 = vmax.f32 %v2141_v35, 0.0  ;;  %v2143_v49 = vadd.f32 %v3755_v40, %v2104_v44  ;;  %v2662_v51 = vpack.c.bf16 %v2171_v14, %v2170_v56  ;;  %v2043_v2 = vld [vmem:[#allocation2 + $0xf0] sm:$0xff] }
 0x17b   : > { %v2174_v59 = vmax.f32 %v2142_v58, 0.0  ;;  %v2144_v15 = vadd.f32 %v3755_v40, %v2105_v63  ;;  %v2145_v60 = vadd.f32 %v3755_v40, %v2106_v6  ;;  %v2071_v62 = vadd.f32 %v3743_v53, %v2032_v57  ;;  %v2041_v35 = vld [vmem:[#allocation2 + $0xe0] sm:$0xff] }
 0x17c   : > { %v2667_v33 = vpack.c.bf16 %v2173_v48, %v2172_v5  ;;  %v2175_v24 = vmax.f32 %v2143_v49, 0.0  ;;  %2722 = vst [vmem:[%s3256_s8 + $0x20] sm:$0xff] %v2662_v51   ;;  %v2108_v19 = vmul.f32 %v3750_v38, %v2069_v22  ;;  %v2146_v50 = vadd.f32 %v3755_v40, %v2107_v20 }
 0x17d   : > { %v2176_v42 = vmax.f32 %v2144_v15, 0.0  ;;  %v2177_v3 = vmax.f32 %v2145_v60, 0.0  ;;  %v2072_v7 = vadd.f32 %v3743_v53, %v2033_v12  ;;  %v2109_v23 = vmul.f32 %v3750_v38, %v2070_v45  ;;  %v2042_v6 = vld [vmem:[#allocation2 + $0xe8] sm:$0xff] }
 0x17e   : > { %2723 = vst [vmem:[%s3256_s8 + $0x28] sm:$0xff] %v2667_v33   ;;  %v2672_v36 = vpack.c.bf16 %v2175_v24, %v2174_v59  ;;  %v2110_v32 = vmul.f32 %v3750_v38, %v2071_v62  ;;  %v2073_v1 = vadd.f32 %v3743_v53, %v2034_v0  ;;  %v2147_v9 = vadd.f32 %v3755_v40, %v2108_v19  ;;  %v2044_v24 = vld [vmem:[#allocation2 + $0xf8] sm:$0xff] }
 0x17f   : > { %v2677_v17 = vpack.c.bf16 %v2177_v3, %v2176_v42  ;;  %v2178_v18 = vmax.f32 %v2146_v50, 0.0  ;;  %v2111_v26 = vmul.f32 %v3750_v38, %v2072_v7  ;;  %v2074_v47 = vadd.f32 %v3743_v53, %v2035_v39 }
 0x180   : > { %2724 = vst [vmem:[%s3256_s8 + $0x30] sm:$0xff] %v2672_v36   ;;  %v2148_v21 = vadd.f32 %v3755_v40, %v2109_v23  ;;  %v2149_v11 = vadd.f32 %v3755_v40, %v2110_v32  ;;  %v2112_v25 = vmul.f32 %v3750_v38, %v2073_v1  ;;  %v2075_v28 = vadd.f32 %v3743_v53, %v2036_v13 }
 0x181   : > { %2725 = vst [vmem:[%s3256_s8 + $0x38] sm:$0xff] %v2677_v17   ;;  %v2179_v27 = vmax.f32 %v2147_v9, 0.0  ;;  %v2150_v54 = vadd.f32 %v3755_v40, %v2111_v26  ;;  %v2113_v43 = vmul.f32 %v3750_v38, %v2074_v47  ;;  %v2076_v31 = vadd.f32 %v3743_v53, %v2037_v16 }
 0x182   : > { %v2180_v52 = vmax.f32 %v2148_v21, 0.0  ;;  %v2181_v29 = vmax.f32 %v2149_v11, 0.0  ;;  %v2151_v30 = vadd.f32 %v3755_v40, %v2112_v25  ;;  %v2114_v34 = vmul.f32 %v3750_v38, %v2075_v28 }
 0x183   : > { %v2682_v41 = vpack.c.bf16 %v2179_v27, %v2178_v18  ;;  %v2182_v8 = vmax.f32 %v2150_v54, 0.0  ;;  %v2152_v56 = vadd.f32 %v3755_v40, %v2113_v43  ;;  %v2077_v61 = vadd.f32 %v3743_v53, %v2038_v46 }
 0x184   : > { %v2687_v44 = vpack.c.bf16 %v2181_v29, %v2180_v52  ;;  %v2183_v14 = vmax.f32 %v2151_v30, 0.0  ;;  %v2153_v58 = vadd.f32 %v3755_v40, %v2114_v34  ;;  %v2115_v63 = vmul.f32 %v3750_v38, %v2076_v31 }
 0x185   : > { %2726 = vst [vmem:[%s3256_s8 + $0x40] sm:$0xff] %v2682_v41   ;;  %v2184_v4 = vmax.f32 %v2152_v56, 0.0  ;;  %v2116_v5 = vmul.f32 %v3750_v38, %v2077_v61  ;;  %v2078_v48 = vadd.f32 %v3743_v53, %v2039_v37  ;;  %v2079_v49 = vadd.f32 %v3743_v53, %v2040_v10 }
 0x186   : > { %2727 = vst [vmem:[%s3256_s8 + $0x48] sm:$0xff] %v2687_v44   ;;  %v2692_v55 = vpack.c.bf16 %v2183_v14, %v2182_v8  ;;  %v2185_v57 = vmax.f32 %v2153_v58, 0.0  ;;  %v2154_v51 = vadd.f32 %v3755_v40, %v2115_v63  ;;  %v2080_v59 = vadd.f32 %v3743_v53, %v2041_v35 }
 0x187   : > { %v2155_v15 = vadd.f32 %v3755_v40, %v2116_v5  ;;  %v2117_v60 = vmul.f32 %v3750_v38, %v2078_v48  ;;  %v2118_v12 = vmul.f32 %v3750_v38, %v2079_v49  ;;  %v2081_v33 = vadd.f32 %v3743_v53, %v2042_v6 }
 0x188   : > { %2728 = vst [vmem:[%s3256_s8 + $0x50] sm:$0xff] %v2692_v55   ;;  %v2697_v22 = vpack.c.bf16 %v2185_v57, %v2184_v4  ;;  %v2186_v20 = vmax.f32 %v2154_v51, 0.0  ;;  %v2119_v0 = vmul.f32 %v3750_v38, %v2080_v59  ;;  %v2082_v42 = vadd.f32 %v3743_v53, %v2043_v2 }
 0x189   : > { %v2187_v3 = vmax.f32 %v2155_v15, 0.0  ;;  %v2156_v45 = vadd.f32 %v3755_v40, %v2117_v60  ;;  %v2157_v62 = vadd.f32 %v3755_v40, %v2118_v12  ;;  %v2120_v39 = vmul.f32 %v3750_v38, %v2081_v33 }
 0x18a   : > { %2729 = vst [vmem:[%s3256_s8 + $0x58] sm:$0xff] %v2697_v22   ;;  %v2158_v36 = vadd.f32 %v3755_v40, %v2119_v0  ;;  %v2083_v19 = vadd.f32 %v3743_v53, %v2044_v24  ;;  %v2121_v50 = vmul.f32 %v3750_v38, %v2082_v42 }
 0x18b   : > { %v2702_v7 = vpack.c.bf16 %v2187_v3, %v2186_v20  ;;  %v2188_v13 = vmax.f32 %v2156_v45, 0.0  ;;  %v2189_v17 = vmax.f32 %v2157_v62, 0.0  ;;  %v2159_v23 = vadd.f32 %v3755_v40, %v2120_v39 }
 0x18c   : > { %v2190_v32 = vmax.f32 %v2158_v36, 0.0  ;;  %v2122_v1 = vmul.f32 %v3750_v38, %v2083_v19  ;;  %v2160_v16 = vadd.f32 %v3755_v40, %v2121_v50 }
 0x18d   : > { %2730 = vst [vmem:[%s3256_s8 + $0x60] sm:$0xff] %v2702_v7   ;;  %v2707_v9 = vpack.c.bf16 %v2189_v17, %v2188_v13  ;;  %v2191_v18 = vmax.f32 %v2159_v23, 0.0 }
 0x18e   : > { %v2161_v26 = vadd.f32 %v3755_v40, %v2122_v1  ;;  %v2192_v53 = vmax.f32 %v2160_v16, 0.0 }
 0x18f   : > { %2731 = vst [vmem:[%s3256_s8 + $0x68] sm:$0xff] %v2707_v9   ;;  %v2712_v47 = vpack.c.bf16 %v2191_v18, %v2190_v32 }
 0x190   : > { %v2193_v21 = vmax.f32 %v2161_v26, 0.0 }
 0x191   : > { %2732 = vst [vmem:[%s3256_s8 + $0x70] sm:$0xff] %v2712_v47  }
 0x192   : > { %v2717_v11 = vpack.c.bf16 %v2193_v21, %v2192_v53 }
 0x194   : > { %2733 = vst [vmem:[%s3256_s8 + $0x78] sm:$0xff] %v2717_v11  }
 0x195 PF: > { %s15_s22 = sadd.s32 1, %s3182_s22   ;;  %s3892_s18 = smov %s3174_s20 }
 0x196   : > { %p12_p9 = scmp.ge.s32.totalorder %s15_s22, 8   ;;  %s3893_s19 = smov %s3178_s21 }
 0x197   : > { %s3894_s20 = smov %s3897_s23  ;;  %s3895_s21 = smov %s3901_s24 }
 0x198   :  { %14 = sbr.rel (!%p12_p9) target bundleno = 3 (0x3), region = 84 }

// kernel: wideresnet_forward.23
= control target key start
LH: loop header
LB: loop body
LE: loop exit
PB: predicated region body
PF: predicated region fallthrough
CT: control target
= control target key end

     0   :  { %s710_s15 = smov 0   ;;  %s768_s0 = inlined_call_operand.vmem [shape: bf16[2,64,128], index: 0, kind: input, shape index: {}]   ;;  %s769_s1 = inlined_call_operand.vmem [shape: bf16[128,128], index: 1, kind: input, shape index: {}]   ;;  %s770_s2 = inlined_call_operand.vmem [shape: f32[1,128], index: 2, kind: input, shape index: {}]   ;;  %s771_s3 = inlined_call_operand.vmem [shape: bf16[2,64,128], index: 3, kind: input, shape index: {}]   ;;  %s772_s4 = inlined_call_operand.vmem [shape: bf16[2,64,128], index: 4, kind: output, shape index: {}]  }
   0x1 LB: > { %s518_s16 = sadd.s32 4294967295, %s683_s15   ;;  %p522_p0 = scmp.ge.s32.totalorder %s683_s15, 1  ;;  %s683_s15 = sphi %s710_s15, %s14_s15  }
   0x2   : > { %p172_p1 = scmp.lt.s32.totalorder %s683_s15, 3 }
   0x4   : > { %p173_p2 = pnand %p522_p0, %p172_p1 }
   0x5   : > { %v665_v0 = vld [vmem:[%s769_s1] sm:$0xff] (!%p173_p2)   ;;  %p203_p3 = scmp.lt.s32.totalorder (!%p173_p2), %s518_s16, 1  ;;  %v666_v1 = vld [vmem:[%s769_s1 + $0x8] sm:$0xff] (!%p173_p2)   ;;  %v667_v2 = vld [vmem:[%s769_s1 + $0x10] sm:$0xff] (!%p173_p2)  }
   0x6   : > { %176 = sbr.rel (%p173_p2) target bundleno = 260 (0x104), region = 36  ;;  %617 = vmatprep.subr.bf16.mxu0 (!%p173_p2), %v665_v0  ;;  %641 = vmatprep.subr.bf16.mxu1 (!%p173_p2), %v665_v0  ;;  %v668_v3 = vld [vmem:[%s769_s1 + $0x18] sm:$0xff] (!%p173_p2)   ;;  %v669_v6 = vld [vmem:[%s769_s1 + $0x20] sm:$0xff] (!%p173_p2)   ;;  %v670_v7 = vld [vmem:[%s769_s1 + $0x28] sm:$0xff] (!%p173_p2)  }
   0x7   : > { %618 = vmatpush3.bf16.msra.mxu0 (!%p173_p2), %v665_v0  ;;  %649 = vmatpush3.bf16.msra.mxu1 (!%p173_p2), %v665_v0  ;;  %v671_v8 = vld [vmem:[%s769_s1 + $0x30] sm:$0xff] (!%p173_p2)   ;;  %v672_v9 = vld [vmem:[%s769_s1 + $0x38] sm:$0xff] (!%p173_p2)   ;;  %v529_v16 = vld [vmem:[%s770_s2] ss:$0 sm:$0xff] (!%p173_p2) }
   0x8   : > { %619 = vmatprep.subr.bf16.mxu0 (!%p173_p2), %v666_v1  ;;  %642 = vmatprep.subr.bf16.mxu1 (!%p173_p2), %v666_v1 }
   0xb   : > { %620 = vmatpush3.bf16.msra.mxu0 (!%p173_p2), %v666_v1  ;;  %650 = vmatpush3.bf16.msra.mxu1 (!%p173_p2), %v666_v1 }
   0xc   : > { %621 = vmatprep.subr.bf16.mxu0 (!%p173_p2), %v667_v2  ;;  %643 = vmatprep.subr.bf16.mxu1 (!%p173_p2), %v667_v2 }
   0xd   : > { %s774_s16 = smov (!%p203_p3, %s518_s16), 1 }
   0xe   : > { %s727_s23 = sshll.u32 %s774_s16, 5 }
   0xf   : > { %s733_s26 = scalar_lea.vmem %s768_s0, %s727_s23  ;;  %622 = vmatpush3.bf16.msra.mxu0 %v667_v2  ;;  %651 = vmatpush3.bf16.msra.mxu1 %v667_v2  ;;  %s212_s13 = scalar_lea.vmem %s771_s3, %s727_s23 }
  0x10   : > { %v673_v4 = vld [vmem:[%s733_s26] sm:$0xff]   ;;  %v674_v5 = vld [vmem:[%s733_s26 + $0x10] sm:$0xff]   ;;  %623 = vmatprep.subr.bf16.mxu0 %v668_v3  ;;  %644 = vmatprep.subr.bf16.mxu1 %v668_v3  ;;  %v675_v10 = vld [vmem:[%s733_s26 + $0x8] sm:$0xff]   ;;  %s217_s19 = scalar_lea.vmem %s772_s4, %s727_s23 }
  0x11   : > { %633 = vmatprep.mubr.bf16.mxu0 %v673_v4  ;;  %637 = vmatprep.mubr.bf16.mxu1 %v674_v5  ;;  %v676_v11 = vld [vmem:[%s733_s26 + $0x18] sm:$0xff]   ;;  %v599_v12 = vld [vmem:[%s212_s13 + $0x8] sm:$0xff]   ;;  %v564_v14 = vld [vmem:[%s212_s13] sm:$0xff]  }
  0x12   : > { %v601_v13 = vld [vmem:[%s212_s13 + $0x18] sm:$0xff]   ;;  %v600_v15 = vld [vmem:[%s212_s13 + $0x10] sm:$0xff]   ;;  %v569_v18 = vunpack.c.l.bf16 %v599_v12  ;;  %v565_v21 = vunpack.c.l.bf16 %v564_v14  ;;  %v570_v27 = vunpack.c.h.bf16 %v599_v12  ;;  %v566_v33 = vunpack.c.h.bf16 %v564_v14 }
  0x13   : > { %624 = vmatpush3.bf16.msra.mxu0 %v668_v3  ;;  %652 = vmatpush3.bf16.msra.mxu1 %v668_v3  ;;  %v577_v20 = vunpack.c.l.bf16 %v601_v13  ;;  %v573_v22 = vunpack.c.l.bf16 %v600_v15  ;;  %v578_v28 = vunpack.c.h.bf16 %v601_v13  ;;  %v574_v34 = vunpack.c.h.bf16 %v600_v15 }
  0x14   : > { %625 = vmatprep.subr.bf16.mxu0 %v669_v6  ;;  %645 = vmatprep.subr.bf16.mxu1 %v669_v6 }
  0x17   : > { %626 = vmatpush3.bf16.msra.mxu0 %v669_v6  ;;  %653 = vmatpush3.bf16.msra.mxu1 %v669_v6 }
  0x18   : > { %627 = vmatprep.subr.bf16.mxu0 %v670_v7  ;;  %646 = vmatprep.subr.bf16.mxu1 %v670_v7 }
  0x1b   : > { %628 = vmatpush3.bf16.msra.mxu0 %v670_v7  ;;  %654 = vmatpush3.bf16.msra.mxu1 %v670_v7 }
  0x1c   : > { %629 = vmatprep.subr.bf16.mxu0 %v671_v8  ;;  %647 = vmatprep.subr.bf16.mxu1 %v671_v8 }
  0x1f   : > { %630 = vmatpush3.bf16.msra.mxu0 %v671_v8  ;;  %655 = vmatpush3.bf16.msra.mxu1 %v671_v8 }
  0x20   : > { %631 = vmatprep.subr.bf16.mxu0 %v672_v9  ;;  %648 = vmatprep.subr.bf16.mxu1 %v672_v9 }
  0x23   : > { %632 = vmatpush3.bf16.msra.mxu0 %v672_v9  ;;  %656 = vmatpush3.bf16.msra.mxu1 %v672_v9 }
  0x26   : > { %634 = vmatmul.mubr.bf16.vlgmr.msra.gmra.mrb[0].mxu0 %v675_v10  ;;  %638 = vmatmul.mubr.bf16.vlgmr.msra.gmra.mrb[0].mxu1 %v676_v11 }
  0xf9   : > { %v635_v17 = vpop.f32.mrb[0].mxu0  ;;  %v639_v19 = vpop.f32.mrb[0].mxu1 }
  0xfa   : > { %v365_v23 = vadd.f32 %v635_v17, %v529_v16  ;;  %v381_v24 = vadd.f32 %v639_v19, %v529_v16  ;;  %v356_v25 = vpop.f32.mrb[1].mxu0  ;;  %v372_v26 = vpop.f32.mrb[1].mxu1 }
  0xfb   : > { %v357_v29 = vadd.f32 %v529_v16, %v356_v25  ;;  %v373_v30 = vadd.f32 %v529_v16, %v372_v26  ;;  %v636_v31 = vpop.f32.mrb[2].mxu0  ;;  %v640_v32 = vpop.f32.mrb[2].mxu1 }
  0xfc   : > { %v368_v35 = vadd.f32 %v636_v31, %v529_v16  ;;  %v384_v36 = vadd.f32 %v640_v32, %v529_v16  ;;  %v359_v37 = vpop.f32.mrb[3].mxu0  ;;  %v375_v38 = vpop.f32.mrb[3].mxu1  ;;  %v405_v41 = vadd.f32 %v569_v18, %v365_v23  ;;  %v409_v42 = vadd.f32 %v577_v20, %v381_v24 }
  0xfd   : > { %v360_v39 = vadd.f32 %v529_v16, %v359_v37  ;;  %v376_v40 = vadd.f32 %v529_v16, %v375_v38  ;;  %v403_v45 = vadd.f32 %v565_v21, %v357_v29  ;;  %v407_v46 = vadd.f32 %v573_v22, %v373_v30 }
  0xfe   : > { %v406_v43 = vadd.f32 %v570_v27, %v368_v35  ;;  %v410_v44 = vadd.f32 %v578_v28, %v384_v36 }
  0xff   : > { %v404_v47 = vadd.f32 %v566_v33, %v360_v39  ;;  %v408_v48 = vadd.f32 %v574_v34, %v376_v40 }
 0x100   : > { %v587_v49 = vpack.c.bf16 %v406_v43, %v405_v41  ;;  %v597_v50 = vpack.c.bf16 %v410_v44, %v409_v42 }
 0x101   : > { %v582_v51 = vpack.c.bf16 %v404_v47, %v403_v45  ;;  %v592_v52 = vpack.c.bf16 %v408_v48, %v407_v46 }
 0x102   : > { %602 = vst [vmem:[%s217_s19 + $0x8] sm:$0xff] %v587_v49   ;;  %604 = vst [vmem:[%s217_s19 + $0x18] sm:$0xff] %v597_v50  }
 0x103   : > { %583 = vst [vmem:[%s217_s19] sm:$0xff] %v582_v51   ;;  %603 = vst [vmem:[%s217_s19 + $0x10] sm:$0xff] %v592_v52  }
 0x104 PF: > { %s14_s15 = sadd.s32 1, %s683_s15  }
 0x105   : > { %p11_p4 = scmp.ge.s32.totalorder %s14_s15, 4  }
 0x107   :  { %13 = sbr.rel (!%p11_p4) target bundleno = 1 (0x1), region = 69 }

// kernel: wideresnet_forward.24
= control target key start
LH: loop header
LB: loop body
LE: loop exit
PB: predicated region body
PF: predicated region fallthrough
CT: control target
= control target key end

     0   :  { %s429_s12 = smov 0   ;;  %s459_s0 = inlined_call_operand.vmem [shape: bf16[2,64,128], index: 0, kind: input, shape index: {}]   ;;  %s460_s1 = inlined_call_operand.vmem [shape: f32[1,128], index: 1, kind: input, shape index: {}]   ;;  %s461_s2 = inlined_call_operand.vmem [shape: f32[1,128], index: 2, kind: input, shape index: {}]   ;;  %s462_s3 = inlined_call_operand.vmem [shape: bf16[2,64,128], index: 3, kind: output, shape index: {}]  }
   0x1 LB: > { %s320_s13 = sadd.s32 4294967295, %s407_s12   ;;  %p324_p0 = scmp.ge.s32.totalorder %s407_s12, 1  ;;  %s407_s12 = sphi %s429_s12, %s13_s12  }
   0x2   : > { %p137_p1 = scmp.lt.s32.totalorder %s407_s12, 3 }
   0x4   : > { %p138_p2 = pnand %p324_p0, %p137_p1 }
   0x5   : > { %p161_p3 = scmp.lt.s32.totalorder (!%p138_p2), %s320_s13, 1  ;;  %v329_v0 = vld [vmem:[%s460_s1] ss:$0 sm:$0xff] (!%p138_p2) }
   0x6   : > { %141 = sbr.rel (%p138_p2) target bundleno = 29 (0x1d), region = 32  ;;  %v330_v9 = vld [vmem:[%s461_s2] ss:$0 sm:$0xff] (!%p138_p2) }
   0xd   : > { %s464_s13 = smov (!%p161_p3, %s320_s13), 1 }
   0xe   : > { %s341_s14 = sshll.u32 %s464_s13, 5 }
   0xf   : > { %s165_s17 = scalar_lea.vmem %s459_s0, %s341_s14  ;;  %s170_s24 = scalar_lea.vmem %s462_s3, %s341_s14 }
  0x10   : > { %v352_v1 = vld [vmem:[%s165_s17] sm:$0xff]   ;;  %v387_v2 = vld [vmem:[%s165_s17 + $0x8] sm:$0xff]   ;;  %v388_v3 = vld [vmem:[%s165_s17 + $0x10] sm:$0xff]  }
  0x11   : > { %v353_v4 = vunpack.c.l.bf16 %v352_v1  ;;  %v354_v5 = vunpack.c.h.bf16 %v352_v1  ;;  %v357_v6 = vunpack.c.l.bf16 %v387_v2  ;;  %v358_v7 = vunpack.c.h.bf16 %v387_v2  ;;  %v389_v8 = vld [vmem:[%s165_s17 + $0x18] sm:$0xff]  }
  0x12   : > { %v361_v10 = vunpack.c.l.bf16 %v388_v3  ;;  %v362_v11 = vunpack.c.h.bf16 %v388_v3  ;;  %v365_v12 = vunpack.c.l.bf16 %v389_v8  ;;  %v366_v13 = vunpack.c.h.bf16 %v389_v8 }
  0x13   : > { %v194_v14 = vmul.f32 %v353_v4, %v329_v0  ;;  %v195_v15 = vmul.f32 %v354_v5, %v329_v0  ;;  %v196_v16 = vmul.f32 %v357_v6, %v329_v0  ;;  %v197_v17 = vmul.f32 %v358_v7, %v329_v0 }
  0x14   : > { %v198_v18 = vmul.f32 %v361_v10, %v329_v0  ;;  %v199_v19 = vmul.f32 %v362_v11, %v329_v0  ;;  %v200_v20 = vmul.f32 %v365_v12, %v329_v0  ;;  %v201_v21 = vmul.f32 %v366_v13, %v329_v0 }
  0x15   : > { %v209_v22 = vadd.f32 %v330_v9, %v194_v14  ;;  %v210_v23 = vadd.f32 %v330_v9, %v195_v15  ;;  %v211_v24 = vadd.f32 %v330_v9, %v196_v16  ;;  %v212_v25 = vadd.f32 %v330_v9, %v197_v17 }
  0x16   : > { %v213_v26 = vadd.f32 %v330_v9, %v198_v18  ;;  %v214_v27 = vadd.f32 %v330_v9, %v199_v19  ;;  %v215_v28 = vadd.f32 %v330_v9, %v200_v20  ;;  %v216_v29 = vadd.f32 %v330_v9, %v201_v21 }
  0x17   : > { %v217_v30 = vmax.f32 %v209_v22, 0.0  ;;  %v218_v31 = vmax.f32 %v210_v23, 0.0  ;;  %v219_v32 = vmax.f32 %v211_v24, 0.0  ;;  %v220_v33 = vmax.f32 %v212_v25, 0.0 }
  0x18   : > { %v221_v34 = vmax.f32 %v213_v26, 0.0  ;;  %v222_v35 = vmax.f32 %v214_v27, 0.0  ;;  %v223_v36 = vmax.f32 %v215_v28, 0.0  ;;  %v224_v37 = vmax.f32 %v216_v29, 0.0 }
  0x19   : > { %v370_v38 = vpack.c.bf16 %v218_v31, %v217_v30  ;;  %v375_v39 = vpack.c.bf16 %v220_v33, %v219_v32 }
  0x1a   : > { %v380_v40 = vpack.c.bf16 %v222_v35, %v221_v34  ;;  %v385_v41 = vpack.c.bf16 %v224_v37, %v223_v36 }
  0x1b   : > { %371 = vst [vmem:[%s170_s24] sm:$0xff] %v370_v38   ;;  %390 = vst [vmem:[%s170_s24 + $0x8] sm:$0xff] %v375_v39  }
  0x1c   : > { %391 = vst [vmem:[%s170_s24 + $0x10] sm:$0xff] %v380_v40   ;;  %392 = vst [vmem:[%s170_s24 + $0x18] sm:$0xff] %v385_v41  }
  0x1d PF: > { %s13_s12 = sadd.s32 1, %s407_s12  }
  0x1e   : > { %p10_p4 = scmp.ge.s32.totalorder %s13_s12, 4  }
  0x20   :  { %12 = sbr.rel (!%p10_p4) target bundleno = 1 (0x1), region = 62 }

// kernel: wideresnet_forward.28
= control target key start
LH: loop header
LB: loop body
LE: loop exit
PB: predicated region body
PF: predicated region fallthrough
CT: control target
= control target key end

     0   :  { %s324_s12 = smov 0   ;;  %s341_s0 = inlined_call_operand.vmem [shape: bf16[2,16,128], index: 0, kind: input, shape index: {}]   ;;  %s342_s1 = inlined_call_operand.vmem [shape: f32[1,128], index: 1, kind: input, shape index: {}]   ;;  %s343_s2 = inlined_call_operand.vmem [shape: f32[1,128], index: 2, kind: input, shape index: {}]   ;;  %s344_s3 = inlined_call_operand.vmem [shape: bf16[2,16,128], index: 3, kind: output, shape index: {}]  }
   0x1 LB: > { %s260_s13 = sadd.s32 4294967295, %s302_s12   ;;  %p264_p0 = scmp.ge.s32.totalorder %s302_s12, 1  ;;  %s302_s12 = sphi %s324_s12, %s13_s12  }
   0x2   : > { %p137_p1 = scmp.lt.s32.totalorder %s302_s12, 3 }
   0x4   : > { %p138_p2 = pnand %p264_p0, %p137_p1 }
   0x5   : > { %p161_p3 = scmp.lt.s32.totalorder (!%p138_p2), %s260_s13, 1  ;;  %v269_v1 = vld [vmem:[%s342_s1] ss:$0 sm:$0xff] (!%p138_p2) }
   0x6   : > { %141 = sbr.rel (%p138_p2) target bundleno = 28 (0x1c), region = 32  ;;  %v270_v4 = vld [vmem:[%s343_s2] ss:$0 sm:$0xff] (!%p138_p2) }
   0xd   : > { %s346_s13 = smov (!%p161_p3, %s260_s13), 1 }
   0xe   : > { %s275_s14 = sshll.u32 %s346_s13, 3 }
   0xf   : > { %s165_s17 = scalar_lea.vmem %s341_s0, %s275_s14  ;;  %s170_s24 = scalar_lea.vmem %s344_s3, %s275_s14 }
  0x10   : > { %v280_v0 = vld [vmem:[%s165_s17] sm:$0xff]  }
  0x11   : > { %v281_v2 = vunpack.c.l.bf16 %v280_v0  ;;  %v282_v3 = vunpack.c.h.bf16 %v280_v0 }
  0x13   : > { %v182_v5 = vmul.f32 %v281_v2, %v269_v1  ;;  %v183_v6 = vmul.f32 %v282_v3, %v269_v1 }
  0x15   : > { %v191_v7 = vadd.f32 %v270_v4, %v182_v5  ;;  %v192_v8 = vadd.f32 %v270_v4, %v183_v6 }
  0x17   : > { %v193_v9 = vmax.f32 %v191_v7, 0.0  ;;  %v194_v10 = vmax.f32 %v192_v8, 0.0 }
  0x19   : > { %v286_v11 = vpack.c.bf16 %v194_v10, %v193_v9 }
  0x1b   : > { %287 = vst [vmem:[%s170_s24] sm:$0xff] %v286_v11  }
  0x1c PF: > { %s13_s12 = sadd.s32 1, %s302_s12  }
  0x1d   : > { %p10_p4 = scmp.ge.s32.totalorder %s13_s12, 4  }
  0x1f   :  { %12 = sbr.rel (!%p10_p4) target bundleno = 1 (0x1), region = 62 }

// kernel: wideresnet_forward.27
= control target key start
LH: loop header
LB: loop body
LE: loop exit
PB: predicated region body
PF: predicated region fallthrough
CT: control target
= control target key end

     0   :  { %s544_s15 = smov 0   ;;  %s596_s0 = inlined_call_operand.vmem [shape: bf16[2,16,128], index: 0, kind: input, shape index: {}]   ;;  %s597_s1 = inlined_call_operand.vmem [shape: bf16[128,128], index: 1, kind: input, shape index: {}]   ;;  %s598_s2 = inlined_call_operand.vmem [shape: f32[1,128], index: 2, kind: input, shape index: {}]   ;;  %s599_s3 = inlined_call_operand.vmem [shape: bf16[2,16,128], index: 3, kind: input, shape index: {}]   ;;  %s600_s4 = inlined_call_operand.vmem [shape: bf16[2,16,128], index: 4, kind: output, shape index: {}]  }
   0x1 LB: > { %s422_s16 = sadd.s32 4294967295, %s515_s15   ;;  %p426_p0 = scmp.ge.s32.totalorder %s515_s15, 1  ;;  %s515_s15 = sphi %s544_s15, %s14_s15  }
   0x2   : > { %p172_p1 = scmp.lt.s32.totalorder %s515_s15, 3 }
   0x4   : > { %p173_p2 = pnand %p426_p0, %p172_p1 }
   0x5   : > { %v500_v0 = vld [vmem:[%s597_s1] sm:$0xff] (!%p173_p2)   ;;  %v517_v1 = vmov (!%p173_p2), 0.0   ;;  %v501_v2 = vld [vmem:[%s597_s1 + $0x8] sm:$0xff] (!%p173_p2)   ;;  %vm518_vm0 = vmmov (!%p173_p2), 0   ;;  %p203_p3 = scmp.lt.s32.totalorder (!%p173_p2), %s422_s16, 1  ;;  %v502_v3 = vld [vmem:[%s597_s1 + $0x10] sm:$0xff] (!%p173_p2)  }
   0x6   : > { %176 = sbr.rel (%p173_p2) target bundleno = 259 (0x103), region = 36  ;;  %470 = vmatprep.subr.bf16.mxu0 (!%p173_p2), %v517_v1  ;;  %486 = vmatprep.mubr.msk.bf16.mxu0 (!%p173_p2), %vm518_vm0, %v517_v1  ;;  %v503_v4 = vld [vmem:[%s597_s1 + $0x18] sm:$0xff] (!%p173_p2)   ;;  %v504_v5 = vld [vmem:[%s597_s1 + $0x20] sm:$0xff] (!%p173_p2)   ;;  %v505_v6 = vld [vmem:[%s597_s1 + $0x28] sm:$0xff] (!%p173_p2)  }
   0x7   : > { %471 = vmatpush3.bf16.msra.mxu0 (!%p173_p2), %v500_v0  ;;  %v506_v7 = vld [vmem:[%s597_s1 + $0x30] sm:$0xff] (!%p173_p2)   ;;  %v507_v8 = vld [vmem:[%s597_s1 + $0x38] sm:$0xff] (!%p173_p2)   ;;  %v433_v10 = vld [vmem:[%s598_s2] ss:$0 sm:$0xff] (!%p173_p2) }
   0x8   : > { %472 = vmatprep.subr.bf16.mxu0 (!%p173_p2), %v517_v1 }
   0xb   : > { %473 = vmatpush3.bf16.msra.mxu0 (!%p173_p2), %v501_v2 }
   0xc   : > { %474 = vmatprep.subr.bf16.mxu0 (!%p173_p2), %v517_v1 }
   0xd   : > { %s602_s16 = smov (!%p203_p3, %s422_s16), 1 }
   0xe   : > { %s561_s23 = sshll.u32 %s602_s16, 3 }
   0xf   : > { %s207_s26 = scalar_lea.vmem %s596_s0, %s561_s23  ;;  %475 = vmatpush3.bf16.msra.mxu0 %v502_v3  ;;  %s212_s13 = scalar_lea.vmem %s599_s3, %s561_s23 }
  0x10   : > { %476 = vmatprep.subr.bf16.mxu0 %v517_v1  ;;  %v508_v9 = vld [vmem:[%s207_s26] sm:$0xff]   ;;  %s217_s19 = scalar_lea.vmem %s600_s4, %s561_s23 }
  0x11   : > { %v453_v11 = vld [vmem:[%s212_s13] sm:$0xff]  }
  0x12   : > { %v454_v14 = vunpack.c.l.bf16 %v453_v11  ;;  %v455_v16 = vunpack.c.h.bf16 %v453_v11 }
  0x13   : > { %477 = vmatpush3.bf16.msra.mxu0 %v503_v4 }
  0x14   : > { %478 = vmatprep.subr.bf16.mxu0 %v517_v1 }
  0x17   : > { %479 = vmatpush3.bf16.msra.mxu0 %v504_v5 }
  0x18   : > { %480 = vmatprep.subr.bf16.mxu0 %v517_v1 }
  0x1b   : > { %481 = vmatpush3.bf16.msra.mxu0 %v505_v6 }
  0x1c   : > { %482 = vmatprep.subr.bf16.mxu0 %v517_v1 }
  0x1f   : > { %483 = vmatpush3.bf16.msra.mxu0 %v506_v7 }
  0x20   : > { %484 = vmatprep.subr.bf16.mxu0 %v517_v1 }
  0x23   : > { %485 = vmatpush3.bf16.msra.mxu0 %v507_v8 }
  0x26   : > { %487 = vmatmul.mubr.bf16.vlgmr.msra.gmra.mrb[0].mxu0 %v508_v9 }
  0xf9   : > { %v332_v12 = vpop.f32.mrb[0].mxu0 }
  0xfa   : > { %v333_v13 = vadd.f32 %v433_v10, %v332_v12  ;;  %v488_v15 = vpop.f32.mrb[1].mxu0 }
  0xfb   : > { %v335_v17 = vpop.f32.mrb[2].mxu0 }
  0xfc   : > { %v336_v18 = vadd.f32 %v433_v10, %v335_v17  ;;  %v489_v19 = vpop.f32.mrb[3].mxu0  ;;  %v343_v20 = vadd.f32 %v454_v14, %v333_v13 }
  0xfe   : > { %v344_v21 = vadd.f32 %v455_v16, %v336_v18 }
 0x100   : > { %v459_v22 = vpack.c.bf16 %v344_v21, %v343_v20 }
 0x102   : > { %460 = vst [vmem:[%s217_s19] sm:$0xff] %v459_v22  }
 0x103 PF: > { %s14_s15 = sadd.s32 1, %s515_s15  }
 0x104   : > { %p11_p4 = scmp.ge.s32.totalorder %s14_s15, 4  }
 0x106   :  { %13 = sbr.rel (!%p11_p4) target bundleno = 1 (0x1), region = 69 }

// kernel: wideresnet_forward.25
= control target key start
LH: loop header
LB: loop body
LE: loop exit
PB: predicated region body
PF: predicated region fallthrough
CT: control target
= control target key end

     0   :  { %s1572_s18 = smov 0   ;;  %s1574_s19 = smov 0   ;;  %s1786_s0 = inlined_call_operand.vmem [shape: bf16[2,10,10,128], index: 0, kind: input, shape index: {}]   ;;  %s1787_s1 = inlined_call_operand.vmem [shape: bf16[9,128,128], index: 1, kind: input, shape index: {}]   ;;  %s1788_s2 = inlined_call_operand.vmem [shape: f32[1,128], index: 2, kind: input, shape index: {}]   ;;  %s1789_s3 = inlined_call_operand.vmem [shape: f32[1,128], index: 3, kind: input, shape index: {}]   ;;  %s1790_s4 = inlined_call_operand.vmem [shape: f32[1,128], index: 4, kind: input, shape index: {}]   ;;  %s1791_s5 = inlined_call_operand.vmem [shape: bf16[2,64,128], index: 5, kind: output, shape index: {}]  }
   0x1   :  { %s1576_s20 = smov 0   ;;  %s1578_s21 = smov 0  }
   0x2   :  { %s1580_s22 = smov 0  }
   0x3 LB: > { %s24_s23 = sadd.s32 1, %s1531_s20  ;;  %s27_s24 = sadd.s32 1, %s1535_s21  ;;  %s1539_s22 = sphi %s1580_s22, %s15_s22   ;;  %s1535_s21 = sphi %s1578_s21, %s1799_s21   ;;  %s1531_s20 = sphi %s1576_s20, %s1798_s20   ;;  %s1527_s19 = sphi %s1574_s19, %s1797_s19   ;;  %s1523_s18 = sphi %s1572_s18, %s1796_s18  }
   0x4   : > { %p25_p0 = scmp.ge.s32.totalorder %s24_s23, 3  ;;  %p1150_p1 = scmp.ge.s32.totalorder %s1539_s22, 1 }
   0x5   : > { %p211_p2 = scmp.lt.s32.totalorder %s1539_s22, 7 }
   0x6   : > { %s1801_s23 = smov (%p25_p0, %s24_s23), 0  ;;  %s1803_s24 = smov (!%p25_p0, %s27_s24), %s1535_s21 }
   0x7   : > { %p212_p3 = pnand %p1150_p1, %p211_p2  ;;  %p29_p4 = scmp.ge.s32.totalorder %s1803_s24, 2 }
   0x8   : > { %p245_p5 = scmp.lt.s32.totalorder (!%p212_p3), %s1527_s19, 1  ;;  %s250_s25 = smul.u32 (!%p212_p3), 3, %s1523_s18 }
   0x9   : > { %s1805_s24 = smov (%p29_p4, %s1803_s24), 0  ;;  %215 = sbr.rel (%p212_p3) target bundleno = 330 (0x14a), region = 40 }
   0xa   : > { %p251_p6 = scmp.lt.s32.totalorder (!%p212_p3), %s250_s25, 8  ;;  %p1156_p7 = scmp.ne.s32.totalorder (!%p212_p3), %s1523_s18, 0 }
  0x10   : > { %s1807_s19 = smov (!%p245_p5, %s1527_s19), 1  ;;  %s1809_s25 = smov (!%p251_p6, %s250_s25), 8 }
  0x11   : > { %s1431_s26 = smul.u32 80, %s1807_s19  ;;  %s1250_s27 = sshll.u32 %s1807_s19, 5  ;;  %v1541_v0 = vmov (!%p1156_p7), 0.0  }
  0x12   : > { %s1613_s8 = scalar_lea.vmem %s1791_s5, %s1250_s27  ;;  %s1249_s9 = sshll.u32 %s1809_s25, 6  ;;  %267 = vst [vmem:[#allocation2] sm:$0xff] (!%p1156_p7), %v1541_v0  ;;  %268 = vst [vmem:[#allocation2 + $0x8] sm:$0xff] (!%p1156_p7), %v1541_v0 }
  0x13   : > { %s1608_s30 = scalar_lea.vmem %s1786_s0, %s1431_s26  ;;  %s1618_s12 = scalar_lea.vmem %s1787_s1, %s1249_s9  ;;  %269 = vst [vmem:[#allocation2 + $0x10] sm:$0xff] (!%p1156_p7), %v1541_v0  ;;  %270 = vst [vmem:[#allocation2 + $0x18] sm:$0xff] (!%p1156_p7), %v1541_v0 }
  0x14   : > { %266 = sbr.rel (%p1156_p7) target bundleno = 27 (0x1b), region = 44  ;;  %271 = vst [vmem:[#allocation2 + $0x20] sm:$0xff] (!%p1156_p7), %v1541_v0  ;;  %272 = vst [vmem:[#allocation2 + $0x28] sm:$0xff] (!%p1156_p7), %v1541_v0 }
  0x15   : > { %273 = vst [vmem:[#allocation2 + $0x30] sm:$0xff] (!%p1156_p7), %v1541_v0  ;;  %274 = vst [vmem:[#allocation2 + $0x38] sm:$0xff] (!%p1156_p7), %v1541_v0 }
  0x1b PF: > { %v1473_v1 = vld [vmem:[%s1618_s12] sm:$0xff]   ;;  %v1475_v3 = vld [vmem:[%s1618_s12 + $0x8] sm:$0xff]   ;;  %v1477_v5 = vld [vmem:[%s1618_s12 + $0x10] sm:$0xff]   ;;  %s1251_s13 = sshll.u32 %s1523_s18, 3  ;;  %vm471_vm0 = vsmask.f32 3328 }
  0x1c   : > { %v1474_v2 = vld [vmem:[%s1618_s12 + $0x40] sm:$0xff]   ;;  %1319 = vmatprep.subr.bf16.mxu1 %v1473_v1  ;;  %v1476_v4 = vld [vmem:[%s1618_s12 + $0x48] sm:$0xff]   ;;  %v1478_v6 = vld [vmem:[%s1618_s12 + $0x50] sm:$0xff]   ;;  %s1634_s14 = scalar_lea.vmem %s1608_s30, %s1251_s13  ;;  %vm472_vm1 = vsmask.f32 7440  ;;  %vm764_vm3 = vcmask 1042432  }
  0x1d   : > { %1343 = vmatprep.subr.bf16.mxu0 %v1474_v2  ;;  %1320 = vmatpush3.bf16.msra.mxu1 %v1473_v1  ;;  %v1479_v7 = vld [vmem:[%s1618_s12 + $0x18] sm:$0xff]   ;;  %v1481_v9 = vld [vmem:[%s1618_s12 + $0x20] sm:$0xff]   ;;  %v1483_v11 = vld [vmem:[%s1618_s12 + $0x28] sm:$0xff]   ;;  %vm765_vm4 = vcmask 1046532   ;;  %p1235_p8 = scmp.ne.s32.totalorder %s1523_s18, 2 }
  0x1e   : > { %1344 = vmatpush3.bf16.msra.mxu0 %v1474_v2  ;;  %1321 = vmatprep.subr.bf16.mxu1 %v1475_v3  ;;  %v1480_v8 = vld [vmem:[%s1618_s12 + $0x58] sm:$0xff]   ;;  %v1482_v10 = vld [vmem:[%s1618_s12 + $0x60] sm:$0xff]   ;;  %v1484_v13 = vld [vmem:[%s1618_s12 + $0x68] sm:$0xff]  }
  0x1f   : > { %1345 = vmatprep.subr.bf16.mxu0 %v1476_v4  ;;  %v1489_v12 = vld [vmem:[%s1634_s14] ss:$8 sps:$4 sm:$0xff]   ;;  %v1640_v15 = vld [vmem:[%s1634_s14 + $0x4] sm:$0x1]  ;;  %v1485_v17 = vld [vmem:[%s1618_s12 + $0x30] sm:$0xff]  }
  0x20   : > { %1335 = vmatprep.mubr.bf16.mxu1 %v1489_v12  ;;  %v455_v14 = vld [vmem:[%s1634_s14] sm:$0xf]  ;;  %v457_v16 = vld [vmem:[%s1634_s14 + $0x8] sm:$0xf]  ;;  %v1486_v18 = vld [vmem:[%s1618_s12 + $0x70] sm:$0xff]   ;;  %v484_v22 = vshll.u32 %v1640_v15, 16 }
  0x21   : > { %1322 = vmatpush3.bf16.msra.mxu1 %v1475_v3  ;;  %v1646_v19 = vld [vmem:[%s1634_s14 + $0xc] sm:$0x1]  ;;  %v475_v20 = vshrl.u32 %v455_v14, 16  ;;  %v478_v21 = vshll.u32 %v455_v14, 16  ;;  %v489_v23 = vshrl.u32 %v457_v16, 16  ;;  %v492_v24 = vshll.u32 %v457_v16, 16  ;;  %vm1662_vm2 = vmor %vm471_vm0, %vm472_vm1 }
  0x22   : > { %1346 = vmatpush3.bf16.msra.mxu0 %v1476_v4  ;;  %1323 = vmatprep.subr.bf16.mxu1 %v1477_v5  ;;  %v498_v25 = vshll.u32 %v1646_v19, 16  ;;  %v1487_v26 = vld [vmem:[%s1618_s12 + $0x38] sm:$0xff]   ;;  %v486_v29 = vrot.slane %v484_v22, 5  ;;  %v459_v33 = vld [vmem:[%s1634_s14 + $0x10] sm:$0xf]  ;;  %v1491_v58 = vld [vmem:[%s1618_s12 + $0x80] sm:$0xff]  }
  0x23   : > { %1347 = vmatprep.subr.bf16.mxu0 %v1478_v6  ;;  %v477_v27 = vrot.slane %v475_v20, 4  ;;  %v480_v28 = vrot.slane %v478_v21, 5  ;;  %v491_v30 = vrot.slane %v489_v23, 4  ;;  %v494_v31 = vrot.slane %v492_v24, 5  ;;  %v1653_v34 = vld [vmem:[%s1634_s14 + $0x14] sm:$0x1]  ;;  %vm1716_vm5 = vmor %vm764_vm3, %vm765_vm4 }
  0x24   : > { %v500_v32 = vrot.slane %v498_v25, 5  ;;  %v461_v36 = vld [vmem:[%s1634_s14 + $0x18] sm:$0xf]  ;;  %v1657_v37 = vld [vmem:[%s1634_s14 + $0x1c] sm:$0x1]  ;;  %v503_v38 = vshrl.u32 %v459_v33, 16 }
  0x25   : > { %1324 = vmatpush3.bf16.msra.mxu1 %v1477_v5  ;;  %v481_v35 = vor.u32 %v480_v28, %v477_v27  ;;  %v506_v39 = vshll.u32 %v459_v33, 16  ;;  %v1488_v40 = vld [vmem:[%s1618_s12 + $0x78] sm:$0xff]   ;;  %v495_v42 = vor.u32 %v494_v31, %v491_v30  ;;  %v512_v43 = vshll.u32 %v1653_v34, 16  ;;  %v1496_v1 = vld [vmem:[%s1634_s14 + $0x20] ss:$8 sps:$4 sm:$0xff]   ;;  %v1493_v14 = vld [vmem:[%s1618_s12 + $0x90] sm:$0xff]  }
  0x26   : > { %1348 = vmatpush3.bf16.msra.mxu0 %v1478_v6  ;;  %1325 = vmatprep.subr.bf16.mxu1 %v1479_v7  ;;  %v517_v44 = vshrl.u32 %v461_v36, 16  ;;  %v520_v45 = vshll.u32 %v461_v36, 16  ;;  %v505_v47 = vrot.slane %v503_v38, 4  ;;  %v526_v49 = vshll.u32 %v1657_v37, 16  ;;  %v1490_v53 = vld [vmem:[%s1634_s14 + $0x10] ss:$8 sps:$4 sm:$0xff]  }
  0x27   : > { %1349 = vmatprep.subr.bf16.mxu0 %v1480_v8  ;;  %v482_v46 = vrot.slane %v481_v35, 4  ;;  %v508_v48 = vrot.slane %v506_v39, 5  ;;  %v496_v50 = vrot.slane %v495_v42, 4  ;;  %v514_v56 = vrot.slane %v512_v43, 5  ;;  %v1492_v4 = vld [vmem:[%s1618_s12 + $0x88] sm:$0xff]  }
  0x28   : > { %v519_v51 = vrot.slane %v517_v44, 4  ;;  %v522_v52 = vrot.slane %v520_v45, 5  ;;  %v528_v60 = vrot.slane %v526_v49, 5  ;;  %v769_v63 = vrot.slane %v1640_v15, 5  ;;  %v463_v6 = vld [vmem:[%s1634_s14 + $0x20] sm:$0xf] }
  0x29   : > { %1326 = vmatpush3.bf16.msra.mxu1 %v1479_v7  ;;  %v487_v54 = vsel %vm1662_vm2, %v482_v46, %v486_v29  ;;  %v509_v55 = vor.u32 %v508_v48, %v505_v47  ;;  %v501_v57 = vsel %vm1662_vm2, %v496_v50, %v500_v32  ;;  %v773_v2 = vrot.slane %v1646_v19, 5  ;;  %v1684_v7 = vld [vmem:[%s1634_s14 + $0x24] sm:$0x1]  ;;  %v1497_v20 = vld [vmem:[%s1634_s14 + $0x30] ss:$8 sps:$4 sm:$0xff]  }
  0x2a   : > { %1350 = vmatpush3.bf16.msra.mxu0 %v1480_v8  ;;  %1327 = vmatprep.subr.bf16.mxu1 %v1481_v9  ;;  %v523_v59 = vor.u32 %v522_v52, %v519_v51  ;;  %v1187_v61 = vcombine.low %v487_v54, %v501_v57  ;;  %v465_v8 = vld [vmem:[%s1634_s14 + $0x28] sm:$0xf]  ;;  %v534_v12 = vshll.u32 %v463_v6, 16  ;;  %v467_v27 = vld [vmem:[%s1634_s14 + $0x30] sm:$0xf]  ;;  %v1494_v32 = vld [vmem:[%s1618_s12 + $0x98] sm:$0xff]  }
  0x2b   : > { %1351 = vmatprep.subr.bf16.mxu0 %v1482_v10  ;;  %v510_v62 = vrot.slane %v509_v55, 4  ;;  %v545_v16 = vshrl.u32 %v465_v8, 16  ;;  %v1696_v29 = vld [vmem:[%s1634_s14 + $0x34] sm:$0x1]  ;;  %v469_v30 = vld [vmem:[%s1634_s14 + $0x38] sm:$0xf] }
  0x2c   : > { %v524_v0 = vrot.slane %v523_v59, 4  ;;  %1359 = vmatprep.mubr.bf16.mxu0 %v1187_v61  ;;  %v536_v22 = vrot.slane %v534_v12, 5  ;;  %v1700_v31 = vld [vmem:[%s1634_s14 + $0x3c] sm:$0x1]  ;;  %v559_v35 = vshrl.u32 %v467_v27, 16  ;;  %v562_v36 = vshll.u32 %v467_v27, 16 }
  0x2d   : > { %1328 = vmatpush3.bf16.msra.mxu1 %v1481_v9  ;;  %v515_v3 = vsel %vm1662_vm2, %v510_v62, %v514_v56  ;;  %v547_v24 = vrot.slane %v545_v16, 4  ;;  %v568_v38 = vshll.u32 %v1696_v29, 16  ;;  %v576_v42 = vshll.u32 %v469_v30, 16  ;;  %v1495_v48 = vld [vmem:[%s1618_s12 + $0xa0] sm:$0xff]   ;;  %v746_v16 = vld [vmem:[%s1634_s14 + $0x30] sm:$0xe] }
  0x2e   : > { %1352 = vmatpush3.bf16.msra.mxu0 %v1482_v10  ;;  %1329 = vmatprep.subr.bf16.mxu1 %v1483_v11  ;;  %v529_v5 = vsel %vm1662_vm2, %v524_v0, %v528_v60  ;;  %v1688_v10 = vld [vmem:[%s1634_s14 + $0x2c] sm:$0x1]  ;;  %v582_v43 = vshll.u32 %v1700_v31, 16  ;;  %v561_v45 = vrot.slane %v559_v35, 4  ;;  %v564_v46 = vrot.slane %v562_v36, 5 }
  0x2f   : > { %1353 = vmatprep.subr.bf16.mxu0 %v1484_v13  ;;  %v1188_v9 = vcombine.low %v515_v3, %v529_v5  ;;  %v785_v47 = vrot.slane %v1684_v7, 5  ;;  %v578_v51 = vrot.slane %v576_v42, 5  ;;  %v789_v52 = vrot.slane %v1688_v10, 5  ;;  %v740_v57 = vld [vmem:[%s1634_s14] sm:$0xe] }
  0x30   : > { %v565_v54 = vor.u32 %v564_v46, %v561_v45  ;;  %v570_v55 = vrot.slane %v568_v38, 5  ;;  %v584_v56 = vrot.slane %v582_v43, 5  ;;  %v1199_v62 = vrot.slane %v740_v57, 9  ;;  %v745_v3 = vld [vmem:[%s1634_s14 + $0x28] sm:$0xe]  ;;  %v281_v43 = vld [vmem:[#allocation2 + $0x30] sm:$0xff] }
  0x31   : > { %1330 = vmatpush3.bf16.msra.mxu1 %v1483_v11  ;;  %v531_v11 = vshrl.u32 %v463_v6, 16  ;;  %v1204_v6 = vrot.slane %v745_v3, 9  ;;  %v742_v41 = vld [vmem:[%s1634_s14 + $0x10] sm:$0xe]  ;;  %v279_v45 = vld [vmem:[#allocation2 + $0x20] sm:$0xff]  ;;  %v282_v46 = vld [vmem:[#allocation2 + $0x38] sm:$0xff] }
  0x32   : > { %1354 = vmatpush3.bf16.msra.mxu0 %v1484_v13  ;;  %1331 = vmatprep.subr.bf16.mxu1 %v1485_v17  ;;  %v540_v13 = vshll.u32 %v1684_v7, 16  ;;  %v1201_v27 = vrot.slane %v742_v41, 9  ;;  %v276_v3 = vld [vmem:[#allocation2 + $0x8] sm:$0xff] }
  0x33   : > { %1355 = vmatprep.subr.bf16.mxu0 %v1486_v18  ;;  %v533_v21 = vrot.slane %v531_v11, 4  ;;  %v790_v15 = vsel %vm1716_vm5, %v1204_v6, %v789_v52 }
  0x34   : > { %v542_v23 = vrot.slane %v540_v13, 5 }
  0x35   : > { %1332 = vmatpush3.bf16.msra.mxu1 %v1485_v17  ;;  %v548_v17 = vshll.u32 %v465_v8, 16  ;;  %v537_v28 = vor.u32 %v536_v22, %v533_v21  ;;  %v770_v8 = vsel %vm1716_vm5, %v1199_v62, %v769_v63  ;;  %v1498_v63 = vld [vmem:[%s1618_s12 + $0xa8] sm:$0xff]   ;;  %v797_v21 = vrot.slane %v1700_v31, 5  ;;  %v278_v62 = vld [vmem:[#allocation2 + $0x18] sm:$0xff] }
  0x36   : > { %1356 = vmatpush3.bf16.msra.mxu0 %v1486_v18  ;;  %1333 = vmatprep.subr.bf16.mxu1 %v1487_v26  ;;  %v554_v18 = vshll.u32 %v1688_v10, 16  ;;  %v1205_v22 = vrot.slane %v746_v16, 9 }
  0x37   : > { %1357 = vmatprep.subr.bf16.mxu0 %v1488_v40  ;;  %v550_v25 = vrot.slane %v548_v17, 5  ;;  %v538_v39 = vrot.slane %v537_v28, 4  ;;  %v747_v17 = vld [vmem:[%s1634_s14 + $0x38] sm:$0xe] }
  0x39   : > { %1334 = vmatpush3.bf16.msra.mxu1 %v1487_v26  ;;  %v556_v26 = vrot.slane %v554_v18, 5  ;;  %v551_v33 = vor.u32 %v550_v25, %v547_v24  ;;  %v543_v49 = vsel %vm1662_vm2, %v538_v39, %v542_v23  ;;  %v743_v18 = vld [vmem:[%s1634_s14 + $0x18] sm:$0xe]  ;;  %v1206_v23 = vrot.slane %v747_v17, 9 }
  0x3a   : > { %1358 = vmatpush3.bf16.msra.mxu0 %v1488_v40  ;;  %1391 = vmatprep.subr.bf16.mxu1 %v1491_v58  ;;  %v573_v40 = vshrl.u32 %v469_v30, 16  ;;  %v1500_v24 = vld [vmem:[%s1618_s12 + $0xb8] sm:$0xff]   ;;  %v777_v25 = vrot.slane %v1653_v34, 5  ;;  %v1202_v28 = vrot.slane %v743_v18, 9 }
  0x3b   : > { %1367 = vmatprep.subr.bf16.mxu0 %v1491_v58  ;;  %v552_v44 = vrot.slane %v551_v33, 4 }
  0x3c   : > { %1336 = vmatmul.mubr.bf16.vlgmr.msra.gmra.mrb[0].mxu1 %v1490_v53  ;;  %v575_v50 = vrot.slane %v573_v40, 4  ;;  %v778_v31 = vsel %vm1716_vm5, %v1201_v27, %v777_v25  ;;  %v1238_v25 = vld [vmem:[%s1790_s4] ss:$0 sm:$0xff] (!%p1235_p8) }
  0x3d   : > { %1399 = vmatpush3.bf16.msra.mxu1 %v1491_v58  ;;  %1339 = vmatprep.mubr.bf16.mxu1 %v1496_v1  ;;  %v557_v53 = vsel %vm1662_vm2, %v552_v44, %v556_v26  ;;  %v744_v1 = vld [vmem:[%s1634_s14 + $0x20] sm:$0xe]  ;;  %v781_v26 = vrot.slane %v1657_v37, 5 }
  0x3e   : > { %1360 = vmatmul.mubr.bf16.vlgmr.msra.gmra.mrb[0].mxu0 %v1188_v9  ;;  %1392 = vmatprep.subr.bf16.mxu1 %v1492_v4  ;;  %v1189_v60 = vcombine.low %v543_v49, %v557_v53  ;;  %v579_v61 = vor.u32 %v578_v51, %v575_v50  ;;  %v1203_v5 = vrot.slane %v744_v1, 9 }
  0x3f   : > { %1368 = vmatpush3.bf16.msra.mxu0 %v1491_v58  ;;  %v741_v58 = vld [vmem:[%s1634_s14 + $0x8] sm:$0xe]  ;;  %v782_v34 = vsel %vm1716_vm5, %v1202_v28, %v781_v26 }
  0x40   : > { %1369 = vmatprep.subr.bf16.mxu0 %v1492_v4  ;;  %v1200_v0 = vrot.slane %v741_v58, 9  ;;  %1363 = vmatprep.mubr.bf16.mxu0 %v1189_v60  ;;  %v580_v7 = vrot.slane %v579_v61, 4  ;;  %v786_v11 = vsel %vm1716_vm5, %v1203_v5, %v785_v47  ;;  %v277_v60 = vld [vmem:[#allocation2 + $0x10] sm:$0xff]  ;;  %v275_v61 = vld [vmem:[#allocation2] sm:$0xff] }
  0x41   : > { %1400 = vmatpush3.bf16.msra.mxu1 %v1492_v4  ;;  %v1225_v12 = vcombine.low %v786_v11, %v790_v15 }
  0x42   : > { %1393 = vmatprep.subr.bf16.mxu1 %v1493_v14  ;;  %v774_v9 = vsel %vm1716_vm5, %v1200_v0, %v773_v2  ;;  %v585_v19 = vsel %vm1662_vm2, %v580_v7, %v584_v56 }
  0x43   : > { %1370 = vmatpush3.bf16.msra.mxu0 %v1492_v4  ;;  %v566_v4 = vrot.slane %v565_v54, 4  ;;  %v1223_v2 = vcombine.low %v770_v8, %v774_v9 }
  0x44   : > { %1371 = vmatprep.subr.bf16.mxu0 %v1493_v14  ;;  %1340 = vmatmul.mubr.bf16.gmra.mrb[4].mxu1 %v1497_v20  ;;  %v793_v20 = vrot.slane %v1696_v29, 5  ;;  %v798_v29 = vsel %vm1716_vm5, %v1206_v23, %v797_v21  ;;  %v1236_v21 = vld [vmem:[%s1788_s2] ss:$0 sm:$0xff] (!%p1235_p8) }
  0x45   : > { %1401 = vmatpush3.bf16.msra.mxu1 %v1493_v14  ;;  %v571_v10 = vsel %vm1662_vm2, %v566_v4, %v570_v55  ;;  %1387 = vmatprep.mubr.bf16.mxu1 %v1225_v12 }
  0x46   : > { %1394 = vmatprep.subr.bf16.mxu1 %v1494_v32  ;;  %v1190_v13 = vcombine.low %v571_v10, %v585_v19  ;;  %v794_v30 = vsel %vm1716_vm5, %v1205_v22, %v793_v20 }
  0x47   : > { %1372 = vmatpush3.bf16.msra.mxu0 %v1493_v14  ;;  %v1499_v14 = vld [vmem:[%s1618_s12 + $0xb0] sm:$0xff]   ;;  %v1226_v37 = vcombine.low %v794_v30, %v798_v29 }
  0x48   : > { %1373 = vmatprep.subr.bf16.mxu0 %v1494_v32  ;;  %1364 = vmatmul.mubr.bf16.gmra.mrb[4].mxu0 %v1190_v13 }
  0x49   : > { %1402 = vmatpush3.bf16.msra.mxu1 %v1494_v32  ;;  %1383 = vmatprep.mubr.bf16.mxu0 %v1223_v2 }
  0x4a   : > { %1395 = vmatprep.subr.bf16.mxu1 %v1495_v48 }
  0x4b   : > { %1374 = vmatpush3.bf16.msra.mxu0 %v1494_v32  ;;  %v1224_v32 = vcombine.low %v778_v31, %v782_v34 }
  0x4c   : > { %1375 = vmatprep.subr.bf16.mxu0 %v1495_v48 }
  0x4d   : > { %1403 = vmatpush3.bf16.msra.mxu1 %v1495_v48 }
  0x4e   : > { %1396 = vmatprep.subr.bf16.mxu1 %v1498_v63 }
  0x4f   : > { %1376 = vmatpush3.bf16.msra.mxu0 %v1495_v48  ;;  %v280_v48 = vld [vmem:[#allocation2 + $0x28] sm:$0xff] }
  0x50   : > { %1377 = vmatprep.subr.bf16.mxu0 %v1498_v63 }
  0x51   : > { %1404 = vmatpush3.bf16.msra.mxu1 %v1498_v63 }
  0x52   : > { %1397 = vmatprep.subr.bf16.mxu1 %v1499_v14 }
  0x53   : > { %1378 = vmatpush3.bf16.msra.mxu0 %v1498_v63 }
  0x54   : > { %1379 = vmatprep.subr.bf16.mxu0 %v1499_v14 }
  0x55   : > { %1405 = vmatpush3.bf16.msra.mxu1 %v1499_v14 }
  0x56   : > { %1398 = vmatprep.subr.bf16.mxu1 %v1500_v24 }
  0x57   : > { %1380 = vmatpush3.bf16.msra.mxu0 %v1499_v14 }
  0x58   : > { %1381 = vmatprep.subr.bf16.mxu0 %v1500_v24 }
  0x59   : > { %1406 = vmatpush3.bf16.msra.mxu1 %v1500_v24 }
  0x5b   : > { %1382 = vmatpush3.bf16.msra.mxu0 %v1500_v24  ;;  %v1237_v24 = vld [vmem:[%s1789_s3] ss:$0 sm:$0xff] (!%p1235_p8) }
  0x5c   : > { %1388 = vmatmul.mubr.bf16.vlgmr.msra.gmra.mrb[8].mxu1 %v1226_v37 }
  0x5e   : > { %1384 = vmatmul.mubr.bf16.vlgmr.msra.gmra.mrb[0].mxu0 %v1224_v32 }
 0x10f   : > { %v1337_v33 = vpop.f32.mrb[0].mxu1 }
 0x110   : > { %v416_v35 = vpop.f32.mrb[1].mxu1  ;;  %v449_v1 = vadd.f32 %v1337_v33, %v277_v60 }
 0x111   : > { %v1338_v36 = vpop.f32.mrb[2].mxu1  ;;  %v447_v6 = vadd.f32 %v416_v35, %v275_v61 }
 0x112   : > { %v419_v38 = vpop.f32.mrb[3].mxu1  ;;  %v450_v10 = vadd.f32 %v1338_v36, %v278_v62 }
 0x113   : > { %v448_v2 = vadd.f32 %v419_v38, %v276_v3 }
 0x117   : > { %v1341_v39 = vpop.f32.mrb[4].mxu1 }
 0x118   : > { %v432_v40 = vpop.f32.mrb[5].mxu1  ;;  %v453_v47 = vadd.f32 %v1341_v39, %v281_v43 }
 0x119   : > { %v1342_v42 = vpop.f32.mrb[6].mxu1  ;;  %v451_v49 = vadd.f32 %v432_v40, %v279_v45 }
 0x11a   : > { %v435_v44 = vpop.f32.mrb[7].mxu1  ;;  %v454_v50 = vadd.f32 %v1342_v42, %v282_v46 }
 0x11b   : > { %v1365_v51 = vpop.f32.mrb[4].mxu0  ;;  %v452_v52 = vadd.f32 %v435_v44, %v280_v48 }
 0x11c   : > { %v738_v53 = vadd.f32 %v1365_v51, %v453_v47  ;;  %v717_v54 = vpop.f32.mrb[5].mxu0 }
 0x11d   : > { %v736_v55 = vadd.f32 %v717_v54, %v451_v49  ;;  %v1366_v56 = vpop.f32.mrb[6].mxu0 }
 0x11e   : > { %v739_v57 = vadd.f32 %v1366_v56, %v454_v50  ;;  %v720_v58 = vpop.f32.mrb[7].mxu0 }
 0x11f   : > { %v737_v59 = vadd.f32 %v720_v58, %v452_v52 }
 0x12f   : > { %v1389_v0 = vpop.f32.mrb[8].mxu1 }
 0x130   : > { %v951_v4 = vadd.f32 %v1389_v0, %v738_v53  ;;  %v930_v5 = vpop.f32.mrb[9].mxu1 }
 0x131   : > { %v1385_v7 = vpop.f32.mrb[0].mxu0  ;;  %v949_v8 = vadd.f32 %v930_v5, %v736_v55  ;;  %v1390_v9 = vpop.f32.mrb[10].mxu1  ;;  %964 = sbr.rel (%p1235_p8) target bundleno = 330 (0x14a), region = 48 }
 0x132   : > { %v1408_v11 = vadd.f32 %v1385_v7, %v449_v1  ;;  %959 = vst [vmem:[#allocation2 + $0x30] sm:$0xff] %v951_v4  ;;  %v914_v15 = vpop.f32.mrb[1].mxu0  ;;  %v952_v63 = vadd.f32 %v1390_v9, %v739_v57  ;;  %v933_v19 = vpop.f32.mrb[11].mxu1 }
 0x133   : > { %v1410_v12 = vadd.f32 %v914_v15, %v447_v6  ;;  %957 = vst [vmem:[#allocation2 + $0x20] sm:$0xff] %v949_v8  ;;  %v1386_v13 = vpop.f32.mrb[2].mxu0  ;;  %v950_v14 = vadd.f32 %v933_v19, %v737_v59 }
 0x134   : > { %955 = vst [vmem:[#allocation2 + $0x10] sm:$0xff] %v1408_v11  ;;  %v1412_v16 = vadd.f32 %v1386_v13, %v450_v10  ;;  %960 = vst [vmem:[#allocation2 + $0x38] sm:$0xff] %v952_v63  ;;  %v917_v17 = vpop.f32.mrb[3].mxu0 }
 0x135   : > { %953 = vst [vmem:[#allocation2] sm:$0xff] %v1410_v12  ;;  %v1414_v41 = vadd.f32 %v917_v17, %v448_v2  ;;  %958 = vst [vmem:[#allocation2 + $0x28] sm:$0xff] %v950_v14 }
 0x136   : > { %956 = vst [vmem:[#allocation2 + $0x18] sm:$0xff] %v1412_v16 }
 0x137   : > { %954 = vst [vmem:[#allocation2 + $0x8] sm:$0xff] %v1414_v41 }
 0x139   : > { %v971_v33 = vld [vmem:[#allocation2 + $0x30] sm:$0xff] }
 0x13a   : > { %v969_v30 = vld [vmem:[#allocation2 + $0x20] sm:$0xff]  ;;  %v986_v39 = vadd.f32 %v1236_v21, %v971_v33 }
 0x13b   : > { %v967_v26 = vld [vmem:[#allocation2 + $0x10] sm:$0xff]  ;;  %v984_v32 = vadd.f32 %v1236_v21, %v969_v30  ;;  %v972_v35 = vld [vmem:[#allocation2 + $0x38] sm:$0xff] }
 0x13c   : > { %v965_v18 = vld [vmem:[#allocation2] sm:$0xff]  ;;  %v982_v28 = vadd.f32 %v1236_v21, %v967_v26  ;;  %v970_v29 = vld [vmem:[#allocation2 + $0x28] sm:$0xff]  ;;  %v987_v40 = vadd.f32 %v1236_v21, %v972_v35  ;;  %v1001_v48 = vmul.f32 %v1237_v24, %v986_v39 }
 0x13d   : > { %v980_v22 = vadd.f32 %v1236_v21, %v965_v18  ;;  %v968_v27 = vld [vmem:[#allocation2 + $0x18] sm:$0xff]  ;;  %v985_v38 = vadd.f32 %v1236_v21, %v970_v29  ;;  %v999_v45 = vmul.f32 %v1237_v24, %v984_v32 }
 0x13e   : > { %v966_v20 = vld [vmem:[#allocation2 + $0x8] sm:$0xff]  ;;  %v983_v37 = vadd.f32 %v1236_v21, %v968_v27  ;;  %v997_v36 = vmul.f32 %v1237_v24, %v982_v28  ;;  %v1002_v49 = vmul.f32 %v1237_v24, %v987_v40  ;;  %v1016_v56 = vadd.f32 %v1238_v25, %v1001_v48 }
 0x13f   : > { %v981_v23 = vadd.f32 %v1236_v21, %v966_v20  ;;  %v995_v31 = vmul.f32 %v1237_v24, %v980_v22  ;;  %v1000_v47 = vmul.f32 %v1237_v24, %v985_v38  ;;  %v1014_v53 = vadd.f32 %v1238_v25, %v999_v45 }
 0x140   : > { %v998_v44 = vmul.f32 %v1237_v24, %v983_v37  ;;  %v1012_v46 = vadd.f32 %v1238_v25, %v997_v36  ;;  %v1017_v57 = vadd.f32 %v1238_v25, %v1002_v49  ;;  %v1024_v62 = vmax.f32 %v1016_v56, 0.0 }
 0x141   : > { %v996_v34 = vmul.f32 %v1237_v24, %v981_v23  ;;  %v1010_v42 = vadd.f32 %v1238_v25, %v995_v31  ;;  %v1015_v55 = vadd.f32 %v1238_v25, %v1000_v47  ;;  %v1022_v60 = vmax.f32 %v1014_v53, 0.0 }
 0x142   : > { %v1013_v52 = vadd.f32 %v1238_v25, %v998_v44  ;;  %v1020_v54 = vmax.f32 %v1012_v46, 0.0  ;;  %v1025_v0 = vmax.f32 %v1017_v57, 0.0 }
 0x143   : > { %v1011_v43 = vadd.f32 %v1238_v25, %v996_v34  ;;  %v1018_v50 = vmax.f32 %v1010_v42, 0.0  ;;  %v1023_v61 = vmax.f32 %v1015_v55, 0.0 }
 0x144   : > { %v1021_v59 = vmax.f32 %v1013_v52, 0.0  ;;  %v1278_v4 = vpack.c.bf16 %v1025_v0, %v1024_v62 }
 0x145   : > { %v1019_v51 = vmax.f32 %v1011_v43, 0.0  ;;  %v1273_v3 = vpack.c.bf16 %v1023_v61, %v1022_v60 }
 0x146   : > { %v1268_v1 = vpack.c.bf16 %v1021_v59, %v1020_v54  ;;  %1282 = vst [vmem:[%s1613_s8 + $0x18] sm:$0xff] %v1278_v4  }
 0x147   : > { %v1263_v58 = vpack.c.bf16 %v1019_v51, %v1018_v50  ;;  %1281 = vst [vmem:[%s1613_s8 + $0x10] sm:$0xff] %v1273_v3  }
 0x148   : > { %1280 = vst [vmem:[%s1613_s8 + $0x8] sm:$0xff] %v1268_v1  }
 0x149   : > { %1264 = vst [vmem:[%s1613_s8] sm:$0xff] %v1263_v58  }
 0x14a PF: > { %s15_s22 = sadd.s32 1, %s1539_s22   ;;  %s1796_s18 = smov %s1531_s20 }
 0x14b   : > { %p12_p9 = scmp.ge.s32.totalorder %s15_s22, 8   ;;  %s1797_s19 = smov %s1535_s21 }
 0x14c   : > { %s1798_s20 = smov %s1801_s23  ;;  %s1799_s21 = smov %s1805_s24 }
 0x14d   :  { %14 = sbr.rel (!%p12_p9) target bundleno = 3 (0x3), region = 84 }

// kernel: wideresnet_forward.26
= control target key start
LH: loop header
LB: loop body
LE: loop exit
PB: predicated region body
PF: predicated region fallthrough
CT: control target
= control target key end

     0   :  { %s1468_s12 = smov 0   ;;  %s1470_s13 = smov 0   ;;  %s1676_s0 = inlined_call_operand.vmem [shape: bf16[2,10,10,128], index: 0, kind: input, shape index: {}]   ;;  %s1677_s1 = inlined_call_operand.vmem [shape: bf16[9,128,128], index: 1, kind: input, shape index: {}]   ;;  %s1678_s2 = inlined_call_operand.vmem [shape: f32[1,128], index: 2, kind: input, shape index: {}]   ;;  %s1679_s3 = inlined_call_operand.vmem [shape: bf16[2,64,128], index: 3, kind: output, shape index: {}]  }
   0x1   :  { %s1472_s14 = smov 0   ;;  %s1474_s15 = smov 0  }
   0x2   :  { %s1476_s16 = smov 0  }
   0x3 LB: > { %s22_s17 = sadd.s32 1, %s1437_s14  ;;  %s25_s18 = sadd.s32 1, %s1441_s15  ;;  %s1445_s16 = sphi %s1476_s16, %s13_s16   ;;  %s1441_s15 = sphi %s1474_s15, %s1687_s15   ;;  %s1437_s14 = sphi %s1472_s14, %s1686_s14   ;;  %s1433_s13 = sphi %s1470_s13, %s1685_s13   ;;  %s1429_s12 = sphi %s1468_s12, %s1684_s12  }
   0x4   : > { %p23_p0 = scmp.ge.s32.totalorder %s22_s17, 3  ;;  %p1058_p1 = scmp.ge.s32.totalorder %s1445_s16, 1 }
   0x5   : > { %p161_p2 = scmp.lt.s32.totalorder %s1445_s16, 7 }
   0x6   : > { %s1689_s17 = smov (%p23_p0, %s22_s17), 0  ;;  %s1691_s18 = smov (!%p23_p0, %s25_s18), %s1441_s15 }
   0x7   : > { %p162_p3 = pnand %p1058_p1, %p161_p2  ;;  %p27_p4 = scmp.ge.s32.totalorder %s1691_s18, 2 }
   0x8   : > { %p191_p5 = scmp.lt.s32.totalorder (!%p162_p3), %s1433_s13, 1  ;;  %s196_s19 = smul.u32 (!%p162_p3), 3, %s1429_s12 }
   0x9   : > { %s1693_s18 = smov (%p27_p4, %s1691_s18), 0  ;;  %165 = sbr.rel (%p162_p3) target bundleno = 324 (0x144), region = 32 }
   0xa   : > { %p197_p6 = scmp.lt.s32.totalorder (!%p162_p3), %s196_s19, 8  ;;  %p1064_p7 = scmp.ne.s32.totalorder (!%p162_p3), %s1429_s12, 0 }
  0x10   : > { %s1695_s13 = smov (!%p191_p5, %s1433_s13), 1  ;;  %s1697_s19 = smov (!%p197_p6, %s196_s19), 8 }
  0x11   : > { %s1337_s20 = smul.u32 80, %s1695_s13  ;;  %s1156_s21 = sshll.u32 %s1695_s13, 5  ;;  %v1447_v0 = vmov (!%p1064_p7), 0.0  }
  0x12   : > { %s1509_s27 = scalar_lea.vmem %s1679_s3, %s1156_s21  ;;  %s1155_s28 = sshll.u32 %s1697_s19, 6  ;;  %213 = vst [vmem:[#allocation2] sm:$0xff] (!%p1064_p7), %v1447_v0  ;;  %214 = vst [vmem:[#allocation2 + $0x8] sm:$0xff] (!%p1064_p7), %v1447_v0 }
  0x13   : > { %s1504_s24 = scalar_lea.vmem %s1676_s0, %s1337_s20  ;;  %s1514_s4 = scalar_lea.vmem %s1677_s1, %s1155_s28  ;;  %215 = vst [vmem:[#allocation2 + $0x10] sm:$0xff] (!%p1064_p7), %v1447_v0  ;;  %216 = vst [vmem:[#allocation2 + $0x18] sm:$0xff] (!%p1064_p7), %v1447_v0 }
  0x14   : > { %212 = sbr.rel (%p1064_p7) target bundleno = 27 (0x1b), region = 36  ;;  %217 = vst [vmem:[#allocation2 + $0x20] sm:$0xff] (!%p1064_p7), %v1447_v0  ;;  %218 = vst [vmem:[#allocation2 + $0x28] sm:$0xff] (!%p1064_p7), %v1447_v0 }
  0x15   : > { %219 = vst [vmem:[#allocation2 + $0x30] sm:$0xff] (!%p1064_p7), %v1447_v0  ;;  %220 = vst [vmem:[#allocation2 + $0x38] sm:$0xff] (!%p1064_p7), %v1447_v0 }
  0x1b PF: > { %v1379_v1 = vld [vmem:[%s1514_s4] sm:$0xff]   ;;  %v1381_v3 = vld [vmem:[%s1514_s4 + $0x8] sm:$0xff]   ;;  %v1383_v5 = vld [vmem:[%s1514_s4 + $0x10] sm:$0xff]   ;;  %s1157_s5 = sshll.u32 %s1429_s12, 3  ;;  %vm417_vm0 = vsmask.f32 3328 }
  0x1c   : > { %v1380_v2 = vld [vmem:[%s1514_s4 + $0x40] sm:$0xff]   ;;  %1225 = vmatprep.subr.bf16.mxu1 %v1379_v1  ;;  %v1382_v4 = vld [vmem:[%s1514_s4 + $0x48] sm:$0xff]   ;;  %v1384_v6 = vld [vmem:[%s1514_s4 + $0x50] sm:$0xff]   ;;  %s1530_s6 = scalar_lea.vmem %s1504_s24, %s1157_s5  ;;  %vm418_vm1 = vsmask.f32 7440  ;;  %vm710_vm3 = vcmask 1042432  }
  0x1d   : > { %1249 = vmatprep.subr.bf16.mxu0 %v1380_v2  ;;  %1226 = vmatpush3.bf16.msra.mxu1 %v1379_v1  ;;  %v1385_v7 = vld [vmem:[%s1514_s4 + $0x18] sm:$0xff]   ;;  %v1387_v9 = vld [vmem:[%s1514_s4 + $0x20] sm:$0xff]   ;;  %v1389_v11 = vld [vmem:[%s1514_s4 + $0x28] sm:$0xff]   ;;  %vm711_vm4 = vcmask 1046532   ;;  %p1143_p8 = scmp.ne.s32.totalorder %s1429_s12, 2 }
  0x1e   : > { %1250 = vmatpush3.bf16.msra.mxu0 %v1380_v2  ;;  %1227 = vmatprep.subr.bf16.mxu1 %v1381_v3  ;;  %v1386_v8 = vld [vmem:[%s1514_s4 + $0x58] sm:$0xff]   ;;  %v1388_v10 = vld [vmem:[%s1514_s4 + $0x60] sm:$0xff]   ;;  %v1390_v13 = vld [vmem:[%s1514_s4 + $0x68] sm:$0xff]  }
  0x1f   : > { %1251 = vmatprep.subr.bf16.mxu0 %v1382_v4  ;;  %v1395_v12 = vld [vmem:[%s1530_s6] ss:$8 sps:$4 sm:$0xff]   ;;  %v1536_v15 = vld [vmem:[%s1530_s6 + $0x4] sm:$0x1]  ;;  %v1391_v17 = vld [vmem:[%s1514_s4 + $0x30] sm:$0xff]  }
  0x20   : > { %1241 = vmatprep.mubr.bf16.mxu1 %v1395_v12  ;;  %v401_v14 = vld [vmem:[%s1530_s6] sm:$0xf]  ;;  %v403_v16 = vld [vmem:[%s1530_s6 + $0x8] sm:$0xf]  ;;  %v1392_v18 = vld [vmem:[%s1514_s4 + $0x70] sm:$0xff]   ;;  %v430_v22 = vshll.u32 %v1536_v15, 16 }
  0x21   : > { %1228 = vmatpush3.bf16.msra.mxu1 %v1381_v3  ;;  %v1542_v19 = vld [vmem:[%s1530_s6 + $0xc] sm:$0x1]  ;;  %v421_v20 = vshrl.u32 %v401_v14, 16  ;;  %v424_v21 = vshll.u32 %v401_v14, 16  ;;  %v435_v23 = vshrl.u32 %v403_v16, 16  ;;  %v438_v24 = vshll.u32 %v403_v16, 16  ;;  %vm1558_vm2 = vmor %vm417_vm0, %vm418_vm1 }
  0x22   : > { %1252 = vmatpush3.bf16.msra.mxu0 %v1382_v4  ;;  %1229 = vmatprep.subr.bf16.mxu1 %v1383_v5  ;;  %v444_v25 = vshll.u32 %v1542_v19, 16  ;;  %v1393_v26 = vld [vmem:[%s1514_s4 + $0x38] sm:$0xff]   ;;  %v432_v29 = vrot.slane %v430_v22, 5  ;;  %v405_v33 = vld [vmem:[%s1530_s6 + $0x10] sm:$0xf]  ;;  %v1397_v58 = vld [vmem:[%s1514_s4 + $0x80] sm:$0xff]  }
  0x23   : > { %1253 = vmatprep.subr.bf16.mxu0 %v1384_v6  ;;  %v423_v27 = vrot.slane %v421_v20, 4  ;;  %v426_v28 = vrot.slane %v424_v21, 5  ;;  %v437_v30 = vrot.slane %v435_v23, 4  ;;  %v440_v31 = vrot.slane %v438_v24, 5  ;;  %v1549_v34 = vld [vmem:[%s1530_s6 + $0x14] sm:$0x1]  ;;  %vm1612_vm5 = vmor %vm710_vm3, %vm711_vm4 }
  0x24   : > { %v446_v32 = vrot.slane %v444_v25, 5  ;;  %v407_v36 = vld [vmem:[%s1530_s6 + $0x18] sm:$0xf]  ;;  %v1553_v37 = vld [vmem:[%s1530_s6 + $0x1c] sm:$0x1]  ;;  %v449_v38 = vshrl.u32 %v405_v33, 16 }
  0x25   : > { %1230 = vmatpush3.bf16.msra.mxu1 %v1383_v5  ;;  %v427_v35 = vor.u32 %v426_v28, %v423_v27  ;;  %v452_v39 = vshll.u32 %v405_v33, 16  ;;  %v1394_v40 = vld [vmem:[%s1514_s4 + $0x78] sm:$0xff]   ;;  %v441_v42 = vor.u32 %v440_v31, %v437_v30  ;;  %v458_v43 = vshll.u32 %v1549_v34, 16  ;;  %v1402_v1 = vld [vmem:[%s1530_s6 + $0x20] ss:$8 sps:$4 sm:$0xff]   ;;  %v1399_v14 = vld [vmem:[%s1514_s4 + $0x90] sm:$0xff]  }
  0x26   : > { %1254 = vmatpush3.bf16.msra.mxu0 %v1384_v6  ;;  %1231 = vmatprep.subr.bf16.mxu1 %v1385_v7  ;;  %v463_v44 = vshrl.u32 %v407_v36, 16  ;;  %v466_v45 = vshll.u32 %v407_v36, 16  ;;  %v451_v47 = vrot.slane %v449_v38, 4  ;;  %v472_v49 = vshll.u32 %v1553_v37, 16  ;;  %v1396_v53 = vld [vmem:[%s1530_s6 + $0x10] ss:$8 sps:$4 sm:$0xff]  }
  0x27   : > { %1255 = vmatprep.subr.bf16.mxu0 %v1386_v8  ;;  %v428_v46 = vrot.slane %v427_v35, 4  ;;  %v454_v48 = vrot.slane %v452_v39, 5  ;;  %v442_v50 = vrot.slane %v441_v42, 4  ;;  %v460_v56 = vrot.slane %v458_v43, 5  ;;  %v1398_v4 = vld [vmem:[%s1514_s4 + $0x88] sm:$0xff]  }
  0x28   : > { %v465_v51 = vrot.slane %v463_v44, 4  ;;  %v468_v52 = vrot.slane %v466_v45, 5  ;;  %v474_v60 = vrot.slane %v472_v49, 5  ;;  %v715_v63 = vrot.slane %v1536_v15, 5  ;;  %v409_v6 = vld [vmem:[%s1530_s6 + $0x20] sm:$0xf] }
  0x29   : > { %1232 = vmatpush3.bf16.msra.mxu1 %v1385_v7  ;;  %v433_v54 = vsel %vm1558_vm2, %v428_v46, %v432_v29  ;;  %v455_v55 = vor.u32 %v454_v48, %v451_v47  ;;  %v447_v57 = vsel %vm1558_vm2, %v442_v50, %v446_v32  ;;  %v719_v2 = vrot.slane %v1542_v19, 5  ;;  %v1580_v7 = vld [vmem:[%s1530_s6 + $0x24] sm:$0x1]  ;;  %v1403_v20 = vld [vmem:[%s1530_s6 + $0x30] ss:$8 sps:$4 sm:$0xff]  }
  0x2a   : > { %1256 = vmatpush3.bf16.msra.mxu0 %v1386_v8  ;;  %1233 = vmatprep.subr.bf16.mxu1 %v1387_v9  ;;  %v469_v59 = vor.u32 %v468_v52, %v465_v51  ;;  %v1095_v61 = vcombine.low %v433_v54, %v447_v57  ;;  %v411_v8 = vld [vmem:[%s1530_s6 + $0x28] sm:$0xf]  ;;  %v480_v12 = vshll.u32 %v409_v6, 16  ;;  %v413_v27 = vld [vmem:[%s1530_s6 + $0x30] sm:$0xf]  ;;  %v1400_v32 = vld [vmem:[%s1514_s4 + $0x98] sm:$0xff]  }
  0x2b   : > { %1257 = vmatprep.subr.bf16.mxu0 %v1388_v10  ;;  %v456_v62 = vrot.slane %v455_v55, 4  ;;  %v491_v16 = vshrl.u32 %v411_v8, 16  ;;  %v1592_v29 = vld [vmem:[%s1530_s6 + $0x34] sm:$0x1]  ;;  %v415_v30 = vld [vmem:[%s1530_s6 + $0x38] sm:$0xf] }
  0x2c   : > { %v470_v0 = vrot.slane %v469_v59, 4  ;;  %1265 = vmatprep.mubr.bf16.mxu0 %v1095_v61  ;;  %v482_v22 = vrot.slane %v480_v12, 5  ;;  %v1596_v31 = vld [vmem:[%s1530_s6 + $0x3c] sm:$0x1]  ;;  %v505_v35 = vshrl.u32 %v413_v27, 16  ;;  %v508_v36 = vshll.u32 %v413_v27, 16 }
  0x2d   : > { %1234 = vmatpush3.bf16.msra.mxu1 %v1387_v9  ;;  %v461_v3 = vsel %vm1558_vm2, %v456_v62, %v460_v56  ;;  %v493_v24 = vrot.slane %v491_v16, 4  ;;  %v514_v38 = vshll.u32 %v1592_v29, 16  ;;  %v522_v42 = vshll.u32 %v415_v30, 16  ;;  %v1401_v48 = vld [vmem:[%s1514_s4 + $0xa0] sm:$0xff]   ;;  %v692_v16 = vld [vmem:[%s1530_s6 + $0x30] sm:$0xe] }
  0x2e   : > { %1258 = vmatpush3.bf16.msra.mxu0 %v1388_v10  ;;  %1235 = vmatprep.subr.bf16.mxu1 %v1389_v11  ;;  %v475_v5 = vsel %vm1558_vm2, %v470_v0, %v474_v60  ;;  %v1584_v10 = vld [vmem:[%s1530_s6 + $0x2c] sm:$0x1]  ;;  %v528_v43 = vshll.u32 %v1596_v31, 16  ;;  %v507_v45 = vrot.slane %v505_v35, 4  ;;  %v510_v46 = vrot.slane %v508_v36, 5 }
  0x2f   : > { %1259 = vmatprep.subr.bf16.mxu0 %v1390_v13  ;;  %v1096_v9 = vcombine.low %v461_v3, %v475_v5  ;;  %v731_v47 = vrot.slane %v1580_v7, 5  ;;  %v524_v51 = vrot.slane %v522_v42, 5  ;;  %v735_v52 = vrot.slane %v1584_v10, 5  ;;  %v686_v57 = vld [vmem:[%s1530_s6] sm:$0xe] }
  0x30   : > { %v511_v54 = vor.u32 %v510_v46, %v507_v45  ;;  %v516_v55 = vrot.slane %v514_v38, 5  ;;  %v530_v56 = vrot.slane %v528_v43, 5  ;;  %v1107_v62 = vrot.slane %v686_v57, 9  ;;  %v691_v3 = vld [vmem:[%s1530_s6 + $0x28] sm:$0xe]  ;;  %v227_v43 = vld [vmem:[#allocation2 + $0x30] sm:$0xff] }
  0x31   : > { %1236 = vmatpush3.bf16.msra.mxu1 %v1389_v11  ;;  %v477_v11 = vshrl.u32 %v409_v6, 16  ;;  %v1112_v6 = vrot.slane %v691_v3, 9  ;;  %v688_v41 = vld [vmem:[%s1530_s6 + $0x10] sm:$0xe]  ;;  %v225_v45 = vld [vmem:[#allocation2 + $0x20] sm:$0xff]  ;;  %v228_v46 = vld [vmem:[#allocation2 + $0x38] sm:$0xff] }
  0x32   : > { %1260 = vmatpush3.bf16.msra.mxu0 %v1390_v13  ;;  %1237 = vmatprep.subr.bf16.mxu1 %v1391_v17  ;;  %v486_v13 = vshll.u32 %v1580_v7, 16  ;;  %v1109_v27 = vrot.slane %v688_v41, 9  ;;  %v222_v3 = vld [vmem:[#allocation2 + $0x8] sm:$0xff] }
  0x33   : > { %1261 = vmatprep.subr.bf16.mxu0 %v1392_v18  ;;  %v479_v21 = vrot.slane %v477_v11, 4  ;;  %v736_v15 = vsel %vm1612_vm5, %v1112_v6, %v735_v52 }
  0x34   : > { %v488_v23 = vrot.slane %v486_v13, 5 }
  0x35   : > { %1238 = vmatpush3.bf16.msra.mxu1 %v1391_v17  ;;  %v494_v17 = vshll.u32 %v411_v8, 16  ;;  %v483_v28 = vor.u32 %v482_v22, %v479_v21  ;;  %v716_v8 = vsel %vm1612_vm5, %v1107_v62, %v715_v63  ;;  %v1404_v63 = vld [vmem:[%s1514_s4 + $0xa8] sm:$0xff]   ;;  %v743_v21 = vrot.slane %v1596_v31, 5  ;;  %v224_v62 = vld [vmem:[#allocation2 + $0x18] sm:$0xff] }
  0x36   : > { %1262 = vmatpush3.bf16.msra.mxu0 %v1392_v18  ;;  %1239 = vmatprep.subr.bf16.mxu1 %v1393_v26  ;;  %v500_v18 = vshll.u32 %v1584_v10, 16  ;;  %v1113_v22 = vrot.slane %v692_v16, 9 }
  0x37   : > { %1263 = vmatprep.subr.bf16.mxu0 %v1394_v40  ;;  %v496_v25 = vrot.slane %v494_v17, 5  ;;  %v484_v39 = vrot.slane %v483_v28, 4  ;;  %v693_v17 = vld [vmem:[%s1530_s6 + $0x38] sm:$0xe] }
  0x39   : > { %1240 = vmatpush3.bf16.msra.mxu1 %v1393_v26  ;;  %v502_v26 = vrot.slane %v500_v18, 5  ;;  %v497_v33 = vor.u32 %v496_v25, %v493_v24  ;;  %v489_v49 = vsel %vm1558_vm2, %v484_v39, %v488_v23  ;;  %v689_v18 = vld [vmem:[%s1530_s6 + $0x18] sm:$0xe]  ;;  %v1114_v23 = vrot.slane %v693_v17, 9 }
  0x3a   : > { %1264 = vmatpush3.bf16.msra.mxu0 %v1394_v40  ;;  %1297 = vmatprep.subr.bf16.mxu1 %v1397_v58  ;;  %v519_v40 = vshrl.u32 %v415_v30, 16  ;;  %v1406_v24 = vld [vmem:[%s1514_s4 + $0xb8] sm:$0xff]   ;;  %v723_v25 = vrot.slane %v1549_v34, 5  ;;  %v1110_v28 = vrot.slane %v689_v18, 9 }
  0x3b   : > { %1273 = vmatprep.subr.bf16.mxu0 %v1397_v58  ;;  %v498_v44 = vrot.slane %v497_v33, 4 }
  0x3c   : > { %1242 = vmatmul.mubr.bf16.vlgmr.msra.gmra.mrb[0].mxu1 %v1396_v53  ;;  %v521_v50 = vrot.slane %v519_v40, 4  ;;  %v724_v31 = vsel %vm1612_vm5, %v1109_v27, %v723_v25 }
  0x3d   : > { %1305 = vmatpush3.bf16.msra.mxu1 %v1397_v58  ;;  %1245 = vmatprep.mubr.bf16.mxu1 %v1402_v1  ;;  %v503_v53 = vsel %vm1558_vm2, %v498_v44, %v502_v26  ;;  %v690_v1 = vld [vmem:[%s1530_s6 + $0x20] sm:$0xe]  ;;  %v727_v26 = vrot.slane %v1553_v37, 5 }
  0x3e   : > { %1266 = vmatmul.mubr.bf16.vlgmr.msra.gmra.mrb[0].mxu0 %v1096_v9  ;;  %1298 = vmatprep.subr.bf16.mxu1 %v1398_v4  ;;  %v1097_v60 = vcombine.low %v489_v49, %v503_v53  ;;  %v525_v61 = vor.u32 %v524_v51, %v521_v50  ;;  %v1111_v5 = vrot.slane %v690_v1, 9 }
  0x3f   : > { %1274 = vmatpush3.bf16.msra.mxu0 %v1397_v58  ;;  %v687_v58 = vld [vmem:[%s1530_s6 + $0x8] sm:$0xe]  ;;  %v728_v34 = vsel %vm1612_vm5, %v1110_v28, %v727_v26 }
  0x40   : > { %1275 = vmatprep.subr.bf16.mxu0 %v1398_v4  ;;  %v1108_v0 = vrot.slane %v687_v58, 9  ;;  %1269 = vmatprep.mubr.bf16.mxu0 %v1097_v60  ;;  %v526_v7 = vrot.slane %v525_v61, 4  ;;  %v732_v11 = vsel %vm1612_vm5, %v1111_v5, %v731_v47  ;;  %v223_v60 = vld [vmem:[#allocation2 + $0x10] sm:$0xff]  ;;  %v221_v61 = vld [vmem:[#allocation2] sm:$0xff] }
  0x41   : > { %1306 = vmatpush3.bf16.msra.mxu1 %v1398_v4  ;;  %v1133_v12 = vcombine.low %v732_v11, %v736_v15 }
  0x42   : > { %1299 = vmatprep.subr.bf16.mxu1 %v1399_v14  ;;  %v720_v9 = vsel %vm1612_vm5, %v1108_v0, %v719_v2  ;;  %v531_v19 = vsel %vm1558_vm2, %v526_v7, %v530_v56 }
  0x43   : > { %1276 = vmatpush3.bf16.msra.mxu0 %v1398_v4  ;;  %v512_v4 = vrot.slane %v511_v54, 4  ;;  %v1131_v2 = vcombine.low %v716_v8, %v720_v9 }
  0x44   : > { %1277 = vmatprep.subr.bf16.mxu0 %v1399_v14  ;;  %1246 = vmatmul.mubr.bf16.gmra.mrb[4].mxu1 %v1403_v20  ;;  %v739_v20 = vrot.slane %v1592_v29, 5  ;;  %v744_v29 = vsel %vm1612_vm5, %v1114_v23, %v743_v21  ;;  %v1144_v21 = vld [vmem:[%s1678_s2] ss:$0 sm:$0xff] (!%p1143_p8) }
  0x45   : > { %1307 = vmatpush3.bf16.msra.mxu1 %v1399_v14  ;;  %v517_v10 = vsel %vm1558_vm2, %v512_v4, %v516_v55  ;;  %1293 = vmatprep.mubr.bf16.mxu1 %v1133_v12 }
  0x46   : > { %1300 = vmatprep.subr.bf16.mxu1 %v1400_v32  ;;  %v1098_v13 = vcombine.low %v517_v10, %v531_v19  ;;  %v740_v30 = vsel %vm1612_vm5, %v1113_v22, %v739_v20 }
  0x47   : > { %1278 = vmatpush3.bf16.msra.mxu0 %v1399_v14  ;;  %v1405_v14 = vld [vmem:[%s1514_s4 + $0xb0] sm:$0xff]   ;;  %v1134_v37 = vcombine.low %v740_v30, %v744_v29 }
  0x48   : > { %1279 = vmatprep.subr.bf16.mxu0 %v1400_v32  ;;  %1270 = vmatmul.mubr.bf16.gmra.mrb[4].mxu0 %v1098_v13 }
  0x49   : > { %1308 = vmatpush3.bf16.msra.mxu1 %v1400_v32  ;;  %1289 = vmatprep.mubr.bf16.mxu0 %v1131_v2 }
  0x4a   : > { %1301 = vmatprep.subr.bf16.mxu1 %v1401_v48 }
  0x4b   : > { %1280 = vmatpush3.bf16.msra.mxu0 %v1400_v32  ;;  %v1132_v32 = vcombine.low %v724_v31, %v728_v34 }
  0x4c   : > { %1281 = vmatprep.subr.bf16.mxu0 %v1401_v48 }
  0x4d   : > { %1309 = vmatpush3.bf16.msra.mxu1 %v1401_v48 }
  0x4e   : > { %1302 = vmatprep.subr.bf16.mxu1 %v1404_v63 }
  0x4f   : > { %1282 = vmatpush3.bf16.msra.mxu0 %v1401_v48  ;;  %v226_v48 = vld [vmem:[#allocation2 + $0x28] sm:$0xff] }
  0x50   : > { %1283 = vmatprep.subr.bf16.mxu0 %v1404_v63 }
  0x51   : > { %1310 = vmatpush3.bf16.msra.mxu1 %v1404_v63 }
  0x52   : > { %1303 = vmatprep.subr.bf16.mxu1 %v1405_v14 }
  0x53   : > { %1284 = vmatpush3.bf16.msra.mxu0 %v1404_v63 }
  0x54   : > { %1285 = vmatprep.subr.bf16.mxu0 %v1405_v14 }
  0x55   : > { %1311 = vmatpush3.bf16.msra.mxu1 %v1405_v14 }
  0x56   : > { %1304 = vmatprep.subr.bf16.mxu1 %v1406_v24 }
  0x57   : > { %1286 = vmatpush3.bf16.msra.mxu0 %v1405_v14 }
  0x58   : > { %1287 = vmatprep.subr.bf16.mxu0 %v1406_v24 }
  0x59   : > { %1312 = vmatpush3.bf16.msra.mxu1 %v1406_v24 }
  0x5b   : > { %1288 = vmatpush3.bf16.msra.mxu0 %v1406_v24 }
  0x5c   : > { %1294 = vmatmul.mubr.bf16.vlgmr.msra.gmra.mrb[8].mxu1 %v1134_v37 }
  0x5e   : > { %1290 = vmatmul.mubr.bf16.vlgmr.msra.gmra.mrb[0].mxu0 %v1132_v32 }
 0x10f   : > { %v1243_v33 = vpop.f32.mrb[0].mxu1 }
 0x110   : > { %v362_v35 = vpop.f32.mrb[1].mxu1  ;;  %v395_v1 = vadd.f32 %v1243_v33, %v223_v60 }
 0x111   : > { %v1244_v36 = vpop.f32.mrb[2].mxu1  ;;  %v393_v6 = vadd.f32 %v362_v35, %v221_v61 }
 0x112   : > { %v365_v38 = vpop.f32.mrb[3].mxu1  ;;  %v396_v10 = vadd.f32 %v1244_v36, %v224_v62 }
 0x113   : > { %v394_v2 = vadd.f32 %v365_v38, %v222_v3 }
 0x117   : > { %v1247_v39 = vpop.f32.mrb[4].mxu1 }
 0x118   : > { %v378_v40 = vpop.f32.mrb[5].mxu1  ;;  %v399_v47 = vadd.f32 %v1247_v39, %v227_v43 }
 0x119   : > { %v1248_v42 = vpop.f32.mrb[6].mxu1  ;;  %v397_v49 = vadd.f32 %v378_v40, %v225_v45 }
 0x11a   : > { %v381_v44 = vpop.f32.mrb[7].mxu1  ;;  %v400_v50 = vadd.f32 %v1248_v42, %v228_v46 }
 0x11b   : > { %v1271_v51 = vpop.f32.mrb[4].mxu0  ;;  %v398_v52 = vadd.f32 %v381_v44, %v226_v48 }
 0x11c   : > { %v684_v53 = vadd.f32 %v1271_v51, %v399_v47  ;;  %v663_v54 = vpop.f32.mrb[5].mxu0 }
 0x11d   : > { %v682_v55 = vadd.f32 %v663_v54, %v397_v49  ;;  %v1272_v56 = vpop.f32.mrb[6].mxu0 }
 0x11e   : > { %v685_v57 = vadd.f32 %v1272_v56, %v400_v50  ;;  %v666_v58 = vpop.f32.mrb[7].mxu0 }
 0x11f   : > { %v683_v59 = vadd.f32 %v666_v58, %v398_v52 }
 0x12f   : > { %v1295_v0 = vpop.f32.mrb[8].mxu1 }
 0x130   : > { %v897_v4 = vadd.f32 %v1295_v0, %v684_v53  ;;  %v876_v5 = vpop.f32.mrb[9].mxu1 }
 0x131   : > { %v1291_v7 = vpop.f32.mrb[0].mxu0  ;;  %v895_v8 = vadd.f32 %v876_v5, %v682_v55  ;;  %v1296_v9 = vpop.f32.mrb[10].mxu1  ;;  %910 = sbr.rel (%p1143_p8) target bundleno = 324 (0x144), region = 40 }
 0x132   : > { %v1314_v11 = vadd.f32 %v1291_v7, %v395_v1  ;;  %905 = vst [vmem:[#allocation2 + $0x30] sm:$0xff] %v897_v4  ;;  %v860_v15 = vpop.f32.mrb[1].mxu0  ;;  %v898_v63 = vadd.f32 %v1296_v9, %v685_v57  ;;  %v879_v19 = vpop.f32.mrb[11].mxu1 }
 0x133   : > { %v1316_v12 = vadd.f32 %v860_v15, %v393_v6  ;;  %903 = vst [vmem:[#allocation2 + $0x20] sm:$0xff] %v895_v8  ;;  %v1292_v13 = vpop.f32.mrb[2].mxu0  ;;  %v896_v14 = vadd.f32 %v879_v19, %v683_v59 }
 0x134   : > { %901 = vst [vmem:[#allocation2 + $0x10] sm:$0xff] %v1314_v11  ;;  %v1318_v16 = vadd.f32 %v1292_v13, %v396_v10  ;;  %906 = vst [vmem:[#allocation2 + $0x38] sm:$0xff] %v898_v63  ;;  %v863_v17 = vpop.f32.mrb[3].mxu0 }
 0x135   : > { %899 = vst [vmem:[#allocation2] sm:$0xff] %v1316_v12  ;;  %v1320_v41 = vadd.f32 %v863_v17, %v394_v2  ;;  %904 = vst [vmem:[#allocation2 + $0x28] sm:$0xff] %v896_v14 }
 0x136   : > { %902 = vst [vmem:[#allocation2 + $0x18] sm:$0xff] %v1318_v16 }
 0x137   : > { %900 = vst [vmem:[#allocation2 + $0x8] sm:$0xff] %v1320_v41 }
 0x139   : > { %v917_v31 = vld [vmem:[#allocation2 + $0x30] sm:$0xff] }
 0x13a   : > { %v915_v26 = vld [vmem:[#allocation2 + $0x20] sm:$0xff]  ;;  %v932_v33 = vadd.f32 %v1144_v21, %v917_v31 }
 0x13b   : > { %v913_v24 = vld [vmem:[#allocation2 + $0x10] sm:$0xff]  ;;  %v930_v29 = vadd.f32 %v1144_v21, %v915_v26  ;;  %v918_v34 = vld [vmem:[#allocation2 + $0x38] sm:$0xff] }
 0x13c   : > { %v911_v18 = vld [vmem:[#allocation2] sm:$0xff]  ;;  %v928_v27 = vadd.f32 %v1144_v21, %v913_v24  ;;  %v916_v30 = vld [vmem:[#allocation2 + $0x28] sm:$0xff]  ;;  %v933_v35 = vadd.f32 %v1144_v21, %v918_v34 }
 0x13d   : > { %v926_v22 = vadd.f32 %v1144_v21, %v911_v18  ;;  %v914_v25 = vld [vmem:[#allocation2 + $0x18] sm:$0xff]  ;;  %v931_v32 = vadd.f32 %v1144_v21, %v916_v30 }
 0x13e   : > { %v912_v20 = vld [vmem:[#allocation2 + $0x8] sm:$0xff]  ;;  %v929_v28 = vadd.f32 %v1144_v21, %v914_v25  ;;  %v1184_v39 = vpack.c.bf16 %v933_v35, %v932_v33 }
 0x13f   : > { %v927_v23 = vadd.f32 %v1144_v21, %v912_v20  ;;  %v1179_v38 = vpack.c.bf16 %v931_v32, %v930_v29 }
 0x140   : > { %v1174_v36 = vpack.c.bf16 %v929_v28, %v928_v27  ;;  %1188 = vst [vmem:[%s1509_s27 + $0x18] sm:$0xff] %v1184_v39  }
 0x141   : > { %v1169_v37 = vpack.c.bf16 %v927_v23, %v926_v22  ;;  %1187 = vst [vmem:[%s1509_s27 + $0x10] sm:$0xff] %v1179_v38  }
 0x142   : > { %1186 = vst [vmem:[%s1509_s27 + $0x8] sm:$0xff] %v1174_v36  }
 0x143   : > { %1170 = vst [vmem:[%s1509_s27] sm:$0xff] %v1169_v37  }
 0x144 PF: > { %s13_s16 = sadd.s32 1, %s1445_s16   ;;  %s1684_s12 = smov %s1437_s14 }
 0x145   : > { %p10_p9 = scmp.ge.s32.totalorder %s13_s16, 8   ;;  %s1685_s13 = smov %s1441_s15 }
 0x146   : > { %s1686_s14 = smov %s1689_s17  ;;  %s1687_s15 = smov %s1693_s18 }
 0x147   :  { %12 = sbr.rel (!%p10_p9) target bundleno = 3 (0x3), region = 76 }

// kernel: wideresnet_forward.29
= control target key start
LH: loop header
LB: loop body
LE: loop exit
PB: predicated region body
PF: predicated region fallthrough
CT: control target
= control target key end

     0   :  { %v266_v3 = vmov 0.0|0.0   ;;  %vm267_vm0 = vmmov 0   ;;  %v268_v6 = vmov 0.0   ;;  %s359_s0 = inlined_call_operand.vmem [shape: bf16[2,16,128], index: 0, kind: input, shape index: {}]   ;;  %s360_s1 = inlined_call_operand.vmem [shape: f32[128,128], index: 1, kind: input, shape index: {}]   ;;  %s361_s2 = inlined_call_operand.vmem [shape: f32[1,128], index: 2, kind: input, shape index: {}]   ;;  %s362_s3 = inlined_call_operand.hbm [shape: f32[2,128], index: 3, kind: output, shape index: {}]  }
   0x1   :  { %v39_v0 = vld [vmem:[%s360_s1] sm:$0xff]  ;;  %v40_v1 = vld [vmem:[%s360_s1 + $0x8] sm:$0xff]  ;;  %v41_v2 = vld [vmem:[%s360_s1 + $0x10] sm:$0xff]  ;;  %214 = vmatprep.subr.bf16.mxu0 %v266_v3  ;;  %211 = vmatprep.mubr.msk.f32.mxu0 %vm267_vm0, %v268_v6 }
   0x2   :  { %v215_v4 = vpack.c.bf16 %v40_v1, %v39_v0  ;;  %v42_v5 = vld [vmem:[%s360_s1 + $0x18] sm:$0xff]  ;;  %v43_v8 = vld [vmem:[%s360_s1 + $0x20] sm:$0xff]  ;;  %v44_v9 = vld [vmem:[%s360_s1 + $0x28] sm:$0xff] }
   0x3   :  { %v218_v7 = vpack.c.bf16 %v42_v5, %v41_v2  ;;  %v154_v10 = vld [vmem:[%s359_s0] sm:$0xff]   ;;  %v161_v11 = vld [vmem:[%s359_s0 + $0x8] sm:$0xff]  }
   0x4   :  { %216 = vmatpush3.bf16.msra.mxu0 %v215_v4  ;;  %v155_v12 = vunpack.c.l.bf16 %v154_v10  ;;  %v156_v13 = vunpack.c.h.bf16 %v154_v10  ;;  %v159_v14 = vunpack.c.l.bf16 %v161_v11 }
   0x5   :  { %217 = vmatprep.subr.bf16.mxu0 %v266_v3 }
   0x6   :  { %8 = vsyncpa [#allocation3], 0  ;;  %v221_v15 = vpack.c.bf16 %v44_v9, %v43_v8  ;;  %v160_v16 = vunpack.c.h.bf16 %v161_v11  ;;  %v45_v17 = vld [vmem:[%s360_s1 + $0x30] sm:$0xff]  ;;  %v46_v18 = vld [vmem:[%s360_s1 + $0x38] sm:$0xff]  ;;  %v23_v19 = vadd.f32 %v156_v13, %v155_v12  ;;  %vm64_vm1 = vcmask 1041409   ;;  %s269_s22 = smov [#allocation2]  }
   0x7   :  { %v224_v22 = vpack.c.bf16 %v46_v18, %v45_v17  ;;  %v47_v24 = vld [vmem:[%s360_s1 + $0x40] sm:$0xff]  ;;  %v48_v25 = vld [vmem:[%s360_s1 + $0x48] sm:$0xff]  ;;  %v49_v31 = vld [vmem:[%s360_s1 + $0x50] sm:$0xff]  ;;  %s144_s23 = sshll.u32 %s269_s22, 4  ;;  %s145_s23 = int_to_ptr.vmem [resolvable:$true] %s144_s23 }
   0x8   :  { %219 = vmatpush3.bf16.msra.mxu0 %v218_v7  ;;  %v30_v20 = vadd.f32 %v160_v16, %v159_v14  ;;  %v24_v21 = vrot.slane %v23_v19, 4  ;;  %v227_v29 = vpack.c.bf16 %v48_v25, %v47_v24  ;;  %v50_v32 = vld [vmem:[%s360_s1 + $0x58] sm:$0xff]  ;;  %v51_v38 = vld [vmem:[%s360_s1 + $0x60] sm:$0xff]  ;;  %v52_v39 = vld [vmem:[%s360_s1 + $0x68] sm:$0xff]  ;;  %p247_p1 = scmp.lt.s32.totalorder %s145_s23, %s145_s23 }
   0x9   :  { %220 = vmatprep.subr.bf16.mxu0 %v266_v3  ;;  %v230_v35 = vpack.c.bf16 %v50_v32, %v49_v31  ;;  %v233_v40 = vpack.c.bf16 %v52_v39, %v51_v38  ;;  %v53_v43 = vld [vmem:[%s360_s1 + $0x70] sm:$0xff]  ;;  %v54_v44 = vld [vmem:[%s360_s1 + $0x78] sm:$0xff]  ;;  %v152_v49 = vld [vmem:[%s361_s2] ss:$0 sm:$0xff]  ;;  %s242_s1 = scalar_lea.vmem %s145_s23, 32 }
   0xa   :  { %v31_v23 = vrot.slane %v30_v20, 4  ;;  %v25_v26 = vadd.f32 %v24_v21, %v23_v19  ;;  %v236_v45 = vpack.c.bf16 %v54_v44, %v53_v43  ;;  %p243_p0 = scmp.ne.s32.totalorder %s145_s23, %s242_s1  ;;  %p248_p2 = scmp.lt.s32.totalorder %s242_s1, %s242_s1 }
   0xc   :  { %222 = vmatpush3.bf16.msra.mxu0 %v221_v15  ;;  %v32_v27 = vadd.f32 %v31_v23, %v30_v20  ;;  %v26_v28 = vrot.slane %v25_v26, 2  ;;  %p249_p3 = por %p248_p2, %p247_p1 }
   0xd   :  { %223 = vmatprep.subr.bf16.mxu0 %v266_v3 }
   0xe   :  { %v33_v30 = vrot.slane %v32_v27, 2  ;;  %v27_v33 = vadd.f32 %v26_v28, %v25_v26  ;;  %p250_p4 = pnand %p249_p3, %p243_p0 }
  0x10   :  { %225 = vmatpush3.bf16.msra.mxu0 %v224_v22  ;;  %v34_v34 = vadd.f32 %v33_v30, %v32_v27  ;;  %v28_v36 = vrot.slane %v27_v33, 1 }
  0x11   :  { %226 = vmatprep.subr.bf16.mxu0 %v266_v3 }
  0x12   :  { %v35_v37 = vrot.slane %v34_v34, 1  ;;  %v29_v41 = vadd.f32 %v28_v36, %v27_v33 }
  0x14   :  { %228 = vmatpush3.bf16.msra.mxu0 %v227_v29  ;;  %v36_v42 = vadd.f32 %v35_v37, %v34_v34  ;;  %v37_v46 = vmul.f32 0.0625, %v29_v41 }
  0x15   :  { %229 = vmatprep.subr.bf16.mxu0 %v266_v3 }
  0x16   :  { %v38_v47 = vmul.f32 0.0625, %v36_v42 }
  0x18   :  { %231 = vmatpush3.bf16.msra.mxu0 %v230_v35  ;;  %v65_v48 = vsel %vm64_vm1, %v38_v47, %v37_v46 }
  0x19   :  { %232 = vmatprep.subr.bf16.mxu0 %v266_v3 }
  0x1c   :  { %234 = vmatpush3.bf16.msra.mxu0 %v233_v40 }
  0x1d   :  { %235 = vmatprep.subr.bf16.mxu0 %v266_v3 }
  0x20   :  { %237 = vmatpush3.bf16.msra.mxu0 %v236_v45 }
  0x23   :  { %212 = vmatmul.mubr.f32.vlgmr.msra.gmra.mrb[0].mxu0 %v65_v48 }
  0xf6   :  { %v133_v50 = vpop.f32.mrb[0].mxu0 }
  0xf7   :  { %v134_v51 = vadd.f32 %v152_v49, %v133_v50  ;;  %v213_v52 = vpop.f32.mrb[1].mxu0 }
  0xf9   :  { %137 = vst [vmem:[#allocation2] sm:$0x3] %v134_v51 }
  0xfa   :  { %253 = shalt.err (!%p250_p4)
}
  0xfb   :  { %s254_s26 = scalar_lea.hbm %s362_s3, 32 }
  0xfc   :  { %p255_p5 = scmp.ne.s32.totalorder %s362_s3, %s254_s26  ;;  %p258_p6 = scmp.lt.u32.totalorder %s254_s26, %s362_s3 }
  0xfe   :  { %p260_p7 = pnand %p258_p6, %p255_p5 }
 0x100   :  { %263 = shalt.err (!%p260_p7)
}
 0x101   :  { %147 = dma.vmem_to_hbm [thread:$0]  %s145_s23, 32, %s362_s3, [#allocation3]  }
 0x102   :  { %264 = dma.done.wait [#allocation3], 32  }
 0x103   :  { %265 = vsyncadd [#allocation3], 4294967264 }
 0x104   :  { %151 = vsyncpa [#allocation3], 1 }

</bundles_post_ra>
